<compile_context>
chip_gen: v5e
topology: v5e:2x2
jax: 0.10.0
libtpu: 0.0.40
codegen_flags: <defaults>
</compile_context>

<pallas_src>
import functools
import math

import jax
import jax.numpy as jnp
from jax.experimental import pallas as pl
from jax.experimental.pallas import tpu as pltpu

EPS = 1e-12  # BERT LayerNorm eps


# ----------------------------- helpers ---------------------------------------

def _layernorm(x, gamma, beta):
    mu = jnp.mean(x, axis=-1, keepdims=True)
    var = jnp.mean((x - mu) ** 2, axis=-1, keepdims=True)
    return (x - mu) * jax.lax.rsqrt(var + EPS) * gamma + beta


def _vmem_limit_bytes():
    # ~75% of physical VMEM: 48 MiB on v7x (64 MiB), 96 MiB on v5e/v6e (128 MiB).
    try:
        cap = pltpu.get_tpu_info().vmem_capacity_bytes
    except Exception:
        cap = 64 * 1024 * 1024
    return int(min(cap * 3 // 4, 112 * 1024 * 1024))


# ------------------------------- pooler --------------------------------------

def pooler_kernel(x_ref, w_ref, b_ref, o_ref):
    # bf16 operands, f32 accumulation (native MXU fast path on all generations).
    y = jnp.dot(x_ref[...].astype(jnp.bfloat16), w_ref[...],
                preferred_element_type=jnp.float32)
    o_ref[...] = jnp.tanh(y + b_ref[...])


def pooler(cls, w, b):
    # cls: (B, H) f32 — tiny relative to (B,S,H), single ungridded block is fine.
    return pl.pallas_call(
        pooler_kernel,
        out_shape=jax.ShapeDtypeStruct(cls.shape, cls.dtype),
    )(cls, w, b)


# ----------------- fused multi-layer BERT encoder kernel ---------------------

def bert_layers_kernel(x_ref, mask_ref, eg_ref, eb_ref,
                       wq_ref, bq_ref, wk_ref, bk_ref, wv_ref, bv_ref,
                       wo_ref, bo_ref, g1_ref, b1_ref,
                       wi_ref, bi_ref, wd_ref, bd_ref, g2_ref, b2_ref,
                       o_ref, h_ref, *, num_heads, batch_tile):
    layer = pl.program_id(1)

    Bt = batch_tile
    _, S, H = x_ref.shape
    M = Bt * S
    hd = H // num_heads
    scale = 1.0 / math.sqrt(hd)

    # Layer 0 of each batch tile: fused embedding LayerNorm into the carry.
    @pl.when(layer == 0)
    def _():
        h_ref[...] = _layernorm(x_ref[...].reshape(M, H), eg_ref[...], eb_ref[...])

    x = h_ref[...]                          # (M, H) f32, resident across layers
    x_bf = x.astype(jnp.bfloat16)

    # Additive mask precomputed in the wrapper; broadcast hoisted out of the
    # head loop (JAX does not CSE broadcast_in_dim).
    mask_b = jnp.broadcast_to(mask_ref[...], (Bt, S, S))   # (Bt, S, S) f32

    # QKV projections: bf16 operands, f32 accumulation.  Scale folded into q.
    q = (jnp.dot(x_bf, wq_ref[0], preferred_element_type=jnp.float32)
         + bq_ref[0]) * scale
    k = jnp.dot(x_bf, wk_ref[0], preferred_element_type=jnp.float32) + bk_ref[0]
    v = jnp.dot(x_bf, wv_ref[0], preferred_element_type=jnp.float32) + bv_ref[0]

    q_bf = q.astype(jnp.bfloat16)
    k_bf = k.astype(jnp.bfloat16)
    v_bf = v.astype(jnp.bfloat16)

    wo = wo_ref[0]                          # (H, H) bf16

    # Multi-head attention.  The output projection Wo is folded into the head
    # loop so every head contributes a lane-dense (M, H) f32 accumulation
    # (no sub-lane masked ctx stores, no concatenate).
    # TODO(synk): for long sequences add a query-tile grid axis (flash-style)
    # instead of materializing the full (S, S) scores; for many heads (e.g. 12)
    # switch to lax.fori_loop(..., unroll=2..4) to bound vreg live ranges (v5e).
    attn = jnp.zeros((M, H), jnp.float32)
    for h in range(num_heads):
        sl = slice(h * hd, (h + 1) * hd)
        qh = q_bf[:, sl].reshape(Bt, S, hd)     # leading-dim split: layout-trivial
        kh = k_bf[:, sl].reshape(Bt, S, hd)
        vh = v_bf[:, sl].reshape(Bt, S, hd)
        s = jnp.einsum('bqd,bkd->bqk', qh, kh,
                       preferred_element_type=jnp.float32)      # (Bt, S, S) f32
        s = s + mask_b
        s = s - jnp.max(s, axis=-1, keepdims=True)
        p = jnp.exp(s)
        p = p * pl.reciprocal(jnp.sum(p, axis=-1, keepdims=True), approx=True)
        ctx = jnp.einsum('bqk,bkd->bqd', p.astype(jnp.bfloat16), vh,
                         preferred_element_type=jnp.float32)    # (Bt, S, hd) f32
        attn = attn + jnp.dot(ctx.reshape(M, hd).astype(jnp.bfloat16),
                              wo[sl, :], preferred_element_type=jnp.float32)
    attn = attn + bo_ref[0]

    h1 = _layernorm(x + attn, g1_ref[0], b1_ref[0])

    ff = jnp.dot(h1.astype(jnp.bfloat16), wi_ref[0],
                 preferred_element_type=jnp.float32) + bi_ref[0]
    # TODO(synk): BERT default hidden_act is exact erf-GELU; tanh-approx here.
    ff = 0.5 * ff * (1.0 + jnp.tanh(0.7978845608028654
                                    * (ff + 0.044715 * ff * ff * ff)))
    ff_out = jnp.dot(ff.astype(jnp.bfloat16), wd_ref[0],
                     preferred_element_type=jnp.float32) + bd_ref[0]

    new_h = _layernorm(h1 + ff_out, g2_ref[0], b2_ref[0])
    h_ref[...] = new_h

    @pl.when(layer == pl.num_programs(1) - 1)
    def _():
        o_ref[...] = new_h.reshape(Bt, S, H)


def bert_encoder(x, mask_add, emb_g, emb_b, layers, num_heads, batch_tile=1):
    """x: (B,S,H) f32 raw embeddings (pre-LayerNorm); mask_add: (B,1,S) f32 additive.

    layers: dict of per-layer params stacked along a leading layer axis."""
    B, S, H = x.shape
    Bt = batch_tile
    assert B % Bt == 0, "batch must be divisible by batch_tile"
    n_layers = layers["wq"].shape[0]

    w_args = [layers["wq"], layers["bq"], layers["wk"], layers["bk"],
              layers["wv"], layers["bv"], layers["wo"], layers["bo"],
              layers["g1"], layers["b1"], layers["wi"], layers["bi"],
              layers["wd"], layers["bd"], layers["g2"], layers["b2"]]

    def wspec(arr):
        nd = arr.ndim
        return pl.BlockSpec((1,) + arr.shape[1:],
                            lambda b, l, nd=nd: (l,) + (0,) * (nd - 1))

    in_specs = [pl.BlockSpec((Bt, S, H), lambda b, l: (b, 0, 0)),
                pl.BlockSpec((Bt, 1, S), lambda b, l: (b, 0, 0)),
                pl.BlockSpec((1, H), lambda b, l: (0, 0)),
                pl.BlockSpec((1, H), lambda b, l: (0, 0))]
    in_specs += [wspec(a) for a in w_args]

    # TODO(synk): for BERT-large-class shapes on v7x, split wi/wd along the
    # intermediate dim (inner grid axis) or set pipeline_mode=pl.Buffered(1)
    # on them so double-buffered weights stay under the VMEM budget.
    return pl.pallas_call(
        functools.partial(bert_layers_kernel, num_heads=num_heads,
                          batch_tile=Bt),
        grid=(B // Bt, n_layers),
        in_specs=in_specs,
        out_specs=pl.BlockSpec((Bt, S, H), lambda b, l: (b, 0, 0)),
        out_shape=jax.ShapeDtypeStruct((B, S, H), jnp.float32),
        scratch_shapes=[pltpu.VMEM((Bt * S, H), jnp.float32)],  # hidden carry
        compiler_params=pltpu.CompilerParams(
            dimension_semantics=("parallel", "arbitrary"),
            vmem_limit_bytes=_vmem_limit_bytes()),
    )(x, mask_add, emb_g, emb_b, *w_args)


# ------------------------------ parameter init --------------------------------

def init_params(key, vocab, max_pos, H, I, n_layers):
    keys = iter(jax.random.split(key, 16))
    std = 0.02

    def nrm(shape, k, dtype=jnp.float32):
        return (std * jax.random.normal(k, shape)).astype(dtype)

    params = {
        "word_emb": nrm((vocab, H), next(keys)),
        "pos_emb": nrm((max_pos, H), next(keys)),
        "type_emb": nrm((2, H), next(keys)),
        "emb_g": jnp.ones((1, H), jnp.float32),
        "emb_b": jnp.zeros((1, H), jnp.float32),
        "pool_w": nrm((H, H), next(keys), jnp.bfloat16),   # bf16 MXU operand
        "pool_b": jnp.zeros((1, H), jnp.float32),
    }

    # Stacked per-layer params: matmul weights bf16, biases/LN params f32.
    # TODO(synk): on v5e/v6e int8 weights + per-channel scales would halve
    # weight HBM traffic (not portable to v7x's fp8 MXU).
    def wstack(shape, k):
        return (std * jax.random.normal(k, (n_layers,) + shape)).astype(jnp.bfloat16)

    layers = {
        "wq": wstack((H, H), next(keys)), "bq": jnp.zeros((n_layers, 1, H), jnp.float32),
        "wk": wstack((H, H), next(keys)), "bk": jnp.zeros((n_layers, 1, H), jnp.float32),
        "wv": wstack((H, H), next(keys)), "bv": jnp.zeros((n_layers, 1, H), jnp.float32),
        "wo": wstack((H, H), next(keys)), "bo": jnp.zeros((n_layers, 1, H), jnp.float32),
        "g1": jnp.ones((n_layers, 1, H), jnp.float32),
        "b1": jnp.zeros((n_layers, 1, H), jnp.float32),
        "wi": wstack((H, I), next(keys)), "bi": jnp.zeros((n_layers, 1, I), jnp.float32),
        "wd": wstack((I, H), next(keys)), "bd": jnp.zeros((n_layers, 1, H), jnp.float32),
        "g2": jnp.ones((n_layers, 1, H), jnp.float32),
        "b2": jnp.zeros((n_layers, 1, H), jnp.float32),
    }
    params["layers"] = layers
    return params


# --------------------------------- forward ------------------------------------

def text_encoder_forward(input_ids, attention_mask, params, num_heads,
                         batch_tile=1):
    B, S = input_ids.shape
    # Embedding gathers are glue, done in plain JAX.  token_type_ids defaults
    # to all-zeros in BertModel, hence type_emb[0].  The embedding LayerNorm is
    # fused into layer 0 of the encoder kernel.
    emb = (params["word_emb"][input_ids]
           + params["pos_emb"][:S][None, :, :]
           + params["type_emb"][0][None, None, :])

    # Additive attention mask, precomputed once.
    mask_add = ((1.0 - attention_mask.astype(jnp.float32))
                * (-1e9)).reshape(B, 1, S)

    h = bert_encoder(emb, mask_add, params["emb_g"], params["emb_b"],
                     params["layers"], num_heads, batch_tile=batch_tile)

    pooled = pooler(h[:, 0, :], params["pool_w"], params["pool_b"])
    return h, pooled  # (last_hidden_state, pooler_output) like BertModel


# ----------------------------------- main --------------------------------------

if __name__ == "__main__":
    # Small but lane-dense shapes (H, S multiples of 128).
    B, S, H, I = 2, 128, 128, 512
    NUM_HEADS, N_LAYERS, VOCAB, MAX_POS = 4, 2, 100, 128
    BATCH_TILE = 1   # B // BATCH_TILE = 2 batch tiles -> both v7x TCs get work

    key = jax.random.PRNGKey(0)
    k_param, k_ids = jax.random.split(key)
    params = init_params(k_param, VOCAB, MAX_POS, H, I, N_LAYERS)

    input_ids = jax.random.randint(k_ids, (B, S), 0, VOCAB, dtype=jnp.int32)
    # forward(..., attention_mask=True) -> all tokens attended
    attention_mask = jnp.ones((B, S), jnp.float32)

    last_hidden, pooled = text_encoder_forward(input_ids, attention_mask,
                                               params, NUM_HEADS,
                                               batch_tile=BATCH_TILE)
    jax.block_until_ready(last_hidden)
    jax.block_until_ready(pooled)

    assert last_hidden.shape == (B, S, H) and pooled.shape == (B, H)
    assert bool(jnp.all(jnp.isfinite(last_hidden))) and bool(jnp.all(jnp.isfinite(pooled)))
    print("KERNEL_OK")
</pallas_src>

<mosaic_0001>
module attributes {stable_mosaic.version = 11 : i64} {
  func.func @bert_layers_kernel(%arg0: i32, %arg1: i32, %arg2: memref<1x128x128xf32, #tpu.memory_space<vmem>>, %arg3: memref<1x1x128xf32, #tpu.memory_space<vmem>>, %arg4: memref<1x128xf32, #tpu.memory_space<vmem>>, %arg5: memref<1x128xf32, #tpu.memory_space<vmem>>, %arg6: memref<1x128x128xbf16, #tpu.memory_space<vmem>>, %arg7: memref<1x1x128xf32, #tpu.memory_space<vmem>>, %arg8: memref<1x128x128xbf16, #tpu.memory_space<vmem>>, %arg9: memref<1x1x128xf32, #tpu.memory_space<vmem>>, %arg10: memref<1x128x128xbf16, #tpu.memory_space<vmem>>, %arg11: memref<1x1x128xf32, #tpu.memory_space<vmem>>, %arg12: memref<1x128x128xbf16, #tpu.memory_space<vmem>>, %arg13: memref<1x1x128xf32, #tpu.memory_space<vmem>>, %arg14: memref<1x1x128xf32, #tpu.memory_space<vmem>>, %arg15: memref<1x1x128xf32, #tpu.memory_space<vmem>>, %arg16: memref<1x128x512xbf16, #tpu.memory_space<vmem>>, %arg17: memref<1x1x512xf32, #tpu.memory_space<vmem>>, %arg18: memref<1x512x128xbf16, #tpu.memory_space<vmem>>, %arg19: memref<1x1x128xf32, #tpu.memory_space<vmem>>, %arg20: memref<1x1x128xf32, #tpu.memory_space<vmem>>, %arg21: memref<1x1x128xf32, #tpu.memory_space<vmem>>, %arg22: memref<1x128x128xf32, #tpu.memory_space<vmem>>, %arg23: memref<128x128xf32, #tpu.memory_space<vmem>>) attributes {dimension_semantics = [#tpu.dimension_semantics<parallel>, #tpu.dimension_semantics<arbitrary>], iteration_bounds = array<i64: 2, 2>, scalar_prefetch = 0 : i64, scratch_operands = 1 : i64, tpu.core_type = #tpu.core_type<tc>, window_params = [{transform_indices = @transform_0, window_bounds = array<i64: 1, 128, 128>}, {transform_indices = @transform_1, window_bounds = array<i64: 1, 1, 128>}, {pipeline_mode = #tpu.pipeline_mode<synchronous>, transform_indices = @transform_2, window_bounds = array<i64: 1, 128>}, {pipeline_mode = #tpu.pipeline_mode<synchronous>, transform_indices = @transform_3, window_bounds = array<i64: 1, 128>}, {transform_indices = @transform_4, window_bounds = array<i64: 1, 128, 128>}, {transform_indices = @transform_5, window_bounds = array<i64: 1, 1, 128>}, {transform_indices = @transform_6, window_bounds = array<i64: 1, 128, 128>}, {transform_indices = @transform_7, window_bounds = array<i64: 1, 1, 128>}, {transform_indices = @transform_8, window_bounds = array<i64: 1, 128, 128>}, {transform_indices = @transform_9, window_bounds = array<i64: 1, 1, 128>}, {transform_indices = @transform_10, window_bounds = array<i64: 1, 128, 128>}, {transform_indices = @transform_11, window_bounds = array<i64: 1, 1, 128>}, {transform_indices = @transform_12, window_bounds = array<i64: 1, 1, 128>}, {transform_indices = @transform_13, window_bounds = array<i64: 1, 1, 128>}, {transform_indices = @transform_14, window_bounds = array<i64: 1, 128, 512>}, {transform_indices = @transform_15, window_bounds = array<i64: 1, 1, 512>}, {transform_indices = @transform_16, window_bounds = array<i64: 1, 512, 128>}, {transform_indices = @transform_17, window_bounds = array<i64: 1, 1, 128>}, {transform_indices = @transform_18, window_bounds = array<i64: 1, 1, 128>}, {transform_indices = @transform_19, window_bounds = array<i64: 1, 1, 128>}, {transform_indices = @transform_20, window_bounds = array<i64: 1, 128, 128>}]} {
    %c0_i32 = arith.constant 0 : i32
    %0 = arith.cmpi eq, %arg1, %c0_i32 : i32
    %1 = arith.extui %0 : i1 to i32
    %c0_i32_0 = arith.constant 0 : i32
    %2 = arith.cmpi ne, %1, %c0_i32_0 : i32
    scf.if %2 {
      %c0_96 = arith.constant 0 : index
      %c0_97 = arith.constant 0 : index
      %c0_98 = arith.constant 0 : index
      %228 = vector.load %arg2[%c0_96, %c0_97, %c0_98] : memref<1x128x128xf32, #tpu.memory_space<vmem>>, vector<1x128x128xf32>
      %229 = vector.shape_cast %228 : vector<1x128x128xf32> to vector<128x128xf32>
      %c0_99 = arith.constant 0 : index
      %c0_100 = arith.constant 0 : index
      %230 = vector.load %arg4[%c0_99, %c0_100] : memref<1x128xf32, #tpu.memory_space<vmem>>, vector<1x128xf32>
      %c0_101 = arith.constant 0 : index
      %c0_102 = arith.constant 0 : index
      %231 = vector.load %arg5[%c0_101, %c0_102] : memref<1x128xf32, #tpu.memory_space<vmem>>, vector<1x128xf32>
      %cst_103 = arith.constant dense<0.000000e+00> : vector<128xf32>
      %232 = vector.multi_reduction <add>, %229, %cst_103 [1] : vector<128x128xf32> to vector<128xf32>
      %233 = vector.shape_cast %232 : vector<128xf32> to vector<128x1xf32>
      %cst_104 = arith.constant 1.280000e+02 : f32
      %234 = vector.broadcast %cst_104 : f32 to vector<128x1xf32>
      %235 = arith.divf %233, %234 : vector<128x1xf32>
      %236 = vector.broadcast %235 : vector<128x1xf32> to vector<128x128xf32>
      %237 = arith.subf %229, %236 : vector<128x128xf32>
      %238 = arith.mulf %237, %237 : vector<128x128xf32>
      %cst_105 = arith.constant dense<0.000000e+00> : vector<128xf32>
      %239 = vector.multi_reduction <add>, %238, %cst_105 [1] : vector<128x128xf32> to vector<128xf32>
      %240 = vector.shape_cast %239 : vector<128xf32> to vector<128x1xf32>
      %cst_106 = arith.constant 1.280000e+02 : f32
      %241 = vector.broadcast %cst_106 : f32 to vector<128x1xf32>
      %242 = arith.divf %240, %241 : vector<128x1xf32>
      %243 = vector.broadcast %235 : vector<128x1xf32> to vector<128x128xf32>
      %244 = arith.subf %229, %243 : vector<128x128xf32>
      %cst_107 = arith.constant 9.99999996E-13 : f32
      %245 = vector.broadcast %cst_107 : f32 to vector<128x1xf32>
      %246 = arith.addf %242, %245 : vector<128x1xf32>
      %247 = math.rsqrt %246 : vector<128x1xf32>
      %248 = vector.broadcast %247 : vector<128x1xf32> to vector<128x128xf32>
      %249 = arith.mulf %244, %248 : vector<128x128xf32>
      %250 = vector.broadcast %230 : vector<1x128xf32> to vector<128x128xf32>
      %251 = arith.mulf %249, %250 : vector<128x128xf32>
      %252 = vector.broadcast %231 : vector<1x128xf32> to vector<128x128xf32>
      %253 = arith.addf %251, %252 : vector<128x128xf32>
      %c0_108 = arith.constant 0 : index
      %c0_109 = arith.constant 0 : index
      %254 = vector.load %arg23[%c0_108, %c0_109] : memref<128x128xf32, #tpu.memory_space<vmem>>, vector<128x128xf32>
      tpu.vector_store %arg23[%c0_108, %c0_109], %253 {strides = array<i32>} : memref<128x128xf32, #tpu.memory_space<vmem>>, vector<128x128xf32>,
    } else {
    }
    %c0 = arith.constant 0 : index
    %c0_1 = arith.constant 0 : index
    %3 = vector.load %arg23[%c0, %c0_1] : memref<128x128xf32, #tpu.memory_space<vmem>>, vector<128x128xf32>
    %4 = arith.truncf %3 : vector<128x128xf32> to vector<128x128xbf16>
    %c0_2 = arith.constant 0 : index
    %c0_3 = arith.constant 0 : index
    %c0_4 = arith.constant 0 : index
    %5 = vector.load %arg3[%c0_2, %c0_3, %c0_4] : memref<1x1x128xf32, #tpu.memory_space<vmem>>, vector<1x1x128xf32>
    %6 = vector.shape_cast %5 : vector<1x1x128xf32> to vector<1x1x128xf32>
    %7 = vector.broadcast %6 : vector<1x1x128xf32> to vector<1x128x128xf32>
    %c0_5 = arith.constant 0 : index
    %c0_6 = arith.constant 0 : index
    %c0_7 = arith.constant 0 : index
    %8 = vector.load %arg6[%c0_5, %c0_6, %c0_7] : memref<1x128x128xbf16, #tpu.memory_space<vmem>>, vector<1x128x128xbf16>
    %9 = vector.shape_cast %8 : vector<1x128x128xbf16> to vector<128x128xbf16>
    %cst = arith.constant dense<0.000000e+00> : vector<128x128xf32>
    %10 = tpu.matmul %4, %9, %cst {dimension_numbers = #tpu.dot_dimension_numbers<[1], [0], [0], [1], [0, 0, 1, 1], [], []>} : vector<128x128xbf16>, vector<128x128xbf16>, vector<128x128xf32> -> vector<128x128xf32>
    %c0_8 = arith.constant 0 : index
    %c0_9 = arith.constant 0 : index
    %c0_10 = arith.constant 0 : index
    %11 = vector.load %arg7[%c0_8, %c0_9, %c0_10] : memref<1x1x128xf32, #tpu.memory_space<vmem>>, vector<1x1x128xf32>
    %12 = vector.shape_cast %11 : vector<1x1x128xf32> to vector<1x128xf32>
    %13 = vector.broadcast %12 : vector<1x128xf32> to vector<128x128xf32>
    %14 = arith.addf %10, %13 : vector<128x128xf32>
    %cst_11 = arith.constant 0.176776692 : f32
    %15 = vector.broadcast %cst_11 : f32 to vector<128x128xf32>
    %16 = arith.mulf %14, %15 : vector<128x128xf32>
    %c0_12 = arith.constant 0 : index
    %c0_13 = arith.constant 0 : index
    %c0_14 = arith.constant 0 : index
    %17 = vector.load %arg8[%c0_12, %c0_13, %c0_14] : memref<1x128x128xbf16, #tpu.memory_space<vmem>>, vector<1x128x128xbf16>
    %18 = vector.shape_cast %17 : vector<1x128x128xbf16> to vector<128x128xbf16>
    %cst_15 = arith.constant dense<0.000000e+00> : vector<128x128xf32>
    %19 = tpu.matmul %4, %18, %cst_15 {dimension_numbers = #tpu.dot_dimension_numbers<[1], [0], [0], [1], [0, 0, 1, 1], [], []>} : vector<128x128xbf16>, vector<128x128xbf16>, vector<128x128xf32> -> vector<128x128xf32>
    %c0_16 = arith.constant 0 : index
    %c0_17 = arith.constant 0 : index
    %c0_18 = arith.constant 0 : index
    %20 = vector.load %arg9[%c0_16, %c0_17, %c0_18] : memref<1x1x128xf32, #tpu.memory_space<vmem>>, vector<1x1x128xf32>
    %21 = vector.shape_cast %20 : vector<1x1x128xf32> to vector<1x128xf32>
    %22 = vector.broadcast %21 : vector<1x128xf32> to vector<128x128xf32>
    %23 = arith.addf %19, %22 : vector<128x128xf32>
    %c0_19 = arith.constant 0 : index
    %c0_20 = arith.constant 0 : index
    %c0_21 = arith.constant 0 : index
    %24 = vector.load %arg10[%c0_19, %c0_20, %c0_21] : memref<1x128x128xbf16, #tpu.memory_space<vmem>>, vector<1x128x128xbf16>
    %25 = vector.shape_cast %24 : vector<1x128x128xbf16> to vector<128x128xbf16>
    %cst_22 = arith.constant dense<0.000000e+00> : vector<128x128xf32>
    %26 = tpu.matmul %4, %25, %cst_22 {dimension_numbers = #tpu.dot_dimension_numbers<[1], [0], [0], [1], [0, 0, 1, 1], [], []>} : vector<128x128xbf16>, vector<128x128xbf16>, vector<128x128xf32> -> vector<128x128xf32>
    %c0_23 = arith.constant 0 : index
    %c0_24 = arith.constant 0 : index
    %c0_25 = arith.constant 0 : index
    %27 = vector.load %arg11[%c0_23, %c0_24, %c0_25] : memref<1x1x128xf32, #tpu.memory_space<vmem>>, vector<1x1x128xf32>
    %28 = vector.shape_cast %27 : vector<1x1x128xf32> to vector<1x128xf32>
    %29 = vector.broadcast %28 : vector<1x128xf32> to vector<128x128xf32>
    %30 = arith.addf %26, %29 : vector<128x128xf32>
    %31 = arith.truncf %16 : vector<128x128xf32> to vector<128x128xbf16>
    %32 = arith.truncf %23 : vector<128x128xf32> to vector<128x128xbf16>
    %33 = arith.truncf %30 : vector<128x128xf32> to vector<128x128xbf16>
    %c0_26 = arith.constant 0 : index
    %c0_27 = arith.constant 0 : index
    %c0_28 = arith.constant 0 : index
    %34 = vector.load %arg12[%c0_26, %c0_27, %c0_28] : memref<1x128x128xbf16, #tpu.memory_space<vmem>>, vector<1x128x128xbf16>
    %35 = vector.shape_cast %34 : vector<1x128x128xbf16> to vector<128x128xbf16>
    %cst_29 = arith.constant 0.000000e+00 : f32
    %36 = vector.broadcast %cst_29 : f32 to vector<128x128xf32>
    %37 = vector.extract_strided_slice %31 {offsets = [0, 0], sizes = [128, 32], strides = [1, 1]} : vector<128x128xbf16> to vector<128x32xbf16>
    %38 = vector.shape_cast %37 : vector<128x32xbf16> to vector<1x128x32xbf16>
    %39 = vector.extract_strided_slice %32 {offsets = [0, 0], sizes = [128, 32], strides = [1, 1]} : vector<128x128xbf16> to vector<128x32xbf16>
    %40 = vector.shape_cast %39 : vector<128x32xbf16> to vector<1x128x32xbf16>
    %41 = vector.extract_strided_slice %33 {offsets = [0, 0], sizes = [128, 32], strides = [1, 1]} : vector<128x128xbf16> to vector<128x32xbf16>
    %42 = vector.shape_cast %41 : vector<128x32xbf16> to vector<1x128x32xbf16>
    "tpu.trace_start"() <{level = 10 : i32, message = "bqd,bkd->bqk"}> : () -> ()
    %cst_30 = arith.constant dense<0.000000e+00> : vector<1x128x128xf32>
    %43 = tpu.matmul %38, %40, %cst_30 {dimension_numbers = #tpu.dot_dimension_numbers<[2], [2], [1], [1], [0, 0, 0, 1, 1, 1], [0], [0]>} : vector<1x128x32xbf16>, vector<1x128x32xbf16>, vector<1x128x128xf32> -> vector<1x128x128xf32>
    "tpu.trace_stop"() : () -> ()
    %44 = arith.addf %43, %7 : vector<1x128x128xf32>
    %cst_31 = arith.constant dense<0xFF800000> : vector<1x128xf32>
    %45 = vector.multi_reduction <maximumf>, %44, %cst_31 [2] : vector<1x128x128xf32> to vector<1x128xf32>
    %46 = vector.shape_cast %45 : vector<1x128xf32> to vector<1x128x1xf32>
    %47 = vector.broadcast %46 : vector<1x128x1xf32> to vector<1x128x128xf32>
    %48 = arith.subf %44, %47 : vector<1x128x128xf32>
    %49 = math.exp %48 : vector<1x128x128xf32>
    %cst_32 = arith.constant dense<0.000000e+00> : vector<1x128xf32>
    %50 = vector.multi_reduction <add>, %49, %cst_32 [2] : vector<1x128x128xf32> to vector<1x128xf32>
    %51 = vector.shape_cast %50 : vector<1x128xf32> to vector<1x128x1xf32>
    %52 = tpu.reciprocal %51 {approx = true} : vector<1x128x1xf32> -> vector<1x128x1xf32>
    %53 = vector.broadcast %52 : vector<1x128x1xf32> to vector<1x128x128xf32>
    %54 = arith.mulf %49, %53 : vector<1x128x128xf32>
    %55 = arith.truncf %54 : vector<1x128x128xf32> to vector<1x128x128xbf16>
    "tpu.trace_start"() <{level = 10 : i32, message = "bqk,bkd->bqd"}> : () -> ()
    %cst_33 = arith.constant dense<0.000000e+00> : vector<1x128x32xf32>
    %56 = tpu.matmul %55, %42, %cst_33 {dimension_numbers = #tpu.dot_dimension_numbers<[2], [1], [1], [2], [0, 0, 0, 1, 1, 2], [0], [0]>} : vector<1x128x128xbf16>, vector<1x128x32xbf16>, vector<1x128x32xf32> -> vector<1x128x32xf32>
    "tpu.trace_stop"() : () -> ()
    %57 = vector.shape_cast %56 : vector<1x128x32xf32> to vector<128x32xf32>
    %58 = arith.truncf %57 : vector<128x32xf32> to vector<128x32xbf16>
    %59 = vector.extract_strided_slice %35 {offsets = [0, 0], sizes = [32, 128], strides = [1, 1]} : vector<128x128xbf16> to vector<32x128xbf16>
    %cst_34 = arith.constant dense<0.000000e+00> : vector<128x128xf32>
    %60 = tpu.matmul %58, %59, %cst_34 {dimension_numbers = #tpu.dot_dimension_numbers<[1], [0], [0], [1], [0, 0, 1, 1], [], []>} : vector<128x32xbf16>, vector<32x128xbf16>, vector<128x128xf32> -> vector<128x128xf32>
    %61 = arith.addf %36, %60 : vector<128x128xf32>
    %62 = vector.extract_strided_slice %31 {offsets = [0, 32], sizes = [128, 32], strides = [1, 1]} : vector<128x128xbf16> to vector<128x32xbf16>
    %63 = vector.shape_cast %62 : vector<128x32xbf16> to vector<1x128x32xbf16>
    %64 = vector.extract_strided_slice %32 {offsets = [0, 32], sizes = [128, 32], strides = [1, 1]} : vector<128x128xbf16> to vector<128x32xbf16>
    %65 = vector.shape_cast %64 : vector<128x32xbf16> to vector<1x128x32xbf16>
    %66 = vector.extract_strided_slice %33 {offsets = [0, 32], sizes = [128, 32], strides = [1, 1]} : vector<128x128xbf16> to vector<128x32xbf16>
    %67 = vector.shape_cast %66 : vector<128x32xbf16> to vector<1x128x32xbf16>
    "tpu.trace_start"() <{level = 10 : i32, message = "bqd,bkd->bqk"}> : () -> ()
    %cst_35 = arith.constant dense<0.000000e+00> : vector<1x128x128xf32>
    %68 = tpu.matmul %63, %65, %cst_35 {dimension_numbers = #tpu.dot_dimension_numbers<[2], [2], [1], [1], [0, 0, 0, 1, 1, 1], [0], [0]>} : vector<1x128x32xbf16>, vector<1x128x32xbf16>, vector<1x128x128xf32> -> vector<1x128x128xf32>
    "tpu.trace_stop"() : () -> ()
    %69 = arith.addf %68, %7 : vector<1x128x128xf32>
    %cst_36 = arith.constant dense<0xFF800000> : vector<1x128xf32>
    %70 = vector.multi_reduction <maximumf>, %69, %cst_36 [2] : vector<1x128x128xf32> to vector<1x128xf32>
    %71 = vector.shape_cast %70 : vector<1x128xf32> to vector<1x128x1xf32>
    %72 = vector.broadcast %71 : vector<1x128x1xf32> to vector<1x128x128xf32>
    %73 = arith.subf %69, %72 : vector<1x128x128xf32>
    %74 = math.exp %73 : vector<1x128x128xf32>
    %cst_37 = arith.constant dense<0.000000e+00> : vector<1x128xf32>
    %75 = vector.multi_reduction <add>, %74, %cst_37 [2] : vector<1x128x128xf32> to vector<1x128xf32>
    %76 = vector.shape_cast %75 : vector<1x128xf32> to vector<1x128x1xf32>
    %77 = tpu.reciprocal %76 {approx = true} : vector<1x128x1xf32> -> vector<1x128x1xf32>
    %78 = vector.broadcast %77 : vector<1x128x1xf32> to vector<1x128x128xf32>
    %79 = arith.mulf %74, %78 : vector<1x128x128xf32>
    %80 = arith.truncf %79 : vector<1x128x128xf32> to vector<1x128x128xbf16>
    "tpu.trace_start"() <{level = 10 : i32, message = "bqk,bkd->bqd"}> : () -> ()
    %cst_38 = arith.constant dense<0.000000e+00> : vector<1x128x32xf32>
    %81 = tpu.matmul %80, %67, %cst_38 {dimension_numbers = #tpu.dot_dimension_numbers<[2], [1], [1], [2], [0, 0, 0, 1, 1, 2], [0], [0]>} : vector<1x128x128xbf16>, vector<1x128x32xbf16>, vector<1x128x32xf32> -> vector<1x128x32xf32>
    "tpu.trace_stop"() : () -> ()
    %82 = vector.shape_cast %81 : vector<1x128x32xf32> to vector<128x32xf32>
    %83 = arith.truncf %82 : vector<128x32xf32> to vector<128x32xbf16>
    %84 = vector.extract_strided_slice %35 {offsets = [32, 0], sizes = [32, 128], strides = [1, 1]} : vector<128x128xbf16> to vector<32x128xbf16>
    %cst_39 = arith.constant dense<0.000000e+00> : vector<128x128xf32>
    %85 = tpu.matmul %83, %84, %cst_39 {dimension_numbers = #tpu.dot_dimension_numbers<[1], [0], [0], [1], [0, 0, 1, 1], [], []>} : vector<128x32xbf16>, vector<32x128xbf16>, vector<128x128xf32> -> vector<128x128xf32>
    %86 = arith.addf %61, %85 : vector<128x128xf32>
    %87 = vector.extract_strided_slice %31 {offsets = [0, 64], sizes = [128, 32], strides = [1, 1]} : vector<128x128xbf16> to vector<128x32xbf16>
    %88 = vector.shape_cast %87 : vector<128x32xbf16> to vector<1x128x32xbf16>
    %89 = vector.extract_strided_slice %32 {offsets = [0, 64], sizes = [128, 32], strides = [1, 1]} : vector<128x128xbf16> to vector<128x32xbf16>
    %90 = vector.shape_cast %89 : vector<128x32xbf16> to vector<1x128x32xbf16>
    %91 = vector.extract_strided_slice %33 {offsets = [0, 64], sizes = [128, 32], strides = [1, 1]} : vector<128x128xbf16> to vector<128x32xbf16>
    %92 = vector.shape_cast %91 : vector<128x32xbf16> to vector<1x128x32xbf16>
    "tpu.trace_start"() <{level = 10 : i32, message = "bqd,bkd->bqk"}> : () -> ()
    %cst_40 = arith.constant dense<0.000000e+00> : vector<1x128x128xf32>
    %93 = tpu.matmul %88, %90, %cst_40 {dimension_numbers = #tpu.dot_dimension_numbers<[2], [2], [1], [1], [0, 0, 0, 1, 1, 1], [0], [0]>} : vector<1x128x32xbf16>, vector<1x128x32xbf16>, vector<1x128x128xf32> -> vector<1x128x128xf32>
    "tpu.trace_stop"() : () -> ()
    %94 = arith.addf %93, %7 : vector<1x128x128xf32>
    %cst_41 = arith.constant dense<0xFF800000> : vector<1x128xf32>
    %95 = vector.multi_reduction <maximumf>, %94, %cst_41 [2] : vector<1x128x128xf32> to vector<1x128xf32>
    %96 = vector.shape_cast %95 : vector<1x128xf32> to vector<1x128x1xf32>
    %97 = vector.broadcast %96 : vector<1x128x1xf32> to vector<1x128x128xf32>
    %98 = arith.subf %94, %97 : vector<1x128x128xf32>
    %99 = math.exp %98 : vector<1x128x128xf32>
    %cst_42 = arith.constant dense<0.000000e+00> : vector<1x128xf32>
    %100 = vector.multi_reduction <add>, %99, %cst_42 [2] : vector<1x128x128xf32> to vector<1x128xf32>
    %101 = vector.shape_cast %100 : vector<1x128xf32> to vector<1x128x1xf32>
    %102 = tpu.reciprocal %101 {approx = true} : vector<1x128x1xf32> -> vector<1x128x1xf32>
    %103 = vector.broadcast %102 : vector<1x128x1xf32> to vector<1x128x128xf32>
    %104 = arith.mulf %99, %103 : vector<1x128x128xf32>
    %105 = arith.truncf %104 : vector<1x128x128xf32> to vector<1x128x128xbf16>
    "tpu.trace_start"() <{level = 10 : i32, message = "bqk,bkd->bqd"}> : () -> ()
    %cst_43 = arith.constant dense<0.000000e+00> : vector<1x128x32xf32>
    %106 = tpu.matmul %105, %92, %cst_43 {dimension_numbers = #tpu.dot_dimension_numbers<[2], [1], [1], [2], [0, 0, 0, 1, 1, 2], [0], [0]>} : vector<1x128x128xbf16>, vector<1x128x32xbf16>, vector<1x128x32xf32> -> vector<1x128x32xf32>
    "tpu.trace_stop"() : () -> ()
    %107 = vector.shape_cast %106 : vector<1x128x32xf32> to vector<128x32xf32>
    %108 = arith.truncf %107 : vector<128x32xf32> to vector<128x32xbf16>
    %109 = vector.extract_strided_slice %35 {offsets = [64, 0], sizes = [32, 128], strides = [1, 1]} : vector<128x128xbf16> to vector<32x128xbf16>
    %cst_44 = arith.constant dense<0.000000e+00> : vector<128x128xf32>
    %110 = tpu.matmul %108, %109, %cst_44 {dimension_numbers = #tpu.dot_dimension_numbers<[1], [0], [0], [1], [0, 0, 1, 1], [], []>} : vector<128x32xbf16>, vector<32x128xbf16>, vector<128x128xf32> -> vector<128x128xf32>
    %111 = arith.addf %86, %110 : vector<128x128xf32>
    %112 = vector.extract_strided_slice %31 {offsets = [0, 96], sizes = [128, 32], strides = [1, 1]} : vector<128x128xbf16> to vector<128x32xbf16>
    %113 = vector.shape_cast %112 : vector<128x32xbf16> to vector<1x128x32xbf16>
    %114 = vector.extract_strided_slice %32 {offsets = [0, 96], sizes = [128, 32], strides = [1, 1]} : vector<128x128xbf16> to vector<128x32xbf16>
    %115 = vector.shape_cast %114 : vector<128x32xbf16> to vector<1x128x32xbf16>
    %116 = vector.extract_strided_slice %33 {offsets = [0, 96], sizes = [128, 32], strides = [1, 1]} : vector<128x128xbf16> to vector<128x32xbf16>
    %117 = vector.shape_cast %116 : vector<128x32xbf16> to vector<1x128x32xbf16>
    "tpu.trace_start"() <{level = 10 : i32, message = "bqd,bkd->bqk"}> : () -> ()
    %cst_45 = arith.constant dense<0.000000e+00> : vector<1x128x128xf32>
    %118 = tpu.matmul %113, %115, %cst_45 {dimension_numbers = #tpu.dot_dimension_numbers<[2], [2], [1], [1], [0, 0, 0, 1, 1, 1], [0], [0]>} : vector<1x128x32xbf16>, vector<1x128x32xbf16>, vector<1x128x128xf32> -> vector<1x128x128xf32>
    "tpu.trace_stop"() : () -> ()
    %119 = arith.addf %118, %7 : vector<1x128x128xf32>
    %cst_46 = arith.constant dense<0xFF800000> : vector<1x128xf32>
    %120 = vector.multi_reduction <maximumf>, %119, %cst_46 [2] : vector<1x128x128xf32> to vector<1x128xf32>
    %121 = vector.shape_cast %120 : vector<1x128xf32> to vector<1x128x1xf32>
    %122 = vector.broadcast %121 : vector<1x128x1xf32> to vector<1x128x128xf32>
    %123 = arith.subf %119, %122 : vector<1x128x128xf32>
    %124 = math.exp %123 : vector<1x128x128xf32>
    %cst_47 = arith.constant dense<0.000000e+00> : vector<1x128xf32>
    %125 = vector.multi_reduction <add>, %124, %cst_47 [2] : vector<1x128x128xf32> to vector<1x128xf32>
    %126 = vector.shape_cast %125 : vector<1x128xf32> to vector<1x128x1xf32>
    %127 = tpu.reciprocal %126 {approx = true} : vector<1x128x1xf32> -> vector<1x128x1xf32>
    %128 = vector.broadcast %127 : vector<1x128x1xf32> to vector<1x128x128xf32>
    %129 = arith.mulf %124, %128 : vector<1x128x128xf32>
    %130 = arith.truncf %129 : vector<1x128x128xf32> to vector<1x128x128xbf16>
    "tpu.trace_start"() <{level = 10 : i32, message = "bqk,bkd->bqd"}> : () -> ()
    %cst_48 = arith.constant dense<0.000000e+00> : vector<1x128x32xf32>
    %131 = tpu.matmul %130, %117, %cst_48 {dimension_numbers = #tpu.dot_dimension_numbers<[2], [1], [1], [2], [0, 0, 0, 1, 1, 2], [0], [0]>} : vector<1x128x128xbf16>, vector<1x128x32xbf16>, vector<1x128x32xf32> -> vector<1x128x32xf32>
    "tpu.trace_stop"() : () -> ()
    %132 = vector.shape_cast %131 : vector<1x128x32xf32> to vector<128x32xf32>
    %133 = arith.truncf %132 : vector<128x32xf32> to vector<128x32xbf16>
    %134 = vector.extract_strided_slice %35 {offsets = [96, 0], sizes = [32, 128], strides = [1, 1]} : vector<128x128xbf16> to vector<32x128xbf16>
    %cst_49 = arith.constant dense<0.000000e+00> : vector<128x128xf32>
    %135 = tpu.matmul %133, %134, %cst_49 {dimension_numbers = #tpu.dot_dimension_numbers<[1], [0], [0], [1], [0, 0, 1, 1], [], []>} : vector<128x32xbf16>, vector<32x128xbf16>, vector<128x128xf32> -> vector<128x128xf32>
    %136 = arith.addf %111, %135 : vector<128x128xf32>
    %c0_50 = arith.constant 0 : index
    %c0_51 = arith.constant 0 : index
    %c0_52 = arith.constant 0 : index
    %137 = vector.load %arg13[%c0_50, %c0_51, %c0_52] : memref<1x1x128xf32, #tpu.memory_space<vmem>>, vector<1x1x128xf32>
    %138 = vector.shape_cast %137 : vector<1x1x128xf32> to vector<1x128xf32>
    %139 = vector.broadcast %138 : vector<1x128xf32> to vector<128x128xf32>
    %140 = arith.addf %136, %139 : vector<128x128xf32>
    %141 = arith.addf %3, %140 : vector<128x128xf32>
    %c0_53 = arith.constant 0 : index
    %c0_54 = arith.constant 0 : index
    %c0_55 = arith.constant 0 : index
    %142 = vector.load %arg14[%c0_53, %c0_54, %c0_55] : memref<1x1x128xf32, #tpu.memory_space<vmem>>, vector<1x1x128xf32>
    %143 = vector.shape_cast %142 : vector<1x1x128xf32> to vector<1x128xf32>
    %c0_56 = arith.constant 0 : index
    %c0_57 = arith.constant 0 : index
    %c0_58 = arith.constant 0 : index
    %144 = vector.load %arg15[%c0_56, %c0_57, %c0_58] : memref<1x1x128xf32, #tpu.memory_space<vmem>>, vector<1x1x128xf32>
    %145 = vector.shape_cast %144 : vector<1x1x128xf32> to vector<1x128xf32>
    %cst_59 = arith.constant dense<0.000000e+00> : vector<128xf32>
    %146 = vector.multi_reduction <add>, %141, %cst_59 [1] : vector<128x128xf32> to vector<128xf32>
    %147 = vector.shape_cast %146 : vector<128xf32> to vector<128x1xf32>
    %cst_60 = arith.constant 1.280000e+02 : f32
    %148 = vector.broadcast %cst_60 : f32 to vector<128x1xf32>
    %149 = arith.divf %147, %148 : vector<128x1xf32>
    %150 = vector.broadcast %149 : vector<128x1xf32> to vector<128x128xf32>
    %151 = arith.subf %141, %150 : vector<128x128xf32>
    %152 = arith.mulf %151, %151 : vector<128x128xf32>
    %cst_61 = arith.constant dense<0.000000e+00> : vector<128xf32>
    %153 = vector.multi_reduction <add>, %152, %cst_61 [1] : vector<128x128xf32> to vector<128xf32>
    %154 = vector.shape_cast %153 : vector<128xf32> to vector<128x1xf32>
    %cst_62 = arith.constant 1.280000e+02 : f32
    %155 = vector.broadcast %cst_62 : f32 to vector<128x1xf32>
    %156 = arith.divf %154, %155 : vector<128x1xf32>
    %157 = vector.broadcast %149 : vector<128x1xf32> to vector<128x128xf32>
    %158 = arith.subf %141, %157 : vector<128x128xf32>
    %cst_63 = arith.constant 9.99999996E-13 : f32
    %159 = vector.broadcast %cst_63 : f32 to vector<128x1xf32>
    %160 = arith.addf %156, %159 : vector<128x1xf32>
    %161 = math.rsqrt %160 : vector<128x1xf32>
    %162 = vector.broadcast %161 : vector<128x1xf32> to vector<128x128xf32>
    %163 = arith.mulf %158, %162 : vector<128x128xf32>
    %164 = vector.broadcast %143 : vector<1x128xf32> to vector<128x128xf32>
    %165 = arith.mulf %163, %164 : vector<128x128xf32>
    %166 = vector.broadcast %145 : vector<1x128xf32> to vector<128x128xf32>
    %167 = arith.addf %165, %166 : vector<128x128xf32>
    %168 = arith.truncf %167 : vector<128x128xf32> to vector<128x128xbf16>
    %c0_64 = arith.constant 0 : index
    %c0_65 = arith.constant 0 : index
    %c0_66 = arith.constant 0 : index
    %169 = vector.load %arg16[%c0_64, %c0_65, %c0_66] : memref<1x128x512xbf16, #tpu.memory_space<vmem>>, vector<1x128x512xbf16>
    %170 = vector.shape_cast %169 : vector<1x128x512xbf16> to vector<128x512xbf16>
    %cst_67 = arith.constant dense<0.000000e+00> : vector<128x512xf32>
    %171 = tpu.matmul %168, %170, %cst_67 {dimension_numbers = #tpu.dot_dimension_numbers<[1], [0], [0], [1], [0, 0, 1, 1], [], []>} : vector<128x128xbf16>, vector<128x512xbf16>, vector<128x512xf32> -> vector<128x512xf32>
    %c0_68 = arith.constant 0 : index
    %c0_69 = arith.constant 0 : index
    %c0_70 = arith.constant 0 : index
    %172 = vector.load %arg17[%c0_68, %c0_69, %c0_70] : memref<1x1x512xf32, #tpu.memory_space<vmem>>, vector<1x1x512xf32>
    %173 = vector.shape_cast %172 : vector<1x1x512xf32> to vector<1x512xf32>
    %174 = vector.broadcast %173 : vector<1x512xf32> to vector<128x512xf32>
    %175 = arith.addf %171, %174 : vector<128x512xf32>
    %cst_71 = arith.constant 5.000000e-01 : f32
    %176 = vector.broadcast %cst_71 : f32 to vector<128x512xf32>
    %177 = arith.mulf %176, %175 : vector<128x512xf32>
    %cst_72 = arith.constant 4.471500e-02 : f32
    %178 = vector.broadcast %cst_72 : f32 to vector<128x512xf32>
    %179 = arith.mulf %178, %175 : vector<128x512xf32>
    %180 = arith.mulf %179, %175 : vector<128x512xf32>
    %181 = arith.mulf %180, %175 : vector<128x512xf32>
    %182 = arith.addf %175, %181 : vector<128x512xf32>
    %cst_73 = arith.constant 0.797884583 : f32
    %183 = vector.broadcast %cst_73 : f32 to vector<128x512xf32>
    %184 = arith.mulf %183, %182 : vector<128x512xf32>
    %185 = math.tanh %184 : vector<128x512xf32>
    %cst_74 = arith.constant 1.000000e+00 : f32
    %186 = vector.broadcast %cst_74 : f32 to vector<128x512xf32>
    %187 = arith.addf %186, %185 : vector<128x512xf32>
    %188 = arith.mulf %177, %187 : vector<128x512xf32>
    %189 = arith.truncf %188 : vector<128x512xf32> to vector<128x512xbf16>
    %c0_75 = arith.constant 0 : index
    %c0_76 = arith.constant 0 : index
    %c0_77 = arith.constant 0 : index
    %190 = vector.load %arg18[%c0_75, %c0_76, %c0_77] : memref<1x512x128xbf16, #tpu.memory_space<vmem>>, vector<1x512x128xbf16>
    %191 = vector.shape_cast %190 : vector<1x512x128xbf16> to vector<512x128xbf16>
    %cst_78 = arith.constant dense<0.000000e+00> : vector<128x128xf32>
    %192 = tpu.matmul %189, %191, %cst_78 {dimension_numbers = #tpu.dot_dimension_numbers<[1], [0], [0], [1], [0, 0, 1, 1], [], []>} : vector<128x512xbf16>, vector<512x128xbf16>, vector<128x128xf32> -> vector<128x128xf32>
    %c0_79 = arith.constant 0 : index
    %c0_80 = arith.constant 0 : index
    %c0_81 = arith.constant 0 : index
    %193 = vector.load %arg19[%c0_79, %c0_80, %c0_81] : memref<1x1x128xf32, #tpu.memory_space<vmem>>, vector<1x1x128xf32>
    %194 = vector.shape_cast %193 : vector<1x1x128xf32> to vector<1x128xf32>
    %195 = vector.broadcast %194 : vector<1x128xf32> to vector<128x128xf32>
    %196 = arith.addf %192, %195 : vector<128x128xf32>
    %197 = arith.addf %167, %196 : vector<128x128xf32>
    %c0_82 = arith.constant 0 : index
    %c0_83 = arith.constant 0 : index
    %c0_84 = arith.constant 0 : index
    %198 = vector.load %arg20[%c0_82, %c0_83, %c0_84] : memref<1x1x128xf32, #tpu.memory_space<vmem>>, vector<1x1x128xf32>
    %199 = vector.shape_cast %198 : vector<1x1x128xf32> to vector<1x128xf32>
    %c0_85 = arith.constant 0 : index
    %c0_86 = arith.constant 0 : index
    %c0_87 = arith.constant 0 : index
    %200 = vector.load %arg21[%c0_85, %c0_86, %c0_87] : memref<1x1x128xf32, #tpu.memory_space<vmem>>, vector<1x1x128xf32>
    %201 = vector.shape_cast %200 : vector<1x1x128xf32> to vector<1x128xf32>
    %cst_88 = arith.constant dense<0.000000e+00> : vector<128xf32>
    %202 = vector.multi_reduction <add>, %197, %cst_88 [1] : vector<128x128xf32> to vector<128xf32>
    %203 = vector.shape_cast %202 : vector<128xf32> to vector<128x1xf32>
    %cst_89 = arith.constant 1.280000e+02 : f32
    %204 = vector.broadcast %cst_89 : f32 to vector<128x1xf32>
    %205 = arith.divf %203, %204 : vector<128x1xf32>
    %206 = vector.broadcast %205 : vector<128x1xf32> to vector<128x128xf32>
    %207 = arith.subf %197, %206 : vector<128x128xf32>
    %208 = arith.mulf %207, %207 : vector<128x128xf32>
    %cst_90 = arith.constant dense<0.000000e+00> : vector<128xf32>
    %209 = vector.multi_reduction <add>, %208, %cst_90 [1] : vector<128x128xf32> to vector<128xf32>
    %210 = vector.shape_cast %209 : vector<128xf32> to vector<128x1xf32>
    %cst_91 = arith.constant 1.280000e+02 : f32
    %211 = vector.broadcast %cst_91 : f32 to vector<128x1xf32>
    %212 = arith.divf %210, %211 : vector<128x1xf32>
    %213 = vector.broadcast %205 : vector<128x1xf32> to vector<128x128xf32>
    %214 = arith.subf %197, %213 : vector<128x128xf32>
    %cst_92 = arith.constant 9.99999996E-13 : f32
    %215 = vector.broadcast %cst_92 : f32 to vector<128x1xf32>
    %216 = arith.addf %212, %215 : vector<128x1xf32>
    %217 = math.rsqrt %216 : vector<128x1xf32>
    %218 = vector.broadcast %217 : vector<128x1xf32> to vector<128x128xf32>
    %219 = arith.mulf %214, %218 : vector<128x128xf32>
    %220 = vector.broadcast %199 : vector<1x128xf32> to vector<128x128xf32>
    %221 = arith.mulf %219, %220 : vector<128x128xf32>
    %222 = vector.broadcast %201 : vector<1x128xf32> to vector<128x128xf32>
    %223 = arith.addf %221, %222 : vector<128x128xf32>
    %c0_93 = arith.constant 0 : index
    %c0_94 = arith.constant 0 : index
    %224 = vector.load %arg23[%c0_93, %c0_94] : memref<128x128xf32, #tpu.memory_space<vmem>>, vector<128x128xf32>
    tpu.vector_store %arg23[%c0_93, %c0_94], %223 {strides = array<i32>} : memref<128x128xf32, #tpu.memory_space<vmem>>, vector<128x128xf32>,
    %c1_i32 = arith.constant 1 : i32
    %225 = arith.cmpi eq, %arg1, %c1_i32 : i32
    %226 = arith.extui %225 : i1 to i32
    %c0_i32_95 = arith.constant 0 : i32
    %227 = arith.cmpi ne, %226, %c0_i32_95 : i32
    scf.if %227 {
      %228 = vector.shape_cast %223 : vector<128x128xf32> to vector<1x128x128xf32>
      %c0_96 = arith.constant 0 : index
      %c0_97 = arith.constant 0 : index
      %c0_98 = arith.constant 0 : index
      %229 = vector.load %arg22[%c0_96, %c0_97, %c0_98] : memref<1x128x128xf32, #tpu.memory_space<vmem>>, vector<1x128x128xf32>
      tpu.vector_store %arg22[%c0_96, %c0_97, %c0_98], %228 {strides = array<i32>} : memref<1x128x128xf32, #tpu.memory_space<vmem>>, vector<1x128x128xf32>,
    } else {
    }
    return
  }
  func.func @transform_0(%arg0: i32, %arg1: i32) -> (i32, i32, i32) {
    %c0_i32 = arith.constant 0 : i32
    %c0_i32_0 = arith.constant 0 : i32
    %c0_i32_1 = arith.constant 0 : i32
    return %arg0, %c0_i32, %c0_i32_0 : i32, i32, i32
  }
  func.func @transform_1(%arg0: i32, %arg1: i32) -> (i32, i32, i32) {
    %c0_i32 = arith.constant 0 : i32
    %c0_i32_0 = arith.constant 0 : i32
    %c0_i32_1 = arith.constant 0 : i32
    return %arg0, %c0_i32, %c0_i32_0 : i32, i32, i32
  }
  func.func @transform_2(%arg0: i32, %arg1: i32) -> (i32, i32) {
    %c0_i32 = arith.constant 0 : i32
    %c0_i32_0 = arith.constant 0 : i32
    %c0_i32_1 = arith.constant 0 : i32
    return %c0_i32, %c0_i32_0 : i32, i32
  }
  func.func @transform_3(%arg0: i32, %arg1: i32) -> (i32, i32) {
    %c0_i32 = arith.constant 0 : i32
    %c0_i32_0 = arith.constant 0 : i32
    %c0_i32_1 = arith.constant 0 : i32
    return %c0_i32, %c0_i32_0 : i32, i32
  }
  func.func @transform_4(%arg0: i32, %arg1: i32) -> (i32, i32, i32) {
    %c0_i32 = arith.constant 0 : i32
    %c0_i32_0 = arith.constant 0 : i32
    %c0_i32_1 = arith.constant 0 : i32
    return %arg1, %c0_i32, %c0_i32_0 : i32, i32, i32
  }
  func.func @transform_5(%arg0: i32, %arg1: i32) -> (i32, i32, i32) {
    %c0_i32 = arith.constant 0 : i32
    %c0_i32_0 = arith.constant 0 : i32
    %c0_i32_1 = arith.constant 0 : i32
    return %arg1, %c0_i32, %c0_i32_0 : i32, i32, i32
  }
  func.func @transform_6(%arg0: i32, %arg1: i32) -> (i32, i32, i32) {
    %c0_i32 = arith.constant 0 : i32
    %c0_i32_0 = arith.constant 0 : i32
    %c0_i32_1 = arith.constant 0 : i32
    return %arg1, %c0_i32, %c0_i32_0 : i32, i32, i32
  }
  func.func @transform_7(%arg0: i32, %arg1: i32) -> (i32, i32, i32) {
    %c0_i32 = arith.constant 0 : i32
    %c0_i32_0 = arith.constant 0 : i32
    %c0_i32_1 = arith.constant 0 : i32
    return %arg1, %c0_i32, %c0_i32_0 : i32, i32, i32
  }
  func.func @transform_8(%arg0: i32, %arg1: i32) -> (i32, i32, i32) {
    %c0_i32 = arith.constant 0 : i32
    %c0_i32_0 = arith.constant 0 : i32
    %c0_i32_1 = arith.constant 0 : i32
    return %arg1, %c0_i32, %c0_i32_0 : i32, i32, i32
  }
  func.func @transform_9(%arg0: i32, %arg1: i32) -> (i32, i32, i32) {
    %c0_i32 = arith.constant 0 : i32
    %c0_i32_0 = arith.constant 0 : i32
    %c0_i32_1 = arith.constant 0 : i32
    return %arg1, %c0_i32, %c0_i32_0 : i32, i32, i32
  }
  func.func @transform_10(%arg0: i32, %arg1: i32) -> (i32, i32, i32) {
    %c0_i32 = arith.constant 0 : i32
    %c0_i32_0 = arith.constant 0 : i32
    %c0_i32_1 = arith.constant 0 : i32
    return %arg1, %c0_i32, %c0_i32_0 : i32, i32, i32
  }
  func.func @transform_11(%arg0: i32, %arg1: i32) -> (i32, i32, i32) {
    %c0_i32 = arith.constant 0 : i32
    %c0_i32_0 = arith.constant 0 : i32
    %c0_i32_1 = arith.constant 0 : i32
    return %arg1, %c0_i32, %c0_i32_0 : i32, i32, i32
  }
  func.func @transform_12(%arg0: i32, %arg1: i32) -> (i32, i32, i32) {
    %c0_i32 = arith.constant 0 : i32
    %c0_i32_0 = arith.constant 0 : i32
    %c0_i32_1 = arith.constant 0 : i32
    return %arg1, %c0_i32, %c0_i32_0 : i32, i32, i32
  }
  func.func @transform_13(%arg0: i32, %arg1: i32) -> (i32, i32, i32) {
    %c0_i32 = arith.constant 0 : i32
    %c0_i32_0 = arith.constant 0 : i32
    %c0_i32_1 = arith.constant 0 : i32
    return %arg1, %c0_i32, %c0_i32_0 : i32, i32, i32
  }
  func.func @transform_14(%arg0: i32, %arg1: i32) -> (i32, i32, i32) {
    %c0_i32 = arith.constant 0 : i32
    %c0_i32_0 = arith.constant 0 : i32
    %c0_i32_1 = arith.constant 0 : i32
    return %arg1, %c0_i32, %c0_i32_0 : i32, i32, i32
  }
  func.func @transform_15(%arg0: i32, %arg1: i32) -> (i32, i32, i32) {
    %c0_i32 = arith.constant 0 : i32
    %c0_i32_0 = arith.constant 0 : i32
    %c0_i32_1 = arith.constant 0 : i32
    return %arg1, %c0_i32, %c0_i32_0 : i32, i32, i32
  }
  func.func @transform_16(%arg0: i32, %arg1: i32) -> (i32, i32, i32) {
    %c0_i32 = arith.constant 0 : i32
    %c0_i32_0 = arith.constant 0 : i32
    %c0_i32_1 = arith.constant 0 : i32
    return %arg1, %c0_i32, %c0_i32_0 : i32, i32, i32
  }
  func.func @transform_17(%arg0: i32, %arg1: i32) -> (i32, i32, i32) {
    %c0_i32 = arith.constant 0 : i32
    %c0_i32_0 = arith.constant 0 : i32
    %c0_i32_1 = arith.constant 0 : i32
    return %arg1, %c0_i32, %c0_i32_0 : i32, i32, i32
  }
  func.func @transform_18(%arg0: i32, %arg1: i32) -> (i32, i32, i32) {
    %c0_i32 = arith.constant 0 : i32
    %c0_i32_0 = arith.constant 0 : i32
    %c0_i32_1 = arith.constant 0 : i32
    return %arg1, %c0_i32, %c0_i32_0 : i32, i32, i32
  }
  func.func @transform_19(%arg0: i32, %arg1: i32) -> (i32, i32, i32) {
    %c0_i32 = arith.constant 0 : i32
    %c0_i32_0 = arith.constant 0 : i32
    %c0_i32_1 = arith.constant 0 : i32
    return %arg1, %c0_i32, %c0_i32_0 : i32, i32, i32
  }
  func.func @transform_20(%arg0: i32, %arg1: i32) -> (i32, i32, i32) {
    %c0_i32 = arith.constant 0 : i32
    %c0_i32_0 = arith.constant 0 : i32
    %c0_i32_1 = arith.constant 0 : i32
    return %arg0, %c0_i32, %c0_i32_0 : i32, i32, i32
  }
}

</mosaic_0001>

<bundles_post_ra>
// kernel: tpu_custom_call.1
= control target key start
LH: loop header
LB: loop body
LE: loop exit
PB: predicated region body
PF: predicated region fallthrough
CT: control target
= control target key end

     0   :  { %s12501_s0 = inlined_call_operand.hbm [shape: f32[2,128,128], index: 0, kind: input, shape index: {}]   ;;  %s12502_s1 = inlined_call_operand.hbm [shape: f32[2,1,128], index: 1, kind: input, shape index: {}]   ;;  %s12503_s2 = inlined_call_operand.hbm [shape: f32[1,128], index: 2, kind: input, shape index: {}]   ;;  %s12504_s3 = inlined_call_operand.hbm [shape: f32[1,128], index: 3, kind: input, shape index: {}]   ;;  %s12505_s4 = inlined_call_operand.hbm [shape: bf16[2,128,128], index: 4, kind: input, shape index: {}]   ;;  %s12506_s5 = inlined_call_operand.vmem [shape: f32[2,1,128], index: 5, kind: input, shape index: {}]   ;;  %s12507_s6 = inlined_call_operand.hbm [shape: bf16[2,128,128], index: 6, kind: input, shape index: {}]   ;;  %s12508_s7 = inlined_call_operand.vmem [shape: f32[2,1,128], index: 7, kind: input, shape index: {}]   ;;  %s12509_s8 = inlined_call_operand.hbm [shape: bf16[2,128,128], index: 8, kind: input, shape index: {}]   ;;  %s12510_s9 = inlined_call_operand.vmem [shape: f32[2,1,128], index: 9, kind: input, shape index: {}]   ;;  %s12511_s10 = inlined_call_operand.hbm [shape: bf16[2,128,128], index: 10, kind: input, shape index: {}]   ;;  %s12512_s11 = inlined_call_operand.hbm [shape: f32[2,1,128], index: 11, kind: input, shape index: {}]   ;;  %s12513_s12 = inlined_call_operand.hbm [shape: f32[2,1,128], index: 12, kind: input, shape index: {}]   ;;  %s12514_s13 = inlined_call_operand.hbm [shape: f32[2,1,128], index: 13, kind: input, shape index: {}]   ;;  %s12515_s14 = inlined_call_operand.hbm [shape: bf16[2,128,512], index: 14, kind: input, shape index: {}]   ;;  %s12516_s15 = inlined_call_operand.vmem [shape: f32[2,1,512], index: 15, kind: input, shape index: {}]   ;;  %s12517_s16 = inlined_call_operand.hbm [shape: bf16[2,512,128], index: 16, kind: input, shape index: {}]   ;;  %s12518_s17 = inlined_call_operand.vmem [shape: f32[2,1,128], index: 17, kind: input, shape index: {}]   ;;  %s12519_s18 = inlined_call_operand.hbm [shape: f32[2,1,128], index: 18, kind: input, shape index: {}]   ;;  %s12520_s19 = inlined_call_operand.vmem [shape: f32[2,1,128], index: 19, kind: input, shape index: {}]   ;;  %s12521_s20 = inlined_call_operand.hbm [shape: f32[2,128,128], index: 20, kind: output, shape index: {}]  }
   0x1   :  { %12574 = sst [smem:[#allocation77_spill]] %s12501_s0 }
   0x2   :  { %12575 = sst [smem:[#allocation78_spill]] %s12502_s1 }
   0x3   :  { %12576 = sst [smem:[#allocation79_spill]] %s12503_s2 }
   0x4   :  { %12577 = sst [smem:[#allocation80_spill]] %s12504_s3 }
   0x5   :  { %12578 = sst [smem:[#allocation81_spill]] %s12505_s4 }
   0x6   :  { %12579 = sst [smem:[#allocation82_spill]] %s12506_s5 }
   0x7   :  { %12580 = sst [smem:[#allocation83_spill]] %s12507_s6 }
   0x8   :  { %12581 = sst [smem:[#allocation84_spill]] %s12508_s7 }
   0x9   :  { %12582 = sst [smem:[#allocation85_spill]] %s12509_s8 }
   0xa   :  { %12583 = sst [smem:[#allocation86_spill]] %s12510_s9 }
   0xb   :  { %12584 = sst [smem:[#allocation87_spill]] %s12511_s10 }
   0xc   :  { %12585 = sst [smem:[#allocation88_spill]] %s12512_s11 }
   0xd   :  { %12586 = sst [smem:[#allocation89_spill]] %s12513_s12 }
   0xe   :  { %12587 = sst [smem:[#allocation90_spill]] %s12514_s13 }
   0xf   :  { %12588 = sst [smem:[#allocation91_spill]] %s12515_s14 }
  0x10   :  { %12589 = sst [smem:[#allocation92_spill]] %s12516_s15 }
  0x11   :  { %12590 = sst [smem:[#allocation93_spill]] %s12517_s16 }
  0x12   :  { %12591 = sst [smem:[#allocation94_spill]] %s12518_s17 }
  0x13   :  { %12592 = sst [smem:[#allocation95_spill]] %s12519_s18 }
  0x14   :  { %12593 = sst [smem:[#allocation96_spill]] %s12520_s19 }
  0x15   :  { %12594 = sst [smem:[#allocation97_spill]] %s12521_s20 }
  0x16   :  { %25 = vsyncpa [#allocation4], 0 }
  0x17   :  { %27 = vsyncpa [#allocation4 + $0x1], 0 }
  0x18   :  { %28 = vsyncpa [#allocation7], 0 }
  0x19   :  { %30 = vsyncpa [#allocation7 + $0x1], 0 }
  0x1a   :  { %31 = vsyncpa [#allocation10], 0 }
  0x1b   :  { %32 = vsyncpa [#allocation5], 0 }
  0x1c   :  { %34 = vsyncpa [#allocation5 + $0x1], 0  ;;  %s8802_s1 = smov 0   ;;  %s8804_s22 = smov 0  }
  0x1d   :  { %s8806_s23 = smov 0   ;;  %s8808_s24 = smov 0  }
  0x1e   :  { %s8810_s2 = smov 0   ;;  %s8812_s25 = smov 0  }
  0x1f   :  { %s8814_s3 = smov 0   ;;  %s8816_s26 = smov 0  }
  0x20   :  { %s8818_s27 = smov 0   ;;  %s8820_s28 = smov 0  }
  0x21   :  { %s8822_s4 = smov 0  }
  0x22 LB: > { %12595 = sst [smem:[#allocation37_spill]] %s8644_s22  ;;  %s8858_s29 = sadd.s32 4294967295, %s8680_s4   ;;  %s8680_s4 = sphi %s8822_s4, %s40_s4   ;;  %s8676_s28 = sphi %s8820_s28, %s12739_s28   ;;  %s8672_s27 = sphi %s8818_s27, %s12738_s27   ;;  %s8668_s26 = sphi %s8816_s26, %s12737_s26   ;;  %s8664_s3 = sphi %s8814_s3, %s12736_s3   ;;  %s8660_s25 = sphi %s8812_s25, %s12735_s25   ;;  %s8656_s2 = sphi %s8810_s2, %s12734_s2   ;;  %s8652_s24 = sphi %s8808_s24, %s12733_s24   ;;  %s8648_s23 = sphi %s8806_s23, %s12732_s23   ;;  %s8644_s22 = sphi %s8804_s22, %s12731_s22   ;;  %s8640_s1 = sphi %s8802_s1, %s12730_s1  }
  0x23   : > { %12596 = sst [smem:[#allocation38_spill]] %s8648_s23  ;;  %s6820_s30 = sadd.s32 4294967294, %s8680_s4  }
  0x24   : > { %12597 = sst [smem:[#allocation39_spill]] %s8652_s24  ;;  %s49_s0 = sadd.s32 1, %s8672_s27 }
  0x25   : > { %12598 = sst [smem:[#allocation40_spill]] %s8656_s2  ;;  %s52_s21 = sadd.s32 1, %s8676_s28 }
  0x26   : > { %12599 = sst [smem:[#allocation41_spill]] %s8660_s25  ;;  %p50_p0 = scmp.ge.s32.totalorder %s49_s0, 2 }
  0x27   : > { %12600 = sst [smem:[#allocation42_spill]] %s8664_s3  ;;  %s59_s20 = sadd.s32 1, %s8660_s25 }
  0x28   : > { %12601 = sst [smem:[#allocation43_spill]] %s8668_s26  ;;  %p12526_p1 = scmp.ne.s32.totalorder %s8660_s25, %s8656_s2 }
  0x29   : > { %12602 = sst [smem:[#allocation44_spill]] %s8672_s27  ;;  %p67_p2 = scmp.eq.s32.totalorder %s8680_s4, 0 }
  0x2a   : > { %12603 = sst [smem:[#allocation45_spill]] %s8676_s28  ;;  %s12741_s0 = smov (%p50_p0, %s49_s0), 0 }
  0x2b   : > { %12604 = sst [smem:[#allocation46_spill]] %s8680_s4  ;;  %s12743_s21 = smov (!%p50_p0, %s52_s21), %s8676_s28 }
  0x2c   : > { %12605 = sst [smem:[#allocation47_spill]] %s8858_s29  ;;  %p8875_p3 = por %p67_p2, %p12526_p1 }
  0x2d   : > { %12606 = sst [smem:[#allocation48_spill]] %s12741_s0  ;;  %p12525_p4 = scmp.ne.s32.totalorder %s8656_s2, %s8652_s24 }
  0x2e   : > { %p54_p5 = scmp.ge.s32.totalorder %s12743_s21, 2  ;;  %p73_p6 = scmp.eq.s32.totalorder %s8858_s29, 0 }
  0x2f   : > { %s150_s19 = ssub.s32 %s8672_s27, %s12741_s0  ;;  %s153_s17 = sadd.s32 1, %s8648_s23 }
  0x30   : > { %s12745_s21 = smov (%p54_p5, %s12743_s21), 0  ;;  %p8892_p7 = por %p73_p6, %p12525_p4 }
  0x31   : > { %12608 = sst [smem:[#allocation49_spill]] %s12745_s21  ;;  %p151_p8 = scmp.eq.s32.totalorder %s150_s19, 0 }
  0x32   : > { %s12609_s15 = scalar_select %p8892_p7, 1, 0 }
  0x33   : > { %s56_s9 = ssub.s32 %s8676_s28, %s12745_s21  ;;  %p160_p9 = scmp.ne.s32.totalorder %s8648_s23, %s8644_s22 }
  0x34   : > { %12610 = sst [smem:[#allocation50_spill]] %s12609_s15  ;;  %p57_p10 = scmp.eq.s32.totalorder %s56_s9, 0 }
  0x35   : > { %p166_p11 = scmp.ne.s32.totalorder %s8644_s22, %s8640_s1  ;;  %p8910_p12 = por %p160_p9, %p67_p2 }
  0x36   : > { %s8903_s0 = scalar_select %p151_p8, %s8648_s23, %s153_s17  }
  0x37   : > { %s8906_s7 = scalar_select %p57_p10, %s8660_s25, %s59_s20  }
  0x38   : > { %12611 = sst [smem:[#allocation51_spill]] %s8903_s0  ;;  %p8916_p13 = por %p166_p11, %p73_p6 }
  0x39   : > { %12612 = sst [smem:[#allocation52_spill]] %s8906_s7  ;;  %p580_p0 = scmp.eq.s32.totalorder %s8858_s29, 3 }
  0x3a   : > { %s12614_s3 = scalar_select %p8916_p13, 1, 0 }
  0x3b   : > { %p586_p5 = scmp.eq.s32.totalorder %s6820_s30, 3  ;;  %p6821_p4 = scmp.ge.s32.totalorder %s8680_s4, 1 }
  0x3c   : > { %12615 = sst [smem:[#allocation53_spill]] %s12614_s3  ;;  %p593_p1 = scmp.lt.s32.totalorder %s8680_s4, 5 }
  0x3d   : > { %p12616_p7 = scmp.ne.s32.totalorder %s8660_s25, %s8656_s2  ;;  %p12619_p10 = scmp.ne.s32.totalorder %s8656_s2, %s8652_s24 }
  0x3e   : > { %p8937_p9 = pnand %p6821_p4, %p593_p1  ;;  %s12624_s21 = sld [smem:[#allocation79_spill]] }
  0x3f   : > { %p8926_p8 = por %p580_p0, %p12616_p7  ;;  %p8933_p2 = por %p586_p5, %p12619_p10 }
  0x40   : > { %s12622_s19 = scalar_select %p8937_p9, 1, 0 }
  0x41   : > { %s12617_s9 = scalar_select %p8926_p8, 1, 0 }
  0x42   : > { %s12620_s17 = scalar_select %p8933_p2, 1, 0 }
  0x43   : > { %12618 = sst [smem:[#allocation54_spill]] %s12617_s9  ;;  %p7475_p11 = pneg %p8937_p9 }
  0x44   : > { %12621 = sst [smem:[#allocation55_spill]] %s12620_s17  ;;  %s605_s30 = sshll.u32 %s12624_s21, 4  ;;  %s606_s30 = int_to_ptr.hbm [resolvable:$true] %s605_s30 }
  0x45   : > { %12623 = sst [smem:[#allocation56_spill]] %s12622_s19  ;;  %s8682_s7 = smov [#allocation8]  }
  0x46   : > { %s607_s0 = sshll.u32 %s8682_s7, 4  ;;  %s12625_s3 = sld [smem:[#allocation80_spill]]  ;;  %s608_s0 = int_to_ptr.vmem [resolvable:$true] %s607_s0 }
  0x47   : > { %p7476_p1 = pnand %p7475_p11, %p73_p6  ;;  %s8683_s17 = smov [#allocation9]  }
  0x48   : > { %s619_s15 = sshll.u32 %s8683_s17, 4  ;;  %p6824_p4 = scmp.ge.s32.totalorder %s8680_s4, 4  ;;  %s620_s15 = int_to_ptr.vmem [resolvable:$true] %s619_s15 }
  0x49   : > { %7478 = dma.hbm_to_vmem [thread:$0]  (!%p7476_p1), %s606_s30, 16, %s608_s0, [#allocation7]  }
  0x4a   : > { %626 = sbr.rel (%p6824_p4) target bundleno = 132 (0x84), region = 24  ;;  %s630_s7 = sand.u32 (!%p6824_p4), 1, %s8680_s4  }
  0x4b   : > { %s632_s24 = sand.u32 (!%p6824_p4), 1, %s8660_s25   ;;  %s7313_s21 = sshll.u32 (!%p6824_p4), %s8676_s28, 7 }
  0x4c   : > { %s617_s22 = sshll.u32 %s12625_s3, 4  ;;  %s6825_s3 = sshll.u32 (!%p6824_p4), %s632_s24, 7  ;;  %s618_s22 = int_to_ptr.hbm [resolvable:$true] %s617_s22 }
  0x4d   : > { %7481 = dma.hbm_to_vmem [thread:$0]  (!%p7476_p1), %s618_s22, 16, %s620_s15, [#allocation10]  }
  0x4e   : > { %s12626_s1 = sld [smem:[#allocation77_spill]] (!%p6824_p4)  ;;  %s634_s17 = scalar_lea.vmem (!%p6824_p4), [#allocation3], %s6825_s3 }
  0x4f   : > { %s642_s0 = sshll.u32 %s634_s17, 4  ;;  %s8958_s22 = scalar_lea.sflag [#allocation4], %s630_s7  ;;  %s643_s0 = int_to_ptr.vmem [resolvable:$true] %s642_s0 }
  0x50   : > { %s8684_s30 = smov 128   ;;  %s8685_s4 = smov 8  }
  0x51   : > { %s12627_s19 = sld [smem:[#allocation78_spill]]  ;;  %s655_s3 = scalar_lea.vmem [#allocation6], %s632_s24 }
  0x52   : > { %s662_s20 = sshll.u32 %s655_s3, 4  ;;  %s12628_s24 = sld [smem:[#allocation81_spill]]  ;;  %s663_s20 = int_to_ptr.vmem [resolvable:$true] %s662_s20 }
  0x53   : > { %s12629_s6 = sld [smem:[#allocation83_spill]] }
  0x54   : > { %s639_s2 = scalar_lea.hbm %s12626_s1, %s7313_s21  ;;  %s8973_s1 = sand.u32 1, %s8648_s23  }
  0x55   : > { %s640_s15 = sshll.u32 %s639_s2, 4  ;;  %s8967_s2 = scalar_lea.sflag [#allocation7], %s630_s7  ;;  %s641_s15 = int_to_ptr.hbm [resolvable:$true] %s640_s15 }
  0x56   : > { %7445 = dma.hbm_to_vmem [thread:$0]  (%p8875_p3), %s641_s15, 2048, %s643_s0, %s8958_s22, %s8684_s30, %s8684_s30, %s8685_s4  }
  0x57   : > { %s658_s9 = scalar_lea.hbm %s12627_s19, %s8676_s28  ;;  %s8976_s4 = sshll.u32 %s8672_s27, 6 }
  0x58   : > { %s660_s21 = sshll.u32 %s658_s9, 4  ;;  %s6828_s25 = sshll.u32 %s8973_s1, 6  ;;  %s661_s21 = int_to_ptr.hbm [resolvable:$true] %s660_s21 }
  0x59   : > { %7446 = dma.hbm_to_vmem [thread:$0]  (%p8875_p3), %s661_s21, 16, %s663_s20, %s8967_s2  }
  0x5a   : > { %s678_s17 = scalar_lea.hbm %s12628_s24, %s8976_s4  ;;  %s673_s26 = scalar_lea.vmem [#allocation11], %s6828_s25 }
  0x5b   : > { %s679_s7 = sshll.u32 %s678_s17, 4  ;;  %s681_s0 = sshll.u32 %s673_s26, 4  ;;  %s680_s7 = int_to_ptr.hbm [resolvable:$true] %s679_s7  ;;  %s682_s0 = int_to_ptr.vmem [resolvable:$true] %s681_s0 }
  0x5c   : > { %s12545_s15 = smov 64   ;;  %s8687_s30 = smov 4  }
  0x5d   : > { %7447 = dma.hbm_to_vmem [thread:$0]  (%p8910_p12), %s680_s7, 1024, %s682_s0, %s8958_s22, %s12545_s15, %s12545_s15, %s8687_s30  }
  0x5e   : > { %s706_s3 = scalar_lea.hbm %s12629_s6, %s8976_s4  ;;  %s701_s20 = scalar_lea.vmem [#allocation12], %s6828_s25 }
  0x5f   : > { %s709_s29 = sshll.u32 %s701_s20, 4  ;;  %s707_s19 = sshll.u32 %s706_s3, 4  ;;  %s710_s29 = int_to_ptr.vmem [resolvable:$true] %s709_s29  ;;  %s708_s19 = int_to_ptr.hbm [resolvable:$true] %s707_s19 }
  0x60   : > { %7448 = dma.hbm_to_vmem [thread:$0]  (%p8910_p12), %s708_s19, 1024, %s710_s29, %s8967_s2, %s12545_s15, %s12545_s15, %s8687_s30  }
  0x61   : > { %s12630_s8 = sld [smem:[#allocation85_spill]]  ;;  %s729_s26 = scalar_lea.vmem [#allocation13], %s6828_s25 }
  0x62   : > { %s737_s0 = sshll.u32 %s729_s26, 4  ;;  %s12631_s10 = sld [smem:[#allocation87_spill]]  ;;  %s738_s0 = int_to_ptr.vmem [resolvable:$true] %s737_s0 }
  0x63   : > { %s757_s29 = scalar_lea.vmem [#allocation14], %s6828_s25  ;;  %s12632_s11 = sld [smem:[#allocation88_spill]] }
  0x64   : > { %s765_s19 = sshll.u32 %s757_s29, 4  ;;  %s12633_s12 = sld [smem:[#allocation89_spill]]  ;;  %s766_s19 = int_to_ptr.vmem [resolvable:$true] %s765_s19 }
  0x65   : > { %s12634_s13 = sld [smem:[#allocation90_spill]]  ;;  %s8688_s17 = smov 256  }
  0x66   : > { %s12635_s14 = sld [smem:[#allocation91_spill]] }
  0x67   : > { %s734_s7 = scalar_lea.hbm %s12630_s8, %s8976_s4  ;;  %s12636_s16 = sld [smem:[#allocation93_spill]] }
  0x68   : > { %s735_s9 = sshll.u32 %s734_s7, 4  ;;  %s762_s20 = scalar_lea.hbm %s12631_s10, %s8976_s4  ;;  %s736_s9 = int_to_ptr.hbm [resolvable:$true] %s735_s9 }
  0x69   : > { %7449 = dma.hbm_to_vmem [thread:$0]  (%p8910_p12), %s736_s9, 1024, %s738_s0, %s8958_s22, %s12545_s15, %s12545_s15, %s8687_s30  }
  0x6a   : > { %s763_s24 = sshll.u32 %s762_s20, 4  ;;  %s781_s26 = scalar_lea.hbm %s12632_s11, %s8672_s27  ;;  %s764_s24 = int_to_ptr.hbm [resolvable:$true] %s763_s24 }
  0x6b   : > { %7450 = dma.hbm_to_vmem [thread:$0]  (%p8910_p12), %s764_s24, 1024, %s766_s19, %s8967_s2, %s12545_s15, %s12545_s15, %s8687_s30  }
  0x6c   : > { %s778_s0 = scalar_lea.vmem [#allocation15], %s8973_s1  ;;  %s783_s25 = sshll.u32 %s781_s26, 4  ;;  %s784_s25 = int_to_ptr.hbm [resolvable:$true] %s783_s25 }
  0x6d   : > { %s785_s4 = sshll.u32 %s778_s0, 4  ;;  %s798_s3 = scalar_lea.hbm %s12633_s12, %s8672_s27  ;;  %s786_s4 = int_to_ptr.vmem [resolvable:$true] %s785_s4 }
  0x6e   : > { %7451 = dma.hbm_to_vmem [thread:$0]  (%p8910_p12), %s784_s25, 16, %s786_s4, %s8958_s22  }
  0x6f   : > { %s795_s20 = scalar_lea.vmem [#allocation16], %s8973_s1  ;;  %s800_s19 = sshll.u32 %s798_s3, 4  ;;  %s801_s19 = int_to_ptr.hbm [resolvable:$true] %s800_s19 }
  0x70   : > { %s802_s29 = sshll.u32 %s795_s20, 4  ;;  %s815_s7 = scalar_lea.hbm %s12634_s13, %s8672_s27  ;;  %s803_s29 = int_to_ptr.vmem [resolvable:$true] %s802_s29 }
  0x71   : > { %7452 = dma.hbm_to_vmem [thread:$0]  (%p8910_p12), %s801_s19, 16, %s803_s29, %s8967_s2  }
  0x72   : > { %s812_s26 = scalar_lea.vmem [#allocation17], %s8973_s1  ;;  %s817_s4 = sshll.u32 %s815_s7, 4  ;;  %s818_s4 = int_to_ptr.hbm [resolvable:$true] %s817_s4 }
  0x73   : > { %s819_s0 = sshll.u32 %s812_s26, 4  ;;  %s6840_s25 = sshll.u32 %s8973_s1, 8  ;;  %s820_s0 = int_to_ptr.vmem [resolvable:$true] %s819_s0 }
  0x74   : > { %7453 = dma.hbm_to_vmem [thread:$0]  (%p8910_p12), %s818_s4, 16, %s820_s0, %s8958_s22  }
  0x75   : > { %s7318_s9 = sshll.u32 %s8672_s27, 8  ;;  %s830_s29 = scalar_lea.vmem [#allocation18], %s6840_s25 }
  0x76   : > { %s835_s20 = scalar_lea.hbm %s12635_s14, %s7318_s9  ;;  %s838_s19 = sshll.u32 %s830_s29, 4  ;;  %s839_s19 = int_to_ptr.vmem [resolvable:$true] %s838_s19 }
  0x77   : > { %s836_s24 = sshll.u32 %s835_s20, 4  ;;  %s8689_s7 = smov 16   ;;  %s837_s24 = int_to_ptr.hbm [resolvable:$true] %s836_s24 }
  0x78   : > { %7454 = dma.hbm_to_vmem [thread:$0]  (%p8910_p12), %s837_s24, 4096, %s839_s19, %s8967_s2, %s8688_s17, %s8688_s17, %s8689_s7  }
  0x79   : > { %s864_s4 = scalar_lea.hbm %s12636_s16, %s7318_s9  ;;  %s859_s21 = scalar_lea.vmem [#allocation19], %s6840_s25 }
  0x7a   : > { %s867_s3 = sshll.u32 %s859_s21, 4  ;;  %s865_s15 = sshll.u32 %s864_s4, 4  ;;  %s868_s3 = int_to_ptr.vmem [resolvable:$true] %s867_s3  ;;  %s866_s15 = int_to_ptr.hbm [resolvable:$true] %s865_s15 }
  0x7b   : > { %s12637_s20 = smov 64   ;;  %s12638_s18 = sld [smem:[#allocation95_spill]] }
  0x7c   : > { %7455 = dma.hbm_to_vmem [thread:$0]  (%p8910_p12), %s866_s15, 4096, %s868_s3, %s8958_s22, %s12637_s20, %s12637_s20, %s8687_s30  }
  0x7d   : > { %s886_s10 = scalar_lea.vmem [#allocation20], %s8973_s1 }
  0x7e   : > { %s893_s19 = sshll.u32 %s886_s10, 4  ;;  %s894_s19 = int_to_ptr.vmem [resolvable:$true] %s893_s19 }
  0x81   : > { %s889_s8 = scalar_lea.hbm %s12638_s18, %s8672_s27 }
  0x82   : > { %s891_s24 = sshll.u32 %s889_s8, 4  ;;  %s892_s24 = int_to_ptr.hbm [resolvable:$true] %s891_s24 }
  0x83   : > { %7456 = dma.hbm_to_vmem [thread:$0]  (%p8910_p12), %s892_s24, 16, %s894_s19, %s8967_s2  }
  0x84 PF: > { %908 = sbr.rel (%p8937_p9) target bundleno = 3485 (0xd9d), region = 100 }
  0x89   : > { %s12640_s9 = sld [smem:[#allocation47_spill]] }
  0x8a   : > { %s12641_s17 = sld [smem:[#allocation40_spill]] }
  0x8b   : > { %s12642_s7 = sld [smem:[#allocation50_spill]] }
  0x8f   : > { %s910_s26 = sand.u32 1, %s12640_s9  }
  0x90   : > { %s9072_s22 = sand.u32 1, %s12641_s17   ;;  %s9075_s1 = scalar_lea.sflag [#allocation4], %s910_s26 }
  0x91   : > { %s12546_s6 = sshll.u32 %s9072_s22, 7  ;;  %p12643_p3 = scmp.ne.s32.totalorder %s12642_s7, 0 }
  0x92   : > { %s9079_s8 = scalar_lea.vmem [#allocation3], %s12546_s6 }
  0x93   : > { %8579 = dma.done.wait (%p12643_p3), %s9075_s1, 2048  }
  0x94   : > { %8581 = vsyncadd (%p12643_p3), %s9075_s1, 4294965248  ;;  %s9087_s5 = scalar_lea.sflag [#allocation7], %s910_s26  ;;  %s9090_s10 = scalar_lea.vmem [#allocation6], %s9072_s22 }
  0x95   : > { %8583 = dma.done.wait (%p12643_p3), %s9087_s5, 16  }
  0x96   : > { %8585 = vsyncadd (%p12643_p3), %s9087_s5, 4294967280 }
  0x97   : > { %8587 = dma.done.wait (%p73_p6), [#allocation7], 16  }
  0x98   : > { %8589 = vsyncadd (%p73_p6), [#allocation7], 4294967280 }
  0x99   : > { %8591 = dma.done.wait (%p73_p6), [#allocation10], 16  }
  0x9a   : > { %8593 = vsyncadd (%p73_p6), [#allocation10], 4294967280  ;;  %s12644_s2 = sld [smem:[#allocation37_spill]] }
  0xa0   : > { %s9107_s30 = sand.u32 1, %s12644_s2  }
  0xa1   : > { %s6850_s0 = sshll.u32 %s9107_s30, 6 }
  0xa2   : > { %s9110_s4 = scalar_lea.vmem [#allocation11], %s6850_s0 }
  0xa3   : > { %8595 = dma.done.wait (%p8916_p13), %s9075_s1, 1024  }
  0xa4   : > { %8597 = vsyncadd (%p8916_p13), %s9075_s1, 4294966272  ;;  %s9118_s21 = scalar_lea.vmem [#allocation12], %s6850_s0 }
  0xa5   : > { %8599 = dma.done.wait (%p8916_p13), %s9087_s5, 1024  }
  0xa6   : > { %8601 = vsyncadd (%p8916_p13), %s9087_s5, 4294966272  ;;  %s9126_s3 = scalar_lea.vmem [#allocation13], %s6850_s0 }
  0xa7   : > { %8603 = dma.done.wait (%p8916_p13), %s9075_s1, 1024  }
  0xa8   : > { %8605 = vsyncadd (%p8916_p13), %s9075_s1, 4294966272  ;;  %s9134_s20 = scalar_lea.vmem [#allocation14], %s6850_s0 }
  0xa9   : > { %8607 = dma.done.wait (%p8916_p13), %s9087_s5, 1024  }
  0xaa   : > { %8609 = vsyncadd (%p8916_p13), %s9087_s5, 4294966272 }
  0xab   : > { %8611 = dma.done.wait (%p8916_p13), %s9075_s1, 16  }
  0xac   : > { %8613 = vsyncadd (%p8916_p13), %s9075_s1, 4294967280 }
  0xad   : > { %8615 = dma.done.wait (%p8916_p13), %s9087_s5, 16  }
  0xae   : > { %8617 = vsyncadd (%p8916_p13), %s9087_s5, 4294967280 }
  0xaf   : > { %8619 = dma.done.wait (%p8916_p13), %s9075_s1, 16  }
  0xb0   : > { %8621 = vsyncadd (%p8916_p13), %s9075_s1, 4294967280  ;;  %s6854_s25 = sshll.u32 %s9107_s30, 8 }
  0xb1   : > { %s9164_s9 = scalar_lea.vmem [#allocation18], %s6854_s25 }
  0xb2   : > { %12646 = sst [smem:[#allocation57_spill]] %s9164_s9 }
  0xb3   : > { %8623 = dma.done.wait (%p8916_p13), %s9087_s5, 4096  }
  0xb4   : > { %8625 = vsyncadd (%p8916_p13), %s9087_s5, 4294963200  ;;  %s9172_s17 = scalar_lea.vmem [#allocation19], %s6854_s25 }
  0xb5   : > { %12647 = sst [smem:[#allocation58_spill]] %s9172_s17 }
  0xb6   : > { %8627 = dma.done.wait (%p8916_p13), %s9075_s1, 4096  }
  0xb7   : > { %8629 = vsyncadd (%p8916_p13), %s9075_s1, 4294963200 }
  0xb8   : > { %8631 = dma.done.wait (%p8916_p13), %s9087_s5, 16  }
  0xb9   : > { %8633 = vsyncadd (%p8916_p13), %s9087_s5, 4294967280  ;;  %s12648_s26 = sld [smem:[#allocation42_spill]]  ;;  %s12655_s24 = sshll.u32 %s9072_s22, 7 }
  0xba   : > { %s12650_s19 = sld [smem:[#allocation84_spill]] }
  0xbb   : > { %s12651_s11 = sld [smem:[#allocation86_spill]] }
  0xbc   : > { %s12652_s18 = sld [smem:[#allocation92_spill]] }
  0xbd   : > { %s12653_s27 = sld [smem:[#allocation94_spill]] }
  0xbe   : > { %s12654_s7 = sld [smem:[#allocation96_spill]] }
  0xbf   : > { %p1156_p6 = scmp.lt.s32.totalorder %s12648_s26, 1  ;;  %p6858_p7 = scmp.ne.s32.totalorder %s12648_s26, 0 }
  0xc1   : > { %s9189_s2 = scalar_select %p1156_p6, %s12648_s26, 1 }
  0xc2   : > { %1179 = sbr.rel (%p6858_p7) target bundleno = 516 (0x204), region = 160 }
  0xc3   : > { %s1161_s5 = scalar_lea.vmem %s12650_s19, %s9189_s2  ;;  %s1164_s12 = scalar_lea.vmem %s12651_s11, %s9189_s2 }
  0xc4   : > { %s6857_s13 = sshll.u32 %s9189_s2, 2  ;;  %s1171_s23 = scalar_lea.vmem %s12653_s27, %s9189_s2 }
  0xc5   : > { %s9207_s28 = scalar_lea.vmem %s12652_s18, %s6857_s13  ;;  %s1174_s9 = scalar_lea.vmem %s12654_s7, %s9189_s2 }
  0xc6   : > { %s9219_s19 = scalar_lea.vmem [#allocation21], %s12655_s24 }
  0xc7   : > { %v9223_v0 = vld [vmem:[%s9079_s8 + $0x20] sm:$0xff]  ;;  %v1182_v1 = vld [vmem:[%s9079_s8 + $0x10] sm:$0xff]  ;;  %v1185_v3 = vld [vmem:[%s9079_s8 + $0x28] sm:$0xff]  ;;  %v8690_v16 = vmov 128.0  }
  0xc8   : > { %v1180_v2 = vld [vmem:[%s9079_s8] sm:$0xff]  ;;  %1206 = vadd.xlane.f32.xlu2 %v9223_v0  ;;  %1202 = vadd.xlane.f32.xlu1 %v1182_v1  ;;  %v1183_v4 = vld [vmem:[%s9079_s8 + $0x18] sm:$0xff]  ;;  %v1181_v5 = vld [vmem:[%s9079_s8 + $0x8] sm:$0xff]  ;;  %7596 = vrcp.f32 %v8690_v16 }
  0xc9   : > { %1198 = vadd.xlane.f32.xlu0 %v1180_v2  ;;  %v1188_v6 = vld [vmem:[%s9079_s8 + $0x40] sm:$0xff]  ;;  %v9233_v7 = vld [vmem:[%s9079_s8 + $0x38] sm:$0xff]  ;;  %v1186_v8 = vld [vmem:[%s9079_s8 + $0x30] sm:$0xff] }
  0xca   : > { %v9238_v9 = vld [vmem:[%s9079_s8 + $0x58] sm:$0xff]  ;;  %v9241_v10 = vld [vmem:[%s9079_s8 + $0x50] sm:$0xff]  ;;  %v9244_v11 = vld [vmem:[%s9079_s8 + $0x48] sm:$0xff] }
  0xcb   : > { %v9250_v12 = vld [vmem:[%s9079_s8 + $0x70] sm:$0xff]  ;;  %v9253_v13 = vld [vmem:[%s9079_s8 + $0x68] sm:$0xff]  ;;  %v9256_v14 = vld [vmem:[%s9079_s8 + $0x60] sm:$0xff] }
  0xcc   : > { %v9262_v15 = vld [vmem:[%s9079_s8 + $0x78] sm:$0xff] }
  0xce   : > { %v7597_v17 = vpop.eup %7596 }
  0xcf   : > { %v1231_v18 = vmul.f32 128.0, %v7597_v17  ;;  %vm1235_vm0 = vweird.f32 %v7597_v17 }
  0xd0   : > { %1208 = vadd.xlane.f32.xlu2 %v1185_v3  ;;  %1204 = vadd.xlane.f32.xlu1 %v1183_v4 }
  0xd1   : > { %1200 = vadd.xlane.f32.xlu0 %v1181_v5  ;;  %v1232_v19 = vsub.f32 1.0, %v1231_v18 }
  0xd3   : > { %v1233_v20 = vmul.f32 %v7597_v17, %v1232_v19 }
  0xd5   : > { %v1234_v21 = vadd.f32 %v7597_v17, %v1233_v20 }
  0xd7   : > { %v9265_v22 = vsel %vm1235_vm0, %v7597_v17, %v1234_v21 }
  0xd8   : > { %1214 = vadd.xlane.f32.xlu2 %v1188_v6  ;;  %1212 = vadd.xlane.f32.xlu1 %v9233_v7 }
  0xd9   : > { %1210 = vadd.xlane.f32.xlu0 %v1186_v8 }
  0xe0   : > { %1220 = vadd.xlane.f32.xlu2 %v9238_v9  ;;  %1218 = vadd.xlane.f32.xlu1 %v9241_v10 }
  0xe1   : > { %1216 = vadd.xlane.f32.xlu0 %v9244_v11 }
  0xe8   : > { %1226 = vadd.xlane.f32.xlu2 %v9250_v12  ;;  %1224 = vadd.xlane.f32.xlu1 %v9253_v13 }
  0xe9   : > { %1222 = vadd.xlane.f32.xlu0 %v9256_v14 }
  0xf1   : > { %1228 = vadd.xlane.f32.xlu0 %v9262_v15 }
 0x13b   : > { %v1207_v23 = vpop.xlane.xlu2 %1206  ;;  %v1203_v24 = vpop.xlane.xlu1 %1202 }
 0x13c   : > { %v1239_v25 = vmul.f32 %v9265_v22, %v1203_v24  ;;  %v1199_v26 = vpop.xlane.xlu0 %1198  ;;  %v1241_v43 = vmul.f32 %v9265_v22, %v1207_v23 }
 0x13d   : > { %v1237_v27 = vmul.f32 %v9265_v22, %v1199_v26 }
 0x13e   : > { %v9269_v28 = vsub.f32 %v1182_v1, %v1239_v25  ;;  %v9295_v49 = vsub.f32 %v9223_v0, %v1241_v43 }
 0x13f   : > { %v9271_v29 = vsub.f32 %v1180_v2, %v1237_v27 }
 0x140   : > { %v1271_v30 = vmul.f32 %v9269_v28, %v9269_v28  ;;  %v1273_v55 = vmul.f32 %v9295_v49, %v9295_v49 }
 0x141   : > { %v1269_v31 = vmul.f32 %v9271_v29, %v9271_v29 }
 0x142   : > { %1289 = vadd.xlane.f32.xlu0 %v1271_v30 }
 0x143   : > { %1285 = vadd.xlane.f32.xlu1 %v1269_v31  ;;  %v1209_v32 = vpop.xlane.xlu2 %1208  ;;  %v1205_v33 = vpop.xlane.xlu1 %1204 }
 0x144   : > { %v1242_v34 = vmul.f32 %v9265_v22, %v1209_v32  ;;  %v1240_v35 = vmul.f32 %v9265_v22, %v1205_v33  ;;  %v1201_v36 = vpop.xlane.xlu0 %1200 }
 0x145   : > { %v1238_v37 = vmul.f32 %v9265_v22, %v1201_v36 }
 0x146   : > { %v9280_v38 = vsub.f32 %v1185_v3, %v1242_v34  ;;  %v9282_v39 = vsub.f32 %v1183_v4, %v1240_v35 }
 0x147   : > { %v9284_v40 = vsub.f32 %v1181_v5, %v1238_v37 }
 0x148   : > { %v1274_v41 = vmul.f32 %v9280_v38, %v9280_v38  ;;  %v1272_v42 = vmul.f32 %v9282_v39, %v9282_v39 }
 0x149   : > { %v1270_v44 = vmul.f32 %v9284_v40, %v9284_v40 }
 0x14a   : > { %1295 = vadd.xlane.f32.xlu0 %v1274_v41 }
 0x14b   : > { %1291 = vadd.xlane.f32.xlu1 %v1272_v42  ;;  %1287 = vadd.xlane.f32.xlu2 %v1270_v44  ;;  %v1215_v45 = vpop.xlane.xlu2 %1214  ;;  %v1213_v46 = vpop.xlane.xlu1 %1212 }
 0x14c   : > { %v1245_v47 = vmul.f32 %v9265_v22, %v1215_v45  ;;  %v1211_v48 = vpop.xlane.xlu0 %1210  ;;  %v1244_v53 = vmul.f32 %v9265_v22, %v1213_v46 }
 0x14d   : > { %v1243_v50 = vmul.f32 %v9265_v22, %v1211_v48 }
 0x14e   : > { %v9298_v51 = vsub.f32 %v1188_v6, %v1245_v47  ;;  %v9310_v58 = vsub.f32 %v9233_v7, %v1244_v53 }
 0x14f   : > { %v9300_v52 = vsub.f32 %v1186_v8, %v1243_v50 }
 0x150   : > { %v1277_v54 = vmul.f32 %v9298_v51, %v9298_v51  ;;  %v1276_v1 = vmul.f32 %v9310_v58, %v9310_v58 }
 0x151   : > { %v1275_v56 = vmul.f32 %v9300_v52, %v9300_v52 }
 0x152   : > { %1301 = vadd.xlane.f32.xlu0 %v1277_v54 }
 0x153   : > { %1293 = vadd.xlane.f32.xlu2 %v1273_v55  ;;  %1297 = vadd.xlane.f32.xlu1 %v1275_v56  ;;  %v1221_v57 = vpop.xlane.xlu2 %1220  ;;  %v1219_v59 = vpop.xlane.xlu1 %1218 }
 0x154   : > { %v1248_v60 = vmul.f32 %v9265_v22, %v1221_v57  ;;  %v1217_v61 = vpop.xlane.xlu0 %1216  ;;  %v1247_v2 = vmul.f32 %v9265_v22, %v1219_v59 }
 0x155   : > { %v1246_v62 = vmul.f32 %v9265_v22, %v1217_v61 }
 0x156   : > { %v9315_v63 = vsub.f32 %v9238_v9, %v1248_v60  ;;  %v9328_v6 = vsub.f32 %v9241_v10, %v1247_v2 }
 0x157   : > { %v9318_v0 = vsub.f32 %v9244_v11, %v1246_v62 }
 0x158   : > { %v1280_v3 = vmul.f32 %v9315_v63, %v9315_v63  ;;  %v1279_v18 = vmul.f32 %v9328_v6, %v9328_v6 }
 0x159   : > { %v1278_v4 = vmul.f32 %v9318_v0, %v9318_v0 }
 0x15a   : > { %1307 = vadd.xlane.f32.xlu0 %v1280_v3 }
 0x15b   : > { %1299 = vadd.xlane.f32.xlu2 %v1276_v1  ;;  %1303 = vadd.xlane.f32.xlu1 %v1278_v4  ;;  %v1227_v5 = vpop.xlane.xlu2 %1226  ;;  %v1225_v9 = vpop.xlane.xlu1 %1224 }
 0x15c   : > { %v1251_v7 = vmul.f32 %v9265_v22, %v1227_v5  ;;  %v1223_v8 = vpop.xlane.xlu0 %1222  ;;  %v1250_v19 = vmul.f32 %v9265_v22, %v1225_v9  ;;  %v9383_v9 = vld [vmem:[#allocation8] ss:$0 sm:$0xff] }
 0x15d   : > { %v1249_v11 = vmul.f32 %v9265_v22, %v1223_v8 }
 0x15e   : > { %v9333_v16 = vsub.f32 %v9250_v12, %v1251_v7  ;;  %v9346_v12 = vsub.f32 %v9253_v13, %v1250_v19 }
 0x15f   : > { %v9336_v17 = vsub.f32 %v9256_v14, %v1249_v11 }
 0x160   : > { %v1283_v10 = vmul.f32 %v9333_v16, %v9333_v16  ;;  %v1282_v24 = vmul.f32 %v9346_v12, %v9346_v12 }
 0x161   : > { %v1281_v20 = vmul.f32 %v9336_v17, %v9336_v17 }
 0x162   : > { %1313 = vadd.xlane.f32.xlu0 %v1283_v10 }
 0x163   : > { %1305 = vadd.xlane.f32.xlu2 %v1279_v18  ;;  %1309 = vadd.xlane.f32.xlu1 %v1281_v20 }
 0x164   : > { %v1229_v21 = vpop.xlane.xlu0 %1228 }
 0x165   : > { %v1252_v14 = vmul.f32 %v9265_v22, %v1229_v21 }
 0x167   : > { %v9350_v23 = vsub.f32 %v9262_v15, %v1252_v14 }
 0x169   : > { %v1284_v25 = vmul.f32 %v9350_v23, %v9350_v23 }
 0x16b   : > { %1311 = vadd.xlane.f32.xlu2 %v1282_v24  ;;  %1315 = vadd.xlane.f32.xlu1 %v1284_v25  ;;  %v9395_v24 = vld [vmem:[#allocation9] ss:$0 sm:$0xff] }
 0x1b5   : > { %v1290_v26 = vpop.xlane.xlu0 %1289 }
 0x1b6   : > { %v1286_v27 = vpop.xlane.xlu1 %1285  ;;  %v1319_v30 = vmul.f32 %v1290_v26, %v9265_v22 }
 0x1b7   : > { %v1317_v13 = vmul.f32 %v1286_v27, %v9265_v22 }
 0x1b8   : > { %v1335_v31 = vadd.f32 1e-12, %v1319_v30 }
 0x1b9   : > { %v1333_v32 = vadd.f32 1e-12, %v1317_v13 }
 0x1ba   : > { %7598 = vrsqrt.f32 %v1335_v31  ;;  %vm1375_vm3 = vweird.f32 %v1335_v31 }
 0x1bb   : > { %7600 = vrsqrt.f32 %v1333_v32  ;;  %vm1355_vm4 = vweird.f32 %v1333_v32 }
 0x1bd   : > { %v1296_v15 = vpop.xlane.xlu0 %1295 }
 0x1be   : > { %v1292_v33 = vpop.xlane.xlu1 %1291  ;;  %v1288_v34 = vpop.xlane.xlu2 %1287  ;;  %v1322_v35 = vmul.f32 %v1296_v15, %v9265_v22 }
 0x1bf   : > { %v1320_v36 = vmul.f32 %v1292_v33, %v9265_v22  ;;  %v1318_v37 = vmul.f32 %v1288_v34, %v9265_v22 }
 0x1c0   : > { %v7599_v41 = vpop.eup %7598  ;;  %v9361_v42 = vadd.f32 1e-12, %v1322_v35 }
 0x1c1   : > { %v7601_v43 = vpop.eup %7600  ;;  %v1370_v44 = vmul.f32 %v7599_v41, %v1335_v31  ;;  %v9363_v45 = vadd.f32 1e-12, %v1320_v36  ;;  %v9365_v46 = vadd.f32 1e-12, %v1318_v37  ;;  %vm1376_vm1 = vweird.f32 %v7599_v41 }
 0x1c2   : > { %v1350_v47 = vmul.f32 %v7601_v43, %v1333_v32  ;;  %7602 = vrsqrt.f32 %v9361_v42  ;;  %vm1356_vm2 = vweird.f32 %v7601_v43  ;;  %vm1377_vm5 = vmor %vm1375_vm3, %vm1376_vm1  ;;  %vm1405_vm7 = vweird.f32 %v9361_v42 }
 0x1c3   : > { %v1371_v48 = vmul.f32 %v7599_v41, %v1370_v44  ;;  %7604 = vrsqrt.f32 %v9363_v45  ;;  %vm1357_vm6 = vmor %vm1355_vm4, %vm1356_vm2  ;;  %vm1385_vm11 = vweird.f32 %v9363_v45  ;;  %vm1365_vm12 = vweird.f32 %v9365_v46 }
 0x1c4   : > { %v1351_v50 = vmul.f32 %v7601_v43, %v1350_v47  ;;  %7606 = vrsqrt.f32 %v9365_v46 }
 0x1c5   : > { %v1372_v53 = vmul.f32 0.5, %v1371_v48  ;;  %v1302_v54 = vpop.xlane.xlu0 %1301 }
 0x1c6   : > { %v1352_v55 = vmul.f32 0.5, %v1351_v50  ;;  %v1294_v56 = vpop.xlane.xlu2 %1293  ;;  %v1298_v57 = vpop.xlane.xlu1 %1297  ;;  %v1325_v62 = vmul.f32 %v1302_v54, %v9265_v22 }
 0x1c7   : > { %v1373_v59 = vsub.f32 1.5, %v1372_v53  ;;  %v1321_v60 = vmul.f32 %v1294_v56, %v9265_v22  ;;  %v1323_v61 = vmul.f32 %v1298_v57, %v9265_v22 }
 0x1c8   : > { %v9373_v1 = vpop.eup %7602  ;;  %v1353_v2 = vsub.f32 1.5, %v1352_v55  ;;  %v9393_v14 = vadd.f32 1e-12, %v1325_v62 }
 0x1c9   : > { %v9375_v3 = vpop.eup %7604  ;;  %v1374_v4 = vmul.f32 %v7599_v41, %v1373_v59  ;;  %v1400_v5 = vmul.f32 %v9373_v1, %v9361_v42  ;;  %v9379_v7 = vadd.f32 1e-12, %v1321_v60  ;;  %v9388_v19 = vadd.f32 1e-12, %v1323_v61 }
 0x1ca   : > { %v9381_v8 = vpop.eup %7606  ;;  %v1354_v11 = vmul.f32 %v7601_v43, %v1353_v2  ;;  %v1380_v18 = vmul.f32 %v9375_v3, %v9363_v45  ;;  %vm1406_vm8 = vweird.f32 %v9373_v1  ;;  %vm1386_vm9 = vweird.f32 %v9375_v3 }
 0x1cb   : > { %v1378_v10 = vsel %vm1377_vm5, %v7599_v41, %v1374_v4  ;;  %v1360_v20 = vmul.f32 %v9381_v8, %v9365_v46  ;;  %v1401_v21 = vmul.f32 %v9373_v1, %v1400_v5  ;;  %7608 = vrsqrt.f32 %v9379_v7  ;;  %vm1407_vm13 = vmor %vm1405_vm7, %vm1406_vm8 }
 0x1cc   : > { %v1358_v25 = vsel %vm1357_vm6, %v7601_v43, %v1354_v11  ;;  %v1511_v26 = vmul.f32 %v1378_v10, %v9269_v28  ;;  %v1381_v27 = vmul.f32 %v9375_v3, %v1380_v18  ;;  %7610 = vrsqrt.f32 %v9388_v19  ;;  %vm1387_vm14 = vmor %vm1385_vm11, %vm1386_vm9 }
 0x1cd   : > { %v1509_v30 = vmul.f32 %v1358_v25, %v9271_v29  ;;  %v1361_v13 = vmul.f32 %v9381_v8, %v1360_v20  ;;  %v1402_v31 = vmul.f32 0.5, %v1401_v21  ;;  %7612 = vrsqrt.f32 %v9393_v14  ;;  %v1308_v48 = vpop.xlane.xlu0 %1307 }
 0x1ce   : > { %v1530_v32 = vmul.f32 %v9383_v9, %v1511_v26  ;;  %v1382_v15 = vmul.f32 0.5, %v1381_v27  ;;  %v1300_v33 = vpop.xlane.xlu2 %1299  ;;  %v1304_v41 = vpop.xlane.xlu1 %1303  ;;  %vm1366_vm10 = vweird.f32 %v9381_v8  ;;  %vm1395_vm15 = vweird.f32 %v9379_v7 }
 0x1cf   : > { %v1528_v28 = vmul.f32 %v9383_v9, %v1509_v30  ;;  %v1362_v34 = vmul.f32 0.5, %v1361_v13  ;;  %v1403_v35 = vsub.f32 1.5, %v1402_v31  ;;  %v1324_v37 = vmul.f32 %v1300_v33, %v9265_v22  ;;  %vm1367_vm0 = vmor %vm1365_vm12, %vm1366_vm10 }
 0x1d0   : > { %v1549_v29 = vadd.f32 %v9395_v24, %v1530_v32  ;;  %v1383_v36 = vsub.f32 1.5, %v1382_v15  ;;  %v1326_v46 = vmul.f32 %v1304_v41, %v9265_v22  ;;  %v1328_v60 = vmul.f32 %v1308_v48, %v9265_v22 }
 0x1d1   : > { %v1547_v43 = vadd.f32 %v9395_v24, %v1528_v28  ;;  %v1363_v44 = vsub.f32 1.5, %v1362_v34  ;;  %v1404_v47 = vmul.f32 %v9373_v1, %v1403_v35  ;;  %v9414_v50 = vpop.eup %7608  ;;  %v9423_v54 = vadd.f32 1e-12, %v1324_v37 }
 0x1d2   : > { %1565 = vst [vmem:[#allocation2 + $0x58] sm:$0xff] %v1549_v29  ;;  %v1384_v53 = vmul.f32 %v9375_v3, %v1383_v36  ;;  %v1390_v45 = vmul.f32 %v9414_v50, %v9379_v7  ;;  %v9433_v57 = vpop.eup %7610  ;;  %vm1415_vm1 = vweird.f32 %v9388_v19  ;;  %vm1396_vm2 = vweird.f32 %v9414_v50 }
 0x1d3   : > { %1563 = vst [vmem:[#allocation2 + $0x30] sm:$0xff] %v1547_v43  ;;  %v1364_v55 = vmul.f32 %v9381_v8, %v1363_v44  ;;  %v1408_v56 = vsel %vm1407_vm13, %v9373_v1, %v1404_v47  ;;  %7614 = vrsqrt.f32 %v9423_v54  ;;  %v7613_v61 = vpop.eup %7612  ;;  %v1410_v4 = vmul.f32 %v9433_v57, %v9388_v19  ;;  %vm1397_vm5 = vmor %vm1395_vm15, %vm1396_vm2 }
 0x1d4   : > { %v1388_v42 = vsel %vm1387_vm14, %v9375_v3, %v1384_v53  ;;  %v1514_v59 = vmul.f32 %v1408_v56, %v9280_v38  ;;  %v1391_v2 = vmul.f32 %v9414_v50, %v1390_v45  ;;  %v1430_v38 = vmul.f32 %v7613_v61, %v9393_v14 }
 0x1d5   : > { %v1512_v62 = vmul.f32 %v1388_v42, %v9282_v39  ;;  %v1368_v1 = vsel %vm1367_vm0, %v9381_v8, %v1364_v55  ;;  %v1411_v39 = vmul.f32 %v9433_v57, %v1410_v4  ;;  %v9458_v30 = vadd.f32 1e-12, %v1328_v60  ;;  %v1314_v36 = vpop.xlane.xlu0 %1313 }
 0x1d6   : > { %v1510_v3 = vmul.f32 %v1368_v1, %v9284_v40  ;;  %v1533_v5 = vmul.f32 %v9383_v9, %v1514_v59  ;;  %v1306_v11 = vpop.xlane.xlu2 %1305  ;;  %v1392_v10 = vmul.f32 0.5, %v1391_v2  ;;  %v1431_v21 = vmul.f32 %v7613_v61, %v1430_v38  ;;  %v1310_v15 = vpop.xlane.xlu1 %1309 }
 0x1d7   : > { %v1531_v18 = vmul.f32 %v9383_v9, %v1512_v62  ;;  %v9455_v40 = vadd.f32 1e-12, %v1326_v46  ;;  %v1412_v27 = vmul.f32 0.5, %v1411_v39  ;;  %vm1435_vm3 = vweird.f32 %v9393_v14 }
 0x1d8   : > { %v1529_v8 = vmul.f32 %v9383_v9, %v1510_v3  ;;  %v1552_v20 = vadd.f32 %v9395_v24, %v1533_v5  ;;  %v1393_v26 = vsub.f32 1.5, %v1392_v10  ;;  %v1432_v32 = vmul.f32 0.5, %v1431_v21 }
 0x1d9   : > { %v1550_v25 = vadd.f32 %v9395_v24, %v1531_v18  ;;  %v9460_v13 = vpop.eup %7614  ;;  %7616 = vrsqrt.f32 %v9455_v40  ;;  %v1413_v28 = vsub.f32 1.5, %v1412_v27  ;;  %vm1416_vm4 = vweird.f32 %v9433_v57 }
 0x1da   : > { %v1548_v31 = vadd.f32 %v9395_v24, %v1529_v8  ;;  %1568 = vst [vmem:[#allocation2 + $0x68] sm:$0xff] %v1552_v20  ;;  %v1394_v33 = vmul.f32 %v9414_v50, %v1393_v26  ;;  %v1420_v34 = vmul.f32 %v9460_v13, %v9423_v54  ;;  %v1433_v35 = vsub.f32 1.5, %v1432_v32  ;;  %vm1417_vm7 = vmor %vm1415_vm1, %vm1416_vm4 }
 0x1db   : > { %1566 = vst [vmem:[#allocation2 + $0x18] sm:$0xff] %v1550_v25  ;;  %vm1436_vm6 = vweird.f32 %v7613_v61  ;;  %7618 = vrsqrt.f32 %v9458_v30  ;;  %v1327_v29 = vmul.f32 %v1306_v11, %v9265_v22  ;;  %v1414_v41 = vmul.f32 %v9433_v57, %v1413_v28 }
 0x1dc   : > { %1564 = vst [vmem:[#allocation2] sm:$0xff] %v1548_v31  ;;  %v1398_v37 = vsel %vm1397_vm5, %v9414_v50, %v1394_v33  ;;  %v1421_v43 = vmul.f32 %v9460_v13, %v1420_v34  ;;  %v1329_v44 = vmul.f32 %v1310_v15, %v9265_v22  ;;  %v1434_v7 = vmul.f32 %v7613_v61, %v1433_v35  ;;  %vm1437_vm9 = vmor %vm1435_vm3, %vm1436_vm6 }
 0x1dd   : > { %v1513_v47 = vmul.f32 %v1398_v37, %v9295_v49  ;;  %vm1425_vm8 = vweird.f32 %v9423_v54  ;;  %v9483_v48 = vadd.f32 1e-12, %v1327_v29  ;;  %v1418_v53 = vsel %vm1417_vm7, %v9433_v57, %v1414_v41 }
 0x1de   : > { %v1422_v50 = vmul.f32 0.5, %v1421_v43  ;;  %v9488_v55 = vadd.f32 1e-12, %v1329_v44  ;;  %v1331_v56 = vmul.f32 %v1314_v36, %v9265_v22  ;;  %v1312_v45 = vpop.xlane.xlu2 %1311  ;;  %v1515_v46 = vmul.f32 %v1418_v53, %v9300_v52  ;;  %v1316_v39 = vpop.xlane.xlu1 %1315 }
 0x1df   : > { %v7617_v49 = vpop.eup %7616  ;;  %v1532_v19 = vmul.f32 %v9383_v9, %v1513_v47  ;;  %v1438_v42 = vsel %vm1437_vm9, %v7613_v61, %v1434_v7  ;;  %7620 = vrsqrt.f32 %v9483_v48  ;;  %vm1426_vm10 = vweird.f32 %v9460_v13 }
 0x1e0   : > { %v1517_v59 = vmul.f32 %v1438_v42, %v9298_v51  ;;  %v1423_v57 = vsub.f32 1.5, %v1422_v50  ;;  %v1440_v14 = vmul.f32 %v7617_v49, %v9455_v40  ;;  %v1534_v1 = vmul.f32 %v9383_v9, %v1515_v46  ;;  %vm1427_vm11 = vmor %vm1425_vm8, %vm1426_vm10 }
 0x1e1   : > { %v7619_v60 = vpop.eup %7618  ;;  %v1551_v62 = vadd.f32 %v9395_v24, %v1532_v19  ;;  %7622 = vrsqrt.f32 %v9488_v55  ;;  %v1330_v2 = vmul.f32 %v1312_v45, %v9265_v22  ;;  %vm1445_vm12 = vweird.f32 %v9455_v40 }
 0x1e2   : > { %v1536_v52 = vmul.f32 %v9383_v9, %v1517_v59  ;;  %v1424_v61 = vmul.f32 %v9460_v13, %v1423_v57  ;;  %v1441_v4 = vmul.f32 %v7617_v49, %v1440_v14  ;;  %v1460_v51 = vmul.f32 %v7619_v60, %v9458_v30 }
 0x1e3   : > { %1567 = vst [vmem:[#allocation2 + $0x50] sm:$0xff] %v1551_v62  ;;  %v1553_v3 = vadd.f32 %v9395_v24, %v1534_v1  ;;  %v9508_v5 = vadd.f32 1e-12, %v1331_v56  ;;  %vm1465_vm13 = vweird.f32 %v9458_v30  ;;  %v9515_v54 = vadd.f32 1e-12, %v1330_v2 }
 0x1e4   : > { %v1555_v38 = vadd.f32 %v9395_v24, %v1536_v52  ;;  %v1428_v11 = vsel %vm1427_vm11, %v9460_v13, %v1424_v61  ;;  %v1442_v18 = vmul.f32 0.5, %v1441_v4  ;;  %v1461_v10 = vmul.f32 %v7619_v60, %v1460_v51 }
 0x1e5   : > { %v7621_v8 = vpop.eup %7620  ;;  %1569 = vst [vmem:[#allocation2 + $0x8] sm:$0xff] %v1553_v3  ;;  %v1516_v20 = vmul.f32 %v1428_v11, %v9310_v58  ;;  %7624 = vrsqrt.f32 %v9508_v5  ;;  %vm1446_vm14 = vweird.f32 %v7617_v49  ;;  %vm1466_vm15 = vweird.f32 %v7619_v60 }
 0x1e6   : > { %1571 = vst [vmem:[#allocation2 + $0x40] sm:$0xff] %v1555_v38  ;;  %v1443_v21 = vsub.f32 1.5, %v1442_v18  ;;  %v1462_v25 = vmul.f32 0.5, %v1461_v10  ;;  %v1450_v26 = vmul.f32 %v7621_v8, %v9483_v48  ;;  %7626 = vrsqrt.f32 %v9515_v54  ;;  %vm1447_vm0 = vmor %vm1445_vm12, %vm1446_vm14 }
 0x1e7   : > { %v7623_v27 = vpop.eup %7622  ;;  %v1535_v13 = vmul.f32 %v9383_v9, %v1516_v20  ;;  %v1332_v58 = vmul.f32 %v1316_v39, %v9265_v22  ;;  %vm1467_vm1 = vmor %vm1465_vm13, %vm1466_vm15  ;;  %vm1456_vm2 = vweird.f32 %v7621_v8  ;;  %vm1455_vm3 = vweird.f32 %v9483_v48 }
 0x1e8   : > { %v1444_v31 = vmul.f32 %v7617_v49, %v1443_v21  ;;  %v1463_v32 = vsub.f32 1.5, %v1462_v25  ;;  %v1451_v15 = vmul.f32 %v7621_v8, %v1450_v26  ;;  %v1470_v33 = vmul.f32 %v7623_v27, %v9488_v55  ;;  %vm1457_vm5 = vmor %vm1455_vm3, %vm1456_vm2 }
 0x1e9   : > { %v1554_v28 = vadd.f32 %v9395_v24, %v1535_v13  ;;  %v9525_v34 = vadd.f32 1e-12, %v1332_v58  ;;  %vm1476_vm4 = vweird.f32 %v7623_v27  ;;  %vm1475_vm6 = vweird.f32 %v9488_v55 }
 0x1ea   : > { %v1448_v35 = vsel %vm1447_vm0, %v7617_v49, %v1444_v31  ;;  %v1464_v29 = vmul.f32 %v7619_v60, %v1463_v32  ;;  %v1452_v36 = vmul.f32 0.5, %v1451_v15  ;;  %v1471_v37 = vmul.f32 %v7623_v27, %v1470_v33  ;;  %vm1477_vm7 = vmor %vm1475_vm6, %vm1476_vm4 }
 0x1eb   : > { %v7625_v41 = vpop.eup %7624  ;;  %1570 = vst [vmem:[#allocation2 + $0x48] sm:$0xff] %v1554_v28  ;;  %v1518_v22 = vmul.f32 %v1448_v35, %v9318_v0  ;;  %7628 = vrsqrt.f32 %v9525_v34  ;;  %vm1495_vm8 = vweird.f32 %v9508_v5  ;;  %vm1485_vm12 = vweird.f32 %v9515_v54 }
 0x1ec   : > { %v1468_v43 = vsel %vm1467_vm1, %v7619_v60, %v1464_v29  ;;  %v1453_v40 = vsub.f32 1.5, %v1452_v36  ;;  %v1472_v44 = vmul.f32 0.5, %v1471_v37  ;;  %v1490_v47 = vmul.f32 %v7625_v41, %v9508_v5  ;;  %v7627_v7 = vpop.eup %7626 }
 0x1ed   : > { %v1537_v53 = vmul.f32 %v9383_v9, %v1518_v22  ;;  %v1520_v50 = vmul.f32 %v1468_v43, %v9315_v63  ;;  %v1480_v45 = vmul.f32 %v7627_v7, %v9515_v54  ;;  %vm1496_vm9 = vweird.f32 %v7625_v41 }
 0x1ee   : > { %v1454_v0 = vmul.f32 %v7621_v8, %v1453_v40  ;;  %v1473_v56 = vsub.f32 1.5, %v1472_v44  ;;  %v1491_v30 = vmul.f32 %v7625_v41, %v1490_v47  ;;  %vm1486_vm10 = vweird.f32 %v7627_v7  ;;  %vm1497_vm11 = vmor %vm1495_vm8, %vm1496_vm9 }
 0x1ef   : > { %v1556_v49 = vadd.f32 %v9395_v24, %v1537_v53  ;;  %v1539_v19 = vmul.f32 %v9383_v9, %v1520_v50  ;;  %v1481_v63 = vmul.f32 %v7627_v7, %v1480_v45  ;;  %vm1487_vm13 = vmor %vm1485_vm12, %vm1486_vm10  ;;  %vm1505_vm15 = vweird.f32 %v9525_v34 }
 0x1f0   : > { %v1458_v46 = vsel %vm1457_vm5, %v7621_v8, %v1454_v0  ;;  %v1474_v42 = vmul.f32 %v7623_v27, %v1473_v56  ;;  %v1492_v59 = vmul.f32 0.5, %v1491_v30 }
 0x1f1   : > { %v7629_v57 = vpop.eup %7628  ;;  %1572 = vst [vmem:[#allocation2 + $0x20] sm:$0xff] %v1556_v49  ;;  %v1558_v48 = vadd.f32 %v9395_v24, %v1539_v19  ;;  %v1519_v14 = vmul.f32 %v1458_v46, %v9328_v6  ;;  %v1482_v1 = vmul.f32 0.5, %v1481_v63 }
 0x1f2   : > { %v1478_v60 = vsel %vm1477_vm7, %v7623_v27, %v1474_v42  ;;  %v1493_v62 = vsub.f32 1.5, %v1492_v59  ;;  %v1500_v55 = vmul.f32 %v7629_v57, %v9525_v34  ;;  %vm1506_vm14 = vweird.f32 %v7629_v57 }
 0x1f3   : > { %1574 = vst [vmem:[#allocation2 + $0x38] sm:$0xff] %v1558_v48  ;;  %v1538_v2 = vmul.f32 %v9383_v9, %v1519_v14  ;;  %v1521_v52 = vmul.f32 %v1478_v60, %v9336_v17  ;;  %v1483_v4 = vsub.f32 1.5, %v1482_v1  ;;  %vm1507_vm0 = vmor %vm1505_vm15, %vm1506_vm14 }
 0x1f4   : > { %v1494_v61 = vmul.f32 %v7625_v41, %v1493_v62  ;;  %v1501_v51 = vmul.f32 %v7629_v57, %v1500_v55 }
 0x1f5   : > { %v1557_v6 = vadd.f32 %v9395_v24, %v1538_v2  ;;  %v1540_v3 = vmul.f32 %v9383_v9, %v1521_v52  ;;  %v1484_v11 = vmul.f32 %v7627_v7, %v1483_v4 }
 0x1f6   : > { %v1498_v38 = vsel %vm1497_vm11, %v7625_v41, %v1494_v61  ;;  %v1502_v18 = vmul.f32 0.5, %v1501_v51 }
 0x1f7   : > { %1573 = vst [vmem:[#allocation2 + $0x10] sm:$0xff] %v1557_v6  ;;  %v1559_v10 = vadd.f32 %v9395_v24, %v1540_v3  ;;  %v1523_v17 = vmul.f32 %v1498_v38, %v9333_v16  ;;  %v1488_v39 = vsel %vm1487_vm13, %v7627_v7, %v1484_v11 }
 0x1f8   : > { %v1503_v8 = vsub.f32 1.5, %v1502_v18  ;;  %v1522_v5 = vmul.f32 %v1488_v39, %v9346_v12 }
 0x1f9   : > { %1575 = vst [vmem:[#allocation2 + $0x60] sm:$0xff] %v1559_v10  ;;  %v1542_v20 = vmul.f32 %v9383_v9, %v1523_v17 }
 0x1fa   : > { %v1504_v21 = vmul.f32 %v7629_v57, %v1503_v8  ;;  %v1541_v25 = vmul.f32 %v9383_v9, %v1522_v5 }
 0x1fb   : > { %v1561_v54 = vadd.f32 %v9395_v24, %v1542_v20 }
 0x1fc   : > { %v1508_v26 = vsel %vm1507_vm0, %v7629_v57, %v1504_v21  ;;  %v1560_v16 = vadd.f32 %v9395_v24, %v1541_v25 }
 0x1fd   : > { %1577 = vst [vmem:[#allocation2 + $0x78] sm:$0xff] %v1561_v54  ;;  %v1524_v27 = vmul.f32 %v1508_v26, %v9350_v23 }
 0x1fe   : > { %1576 = vst [vmem:[#allocation2 + $0x70] sm:$0xff] %v1560_v16 }
 0x1ff   : > { %v1543_v13 = vmul.f32 %v9383_v9, %v1524_v27 }
 0x201   : > { %v1562_v58 = vadd.f32 %v9395_v24, %v1543_v13 }
 0x203   : > { %1578 = vst [vmem:[#allocation2 + $0x28] sm:$0xff] %v1562_v58 }
 0x204 PF: > { %v7327_v12 = vld [vmem:[%s9110_s4 + $0x38] sm:$0xff]  ;;  %v7326_v23 = vld [vmem:[%s9110_s4 + $0x30] sm:$0xff]  ;;  %v7325_v24 = vld [vmem:[%s9110_s4 + $0x28] sm:$0xff]  ;;  %s12656_s14 = sld [smem:[#allocation82_spill]]  ;;  %s8691_s8 = smov 96   ;;  %vm2118_vm1 = vcmask 261120  }
 0x205   : > { %v7335_v31 = vld [vmem:[%s9118_s21 + $0x38] sm:$0xff]  ;;  %1675 = vmatpush.bf16.msra.mxu0 %v7327_v12  ;;  %7417 = vmatpush.bf16.msra.mxu3 %v7327_v12  ;;  %v7334_v9 = vld [vmem:[%s9118_s21 + $0x30] sm:$0xff]  ;;  %v7333_v32 = vld [vmem:[%s9118_s21 + $0x28] sm:$0xff]  ;;  %s12670_s7 = scalar_lea.vmem [#allocation17], %s9107_s30  ;;  %s12681_s26 = sld [smem:[#allocation58_spill]] }
 0x206   : > { %7425 = vmatpush.bf16.msra.mxu1 %v7335_v31  ;;  %v7324_v15 = vld [vmem:[%s9110_s4 + $0x20] sm:$0xff]  ;;  %v7323_v28 = vld [vmem:[%s9110_s4 + $0x18] sm:$0xff]  ;;  %v7322_v35 = vld [vmem:[%s9110_s4 + $0x10] sm:$0xff]  ;;  %s12694_s15 = smov %s12670_s7 }
 0x207   : > { %v7332_v33 = vld [vmem:[%s9118_s21 + $0x20] sm:$0xff]  ;;  %v7331_v34 = vld [vmem:[%s9118_s21 + $0x18] sm:$0xff]  ;;  %v7330_v29 = vld [vmem:[%s9118_s21 + $0x10] sm:$0xff] }
 0x208   : > { %v7321_v36 = vld [vmem:[%s9110_s4 + $0x8] sm:$0xff]  ;;  %v7320_v41 = vld [vmem:[%s9110_s4] sm:$0xff]  ;;  %v1581_v30 = vld [vmem:[#allocation2 + $0x58] sm:$0xff]  ;;  %s8692_s4 = smov 64  }
 0x209   : > { %1676 = vmatpush.bf16.msra.mxu0 %v7326_v23  ;;  %7418 = vmatpush.bf16.msra.mxu3 %v7326_v23  ;;  %v7329_v37 = vld [vmem:[%s9118_s21 + $0x8] sm:$0xff]  ;;  %v1580_v43 = vld [vmem:[#allocation2] sm:$0xff]  ;;  %v1582_v45 = vld [vmem:[#allocation2 + $0x18] sm:$0xff] }
 0x20a   : > { %7426 = vmatpush.bf16.msra.mxu1 %v7334_v9  ;;  %v1579_v22 = vld [vmem:[#allocation2 + $0x30] sm:$0xff]  ;;  %v1584_v44 = vld [vmem:[#allocation2 + $0x68] sm:$0xff]  ;;  %v1587_v7 = vld [vmem:[#allocation2 + $0x40] sm:$0xff]  ;;  %v9589_v59 = vpack.c.bf16 %v1582_v45, %v1581_v30  ;;  %s12657_s16 = scalar_lea.vmem %s12656_s14, %s9189_s2 }
 0x20b   : > { %v1583_v40 = vld [vmem:[#allocation2 + $0x50] sm:$0xff]  ;;  %v7328_v47 = vld [vmem:[%s9118_s21] sm:$0xff]  ;;  %v9580_v50 = vpack.c.bf16 %v1580_v43, %v1579_v22  ;;  %v1590_v42 = vld [vmem:[#allocation2 + $0x38] sm:$0xff]  ;;  %s8693_s21 = smov 32  }
 0x20c   : > { %v1588_v53 = vld [vmem:[#allocation2 + $0x20] sm:$0xff]  ;;  %v9582_v0 = vpack.c.bf16 %v1584_v44, %v1583_v40  ;;  %v1585_v49 = vld [vmem:[#allocation2 + $0x8] sm:$0xff]  ;;  %v1589_v46 = vld [vmem:[#allocation2 + $0x10] sm:$0xff] }
 0x20d   : > { %1677 = vmatpush.bf16.msra.mxu0 %v7325_v24  ;;  %7419 = vmatpush.bf16.msra.mxu3 %v7325_v24  ;;  %v9584_v56 = vpack.c.bf16 %v1588_v53, %v1587_v7  ;;  %v1586_v19 = vld [vmem:[#allocation2 + $0x48] sm:$0xff]  ;;  %v9593_v57 = vpack.c.bf16 %v1590_v42, %v1589_v46  ;;  %v1591_v48 = vld [vmem:[#allocation2 + $0x60] sm:$0xff]  ;;  %v1592_v14 = vld [vmem:[#allocation2 + $0x70] sm:$0xff] }
 0x20e   : > { %7427 = vmatpush.bf16.msra.mxu1 %v7333_v32  ;;  %v9591_v63 = vpack.c.bf16 %v1586_v19, %v1585_v49  ;;  %v9598_v60 = vpack.c.bf16 %v1592_v14, %v1591_v48  ;;  %v1593_v62 = vld [vmem:[#allocation2 + $0x78] sm:$0xff]  ;;  %v1594_v1 = vld [vmem:[#allocation2 + $0x28] sm:$0xff]  ;;  %v9617_v2 = vld [vmem:[%s12657_s16] ss:$0 sm:$0xff] }
 0x20f   : > { %v9603_v55 = vpack.c.bf16 %v1594_v1, %v1593_v62  ;;  %v9624_v4 = vld [vmem:[%s1161_s5] ss:$0 sm:$0xff] }
 0x211   : > { %1678 = vmatpush.bf16.msra.mxu0 %v7324_v15  ;;  %7420 = vmatpush.bf16.msra.mxu3 %v7324_v15 }
 0x212   : > { %7428 = vmatpush.bf16.msra.mxu1 %v7332_v33 }
 0x215   : > { %1679 = vmatpush.bf16.msra.mxu0 %v7323_v28  ;;  %7421 = vmatpush.bf16.msra.mxu3 %v7323_v28 }
 0x216   : > { %7429 = vmatpush.bf16.msra.mxu1 %v7331_v34 }
 0x219   : > { %1680 = vmatpush.bf16.msra.mxu0 %v7322_v35  ;;  %7422 = vmatpush.bf16.msra.mxu3 %v7322_v35 }
 0x21a   : > { %7430 = vmatpush.bf16.msra.mxu1 %v7330_v29 }
 0x21d   : > { %1681 = vmatpush.bf16.msra.mxu0 %v7321_v36  ;;  %7423 = vmatpush.bf16.msra.mxu3 %v7321_v36 }
 0x21e   : > { %7431 = vmatpush.bf16.msra.mxu1 %v7329_v37 }
 0x221   : > { %1682 = vmatpush.bf16.msra.mxu0 %v7320_v41  ;;  %7424 = vmatpush.bf16.msra.mxu3 %v7320_v41 }
 0x222   : > { %7432 = vmatpush.bf16.msra.mxu1 %v7328_v47 }
 0x224   : > { %1683 = vmatmul.bf16.vlgmr.msra.gmra.mxu0 %v9580_v50  ;;  %1693 = vmatmul.bf16.vlgmr.msra.gmra.mxu3 %v9582_v0 }
 0x225   : > { %1808 = vmatpush.bf16.msrb.mxu0 %v7335_v31  ;;  %1836 = vmatmul.bf16.vlgmr.msra.gmra.mxu1 %v9584_v56 }
 0x229   : > { %1809 = vmatpush.bf16.msrb.mxu0 %v7334_v9 }
 0x22d   : > { %1810 = vmatpush.bf16.msrb.mxu0 %v7333_v32 }
 0x231   : > { %1811 = vmatpush.bf16.msrb.mxu0 %v7332_v33 }
 0x234   : > { %1688 = vmatmul.bf16.gmra.mxu0 %v9589_v59  ;;  %1698 = vmatmul.bf16.gmra.mxu3 %v9591_v63 }
 0x235   : > { %1812 = vmatpush.bf16.msrb.mxu0 %v7331_v34  ;;  %1841 = vmatmul.bf16.gmra.mxu1 %v9593_v57 }
 0x239   : > { %1813 = vmatpush.bf16.msrb.mxu0 %v7330_v29 }
 0x23d   : > { %1814 = vmatpush.bf16.msrb.mxu0 %v7329_v37 }
 0x241   : > { %1815 = vmatpush.bf16.msrb.mxu0 %v7328_v47 }
 0x244   : > { %1816 = vmatmul.bf16.vlgmr.msrb.gmra.mxu0 %v9580_v50  ;;  %1703 = vmatmul.bf16.gmra.mxu3 %v9584_v56 }
 0x245   : > { %1846 = vmatmul.bf16.gmra.mxu1 %v9598_v60 }
 0x254   : > { %1821 = vmatmul.bf16.gmra.mxu0 %v9589_v59  ;;  %1708 = vmatmul.bf16.gmra.mxu3 %v9593_v57 }
 0x255   : > { %1851 = vmatmul.bf16.gmra.mxu1 %v9603_v55 }
 0x264   : > { %1826 = vmatmul.bf16.gmra.mxu0 %v9582_v0  ;;  %1713 = vmatmul.bf16.gmra.mxu3 %v9598_v60 }
 0x274   : > { %1831 = vmatmul.bf16.gmra.mxu0 %v9591_v63  ;;  %1718 = vmatmul.bf16.gmra.mxu3 %v9603_v55 }
 0x2a1   : > { %v1684_v52 = vpop.f32.mrf.mxu0 }
 0x2a2   : > { %v1837_v61 = vpop.f32.mrf.mxu1  ;;  %v1685_v51 = vadd.f32 %v9617_v2, %v1684_v52 }
 0x2a3   : > { %v1838_v6 = vadd.f32 %v9624_v4, %v1837_v61 }
 0x2a4   : > { %v1724_v38 = vmul.f32 0.17677669, %v1685_v51 }
 0x2a5   : > { %v1998_v39 = vpack.c.bf16 %v1838_v6, %v1838_v6 }
 0x2a6   : > { %v1974_v20 = vpack.c.bf16 %v1724_v38, %v1724_v38 }
 0x2a7   : > { %v1694_v3 = vpop.f32.mrf.mxu3  ;;  %v2102_v26 = vunpack.c.l.b16 %v1998_v39 }
 0x2a8   : > { %v1695_v11 = vadd.f32 %v9617_v2, %v1694_v3  ;;  %v2054_v13 = vunpack.c.l.b16 %v1974_v20 }
 0x2a9   : > { %v1686_v18 = vpop.f32.mrf.mxu0 }
 0x2aa   : > { %v1687_v10 = vadd.f32 %v9617_v2, %v1686_v18  ;;  %v1839_v17 = vpop.f32.mrf.mxu1  ;;  %v1728_v5 = vmul.f32 0.17677669, %v1695_v11 }
 0x2ab   : > { %v1840_v8 = vadd.f32 %v9624_v4, %v1839_v17 }
 0x2ac   : > { %v1725_v21 = vmul.f32 0.17677669, %v1687_v10  ;;  %v1978_v58 = vpack.c.bf16 %v1728_v5, %v1728_v5 }
 0x2ad   : > { %v1999_v54 = vpack.c.bf16 %v1840_v8, %v1840_v8 }
 0x2ae   : > { %v1975_v25 = vpack.c.bf16 %v1725_v21, %v1725_v21  ;;  %v2058_v33 = vunpack.c.l.b16 %v1978_v58 }
 0x2af   : > { %v2103_v16 = vunpack.c.l.b16 %v1999_v54  ;;  %v1696_v27 = vpop.f32.mrf.mxu3 }
 0x2b0   : > { %v2055_v12 = vunpack.c.l.b16 %v1975_v25  ;;  %v1697_v31 = vadd.f32 %v9617_v2, %v1696_v27 }
 0x2b1   : > { %v9632_v23 = vpack.c.b16 %v2103_v16, %v2102_v26  ;;  %v1689_v9 = vpop.f32.mrf.mxu0 }
 0x2b2   : > { %v9634_v24 = vpack.c.b16 %v2055_v12, %v2054_v13  ;;  %v1729_v32 = vmul.f32 0.17677669, %v1697_v31  ;;  %v1842_v15 = vpop.f32.mrf.mxu1  ;;  %v1690_v43 = vadd.f32 %v9617_v2, %v1689_v9 }
 0x2b3   : > { %2553 = vrot.lane.b32.xlu0 %v9632_v23, %s8691_s8  ;;  %v1843_v35 = vadd.f32 %v9624_v4, %v1842_v15 }
 0x2b4   : > { %v1979_v28 = vpack.c.bf16 %v1729_v32, %v1729_v32  ;;  %3117 = vrot.lane.b32.xlu1 %v9634_v24, %s8692_s4  ;;  %v1726_v53 = vmul.f32 0.17677669, %v1690_v43 }
 0x2b5   : > { %v2000_v40 = vpack.c.bf16 %v1843_v35, %v1843_v35 }
 0x2b6   : > { %v2059_v34 = vunpack.c.l.b16 %v1979_v28  ;;  %v1976_v1 = vpack.c.bf16 %v1726_v53, %v1726_v53 }
 0x2b7   : > { %v1699_v29 = vpop.f32.mrf.mxu3  ;;  %v2104_v30 = vunpack.c.l.b16 %v2000_v40 }
 0x2b8   : > { %v9641_v36 = vpack.c.b16 %v2059_v34, %v2058_v33  ;;  %v1700_v49 = vadd.f32 %v9617_v2, %v1699_v29  ;;  %v2056_v6 = vunpack.c.l.b16 %v1976_v1 }
 0x2b9   : > { %v1691_v37 = vpop.f32.mrf.mxu0 }
 0x2ba   : > { %v1692_v41 = vadd.f32 %v9617_v2, %v1691_v37  ;;  %v1844_v22 = vpop.f32.mrf.mxu1  ;;  %2533 = vrot.lane.b32.xlu2 %v9641_v36, %s8691_s8  ;;  %v1730_v52 = vmul.f32 0.17677669, %v1700_v49 }
 0x2bb   : > { %v1845_v44 = vadd.f32 %v9624_v4, %v1844_v22  ;;  %3141 = vrot.lane.b32.xlu0 %v9632_v23, %s8692_s4 }
 0x2bc   : > { %3636 = vrot.lane.b32.xlu1 %v9634_v24, %s8693_s21  ;;  %v1727_v47 = vmul.f32 0.17677669, %v1692_v41  ;;  %v1980_v3 = vpack.c.bf16 %v1730_v52, %v1730_v52 }
 0x2bd   : > { %v2001_v7 = vpack.c.bf16 %v1845_v44, %v1845_v44 }
 0x2be   : > { %v1977_v42 = vpack.c.bf16 %v1727_v47, %v1727_v47  ;;  %v2060_v8 = vunpack.c.l.b16 %v1980_v3 }
 0x2bf   : > { %v2105_v45 = vunpack.c.l.b16 %v2001_v7  ;;  %v1701_v19 = vpop.f32.mrf.mxu3 }
 0x2c0   : > { %v1702_v46 = vadd.f32 %v9617_v2, %v1701_v19  ;;  %v2057_v51 = vunpack.c.l.b16 %v1977_v42 }
 0x2c1   : > { %v9654_v48 = vpack.c.b16 %v2105_v45, %v2104_v30  ;;  %v1817_v14 = vpop.f32.mrf.mxu0 }
 0x2c2   : > { %v1847_v62 = vpop.f32.mrf.mxu1  ;;  %v1731_v61 = vmul.f32 0.17677669, %v1702_v46  ;;  %v9663_v10 = vpack.c.b16 %v2057_v51, %v2056_v6  ;;  %v1818_v9 = vadd.f32 %v9624_v4, %v1817_v14 }
 0x2c3   : > { %3660 = vrot.lane.b32.xlu0 %v9632_v23, %s8693_s21  ;;  %3143 = vrot.lane.b32.xlu2 %v9654_v48, %s8692_s4  ;;  %v1848_v18 = vadd.f32 %v9624_v4, %v1847_v62 }
 0x2c4   : > { %3662 = vrot.lane.b32.xlu1 %v9654_v48, %s8693_s21  ;;  %v1981_v38 = vpack.c.bf16 %v1731_v61, %v1731_v61  ;;  %v1990_v41 = vpack.c.bf16 %v1818_v9, %v1818_v9 }
 0x2c5   : > { %v2002_v21 = vpack.c.bf16 %v1848_v18, %v1848_v18 }
 0x2c6   : > { %v2061_v20 = vunpack.c.l.b16 %v1981_v38  ;;  %v2094_v30 = vunpack.c.l.b16 %v1990_v41 }
 0x2c7   : > { %v1704_v11 = vpop.f32.mrf.mxu3  ;;  %v2106_v27 = vunpack.c.l.b16 %v2002_v21 }
 0x2c8   : > { %v9672_v25 = vpack.c.b16 %v2061_v20, %v2060_v8  ;;  %v1705_v33 = vadd.f32 %v9617_v2, %v1704_v11 }
 0x2c9   : > { %v1819_v17 = vpop.f32.mrf.mxu0 }
 0x2ca   : > { %v1849_v39 = vpop.f32.mrf.mxu1  ;;  %v1820_v31 = vadd.f32 %v9624_v4, %v1819_v17  ;;  %v1732_v40 = vmul.f32 0.17677669, %v1705_v33 }
 0x2cb   : > { %v1850_v5 = vadd.f32 %v9624_v4, %v1849_v39  ;;  %2531 = vrot.lane.b32.xlu2 %v9663_v10, %s8691_s8  ;;  %2529 = vrot.lane.b32.xlu0 %v9634_v24, %s8691_s8 }
 0x2cc   : > { %3119 = vrot.lane.b32.xlu1 %v9663_v10, %s8692_s4  ;;  %v1991_v35 = vpack.c.bf16 %v1820_v31, %v1820_v31  ;;  %v1982_v46 = vpack.c.bf16 %v1732_v40, %v1732_v40  ;;  %v2156_v40 = vsel %vm2118_vm1, %v9632_v23, 0 }
 0x2cd   : > { %v2003_v54 = vpack.c.bf16 %v1850_v5, %v1850_v5 }
 0x2ce   : > { %v2095_v7 = vunpack.c.l.b16 %v1991_v35  ;;  %v2062_v3 = vunpack.c.l.b16 %v1982_v46 }
 0x2cf   : > { %v2107_v26 = vunpack.c.l.b16 %v2003_v54  ;;  %v1706_v16 = vpop.f32.mrf.mxu3 }
 0x2d0   : > { %v1707_v28 = vadd.f32 %v9617_v2, %v1706_v16  ;;  %v9689_v1 = vpack.c.b16 %v2095_v7, %v2094_v30 }
 0x2d1   : > { %v1822_v13 = vpop.f32.mrf.mxu0  ;;  %v2116_v58 = vpack.c.b16 %v2107_v26, %v2106_v27 }
 0x2d2   : > { %v1852_v12 = vpop.f32.mrf.mxu1  ;;  %v1733_v44 = vmul.f32 0.17677669, %v1707_v28  ;;  %v1823_v20 = vadd.f32 %v9624_v4, %v1822_v13 }
 0x2d3   : > { %2535 = vrot.lane.b32.xlu2 %v9672_v25, %s8691_s8  ;;  %2555 = vrot.lane.b32.xlu0 %v9654_v48, %s8691_s8  ;;  %v1853_v32 = vadd.f32 %v9624_v4, %v1852_v12  ;;  %v2162_v31 = vsel %vm2118_vm1, %v2116_v58, 0 }
 0x2d4   : > { %3664 = vrot.lane.b32.xlu1 %v2116_v58, %s8693_s21  ;;  %v1983_v42 = vpack.c.bf16 %v1733_v44, %v1733_v44  ;;  %v1992_v12 = vpack.c.bf16 %v1823_v20, %v1823_v20  ;;  %v7337_v20 = vld [vmem:[%s9126_s3 + $0x8] sm:$0xff] }
 0x2d5   : > { %v2004_v22 = vpack.c.bf16 %v1853_v32, %v1853_v32 }
 0x2d6   : > { %v2063_v38 = vunpack.c.l.b16 %v1983_v42  ;;  %v2096_v33 = vunpack.c.l.b16 %v1992_v12 }
 0x2d7   : > { %v1709_v15 = vpop.f32.mrf.mxu3  ;;  %v2108_v45 = vunpack.c.l.b16 %v2004_v22 }
 0x2d8   : > { %v1710_v34 = vadd.f32 %v9617_v2, %v1709_v15  ;;  %v9700_v5 = vpack.c.b16 %v2063_v38, %v2062_v3  ;;  %v2144_v3 = vsel %vm2118_vm1, %v9689_v1, 0  ;;  %v7341_v38 = vld [vmem:[%s9126_s3 + $0x28] sm:$0xff] }
 0x2d9   : > { %v1824_v29 = vpop.f32.mrf.mxu0 }
 0x2da   : > { %v1854_v37 = vpop.f32.mrf.mxu1  ;;  %v1734_v47 = vmul.f32 0.17677669, %v1710_v34  ;;  %v1825_v17 = vadd.f32 %v9624_v4, %v1824_v29 }
 0x2db   : > { %v1855_v43 = vadd.f32 %v9624_v4, %v1854_v37  ;;  %2557 = vrot.lane.b32.xlu2 %v2116_v58, %s8691_s8  ;;  %3145 = vrot.lane.b32.xlu0 %v2116_v58, %s8692_s4  ;;  %v2159_v58 = vsel %vm2118_vm1, %v9654_v48, 0 }
 0x2dc   : > { %v1984_v14 = vpack.c.bf16 %v1734_v47, %v1734_v47  ;;  %v1993_v54 = vpack.c.bf16 %v1825_v17, %v1825_v17 }
 0x2dd   : > { %v2005_v53 = vpack.c.bf16 %v1855_v43, %v1855_v43 }
 0x2de   : > { %v2064_v11 = vunpack.c.l.b16 %v1984_v14  ;;  %v2097_v13 = vunpack.c.l.b16 %v1993_v54 }
 0x2df   : > { %v2109_v49 = vunpack.c.l.b16 %v2005_v53  ;;  %v1711_v19 = vpop.f32.mrf.mxu3 }
 0x2e0   : > { %v1712_v62 = vadd.f32 %v9617_v2, %v1711_v19  ;;  %v2111_v34 = vpack.c.b16 %v2097_v13, %v2096_v33 }
 0x2e1   : > { %v2117_v52 = vpack.c.b16 %v2109_v49, %v2108_v45  ;;  %v1827_v61 = vpop.f32.mrf.mxu0 }
 0x2e2   : > { %v1735_v51 = vmul.f32 0.17677669, %v1712_v62  ;;  %v1828_v39 = vadd.f32 %v9624_v4, %v1827_v61  ;;  %v2147_v61 = vsel %vm2118_vm1, %v2111_v34, 0 }
 0x2e3   : > { %2545 = vrot.lane.b32.xlu2 %v9689_v1, %s8691_s8  ;;  %2559 = vrot.lane.b32.xlu1 %v2117_v52, %s8691_s8  ;;  %v2165_v6 = vsel %vm2118_vm1, %v2117_v52, 0 }
 0x2e4   : > { %3652 = vrot.lane.b32.xlu0 %v9689_v1, %s8693_s21  ;;  %2167 = vmatpush.bf16.xpose.msrb.mxu3 %v2165_v6  ;;  %v1985_v18 = vpack.c.bf16 %v1735_v51, %v1735_v51  ;;  %v1994_v16 = vpack.c.bf16 %v1828_v39, %v1828_v39  ;;  %v7343_v51 = vld [vmem:[%s9126_s3 + $0x38] sm:$0xff]  ;;  %v7342_v6 = vld [vmem:[%s9126_s3 + $0x30] sm:$0xff] }
 0x2e5   : > { %1925 = vmatpush.bf16.msra.mxu2 %v7343_v51 }
 0x2e6   : > { %v2065_v8 = vunpack.c.l.b16 %v1985_v18  ;;  %v2098_v32 = vunpack.c.l.b16 %v1994_v16  ;;  %v7339_v18 = vld [vmem:[%s9126_s3 + $0x18] sm:$0xff] }
 0x2e7   : > { %v1714_v29 = vpop.f32.mrf.mxu3 }
 0x2e8   : > { %v9702_v21 = vpack.c.b16 %v2065_v8, %v2064_v11  ;;  %v1715_v53 = vadd.f32 %v9617_v2, %v1714_v29  ;;  %v7340_v11 = vld [vmem:[%s9126_s3 + $0x20] sm:$0xff]  ;;  %v7338_v8 = vld [vmem:[%s9126_s3 + $0x10] sm:$0xff] }
 0x2e9   : > { %v1829_v26 = vpop.f32.mrf.mxu0  ;;  %1926 = vmatpush.bf16.msra.mxu2 %v7342_v6 }
 0x2ea   : > { %v1830_v27 = vadd.f32 %v9624_v4, %v1829_v26  ;;  %v7336_v26 = vld [vmem:[%s9126_s3] sm:$0xff] }
 0x2eb   : > { %3133 = vrot.lane.b32.xlu2 %v9689_v1, %s8692_s4  ;;  %2539 = vrot.lane.b32.xlu1 %v9702_v21, %s8691_s8 }
 0x2ec   : > { %v1995_v9 = vpack.c.bf16 %v1830_v27, %v1830_v27  ;;  %2537 = vrot.lane.b32.xlu0 %v9700_v5, %s8691_s8  ;;  %2168 = vmatpush.bf16.xpose.msrb.mxu3 %v2162_v31 }
 0x2ed   : > { %1927 = vmatpush.bf16.msra.mxu2 %v7341_v38  ;;  %v9824_v38 = vld [vmem:[%s9090_s10] ss:$0 sm:$0xff] }
 0x2ee   : > { %v2099_v15 = vunpack.c.l.b16 %v1995_v9 }
 0x2ef   : > { %v1716_v48 = vpop.f32.mrf.mxu3 }
 0x2f0   : > { %v2112_v28 = vpack.c.b16 %v2099_v15, %v2098_v32  ;;  %v1717_v30 = vadd.f32 %v9617_v2, %v1716_v48 }
 0x2f1   : > { %v1832_v35 = vpop.f32.mrf.mxu0  ;;  %1928 = vmatpush.bf16.msra.mxu2 %v7340_v11 }
 0x2f2   : > { %v1833_v37 = vadd.f32 %v9624_v4, %v1832_v35  ;;  %v1737_v19 = vmul.f32 0.17677669, %v1717_v30  ;;  %v2150_v62 = vsel %vm2118_vm1, %v2112_v28, 0 }
 0x2f3   : > { %2547 = vrot.lane.b32.xlu2 %v2111_v34, %s8691_s8  ;;  %2549 = vrot.lane.b32.xlu1 %v2112_v28, %s8691_s8 }
 0x2f4   : > { %3135 = vrot.lane.b32.xlu0 %v2111_v34, %s8692_s4  ;;  %2169 = vmatpush.bf16.xpose.msrb.mxu3 %v2159_v58  ;;  %v1996_v22 = vpack.c.bf16 %v1833_v37, %v1833_v37  ;;  %v1987_v46 = vpack.c.bf16 %v1737_v19, %v1737_v19 }
 0x2f5   : > { %1929 = vmatpush.bf16.msra.mxu2 %v7339_v18 }
 0x2f6   : > { %v2100_v47 = vunpack.c.l.b16 %v1996_v22  ;;  %v2067_v14 = vunpack.c.l.b16 %v1987_v46 }
 0x2f7   : > { %v1719_v37 = vpop.f32.mrf.mxu3 }
 0x2f9   : > { %v1834_v41 = vpop.f32.mrf.mxu0  ;;  %1930 = vmatpush.bf16.msra.mxu2 %v7338_v8 }
 0x2fa   : > { %v1835_v43 = vadd.f32 %v9624_v4, %v1834_v41  ;;  %v1736_v4 = vmul.f32 0.17677669, %v1715_v53  ;;  %v1720_v41 = vadd.f32 %v9617_v2, %v1719_v37 }
 0x2fb   : > { %3147 = vrot.lane.b32.xlu2 %v2117_v52, %s8692_s4 }
 0x2fc   : > { %v1997_v44 = vpack.c.bf16 %v1835_v43, %v1835_v43  ;;  %3137 = vrot.lane.b32.xlu0 %v2112_v28, %s8692_s4  ;;  %2170 = vmatpush.bf16.xpose.msrb.mxu3 %v2156_v40  ;;  %v1986_v23 = vpack.c.bf16 %v1736_v4, %v1736_v4  ;;  %v1738_v22 = vmul.f32 0.17677669, %v1720_v41 }
 0x2fd   : > { %1931 = vmatpush.bf16.msra.mxu2 %v7337_v20 }
 0x2fe   : > { %v2101_v7 = vunpack.c.l.b16 %v1997_v44  ;;  %v2066_v42 = vunpack.c.l.b16 %v1986_v23  ;;  %v1988_v44 = vpack.c.bf16 %v1738_v22, %v1738_v22 }
 0x2ff   : > { %v1721_v40 = vpop.f32.mrf.mxu3 }
 0x300   : > { %v2113_v45 = vpack.c.b16 %v2101_v7, %v2100_v47  ;;  %v1722_v48 = vadd.f32 %v9617_v2, %v1721_v40  ;;  %v2068_v7 = vunpack.c.l.b16 %v1988_v44 }
 0x301   : > { %1932 = vmatpush.bf16.msra.mxu2 %v7336_v26 }
 0x302   : > { %v2153_v49 = vsel %vm2118_vm1, %v2113_v45, 0  ;;  %v1739_v47 = vmul.f32 0.17677669, %v1722_v48 }
 0x303   : > { %3666 = vrot.lane.b32.xlu2 %v2117_v52, %s8693_s21  ;;  %v9731_v52 = vpack.c.b16 %v2067_v14, %v2066_v42 }
 0x304   : > { %3656 = vrot.lane.b32.xlu0 %v2112_v28, %s8693_s21  ;;  %2171 = vmatpush.bf16.xpose.msrb.mxu3 %v2153_v49  ;;  %v1989_v53 = vpack.c.bf16 %v1739_v47, %v1739_v47 }
 0x305   : > { %1933 = vmatmul.bf16.vlgmr.msra.gmra.mxu2 %v9580_v50 }
 0x306   : > { %v2069_v49 = vunpack.c.l.b16 %v1989_v53 }
 0x308   : > { %v9798_v4 = vpack.c.b16 %v2069_v49, %v2068_v7 }
 0x30b   : > { %3654 = vrot.lane.b32.xlu2 %v2111_v34, %s8693_s21 }
 0x30c   : > { %2551 = vrot.lane.b32.xlu0 %v2113_v45, %s8691_s8  ;;  %2172 = vmatpush.bf16.xpose.msrb.mxu3 %v2150_v62 }
 0x313   : > { %2541 = vrot.lane.b32.xlu2 %v9731_v52, %s8691_s8 }
 0x314   : > { %3139 = vrot.lane.b32.xlu0 %v2113_v45, %s8692_s4  ;;  %2173 = vmatpush.bf16.xpose.msrb.mxu3 %v2147_v61  ;;  %v9756_v16 = vpop.permute.xlu2 %2533 }
 0x315   : > { %1938 = vmatmul.bf16.gmra.mxu2 %v9589_v59 }
 0x31b   : > { %3658 = vrot.lane.b32.xlu2 %v2113_v45, %s8693_s21 }
 0x31c   : > { %2174 = vmatpush.bf16.xpose.msrb.mxu3 %v2144_v3 }
 0x31d   : > { %v9765_v12 = vpop.permute.xlu2 %3143 }
 0x323   : > { %6955 = vmatmul.msk.bf16.vlgmr.msrb.gmra.mxu3 %vm2118_vm1, %v9634_v24  ;;  %2543 = vrot.lane.b32.xlu2 %v9798_v4, %s8691_s8 }
 0x325   : > { %v2554_v17 = vpop.permute.xlu0 %2553  ;;  %v9774_v32 = vpop.permute.xlu2 %2531  ;;  %1943 = vmatmul.bf16.gmra.mxu2 %v9582_v0 }
 0x326   : > { %v9747_v39 = vpop.permute.xlu1 %3117  ;;  %v2598_v45 = vsel %vm2118_vm1, %v2554_v17, 0 }
 0x32d   : > { %v9751_v54 = vpop.permute.xlu0 %3141  ;;  %v9778_v50 = vpop.permute.xlu2 %2535 }
 0x32e   : > { %v9753_v1 = vpop.permute.xlu1 %3636 }
 0x32f   : > { %12659 = vst [vmem:[#allocation59_spill] sm:$0xff] %v9753_v1 }
 0x333   : > { %6956 = vmatmul.msk.bf16.gmra.mxu3 %vm2118_vm1, %v9663_v10 }
 0x335   : > { %v9760_v24 = vpop.permute.xlu0 %3660  ;;  %v2558_v29 = vpop.permute.xlu2 %2557  ;;  %1948 = vmatmul.bf16.gmra.mxu2 %v9591_v63 }
 0x336   : > { %v9763_v27 = vpop.permute.xlu1 %3662  ;;  %v2604_v58 = vsel %vm2118_vm1, %v2558_v29, 0 }
 0x33d   : > { %v9767_v31 = vpop.permute.xlu0 %2529  ;;  %v2546_v2 = vpop.permute.xlu2 %2545 }
 0x33e   : > { %v9769_v9 = vpop.permute.xlu1 %3119  ;;  %v2586_v6 = vsel %vm2118_vm1, %v2546_v2, 0 }
 0x343   : > { %6957 = vmatmul.msk.bf16.gmra.mxu3 %vm2118_vm1, %v9641_v36 }
 0x345   : > { %v2556_v13 = vpop.permute.xlu0 %2555  ;;  %1953 = vmatmul.bf16.gmra.mxu2 %v9584_v56  ;;  %v3134_v42 = vpop.permute.xlu2 %3133 }
 0x346   : > { %v9776_v15 = vpop.permute.xlu1 %3664  ;;  %v2601_v43 = vsel %vm2118_vm1, %v2556_v13, 0  ;;  %v3174_v22 = vsel %vm2118_vm1, %v3134_v42, 0 }
 0x34d   : > { %v3146_v33 = vpop.permute.xlu0 %3145  ;;  %v2548_v56 = vpop.permute.xlu2 %2547 }
 0x34e   : > { %v2589_v61 = vsel %vm2118_vm1, %v2548_v56, 0 }
 0x353   : > { %6958 = vmatmul.msk.bf16.gmra.mxu3 %vm2118_vm1, %v9672_v25 }
 0x355   : > { %v2560_v28 = vpop.permute.xlu1 %2559  ;;  %1958 = vmatmul.bf16.gmra.mxu2 %v9593_v57  ;;  %v3148_v51 = vpop.permute.xlu2 %3147  ;;  %v3192_v57 = vsel %vm2118_vm1, %v3146_v33, 0 }
 0x356   : > { %v9783_v34 = vpop.permute.xlu0 %3652  ;;  %v2607_v35 = vsel %vm2118_vm1, %v2560_v28, 0  ;;  %v3195_v3 = vsel %vm2118_vm1, %v3148_v51, 0 }
 0x357   : > { %2609 = vmatpush.bf16.xpose.msrb.mxu1 %v2607_v35 }
 0x35d   : > { %v9807_v19 = vpop.permute.xlu1 %2539 }
 0x35e   : > { %v9786_v59 = vpop.permute.xlu0 %2537 }
 0x35f   : > { %2610 = vmatpush.bf16.xpose.msrb.mxu1 %v2604_v58 }
 0x363   : > { %6959 = vmatmul.msk.bf16.gmra.mxu3 %vm2118_vm1, %v9700_v5 }
 0x365   : > { %v2550_v14 = vpop.permute.xlu1 %2549  ;;  %1963 = vmatmul.bf16.gmra.mxu2 %v9598_v60  ;;  %v3189_v60 = vsel %vm2118_vm1, %v9765_v12, 0 }
 0x366   : > { %v9793_v0 = vpop.permute.xlu0 %3135  ;;  %v2592_v62 = vsel %vm2118_vm1, %v2550_v14, 0 }
 0x367   : > { %2611 = vmatpush.bf16.xpose.msrb.mxu1 %v2601_v43  ;;  %v3177_v58 = vsel %vm2118_vm1, %v9793_v0, 0 }
 0x36e   : > { %v3138_v30 = vpop.permute.xlu0 %3137 }
 0x36f   : > { %2612 = vmatpush.bf16.xpose.msrb.mxu1 %v2598_v45  ;;  %v3180_v33 = vsel %vm2118_vm1, %v3138_v30, 0  ;;  %v9891_v30 = vpop.permute.xlu2 %3666 }
 0x373   : > { %6960 = vmatmul.msk.bf16.gmra.mxu3 %vm2118_vm1, %v9702_v21 }
 0x375   : > { %1968 = vmatmul.bf16.gmra.mxu2 %v9603_v55  ;;  %v3186_v55 = vsel %vm2118_vm1, %v9751_v54, 0 }
 0x376   : > { %v9805_v63 = vpop.permute.xlu0 %3656 }
 0x37e   : > { %v2552_v23 = vpop.permute.xlu0 %2551 }
 0x37f   : > { %v2595_v46 = vsel %vm2118_vm1, %v2552_v23, 0  ;;  %v9904_v23 = vpop.permute.xlu2 %3654 }
 0x380   : > { %2613 = vmatpush.bf16.xpose.msrb.mxu1 %v2595_v46 }
 0x383   : > { %6961 = vmatmul.msk.bf16.gmra.mxu3 %vm2118_vm1, %v9731_v52 }
 0x386   : > { %v3140_v20 = vpop.permute.xlu0 %3139 }
 0x388   : > { %2614 = vmatpush.bf16.xpose.msrb.mxu1 %v2592_v62  ;;  %v9845_v13 = vpop.f32.mrf.mxu2  ;;  %v2542_v62 = vpop.permute.xlu2 %2541 }
 0x390   : > { %2615 = vmatpush.bf16.xpose.msrb.mxu1 %v2589_v61  ;;  %v9854_v28 = vpop.f32.mrf.mxu2  ;;  %v9915_v51 = vpop.permute.xlu2 %3658 }
 0x393   : > { %6962 = vmatmul.msk.bf16.gmra.mxu3 %vm2118_vm1, %v9798_v4 }
 0x398   : > { %2616 = vmatpush.bf16.xpose.msrb.mxu1 %v2586_v6  ;;  %v9862_v37 = vpop.f32.mrf.mxu2 }
 0x39f   : > { %6963 = vmatmul.msk.bf16.vlgmr.msrb.gmra.mxu1 %vm2118_vm1, %v9767_v31  ;;  %v3183_v31 = vsel %vm2118_vm1, %v3140_v20, 0 }
 0x3a0   : > { %3197 = vmatpush.bf16.xpose.msra.mxu1 %v3195_v3  ;;  %v9871_v43 = vpop.f32.mrf.mxu2 }
 0x3a6   : > { %v2176_v11 = vpop.f32.mrf.mxu3 }
 0x3a7   : > { %v9828_v18 = vadd.f32 %v9824_v38, %v2176_v11  ;;  %v2544_v11 = vpop.permute.xlu2 %2543 }
 0x3a8   : > { %3198 = vmatpush.bf16.xpose.msra.mxu1 %v3192_v57  ;;  %v9877_v44 = vpop.f32.mrf.mxu2 }
 0x3a9   : > { %2216 = vmax.xlane.f32.xlu0 %v9828_v18 }
 0x3ae   : > { %v2178_v17 = vpop.f32.mrf.mxu3 }
 0x3af   : > { %6964 = vmatmul.msk.bf16.gmra.mxu1 %vm2118_vm1, %v9774_v32  ;;  %v9836_v8 = vadd.f32 %v9824_v38, %v2178_v17 }
 0x3b0   : > { %3199 = vmatpush.bf16.xpose.msra.mxu1 %v3189_v60  ;;  %v9885_v47 = vpop.f32.mrf.mxu2 }
 0x3b1   : > { %2218 = vmax.xlane.f32.xlu0 %v9836_v8 }
 0x3b6   : > { %v2181_v26 = vpop.f32.mrf.mxu3 }
 0x3b7   : > { %v9842_v12 = vadd.f32 %v9824_v38, %v2181_v26 }
 0x3b8   : > { %3200 = vmatpush.bf16.xpose.msra.mxu1 %v3186_v55  ;;  %v9893_v45 = vpop.f32.mrf.mxu2 }
 0x3b9   : > { %2220 = vmax.xlane.f32.xlu1 %v9842_v12 }
 0x3be   : > { %v2183_v32 = vpop.f32.mrf.mxu3 }
 0x3bf   : > { %6965 = vmatmul.msk.bf16.gmra.mxu1 %vm2118_vm1, %v9756_v16  ;;  %v9851_v54 = vadd.f32 %v9824_v38, %v2183_v32 }
 0x3c0   : > { %3201 = vmatpush.bf16.xpose.msra.mxu1 %v3183_v31  ;;  %v9901_v2 = vpop.f32.mrf.mxu2 }
 0x3c1   : > { %2222 = vmax.xlane.f32.xlu1 %v9851_v54 }
 0x3c6   : > { %v2186_v35 = vpop.f32.mrf.mxu3 }
 0x3c7   : > { %v9858_v29 = vadd.f32 %v9824_v38, %v2186_v35 }
 0x3c8   : > { %3202 = vmatpush.bf16.xpose.msra.mxu1 %v3180_v33  ;;  %v1954_v14 = vpop.f32.mrf.mxu2 }
 0x3c9   : > { %2224 = vmax.xlane.f32.xlu2 %v9858_v29 }
 0x3ce   : > { %v2188_v16 = vpop.f32.mrf.mxu3 }
 0x3cf   : > { %6966 = vmatmul.msk.bf16.gmra.mxu1 %vm2118_vm1, %v9778_v50  ;;  %v9868_v41 = vadd.f32 %v9824_v38, %v2188_v16 }
 0x3d0   : > { %3203 = vmatpush.bf16.xpose.msra.mxu1 %v3177_v58  ;;  %v1956_v61 = vpop.f32.mrf.mxu2 }
 0x3d1   : > { %2226 = vmax.xlane.f32.xlu2 %v9868_v41 }
 0x3d6   : > { %v2191_v0 = vpop.f32.mrf.mxu3 }
 0x3d7   : > { %v9875_v40 = vadd.f32 %v9824_v38, %v2191_v0 }
 0x3d8   : > { %3204 = vmatpush.bf16.xpose.msra.mxu1 %v3174_v22  ;;  %v1959_v57 = vpop.f32.mrf.mxu2 }
 0x3d9   : > { %2228 = vmax.xlane.f32.xlu0 %v9875_v40 }
 0x3de   : > { %v2193_v48 = vpop.f32.mrf.mxu3 }
 0x3df   : > { %6967 = vmatmul.msk.bf16.gmra.mxu1 %vm2118_vm1, %v9786_v59  ;;  %v9883_v50 = vadd.f32 %v9824_v38, %v2193_v48 }
 0x3e0   : > { %v1961_v55 = vpop.f32.mrf.mxu2 }
 0x3e1   : > { %2230 = vmax.xlane.f32.xlu1 %v9883_v50 }
 0x3e6   : > { %v2196_v7 = vpop.f32.mrf.mxu3 }
 0x3e7   : > { %v9889_v53 = vadd.f32 %v9824_v38, %v2196_v7 }
 0x3e8   : > { %v1964_v31 = vpop.f32.mrf.mxu2 }
 0x3e9   : > { %2232 = vmax.xlane.f32.xlu1 %v9889_v53 }
 0x3ee   : > { %v2198_v49 = vpop.f32.mrf.mxu3 }
 0x3ef   : > { %6968 = vmatmul.msk.bf16.gmra.mxu1 %vm2118_vm1, %v9807_v19  ;;  %v9899_v59 = vadd.f32 %v9824_v38, %v2198_v49 }
 0x3f0   : > { %v1966_v22 = vpop.f32.mrf.mxu2 }
 0x3f1   : > { %2234 = vmax.xlane.f32.xlu2 %v9899_v59 }
 0x3f6   : > { %v2201_v46 = vpop.f32.mrf.mxu3 }
 0x3f7   : > { %v9907_v42 = vadd.f32 %v9824_v38, %v2201_v46 }
 0x3f9   : > { %2236 = vmax.xlane.f32.xlu2 %v9907_v42 }
 0x3fe   : > { %v2203_v56 = vpop.f32.mrf.mxu3 }
 0x3ff   : > { %6969 = vmatmul.msk.bf16.gmra.mxu1 %vm2118_vm1, %v2542_v62  ;;  %v9912_v19 = vadd.f32 %v9824_v38, %v2203_v56 }
 0x401   : > { %2238 = vmax.xlane.f32.xlu0 %v9912_v19 }
 0x406   : > { %v2206_v6 = vpop.f32.mrf.mxu3 }
 0x407   : > { %v9918_v3 = vadd.f32 %v9824_v38, %v2206_v6 }
 0x409   : > { %2240 = vmax.xlane.f32.xlu0 %v9918_v3 }
 0x40e   : > { %v2208_v60 = vpop.f32.mrf.mxu3 }
 0x40f   : > { %6970 = vmatmul.msk.bf16.gmra.mxu1 %vm2118_vm1, %v2544_v11  ;;  %v9923_v17 = vadd.f32 %v9824_v38, %v2208_v60 }
 0x411   : > { %2242 = vmax.xlane.f32.xlu1 %v9923_v17 }
 0x416   : > { %v2211_v20 = vpop.f32.mrf.mxu3 }
 0x417   : > { %v9927_v26 = vadd.f32 %v9824_v38, %v2211_v20 }
 0x419   : > { %2244 = vmax.xlane.f32.xlu2 %v9927_v26 }
 0x41c   : > { %v2217_v32 = vpop.xlane.xlu0 %2216 }
 0x41d   : > { %v2248_v33 = vsub.f32 %v9828_v18, %v2217_v32  ;;  %v1969_v18 = vpop.f32.mrf.mxu2 }
 0x41e   : > { %v2213_v35 = vpop.f32.mrf.mxu3 }
 0x41f   : > { %v2264_v58 = vmul.f32 1.442695, %v2248_v33  ;;  %7003 = vmatmul.msk.bf16.vlgmr.msra.gmra.mxu1 %vm2118_vm1, %v9747_v39  ;;  %v9934_v16 = vadd.f32 %v9824_v38, %v2213_v35  ;;  %v9946_v39 = vld [vmem:[%s1164_s12] ss:$0 sm:$0xff]  ;;  %s12664_s12 = scalar_lea.vmem [#allocation15], %s9107_s30 }
 0x420   : > { %v1965_v62 = vadd.f32 %v9946_v39, %v1964_v31  ;;  %v1960_v11 = vadd.f32 %v9946_v39, %v1959_v57  ;;  %v1962_v60 = vadd.f32 %v9946_v39, %v1961_v55  ;;  %v1967_v33 = vadd.f32 %v9946_v39, %v1966_v22 }
 0x421   : > { %7640 = vpow2.f32 %v2264_v58  ;;  %2246 = vmax.xlane.f32.xlu0 %v9934_v16  ;;  %v1970_v31 = vadd.f32 %v9946_v39, %v1969_v18  ;;  %v1955_v35 = vadd.f32 %v9946_v39, %v1954_v14  ;;  %v1950_v14 = vadd.f32 %v9946_v39, %v9893_v45 }
 0x422   : > { %v2018_v20 = vpack.c.bf16 %v1965_v62, %v1965_v62  ;;  %v2019_v58 = vpack.c.bf16 %v1967_v33, %v1967_v33  ;;  %v2016_v57 = vpack.c.bf16 %v1960_v11, %v1960_v11  ;;  %v1947_v45 = vadd.f32 %v9946_v39, %v9885_v47 }
 0x423   : > { %v2014_v33 = vpack.c.bf16 %v1955_v35, %v1955_v35  ;;  %v1942_v47 = vadd.f32 %v9946_v39, %v9871_v43 }
 0x424   : > { %v2219_v0 = vpop.xlane.xlu0 %2218  ;;  %v2452_v55 = vunpack.c.l.b16 %v2018_v20 }
 0x425   : > { %v2249_v48 = vsub.f32 %v9836_v8, %v2219_v0  ;;  %v1971_v32 = vpop.f32.mrf.mxu2  ;;  %v2020_v0 = vpack.c.bf16 %v1970_v31, %v1970_v31  ;;  %v1945_v31 = vadd.f32 %v9946_v39, %v9877_v44  ;;  %v2448_v35 = vunpack.c.l.b16 %v2014_v33 }
 0x426   : > { %v1940_v44 = vadd.f32 %v9946_v39, %v9862_v37  ;;  %v1937_v37 = vadd.f32 %v9946_v39, %v9854_v28 }
 0x427   : > { %v9938_v7 = vpop.eup %7640  ;;  %v2266_v49 = vmul.f32 1.442695, %v2249_v48  ;;  %v1957_v48 = vadd.f32 %v9946_v39, %v1956_v61  ;;  %v1952_v61 = vadd.f32 %v9946_v39, %v9901_v2 }
 0x428   : > { %2296 = vadd.xlane.f32.xlu2 %v9938_v7 }
 0x429   : > { %7642 = vpow2.f32 %v2266_v49  ;;  %v2015_v11 = vpack.c.bf16 %v1957_v48, %v1957_v48 }
 0x42c   : > { %v2221_v46 = vpop.xlane.xlu1 %2220 }
 0x42d   : > { %v2250_v56 = vsub.f32 %v9842_v12, %v2221_v46  ;;  %v1972_v12 = vadd.f32 %v9946_v39, %v1971_v32  ;;  %v2017_v46 = vpack.c.bf16 %v1962_v60, %v1962_v60 }
 0x42f   : > { %v9950_v6 = vpop.eup %7642  ;;  %v2268_v8 = vmul.f32 1.442695, %v2250_v56  ;;  %7004 = vmatmul.msk.bf16.gmra.mxu1 %vm2118_vm1, %v9769_v9  ;;  %v2021_v9 = vpack.c.bf16 %v1972_v12, %v1972_v12  ;;  %v2453_v56 = vunpack.c.l.b16 %v2019_v58  ;;  %v2451_v60 = vunpack.c.l.b16 %v2017_v46 }
 0x430   : > { %2298 = vadd.xlane.f32.xlu0 %v9950_v6  ;;  %v2012_v12 = vpack.c.bf16 %v1950_v14, %v1950_v14  ;;  %v2013_v58 = vpack.c.bf16 %v1952_v61, %v1952_v61  ;;  %v2010_v46 = vpack.c.bf16 %v1945_v31, %v1945_v31 }
 0x431   : > { %7644 = vpow2.f32 %v2268_v8  ;;  %v2454_v8 = vunpack.c.l.b16 %v2020_v0  ;;  %v2455_v22 = vunpack.c.l.b16 %v2021_v9  ;;  %v9972_v20 = vpack.c.b16 %v2453_v56, %v2452_v55 }
 0x432   : > { %v2449_v0 = vunpack.c.l.b16 %v2015_v11  ;;  %v2011_v55 = vpack.c.bf16 %v1947_v45, %v1947_v45  ;;  %v2447_v56 = vunpack.c.l.b16 %v2013_v58  ;;  %v2444_v14 = vunpack.c.l.b16 %v2010_v46 }
 0x433   : > { %v9965_v32 = vpack.c.b16 %v2455_v22, %v2454_v8  ;;  %v1935_v8 = vadd.f32 %v9946_v39, %v9845_v13  ;;  %v2008_v22 = vpack.c.bf16 %v1940_v44, %v1940_v44  ;;  %v2007_v45 = vpack.c.bf16 %v1937_v37, %v1937_v37  ;;  %v7345_v37 = vld [vmem:[%s9134_s20 + $0x8] sm:$0xff] }
 0x434   : > { %v2223_v49 = vpop.xlane.xlu1 %2222  ;;  %v2445_v61 = vunpack.c.l.b16 %v2011_v55 }
 0x435   : > { %v2251_v62 = vsub.f32 %v9851_v54, %v2223_v49  ;;  %v2450_v54 = vunpack.c.l.b16 %v2016_v57  ;;  %2472 = vmatpush.bf16.msra.mxu0 %v9965_v32  ;;  %v2006_v31 = vpack.c.bf16 %v1935_v8, %v1935_v8  ;;  %v2442_v13 = vunpack.c.l.b16 %v2008_v22 }
 0x436   : > { %v10004_v39 = vpack.c.b16 %v2445_v61, %v2444_v14 }
 0x437   : > { %v9963_v1 = vpop.eup %7644  ;;  %v2270_v18 = vmul.f32 1.442695, %v2251_v62  ;;  %v9980_v48 = vpack.c.b16 %v2451_v60, %v2450_v54  ;;  %v2446_v62 = vunpack.c.l.b16 %v2012_v12  ;;  %v2441_v12 = vunpack.c.l.b16 %v2007_v45 }
 0x438   : > { %2300 = vadd.xlane.f32.xlu0 %v9963_v1 }
 0x439   : > { %7646 = vpow2.f32 %v2270_v18  ;;  %2473 = vmatpush.bf16.msra.mxu0 %v9972_v20  ;;  %v2009_v18 = vpack.c.bf16 %v1942_v47, %v1942_v47  ;;  %v9997_v33 = vpack.c.b16 %v2447_v56, %v2446_v62 }
 0x43b   : > { %v2443_v28 = vunpack.c.l.b16 %v2009_v18 }
 0x43c   : > { %v2225_v2 = vpop.xlane.xlu2 %2224 }
 0x43d   : > { %v2252_v9 = vsub.f32 %v9858_v29, %v2225_v2  ;;  %v9990_v29 = vpack.c.b16 %v2449_v0, %v2448_v35  ;;  %2474 = vmatpush.bf16.msra.mxu0 %v9980_v48  ;;  %v10009_v58 = vpack.c.b16 %v2443_v28, %v2442_v13  ;;  %v2618_v0 = vpop.f32.mrf.mxu1 }
 0x43e   : > { %v10050_v45 = vadd.f32 %v9824_v38, %v2618_v0 }
 0x43f   : > { %v9983_v49 = vpop.eup %7646  ;;  %v2272_v57 = vmul.f32 1.442695, %v2252_v9 }
 0x440   : > { %2302 = vadd.xlane.f32.xlu1 %v9983_v49 }
 0x441   : > { %7648 = vpow2.f32 %v2272_v57  ;;  %2475 = vmatpush.bf16.msra.mxu0 %v9990_v29 }
 0x444   : > { %v2227_v43 = vpop.xlane.xlu2 %2226 }
 0x445   : > { %v2253_v11 = vsub.f32 %v9868_v41, %v2227_v43  ;;  %2476 = vmatpush.bf16.msra.mxu0 %v9997_v33  ;;  %v2440_v41 = vunpack.c.l.b16 %v2006_v31  ;;  %v2620_v44 = vpop.f32.mrf.mxu1  ;;  %v7344_v43 = vld [vmem:[%s9134_s20] sm:$0xff] }
 0x446   : > { %v10029_v46 = vadd.f32 %v9824_v38, %v2620_v44 }
 0x447   : > { %v10001_v54 = vpop.eup %7648  ;;  %v2274_v60 = vmul.f32 1.442695, %v2253_v11  ;;  %v10015_v35 = vpack.c.b16 %v2441_v12, %v2440_v41 }
 0x448   : > { %2304 = vadd.xlane.f32.xlu1 %v10001_v54 }
 0x449   : > { %7650 = vpow2.f32 %v2274_v60  ;;  %2477 = vmatpush.bf16.msra.mxu0 %v10004_v39 }
 0x44c   : > { %3121 = vrot.lane.b32.xlu0 %v9641_v36, %s8692_s4 }
 0x44d   : > { %2478 = vmatpush.bf16.msra.mxu0 %v10009_v58  ;;  %v2623_v56 = vpop.f32.mrf.mxu1 }
 0x44e   : > { %v10053_v28 = vadd.f32 %v9824_v38, %v2623_v56 }
 0x44f   : > { %v10012_v2 = vpop.eup %7650 }
 0x450   : > { %2306 = vadd.xlane.f32.xlu2 %v10012_v2 }
 0x451   : > { %2479 = vmatpush.bf16.msra.mxu0 %v10015_v35 }
 0x454   : > { %v2231_v9 = vpop.xlane.xlu1 %2230 }
 0x455   : > { %v2255_v57 = vsub.f32 %v9883_v50, %v2231_v9  ;;  %3074 = vmatpush.bf16.msrb.mxu0 %v7345_v37  ;;  %v2625_v14 = vpop.f32.mrf.mxu1 }
 0x457   : > { %v2278_v47 = vmul.f32 1.442695, %v2255_v57 }
 0x459   : > { %7652 = vpow2.f32 %v2278_v47  ;;  %3075 = vmatpush.bf16.msrb.mxu0 %v7344_v43 }
 0x45c   : > { %v2233_v22 = vpop.xlane.xlu1 %2232 }
 0x45d   : > { %v2256_v61 = vsub.f32 %v9889_v53, %v2233_v22  ;;  %v2628_v12 = vpop.f32.mrf.mxu1 }
 0x45f   : > { %v2280_v31 = vmul.f32 1.442695, %v2256_v61 }
 0x461   : > { %3640 = vrot.lane.b32.xlu1 %v9641_v36, %s8693_s21  ;;  %v10032_v36 = vpop.eup %7652 }
 0x464   : > { %v2235_v55 = vpop.xlane.xlu2 %2234 }
 0x465   : > { %v2630_v47 = vpop.f32.mrf.mxu1 }
 0x466   : > { %v10072_v56 = vadd.f32 %v9824_v38, %v2630_v47  ;;  %v3711_v47 = vsel %vm2118_vm1, %v9776_v15, 0 }
 0x468   : > { %3638 = vrot.lane.b32.xlu2 %v9663_v10, %s8693_s21  ;;  %v2229_v10 = vpop.xlane.xlu0 %2228 }
 0x469   : > { %3123 = vrot.lane.b32.xlu1 %v9672_v25, %s8692_s4  ;;  %v2254_v50 = vsub.f32 %v9875_v40, %v2229_v10 }
 0x46b   : > { %v2276_v62 = vmul.f32 1.442695, %v2254_v50 }
 0x46d   : > { %7654 = vpow2.f32 %v2276_v62  ;;  %v10068_v62 = vadd.f32 %v9824_v38, %v2625_v14 }
 0x46e   : > { %7656 = vpow2.f32 %v2280_v31 }
 0x471   : > { %3642 = vrot.lane.b32.xlu1 %v9672_v25, %s8693_s21  ;;  %v2237_v25 = vpop.xlane.xlu2 %2236 }
 0x472   : > { %v2258_v60 = vsub.f32 %v9907_v42, %v2237_v25 }
 0x473   : > { %v10037_v18 = vpop.eup %7654 }
 0x474   : > { %v2239_v8 = vpop.xlane.xlu0 %2238  ;;  %v2284_v13 = vmul.f32 1.442695, %v2258_v60  ;;  %v10059_v42 = vpop.eup %7656 }
 0x475   : > { %v2259_v9 = vsub.f32 %v9912_v19, %v2239_v8 }
 0x476   : > { %2660 = vmax.xlane.f32.xlu0 %v10029_v46  ;;  %7658 = vpow2.f32 %v2284_v13 }
 0x477   : > { %v2286_v10 = vmul.f32 1.442695, %v2259_v9 }
 0x47c   : > { %v10044_v40 = vpop.xlane.xlu0 %2240  ;;  %v10062_v0 = vpop.eup %7658 }
 0x47e   : > { %2310 = vadd.xlane.f32.xlu0 %v10032_v36 }
 0x484   : > { %v10074_v19 = vpop.xlane.xlu1 %2242 }
 0x48c   : > { %v10046_v11 = vpop.xlane.xlu2 %2244 }
 0x491   : > { %2308 = vadd.xlane.f32.xlu2 %v10037_v18 }
 0x492   : > { %3125 = vrot.lane.b32.xlu0 %v9700_v5, %s8692_s4 }
 0x494   : > { %v10056_v53 = vpop.xlane.xlu0 %2246 }
 0x499   : > { %2658 = vmax.xlane.f32.xlu2 %v10050_v45 }
 0x49b   : > { %2662 = vmax.xlane.f32.xlu1 %v10053_v28  ;;  %v2297_v41 = vpop.xlane.xlu2 %2296 }
 0x49c   : > { %7660 = vrcp.f32 %v2297_v41  ;;  %v3714_v41 = vsel %vm2118_vm1, %v9891_v30, 0 }
 0x4a1   : > { %2312 = vadd.xlane.f32.xlu2 %v10059_v42 }
 0x4a2   : > { %v7661_v44 = vpop.eup %7660 }
 0x4a3   : > { %2316 = vadd.xlane.f32.xlu1 %v10062_v0  ;;  %v2299_v57 = vpop.xlane.xlu0 %2298  ;;  %v2344_v50 = vmul.f32 %v7661_v44, %v9938_v7  ;;  %v2257_v7 = vsub.f32 %v9899_v59, %v2235_v55 }
 0x4a4   : > { %7662 = vrcp.f32 %v2299_v57 }
 0x4a5   : > { %7664 = vpow2.f32 %v2286_v10  ;;  %v2360_v8 = vpack.c.bf16 %v2344_v50, %v2344_v50  ;;  %v2282_v31 = vmul.f32 1.442695, %v2257_v7  ;;  %v10095_v7 = vadd.f32 %v9824_v38, %v2628_v12 }
 0x4a7   : > { %v2392_v14 = vunpack.c.l.b16 %v2360_v8 }
 0x4a9   : > { %2664 = vmax.xlane.f32.xlu2 %v10068_v62 }
 0x4aa   : > { %v7663_v25 = vpop.eup %7662 }
 0x4ab   : > { %v2345_v37 = vmul.f32 %v7663_v25, %v9950_v6  ;;  %2668 = vmax.xlane.f32.xlu1 %v10072_v56  ;;  %v2301_v22 = vpop.xlane.xlu0 %2300  ;;  %v10079_v60 = vpop.eup %7664 }
 0x4ac   : > { %7666 = vrcp.f32 %v2301_v22  ;;  %v10091_v25 = vpop.f32.mrf.mxu1 }
 0x4ad   : > { %v2361_v43 = vpack.c.bf16 %v2345_v37, %v2345_v37 }
 0x4af   : > { %v2393_v61 = vunpack.c.l.b16 %v2361_v43 }
 0x4b1   : > { %2318 = vadd.xlane.f32.xlu2 %v10079_v60  ;;  %v2408_v13 = vpack.c.b16 %v2393_v61, %v2392_v14  ;;  %v2260_v14 = vsub.f32 %v9918_v3, %v10044_v40 }
 0x4b2   : > { %v7667_v6 = vpop.eup %7666 }
 0x4b3   : > { %v2303_v9 = vpop.xlane.xlu1 %2302  ;;  %2480 = vmatmul.bf16.vlgmr.msra.gmra.mxu0 %v2408_v13  ;;  %v2346_v59 = vmul.f32 %v7667_v6, %v9963_v1  ;;  %v2288_v13 = vmul.f32 1.442695, %v2260_v14 }
 0x4b4   : > { %7668 = vrcp.f32 %v2303_v9  ;;  %3716 = vmatpush.bf16.xpose.msra.mxu0 %v3714_v41  ;;  %v2635_v12 = vpop.f32.mrf.mxu1 }
 0x4b5   : > { %7670 = vpow2.f32 %v2282_v31  ;;  %v2362_v50 = vpack.c.bf16 %v2346_v59, %v2346_v59  ;;  %v10110_v41 = vadd.f32 %v9824_v38, %v2635_v12 }
 0x4b7   : > { %v2394_v1 = vunpack.c.l.b16 %v2362_v50 }
 0x4ba   : > { %v7669_v55 = vpop.eup %7668 }
 0x4bb   : > { %v10085_v57 = vpop.eup %7670  ;;  %v2305_v44 = vpop.xlane.xlu1 %2304  ;;  %v2347_v10 = vmul.f32 %v7669_v55, %v9983_v49  ;;  %v3708_v49 = vsel %vm2118_vm1, %v9763_v27, 0  ;;  %v3705_v27 = vsel %vm2118_vm1, %v9760_v24, 0  ;;  %v3702_v55 = vsel %vm2118_vm1, %v9915_v51, 0 }
 0x4bc   : > { %3717 = vmatpush.bf16.xpose.msra.mxu0 %v3711_v47  ;;  %2314 = vadd.xlane.f32.xlu0 %v10085_v57  ;;  %7672 = vrcp.f32 %v2305_v44  ;;  %v3696_v51 = vsel %vm2118_vm1, %v9904_v23, 0 }
 0x4bd   : > { %v2363_v30 = vpack.c.bf16 %v2347_v10, %v2347_v10  ;;  %v2261_v10 = vsub.f32 %v9923_v17, %v10074_v19 }
 0x4be   : > { %v3122_v8 = vpop.permute.xlu0 %3121 }
 0x4bf   : > { %7005 = vmatmul.msk.bf16.gmra.mxu1 %vm2118_vm1, %v3122_v8  ;;  %v2395_v37 = vunpack.c.l.b16 %v2363_v30  ;;  %v2290_v50 = vmul.f32 1.442695, %v2261_v10  ;;  %v2262_v30 = vsub.f32 %v9927_v26, %v10046_v11 }
 0x4c1   : > { %v2409_v22 = vpack.c.b16 %v2395_v37, %v2394_v1  ;;  %v2292_v8 = vmul.f32 1.442695, %v2262_v30  ;;  %v10158_v37 = vadd.f32 %v9824_v38, %v10091_v25 }
 0x4c2   : > { %v7673_v43 = vpop.eup %7672 }
 0x4c3   : > { %v2307_v15 = vpop.xlane.xlu2 %2306  ;;  %2485 = vmatmul.bf16.gmra.mxu0 %v2409_v22  ;;  %v2348_v61 = vmul.f32 %v7673_v43, %v10001_v54 }
 0x4c4   : > { %7674 = vrcp.f32 %v2307_v15  ;;  %3718 = vmatpush.bf16.xpose.msra.mxu0 %v3708_v49  ;;  %3127 = vrot.lane.b32.xlu1 %v9702_v21, %s8692_s4  ;;  %v2638_v15 = vpop.f32.mrf.mxu1 }
 0x4c5   : > { %2666 = vmax.xlane.f32.xlu0 %v10095_v7  ;;  %v2364_v6 = vpack.c.bf16 %v2348_v61, %v2348_v61  ;;  %7676 = vpow2.f32 %v2288_v13 }
 0x4c7   : > { %v2396_v54 = vunpack.c.l.b16 %v2364_v6 }
 0x4c9   : > { %3644 = vrot.lane.b32.xlu2 %v9700_v5, %s8693_s21  ;;  %v2263_v5 = vsub.f32 %v9934_v16, %v10056_v53  ;;  %v3699_v53 = vsel %vm2118_vm1, %v9805_v63, 0  ;;  %v3693_v63 = vsel %vm2118_vm1, %v9783_v34, 0 }
 0x4ca   : > { %v7675_v31 = vpop.eup %7674 }
 0x4cb   : > { %v2349_v9 = vmul.f32 %v7675_v31, %v10012_v2  ;;  %v2294_v59 = vmul.f32 1.442695, %v2263_v5  ;;  %v10124_v44 = vpop.eup %7676  ;;  %v10150_v23 = vpop.permute.xlu2 %3638 }
 0x4cc   : > { %3719 = vmatpush.bf16.xpose.msra.mxu0 %v3705_v27  ;;  %2876 = vrot.lane.b32.xlu1 %v9980_v48, %s8691_s8 }
 0x4cd   : > { %2672 = vmax.xlane.f32.xlu0 %v10110_v41  ;;  %v2365_v3 = vpack.c.bf16 %v2349_v9, %v2349_v9  ;;  %7678 = vpow2.f32 %v2294_v59 }
 0x4ce   : > { %7680 = vpow2.f32 %v2290_v50 }
 0x4cf   : > { %v2397_v40 = vunpack.c.l.b16 %v2365_v3  ;;  %7682 = vpow2.f32 %v2292_v8  ;;  %v10166_v3 = vpop.f32.mrf.mxu1 }
 0x4d1   : > { %2880 = vrot.lane.b32.xlu2 %v9965_v32, %s8691_s8  ;;  %v2410_v24 = vpack.c.b16 %v2397_v40, %v2396_v54  ;;  %v10180_v40 = vadd.f32 %v9824_v38, %v2638_v15 }
 0x4d3   : > { %v10120_v2 = vpop.permute.xlu1 %3640  ;;  %2490 = vmatmul.bf16.gmra.mxu0 %v2410_v24  ;;  %v10131_v47 = vpop.eup %7678 }
 0x4d4   : > { %3720 = vmatpush.bf16.xpose.msra.mxu0 %v3702_v55  ;;  %v10147_v1 = vpop.eup %7680 }
 0x4d5   : > { %2320 = vadd.xlane.f32.xlu0 %v10124_v44  ;;  %v10152_v19 = vpop.eup %7682 }
 0x4d7   : > { %v10177_v54 = vpop.f32.mrf.mxu1 }
 0x4d9   : > { %2878 = vrot.lane.b32.xlu2 %v9972_v20, %s8691_s8 }
 0x4db   : > { %v3124_v16 = vpop.permute.xlu1 %3123 }
 0x4dc   : > { %3721 = vmatpush.bf16.xpose.msra.mxu0 %v3699_v53  ;;  %7006 = vmatmul.msk.bf16.gmra.mxu1 %vm2118_vm1, %v3124_v16 }
 0x4dd   : > { %2326 = vadd.xlane.f32.xlu0 %v10131_v47 }
 0x4df   : > { %v10185_v55 = vpop.f32.mrf.mxu1 }
 0x4e1   : > { %3646 = vrot.lane.b32.xlu2 %v9702_v21, %s8693_s21 }
 0x4e3   : > { %v10164_v6 = vpop.permute.xlu1 %3642 }
 0x4e4   : > { %3722 = vmatpush.bf16.xpose.msra.mxu0 %v3696_v51 }
 0x4e9   : > { %v2661_v21 = vpop.xlane.xlu0 %2660 }
 0x4ea   : > { %v2691_v43 = vsub.f32 %v10029_v46, %v2661_v21 }
 0x4ec   : > { %3723 = vmatpush.bf16.xpose.msra.mxu0 %v3693_v63  ;;  %v2708_v13 = vmul.f32 1.442695, %v2691_v43  ;;  %v10194_v63 = vpop.f32.mrf.mxu1 }
 0x4f1   : > { %3129 = vrot.lane.b32.xlu0 %v9731_v52, %s8692_s4  ;;  %v2311_v17 = vpop.xlane.xlu0 %2310 }
 0x4f2   : > { %7684 = vrcp.f32 %v2311_v17 }
 0x4f6   : > { %2322 = vadd.xlane.f32.xlu1 %v10147_v1 }
 0x4f8   : > { %v7685_v11 = vpop.eup %7684 }
 0x4f9   : > { %v2351_v22 = vmul.f32 %v7685_v11, %v10032_v36 }
 0x4fb   : > { %v2367_v12 = vpack.c.bf16 %v2351_v22, %v2351_v22 }
 0x4fd   : > { %v2399_v9 = vunpack.c.l.b16 %v2367_v12 }
 0x4fe   : > { %2324 = vadd.xlane.f32.xlu1 %v10152_v19 }
 0x504   : > { %v2309_v34 = vpop.xlane.xlu2 %2308  ;;  %v3126_v26 = vpop.permute.xlu0 %3125 }
 0x505   : > { %7686 = vrcp.f32 %v2309_v34  ;;  %7007 = vmatmul.msk.bf16.gmra.mxu1 %vm2118_vm1, %v3126_v26 }
 0x506   : > { %7688 = vpow2.f32 %v2708_v13 }
 0x50a   : > { %2670 = vmax.xlane.f32.xlu2 %v10158_v37 }
 0x50b   : > { %v7687_v49 = vpop.eup %7686 }
 0x50c   : > { %v2659_v14 = vpop.xlane.xlu2 %2658  ;;  %v2350_v61 = vmul.f32 %v7687_v49, %v10037_v18  ;;  %v10170_v46 = vpop.eup %7688 }
 0x50d   : > { %v2690_v50 = vsub.f32 %v10050_v45, %v2659_v14 }
 0x50e   : > { %v2366_v31 = vpack.c.bf16 %v2350_v61, %v2350_v61  ;;  %v10172_v5 = vpop.xlane.xlu1 %2662 }
 0x50f   : > { %v2706_v8 = vmul.f32 1.442695, %v2690_v50 }
 0x510   : > { %v2398_v27 = vunpack.c.l.b16 %v2366_v31 }
 0x512   : > { %v2411_v25 = vpack.c.b16 %v2399_v9, %v2398_v27 }
 0x514   : > { %v2313_v36 = vpop.xlane.xlu2 %2312  ;;  %2495 = vmatmul.bf16.gmra.mxu0 %v2411_v25 }
 0x515   : > { %7690 = vrcp.f32 %v2313_v36 }
 0x516   : > { %v2317_v24 = vpop.xlane.xlu1 %2316 }
 0x517   : > { %2874 = vrot.lane.b32.xlu1 %v9990_v29, %s8691_s8 }
 0x51b   : > { %2740 = vadd.xlane.f32.xlu0 %v10170_v46  ;;  %v7691_v10 = vpop.eup %7690 }
 0x51c   : > { %v10175_v18 = vpop.xlane.xlu2 %2664  ;;  %v2352_v30 = vmul.f32 %v7691_v10, %v10059_v42  ;;  %v2650_v42 = vpop.f32.mrf.mxu1 }
 0x51e   : > { %v10191_v53 = vpop.xlane.xlu1 %2668  ;;  %v2368_v45 = vpack.c.bf16 %v2352_v30, %v2352_v30  ;;  %v10216_v30 = vadd.f32 %v9824_v38, %v10166_v3 }
 0x520   : > { %v2400_v11 = vunpack.c.l.b16 %v2368_v45 }
 0x522   : > { %2872 = vrot.lane.b32.xlu2 %v9997_v33, %s8691_s8 }
 0x523   : > { %2674 = vmax.xlane.f32.xlu0 %v10180_v40 }
 0x524   : > { %v2319_v59 = vpop.xlane.xlu2 %2318  ;;  %v10210_v9 = vpop.f32.mrf.mxu1 }
 0x52a   : > { %3648 = vrot.lane.b32.xlu2 %v9731_v52, %s8693_s21 }
 0x52c   : > { %v10189_v16 = vpop.permute.xlu2 %3644  ;;  %v2655_v10 = vpop.f32.mrf.mxu1 }
 0x52f   : > { %v2315_v51 = vpop.xlane.xlu0 %2314 }
 0x530   : > { %7692 = vrcp.f32 %v2315_v51 }
 0x531   : > { %7694 = vrcp.f32 %v2319_v59 }
 0x532   : > { %2868 = vrot.lane.b32.xlu2 %v10009_v58, %s8691_s8  ;;  %7696 = vpow2.f32 %v2706_v8 }
 0x533   : > { %7698 = vrcp.f32 %v2317_v24 }
 0x534   : > { %v2881_v21 = vpop.permute.xlu2 %2880 }
 0x535   : > { %2890 = vmatpush.bf16.msrb.mxu2 %v2881_v21  ;;  %v10218_v21 = vpop.f32.mrf.mxu1 }
 0x536   : > { %v7693_v52 = vpop.eup %7692  ;;  %v3128_v17 = vpop.permute.xlu1 %3127 }
 0x537   : > { %3131 = vrot.lane.b32.xlu0 %v9798_v4, %s8692_s4  ;;  %7008 = vmatmul.msk.bf16.gmra.mxu1 %vm2118_vm1, %v3128_v17  ;;  %v2353_v34 = vmul.f32 %v7693_v52, %v10085_v57  ;;  %v7695_v14 = vpop.eup %7694 }
 0x538   : > { %v10203_v49 = vpop.xlane.xlu0 %2666  ;;  %v10205_v61 = vpop.eup %7696  ;;  %v2355_v57 = vmul.f32 %v7695_v14, %v10079_v60  ;;  %v10224_v60 = vadd.f32 %v9824_v38, %v2650_v42 }
 0x539   : > { %v2369_v26 = vpack.c.bf16 %v2353_v34, %v2353_v34  ;;  %v7699_v12 = vpop.eup %7698 }
 0x53a   : > { %v2354_v13 = vmul.f32 %v7699_v12, %v10062_v0  ;;  %v2371_v27 = vpack.c.bf16 %v2355_v57, %v2355_v57 }
 0x53b   : > { %v2401_v22 = vunpack.c.l.b16 %v2369_v26  ;;  %v10236_v26 = vadd.f32 %v9824_v38, %v2655_v10 }
 0x53c   : > { %v2879_v15 = vpop.permute.xlu2 %2878  ;;  %v2370_v36 = vpack.c.bf16 %v2354_v13, %v2354_v13  ;;  %v2403_v24 = vunpack.c.l.b16 %v2371_v27  ;;  %v2481_v13 = vpop.f32.mrf.mxu0 }
 0x53d   : > { %2891 = vmatpush.bf16.msrb.mxu2 %v2879_v15  ;;  %v2412_v43 = vpack.c.b16 %v2401_v22, %v2400_v11  ;;  %v3208_v52 = vpop.f32.mrf.mxu1 }
 0x53e   : > { %v2877_v31 = vpop.permute.xlu1 %2876  ;;  %v2402_v59 = vunpack.c.l.b16 %v2370_v36  ;;  %v10231_v3 = vadd.f32 %v9824_v38, %v3208_v52 }
 0x53f   : > { %2500 = vmatmul.bf16.gmra.mxu0 %v2412_v43 }
 0x540   : > { %v10212_v25 = vpop.xlane.xlu0 %2672  ;;  %v2413_v51 = vpack.c.b16 %v2403_v24, %v2402_v59 }
 0x541   : > { %2738 = vadd.xlane.f32.xlu1 %v10205_v61  ;;  %2892 = vmatpush.bf16.msrb.mxu2 %v2877_v31 }
 0x544   : > { %v10242_v27 = vpop.permute.xlu2 %3646  ;;  %v2483_v10 = vpop.f32.mrf.mxu0 }
 0x548   : > { %v2321_v50 = vpop.xlane.xlu0 %2320 }
 0x549   : > { %7700 = vrcp.f32 %v2321_v50 }
 0x54c   : > { %v2486_v52 = vpop.f32.mrf.mxu0 }
 0x54f   : > { %2505 = vmatmul.bf16.gmra.mxu0 %v2413_v51  ;;  %v7701_v34 = vpop.eup %7700 }
 0x550   : > { %v2327_v0 = vpop.xlane.xlu0 %2326  ;;  %v2356_v45 = vmul.f32 %v7701_v34, %v10124_v44  ;;  %v10265_v34 = vadd.f32 %v9824_v38, %v10185_v55 }
 0x552   : > { %v2372_v15 = vpack.c.bf16 %v2356_v45, %v2356_v45 }
 0x554   : > { %v2404_v14 = vunpack.c.l.b16 %v2372_v15 }
 0x55a   : > { %2870 = vrot.lane.b32.xlu1 %v10004_v39, %s8691_s8 }
 0x55b   : > { %2676 = vmax.xlane.f32.xlu2 %v10216_v30 }
 0x561   : > { %2684 = vmax.xlane.f32.xlu0 %v10224_v60 }
 0x562   : > { %2866 = vrot.lane.b32.xlu1 %v10015_v35, %s8691_s8 }
 0x563   : > { %v3130_v8 = vpop.permute.xlu0 %3129 }
 0x564   : > { %7009 = vmatmul.msk.bf16.gmra.mxu1 %vm2118_vm1, %v3130_v8 }
 0x569   : > { %3248 = vmax.xlane.f32.xlu0 %v10231_v3  ;;  %v2323_v17 = vpop.xlane.xlu1 %2322 }
 0x56a   : > { %7702 = vrcp.f32 %v2323_v17  ;;  %v3211_v17 = vpop.f32.mrf.mxu1 }
 0x570   : > { %v7703_v11 = vpop.eup %7702 }
 0x571   : > { %2688 = vmax.xlane.f32.xlu0 %v10236_v26  ;;  %v2325_v22 = vpop.xlane.xlu1 %2324  ;;  %v2357_v42 = vmul.f32 %v7703_v11, %v10147_v1  ;;  %v2488_v11 = vpop.f32.mrf.mxu0 }
 0x572   : > { %7704 = vrcp.f32 %v2325_v22  ;;  %v10274_v22 = vld [vmem:[%s9090_s10] ss:$0 sm:$0xff] }
 0x573   : > { %3650 = vrot.lane.b32.xlu2 %v9798_v4, %s8693_s21  ;;  %v2373_v43 = vpack.c.bf16 %v2357_v42, %v2357_v42  ;;  %7706 = vrcp.f32 %v2327_v0  ;;  %v10278_v42 = vadd.f32 %v10274_v22, %v10194_v63  ;;  %v10289_v55 = vadd.f32 %v10274_v22, %v10218_v21 }
 0x574   : > { %v2522_v63 = vpack.c.bf16 %v2488_v11, %v2486_v52 }
 0x575   : > { %v2405_v12 = vunpack.c.l.b16 %v2373_v43 }
 0x577   : > { %v2414_v31 = vpack.c.b16 %v2405_v12, %v2404_v14  ;;  %v2694_v12 = vsub.f32 %v10095_v7, %v10203_v49 }
 0x578   : > { %v7705_v44 = vpop.eup %7704 }
 0x579   : > { %2510 = vmatmul.bf16.gmra.mxu0 %v2414_v31  ;;  %v7707_v57 = vpop.eup %7706  ;;  %v2358_v1 = vmul.f32 %v7705_v44, %v10152_v19  ;;  %v10256_v19 = vadd.f32 %v9824_v38, %v10177_v54  ;;  %v2521_v54 = vpack.c.bf16 %v2483_v10, %v2481_v13  ;;  %v10280_v38 = vpop.f32.mrf.mxu1  ;;  %v2714_v44 = vmul.f32 1.442695, %v2694_v12 }
 0x57a   : > { %v2359_v36 = vmul.f32 %v7707_v57, %v10131_v47  ;;  %v2491_v15 = vpop.f32.mrf.mxu0 }
 0x57b   : > { %3462 = vrot.lane.b32.xlu2 %v9990_v29, %s8692_s4  ;;  %v2374_v24 = vpack.c.bf16 %v2358_v1, %v2358_v1  ;;  %7708 = vpow2.f32 %v2714_v44 }
 0x57c   : > { %v2375_v4 = vpack.c.bf16 %v2359_v36, %v2359_v36 }
 0x57d   : > { %v10248_v59 = vpop.xlane.xlu2 %2670  ;;  %v2406_v51 = vunpack.c.l.b16 %v2374_v24 }
 0x57e   : > { %v2407_v50 = vunpack.c.l.b16 %v2375_v4 }
 0x580   : > { %v2415_v0 = vpack.c.b16 %v2407_v50, %v2406_v51 }
 0x581   : > { %v10291_v43 = vpop.f32.mrf.mxu1  ;;  %v10308_v36 = vpop.eup %7708 }
 0x582   : > { %v2493_v21 = vpop.f32.mrf.mxu0 }
 0x583   : > { %3458 = vrot.lane.b32.xlu2 %v10004_v39, %s8692_s4  ;;  %v2523_v1 = vpack.c.bf16 %v2493_v21, %v2491_v15 }
 0x585   : > { %3468 = vrot.lane.b32.xlu0 %v9965_v32, %s8692_s4  ;;  %v2873_v47 = vpop.permute.xlu2 %2872 }
 0x589   : > { %v2875_v8 = vpop.permute.xlu1 %2874  ;;  %2515 = vmatmul.bf16.gmra.mxu0 %v2415_v0  ;;  %v10305_v31 = vpop.f32.mrf.mxu1 }
 0x58a   : > { %2893 = vmatpush.bf16.msrb.mxu2 %v2875_v8 }
 0x58b   : > { %3454 = vrot.lane.b32.xlu2 %v10015_v35, %s8692_s4 }
 0x58c   : > { %2678 = vmax.xlane.f32.xlu1 %v10256_v19 }
 0x58d   : > { %3464 = vrot.lane.b32.xlu0 %v9980_v48, %s8692_s4 }
 0x58e   : > { %2894 = vmatpush.bf16.msrb.mxu2 %v2873_v47  ;;  %v2741_v45 = vpop.xlane.xlu0 %2740  ;;  %v2693_v47 = vsub.f32 %v10068_v62, %v10175_v18 }
 0x590   : > { %v2712_v11 = vmul.f32 1.442695, %v2693_v47 }
 0x591   : > { %v2496_v57 = vpop.f32.mrf.mxu0  ;;  %v3221_v13 = vpop.f32.mrf.mxu1 }
 0x592   : > { %v10316_v7 = vadd.f32 %v10274_v22, %v3221_v13 }
 0x593   : > { %3983 = vrot.lane.b32.xlu2 %v9980_v48, %s8693_s21 }
 0x594   : > { %2680 = vmax.xlane.f32.xlu1 %v10265_v34 }
 0x595   : > { %3460 = vrot.lane.b32.xlu0 %v9997_v33, %s8692_s4 }
 0x596   : > { %v10285_v48 = vpop.xlane.xlu0 %2674 }
 0x599   : > { %6995 = vmatmul.msk.bf16.vlgmr.msrb.gmra.mxu0 %vm2118_vm1, %v2521_v54  ;;  %v2498_v24 = vpop.f32.mrf.mxu0  ;;  %v10313_v51 = vpop.f32.mrf.mxu1 }
 0x59a   : > { %v2524_v8 = vpack.c.bf16 %v2498_v24, %v2496_v57 }
 0x59c   : > { %2682 = vmax.xlane.f32.xlu1 %v10278_v42 }
 0x59d   : > { %3987 = vrot.lane.b32.xlu0 %v9965_v32, %s8693_s21  ;;  %v10299_v32 = vadd.f32 %v10274_v22, %v10210_v9  ;;  %v10310_v9 = vpop.permute.xlu2 %3648 }
 0x5a1   : > { %v3226_v0 = vpop.f32.mrf.mxu1 }
 0x5a2   : > { %v10325_v54 = vadd.f32 %v10274_v22, %v3226_v0  ;;  %v2692_v0 = vsub.f32 %v10053_v28, %v10172_v5  ;;  %v10362_v28 = vadd.f32 %v10274_v22, %v10280_v38  ;;  %v2695_v5 = vsub.f32 %v10072_v56, %v10191_v53 }
 0x5a3   : > { %v2697_v38 = vsub.f32 %v10110_v41, %v10212_v25  ;;  %v2696_v53 = vsub.f32 %v10158_v37, %v10248_v59  ;;  %v10387_v41 = vadd.f32 %v10274_v22, %v10305_v31 }
 0x5a4   : > { %3246 = vmax.xlane.f32.xlu1 %v10289_v55 }
 0x5a5   : > { %3985 = vrot.lane.b32.xlu0 %v9972_v20, %s8693_s21  ;;  %v2869_v49 = vpop.permute.xlu2 %2868 }
 0x5a9   : > { %v3132_v14 = vpop.permute.xlu0 %3131  ;;  %6996 = vmatmul.msk.bf16.gmra.mxu0 %vm2118_vm1, %v2522_v63  ;;  %v10331_v63 = vadd.f32 %v10274_v22, %v3211_v17 }
 0x5aa   : > { %7010 = vmatmul.msk.bf16.gmra.mxu1 %vm2118_vm1, %v3132_v14 }
 0x5ac   : > { %2686 = vmax.xlane.f32.xlu1 %v10299_v32 }
 0x5b4   : > { %v2739_v4 = vpop.xlane.xlu1 %2738 }
 0x5b5   : > { %7710 = vrcp.f32 %v2739_v4 }
 0x5b6   : > { %7712 = vrcp.f32 %v2741_v45 }
 0x5b7   : > { %7714 = vpow2.f32 %v2712_v11 }
 0x5b9   : > { %6997 = vmatmul.msk.bf16.gmra.mxu0 %vm2118_vm1, %v2523_v1 }
 0x5bb   : > { %v7711_v50 = vpop.eup %7710 }
 0x5bc   : > { %2746 = vadd.xlane.f32.xlu2 %v10308_v36  ;;  %v2501_v10 = vpop.f32.mrf.mxu0  ;;  %v7713_v52 = vpop.eup %7712  ;;  %v2786_v45 = vmul.f32 %v7711_v50, %v10205_v61 }
 0x5bd   : > { %v10339_v57 = vpop.eup %7714 }
 0x5be   : > { %v2802_v18 = vpack.c.bf16 %v2786_v45, %v2786_v45 }
 0x5c0   : > { %v2834_v44 = vunpack.c.l.b16 %v2802_v18 }
 0x5c4   : > { %3258 = vmax.xlane.f32.xlu2 %v10316_v7  ;;  %v2503_v61 = vpop.f32.mrf.mxu0 }
 0x5c5   : > { %3466 = vrot.lane.b32.xlu1 %v9972_v20, %s8692_s4  ;;  %v2787_v20 = vmul.f32 %v7713_v52, %v10170_v46  ;;  %v2525_v1 = vpack.c.bf16 %v2503_v61, %v2501_v10 }
 0x5c7   : > { %v2803_v21 = vpack.c.bf16 %v2787_v20, %v2787_v20 }
 0x5c9   : > { %6998 = vmatmul.msk.bf16.gmra.mxu0 %vm2118_vm1, %v2524_v8  ;;  %v2835_v17 = vunpack.c.l.b16 %v2803_v21  ;;  %v2710_v8 = vmul.f32 1.442695, %v2692_v0  ;;  %v2716_v21 = vmul.f32 1.442695, %v2695_v5 }
 0x5cb   : > { %v2850_v13 = vpack.c.b16 %v2835_v17, %v2834_v44  ;;  %v2720_v17 = vmul.f32 1.442695, %v2697_v38 }
 0x5cc   : > { %v2871_v15 = vpop.permute.xlu1 %2870  ;;  %3262 = vmax.xlane.f32.xlu2 %v10325_v54  ;;  %v2506_v24 = vpop.f32.mrf.mxu0 }
 0x5cd   : > { %3456 = vrot.lane.b32.xlu1 %v10009_v58, %s8692_s4  ;;  %2895 = vmatpush.bf16.msrb.mxu2 %v2871_v15 }
 0x5ce   : > { %v2677_v62 = vpop.xlane.xlu2 %2676 }
 0x5cf   : > { %v2699_v14 = vsub.f32 %v10216_v30, %v2677_v62  ;;  %3250 = vmax.xlane.f32.xlu0 %v10331_v63 }
 0x5d1   : > { %v2724_v12 = vmul.f32 1.442695, %v2699_v14  ;;  %2896 = vmatpush.bf16.msrb.mxu2 %v2869_v49 }
 0x5d3   : > { %7716 = vpow2.f32 %v2724_v12 }
 0x5d4   : > { %v2867_v46 = vpop.permute.xlu1 %2866  ;;  %v2685_v4 = vpop.xlane.xlu0 %2684  ;;  %7718 = vpow2.f32 %v2710_v8 }
 0x5d5   : > { %3981 = vrot.lane.b32.xlu1 %v9990_v29, %s8693_s21  ;;  %2897 = vmatpush.bf16.msrb.mxu2 %v2867_v46  ;;  %v2508_v49 = vpop.f32.mrf.mxu0  ;;  %v3228_v8 = vpop.f32.mrf.mxu1 }
 0x5d6   : > { %v2526_v29 = vpack.c.bf16 %v2508_v49, %v2506_v24  ;;  %v2703_v24 = vsub.f32 %v10224_v60, %v2685_v4 }
 0x5d7   : > { %2744 = vadd.xlane.f32.xlu0 %v10339_v57 }
 0x5d8   : > { %2898 = vmatmul.bf16.vlgmr.msrb.gmra.mxu2 %v2850_v13  ;;  %v2732_v25 = vmul.f32 1.442695, %v2703_v24  ;;  %v7347_v24 = vld [vmem:[%s9134_s20 + $0x18] sm:$0xff] }
 0x5d9   : > { %v10342_v30 = vpop.eup %7716  ;;  %6999 = vmatmul.msk.bf16.gmra.mxu0 %vm2118_vm1, %v2525_v1  ;;  %v2718_v1 = vmul.f32 1.442695, %v2696_v53  ;;  %2989 = vmatpush.bf16.msra.mxu3 %v7347_v24 }
 0x5da   : > { %2756 = vadd.xlane.f32.xlu2 %v10342_v30  ;;  %v10355_v45 = vpop.eup %7718 }
 0x5dc   : > { %v10346_v50 = vpop.xlane.xlu0 %3248 }
 0x5e4   : > { %v10351_v10 = vpop.xlane.xlu0 %2688 }
 0x5e9   : > { %7000 = vmatmul.msk.bf16.gmra.mxu0 %vm2118_vm1, %v2526_v29 }
 0x5eb   : > { %3979 = vrot.lane.b32.xlu0 %v9997_v33, %s8693_s21 }
 0x5f6   : > { %v2511_v47 = vpop.f32.mrf.mxu0 }
 0x5f7   : > { %v3469_v52 = vpop.permute.xlu0 %3468 }
 0x5f8   : > { %3478 = vmatpush.bf16.msrb.mxu1 %v3469_v52  ;;  %7433 = vmatpush.bf16.msra.mxu2 %v3469_v52 }
 0x5fe   : > { %v2513_v11 = vpop.f32.mrf.mxu0 }
 0x5ff   : > { %v2527_v15 = vpack.c.bf16 %v2513_v11, %v2511_v47  ;;  %2742 = vadd.xlane.f32.xlu1 %v10355_v45  ;;  %v2679_v20 = vpop.xlane.xlu1 %2678  ;;  %v3465_v4 = vpop.permute.xlu0 %3464  ;;  %v2698_v47 = vsub.f32 %v10180_v40, %v10285_v48  ;;  %v12661_v11 = vld [vmem:[#allocation59_spill] sm:$0xff]  ;;  %v10418_v40 = vadd.f32 %v10274_v22, %v10313_v51 }
 0x600   : > { %v2700_v33 = vsub.f32 %v10256_v19, %v2679_v20  ;;  %v10372_v19 = vadd.f32 %v10274_v22, %v10291_v43 }
 0x601   : > { %7001 = vmatmul.msk.bf16.gmra.mxu0 %vm2118_vm1, %v2527_v15 }
 0x602   : > { %v2726_v62 = vmul.f32 1.442695, %v2700_v33  ;;  %v2722_v33 = vmul.f32 1.442695, %v2698_v47 }
 0x604   : > { %7720 = vpow2.f32 %v2726_v62 }
 0x605   : > { %7722 = vpow2.f32 %v2716_v21 }
 0x606   : > { %v2516_v18 = vpop.f32.mrf.mxu0 }
 0x607   : > { %3252 = vmax.xlane.f32.xlu1 %v10362_v28  ;;  %v2681_v14 = vpop.xlane.xlu1 %2680  ;;  %v3461_v48 = vpop.permute.xlu0 %3460 }
 0x608   : > { %v2701_v29 = vsub.f32 %v10265_v34, %v2681_v14  ;;  %v10413_v34 = vadd.f32 %v10274_v22, %v3228_v8 }
 0x60a   : > { %v10367_v61 = vpop.eup %7720 }
 0x60b   : > { %2758 = vadd.xlane.f32.xlu2 %v10367_v61  ;;  %v10381_v43 = vpop.eup %7722 }
 0x60e   : > { %v2518_v12 = vpop.f32.mrf.mxu0 }
 0x60f   : > { %v2528_v44 = vpack.c.bf16 %v2518_v12, %v2516_v18  ;;  %v2683_v56 = vpop.xlane.xlu1 %2682  ;;  %3254 = vmax.xlane.f32.xlu1 %v10372_v19  ;;  %v2705_v18 = vsub.f32 %v10236_v26, %v10351_v10  ;;  %v3279_v26 = vsub.f32 %v10231_v3, %v10346_v50  ;;  %v3988_v10 = vpop.permute.xlu0 %3987 }
 0x610   : > { %v2702_v46 = vsub.f32 %v10278_v42, %v2683_v56 }
 0x611   : > { %7002 = vmatmul.msk.bf16.gmra.mxu0 %vm2118_vm1, %v2528_v44  ;;  %v2736_v51 = vmul.f32 1.442695, %v2705_v18  ;;  %v10436_v44 = vpop.permute.xlu2 %3650  ;;  %v3296_v53 = vmul.f32 1.442695, %v3279_v26 }
 0x612   : > { %v2730_v13 = vmul.f32 1.442695, %v2702_v46 }
 0x614   : > { %7724 = vpow2.f32 %v2730_v13 }
 0x615   : > { %2748 = vadd.xlane.f32.xlu0 %v10381_v43  ;;  %7726 = vpow2.f32 %v2720_v17 }
 0x616   : > { %v10389_v37 = vpop.f32.mrf.mxu0  ;;  %7728 = vpow2.f32 %v2718_v1 }
 0x617   : > { %3256 = vmax.xlane.f32.xlu1 %v10387_v41  ;;  %v3247_v59 = vpop.xlane.xlu1 %3246  ;;  %7730 = vpow2.f32 %v2732_v25  ;;  %v3986_v50 = vpop.permute.xlu0 %3985 }
 0x618   : > { %v3278_v49 = vsub.f32 %v10289_v55, %v3247_v59  ;;  %v2728_v55 = vmul.f32 1.442695, %v2701_v29  ;;  %v7346_v29 = vld [vmem:[%s9134_s20 + $0x10] sm:$0xff] }
 0x619   : > { %v3463_v3 = vpop.permute.xlu2 %3462  ;;  %2990 = vmatpush.bf16.msra.mxu3 %v7346_v29 }
 0x61a   : > { %v10392_v42 = vpop.eup %7724  ;;  %v3294_v52 = vmul.f32 1.442695, %v3278_v49 }
 0x61b   : > { %2762 = vadd.xlane.f32.xlu2 %v10392_v42  ;;  %v10395_v60 = vpop.eup %7726 }
 0x61c   : > { %v10399_v31 = vpop.eup %7728  ;;  %7732 = vpow2.f32 %v3294_v52 }
 0x61d   : > { %2752 = vadd.xlane.f32.xlu0 %v10395_v60  ;;  %v10409_v15 = vpop.eup %7730  ;;  %7734 = vpow2.f32 %v2728_v55 }
 0x61e   : > { %v10402_v0 = vpop.f32.mrf.mxu0  ;;  %7736 = vpow2.f32 %v2722_v33 }
 0x61f   : > { %2750 = vadd.xlane.f32.xlu1 %v10399_v31  ;;  %v2687_v20 = vpop.xlane.xlu1 %2686 }
 0x620   : > { %v2704_v62 = vsub.f32 %v10299_v32, %v2687_v20 }
 0x621   : > { %7027 = vmatmul.msk.bf16.vlgmr.msra.gmra.mxu0 %vm2118_vm1, %v12661_v11  ;;  %v3459_v59 = vpop.permute.xlu2 %3458 }
 0x622   : > { %v10426_v14 = vpop.eup %7732  ;;  %v2734_v21 = vmul.f32 1.442695, %v2704_v62 }
 0x623   : > { %2764 = vadd.xlane.f32.xlu2 %v10409_v15  ;;  %v10429_v38 = vpop.eup %7734 }
 0x624   : > { %v10432_v12 = vpop.eup %7736  ;;  %7738 = vpow2.f32 %v2734_v21 }
 0x625   : > { %3264 = vmax.xlane.f32.xlu0 %v10413_v34  ;;  %7740 = vpow2.f32 %v2736_v51 }
 0x626   : > { %v10421_v5 = vpop.f32.mrf.mxu0  ;;  %7742 = vpow2.f32 %v3296_v53 }
 0x627   : > { %3260 = vmax.xlane.f32.xlu1 %v10418_v40 }
 0x62a   : > { %v10443_v56 = vpop.eup %7738 }
 0x62b   : > { %3326 = vadd.xlane.f32.xlu2 %v10426_v14  ;;  %v10446_v46 = vpop.eup %7740 }
 0x62d   : > { %2760 = vadd.xlane.f32.xlu0 %v10429_v38 }
 0x62e   : > { %v10434_v32 = vpop.f32.mrf.mxu0 }
 0x62f   : > { %2754 = vadd.xlane.f32.xlu1 %v10432_v12 }
 0x631   : > { %7028 = vmatmul.msk.bf16.gmra.mxu0 %vm2118_vm1, %v10150_v23  ;;  %v10451_v23 = vpop.eup %7742 }
 0x635   : > { %2766 = vadd.xlane.f32.xlu0 %v10443_v56 }
 0x636   : > { %v10448_v17 = vpop.f32.mrf.mxu0 }
 0x637   : > { %v3467_v13 = vpop.permute.xlu1 %3466  ;;  %2768 = vadd.xlane.f32.xlu1 %v10446_v46 }
 0x638   : > { %3479 = vmatpush.bf16.msrb.mxu1 %v3467_v13  ;;  %7434 = vmatpush.bf16.msra.mxu2 %v3467_v13 }
 0x63c   : > { %3480 = vmatpush.bf16.msrb.mxu1 %v3465_v4  ;;  %7435 = vmatpush.bf16.msra.mxu2 %v3465_v4 }
 0x63e   : > { %v10453_v1 = vpop.f32.mrf.mxu0 }
 0x63f   : > { %3328 = vadd.xlane.f32.xlu1 %v10451_v23  ;;  %v3457_v47 = vpop.permute.xlu1 %3456 }
 0x640   : > { %3481 = vmatpush.bf16.msrb.mxu1 %v3463_v3  ;;  %7436 = vmatpush.bf16.msra.mxu2 %v3463_v3 }
 0x641   : > { %7029 = vmatmul.msk.bf16.gmra.mxu0 %vm2118_vm1, %v10120_v2  ;;  %v3455_v2 = vpop.permute.xlu2 %3454 }
 0x642   : > { %v3251_v25 = vpop.xlane.xlu0 %3250 }
 0x643   : > { %v3280_v49 = vsub.f32 %v10331_v63, %v3251_v25 }
 0x644   : > { %3482 = vmatpush.bf16.msrb.mxu1 %v3461_v48  ;;  %7437 = vmatpush.bf16.msra.mxu2 %v3461_v48 }
 0x645   : > { %v3298_v4 = vmul.f32 1.442695, %v3280_v49 }
 0x646   : > { %v10461_v8 = vpop.f32.mrf.mxu0 }
 0x647   : > { %7744 = vpow2.f32 %v3298_v4  ;;  %v3982_v48 = vpop.permute.xlu1 %3981 }
 0x648   : > { %3483 = vmatpush.bf16.msrb.mxu1 %v3459_v59  ;;  %7438 = vmatpush.bf16.msra.mxu2 %v3459_v59 }
 0x649   : > { %v3984_v63 = vpop.permute.xlu2 %3983 }
 0x64a   : > { %v2745_v55 = vpop.xlane.xlu0 %2744 }
 0x64b   : > { %7746 = vrcp.f32 %v2745_v55 }
 0x64c   : > { %3484 = vmatpush.bf16.msrb.mxu1 %v3457_v47  ;;  %7439 = vmatpush.bf16.msra.mxu2 %v3457_v47 }
 0x64d   : > { %v10463_v52 = vpop.eup %7744 }
 0x64e   : > { %3330 = vadd.xlane.f32.xlu0 %v10463_v52  ;;  %v10466_v11 = vpop.f32.mrf.mxu0 }
 0x650   : > { %3485 = vmatpush.bf16.msrb.mxu1 %v3455_v2  ;;  %7440 = vmatpush.bf16.msra.mxu2 %v3455_v2 }
 0x651   : > { %7030 = vmatmul.msk.bf16.gmra.mxu0 %vm2118_vm1, %v10164_v6  ;;  %v2747_v6 = vpop.xlane.xlu2 %2746  ;;  %v7747_v53 = vpop.eup %7746 }
 0x652   : > { %v2789_v3 = vmul.f32 %v7747_v53, %v10339_v57 }
 0x654   : > { %3997 = vmatpush.bf16.msra.mxu1 %v3988_v10  ;;  %v2805_v59 = vpack.c.bf16 %v2789_v3, %v2789_v3 }
 0x656   : > { %v10470_v20 = vpop.f32.mrf.mxu0 }
 0x658   : > { %3998 = vmatpush.bf16.msra.mxu1 %v3986_v50 }
 0x659   : > { %v10481_v13 = vpop.xlane.xlu2 %3258 }
 0x65b   : > { %v2899_v33 = vpop.f32.mrf.mxu2 }
 0x65c   : > { %3999 = vmatpush.bf16.msra.mxu1 %v3984_v63  ;;  %v2837_v63 = vunpack.c.l.b16 %v2805_v59 }
 0x65d   : > { %v3980_v62 = vpop.permute.xlu0 %3979 }
 0x65e   : > { %v10474_v18 = vpop.f32.mrf.mxu0 }
 0x660   : > { %4000 = vmatpush.bf16.msra.mxu1 %v3982_v48 }
 0x661   : > { %7031 = vmatmul.msk.bf16.gmra.mxu0 %vm2118_vm1, %v10189_v16  ;;  %v10488_v47 = vpop.xlane.xlu2 %3262 }
 0x663   : > { %v2901_v21 = vpop.f32.mrf.mxu2 }
 0x664   : > { %4001 = vmatpush.bf16.msra.mxu1 %v3980_v62  ;;  %v2939_v51 = vpack.c.bf16 %v2901_v21, %v2899_v33 }
 0x666   : > { %6979 = vmatmul.msk.bf16.vlgmr.msra.gmra.mxu3 %vm2118_vm1, %v2939_v51  ;;  %v10477_v26 = vpop.f32.mrf.mxu0 }
 0x66e   : > { %v10483_v16 = vpop.f32.mrf.mxu0 }
 0x671   : > { %7032 = vmatmul.msk.bf16.gmra.mxu0 %vm2118_vm1, %v10242_v27 }
 0x672   : > { %v2743_v10 = vpop.xlane.xlu1 %2742 }
 0x673   : > { %7748 = vrcp.f32 %v2743_v10 }
 0x679   : > { %v7749_v50 = vpop.eup %7748 }
 0x67a   : > { %v3253_v24 = vpop.xlane.xlu1 %3252  ;;  %v2788_v25 = vmul.f32 %v7749_v50, %v10355_v45 }
 0x67b   : > { %v3281_v49 = vsub.f32 %v10362_v28, %v3253_v24  ;;  %v2757_v28 = vpop.xlane.xlu2 %2756 }
 0x67c   : > { %v2804_v29 = vpack.c.bf16 %v2788_v25, %v2788_v25 }
 0x67d   : > { %v3300_v4 = vmul.f32 1.442695, %v3281_v49 }
 0x67e   : > { %v10490_v27 = vpop.f32.mrf.mxu0  ;;  %v2836_v2 = vunpack.c.l.b16 %v2804_v29 }
 0x67f   : > { %7750 = vpow2.f32 %v3300_v4 }
 0x680   : > { %v2851_v55 = vpack.c.b16 %v2837_v63, %v2836_v2  ;;  %7752 = vrcp.f32 %v2747_v6 }
 0x681   : > { %7033 = vmatmul.msk.bf16.gmra.mxu0 %vm2118_vm1, %v10310_v9 }
 0x682   : > { %v10494_v57 = vpop.xlane.xlu1 %3254  ;;  %2903 = vmatmul.bf16.gmra.mxu2 %v2851_v55 }
 0x683   : > { %v2759_v10 = vpop.xlane.xlu2 %2758 }
 0x685   : > { %v10496_v45 = vpop.eup %7750 }
 0x686   : > { %v10498_v33 = vpop.f32.mrf.mxu0  ;;  %3332 = vadd.xlane.f32.xlu0 %v10496_v45  ;;  %v7753_v62 = vpop.eup %7752 }
 0x687   : > { %v2790_v51 = vmul.f32 %v7753_v62, %v10308_v36 }
 0x688   : > { %v2749_v48 = vpop.xlane.xlu0 %2748 }
 0x689   : > { %7754 = vrcp.f32 %v2749_v48  ;;  %v2806_v50 = vpack.c.bf16 %v2790_v51, %v2790_v51 }
 0x68a   : > { %v10501_v21 = vpop.xlane.xlu1 %3256 }
 0x68b   : > { %v2838_v59 = vunpack.c.l.b16 %v2806_v50 }
 0x68e   : > { %v10504_v9 = vpop.f32.mrf.mxu0  ;;  %v10509_v29 = vpop.xlane.xlu2 %2762 }
 0x68f   : > { %12662 = vst [vmem:[#allocation59_spill] sm:$0xff] %v10504_v9  ;;  %v7755_v53 = vpop.eup %7754 }
 0x690   : > { %v2753_v3 = vpop.xlane.xlu0 %2752  ;;  %v2791_v6 = vmul.f32 %v7755_v53, %v10381_v43 }
 0x691   : > { %7034 = vmatmul.msk.bf16.gmra.mxu0 %vm2118_vm1, %v10436_v44  ;;  %7756 = vrcp.f32 %v2753_v3 }
 0x692   : > { %v2751_v24 = vpop.xlane.xlu1 %2750  ;;  %v2807_v25 = vpack.c.bf16 %v2791_v6, %v2791_v6 }
 0x693   : > { %7758 = vrcp.f32 %v2751_v24 }
 0x694   : > { %v2839_v49 = vunpack.c.l.b16 %v2807_v25  ;;  %7760 = vrcp.f32 %v2757_v28 }
 0x696   : > { %v10511_v36 = vpop.f32.mrf.mxu0  ;;  %v2852_v4 = vpack.c.b16 %v2839_v49, %v2838_v59  ;;  %v2765_v53 = vpop.xlane.xlu2 %2764 }
 0x697   : > { %12663 = vst [vmem:[#allocation60_spill] sm:$0xff] %v10511_v36  ;;  %v7757_v2 = vpop.eup %7756 }
 0x698   : > { %2908 = vmatmul.bf16.gmra.mxu2 %v2852_v4  ;;  %v2793_v44 = vmul.f32 %v7757_v2, %v10395_v60  ;;  %v10521_v24 = vpop.xlane.xlu0 %3264 }
 0x699   : > { %v7759_v63 = vpop.eup %7758 }
 0x69a   : > { %v10513_v55 = vpop.xlane.xlu1 %3260  ;;  %v2792_v43 = vmul.f32 %v7759_v63, %v10399_v31  ;;  %v2809_v3 = vpack.c.bf16 %v2793_v44, %v2793_v44  ;;  %v7761_v49 = vpop.eup %7760 }
 0x69c   : > { %v2808_v62 = vpack.c.bf16 %v2792_v43, %v2792_v43  ;;  %v2841_v25 = vunpack.c.l.b16 %v2809_v3  ;;  %v2795_v43 = vmul.f32 %v7761_v49, %v10342_v30 }
 0x69e   : > { %v3725_v48 = vpop.f32.mrf.mxu0  ;;  %v2840_v50 = vunpack.c.l.b16 %v2808_v62  ;;  %v3327_v2 = vpop.xlane.xlu2 %3326  ;;  %v2811_v3 = vpack.c.bf16 %v2795_v43, %v2795_v43 }
 0x69f   : > { %v10518_v51 = vadd.f32 %v10274_v22, %v3725_v48 }
 0x6a0   : > { %v2853_v31 = vpack.c.b16 %v2841_v25, %v2840_v50  ;;  %v2761_v44 = vpop.xlane.xlu0 %2760 }
 0x6a1   : > { %3765 = vmax.xlane.f32.xlu1 %v10518_v51 }
 0x6a2   : > { %v2755_v6 = vpop.xlane.xlu1 %2754 }
 0x6a3   : > { %7762 = vrcp.f32 %v2755_v6 }
 0x6a4   : > { %7764 = vrcp.f32 %v3327_v2 }
 0x6a5   : > { %7766 = vrcp.f32 %v2761_v44 }
 0x6a6   : > { %v3727_v59 = vpop.f32.mrf.mxu0  ;;  %7768 = vrcp.f32 %v2759_v10 }
 0x6a7   : > { %v10524_v60 = vadd.f32 %v10274_v22, %v3727_v59  ;;  %v2843_v59 = vunpack.c.l.b16 %v2811_v3 }
 0x6a8   : > { %2913 = vmatmul.bf16.gmra.mxu2 %v2853_v31 }
 0x6a9   : > { %v7763_v4 = vpop.eup %7762  ;;  %3767 = vmax.xlane.f32.xlu2 %v10524_v60 }
 0x6aa   : > { %v2769_v63 = vpop.xlane.xlu1 %2768  ;;  %v2794_v28 = vmul.f32 %v7763_v4, %v10432_v12  ;;  %v7765_v25 = vpop.eup %7764 }
 0x6ab   : > { %v3374_v31 = vmul.f32 %v7765_v25, %v10426_v14  ;;  %v7767_v12 = vpop.eup %7766 }
 0x6ac   : > { %v2810_v62 = vpack.c.bf16 %v2794_v28, %v2794_v28  ;;  %v7769_v49 = vpop.eup %7768  ;;  %v2797_v28 = vmul.f32 %v7767_v12, %v10429_v38 }
 0x6ad   : > { %v3390_v2 = vpack.c.bf16 %v3374_v31, %v3374_v31  ;;  %v2796_v43 = vmul.f32 %v7769_v49, %v10367_v61 }
 0x6ae   : > { %v10529_v48 = vpop.f32.mrf.mxu0  ;;  %v2842_v50 = vunpack.c.l.b16 %v2810_v62  ;;  %v2813_v3 = vpack.c.bf16 %v2797_v28, %v2797_v28 }
 0x6af   : > { %v3422_v44 = vunpack.c.l.b16 %v3390_v2 }
 0x6b0   : > { %v2854_v9 = vpack.c.b16 %v2843_v59, %v2842_v50 }
 0x6b2   : > { %v3329_v6 = vpop.xlane.xlu1 %3328 }
 0x6b3   : > { %7770 = vrcp.f32 %v3329_v6 }
 0x6b4   : > { %7772 = vrcp.f32 %v2765_v53  ;;  %v2767_v53 = vpop.xlane.xlu0 %2766 }
 0x6b5   : > { %7774 = vrcp.f32 %v10509_v29 }
 0x6b6   : > { %v3732_v36 = vpop.f32.mrf.mxu0  ;;  %7776 = vrcp.f32 %v2769_v63  ;;  %v10554_v63 = vadd.f32 %v10274_v22, %v10529_v48 }
 0x6b7   : > { %v10533_v30 = vadd.f32 %v10274_v22, %v3732_v36  ;;  %7778 = vrcp.f32 %v2767_v53 }
 0x6b8   : > { %2918 = vmatmul.bf16.gmra.mxu2 %v2854_v9  ;;  %v2812_v9 = vpack.c.bf16 %v2796_v43, %v2796_v43 }
 0x6b9   : > { %v7771_v4 = vpop.eup %7770  ;;  %3771 = vmax.xlane.f32.xlu0 %v10533_v30 }
 0x6ba   : > { %v3375_v10 = vmul.f32 %v7771_v4, %v10451_v23  ;;  %3975 = vrot.lane.b32.xlu1 %v10009_v58, %s8693_s21  ;;  %v2845_v23 = vunpack.c.l.b16 %v2813_v3  ;;  %v2844_v58 = vunpack.c.l.b16 %v2812_v9  ;;  %v7773_v25 = vpop.eup %7772 }
 0x6bb   : > { %v7775_v61 = vpop.eup %7774  ;;  %v2799_v59 = vmul.f32 %v7773_v25, %v10409_v15 }
 0x6bc   : > { %v3391_v14 = vpack.c.bf16 %v3375_v10, %v3375_v10  ;;  %v2855_v38 = vpack.c.b16 %v2845_v23, %v2844_v58  ;;  %v2798_v31 = vmul.f32 %v7775_v61, %v10392_v42  ;;  %v7777_v28 = vpop.eup %7776 }
 0x6bd   : > { %v2815_v49 = vpack.c.bf16 %v2799_v59, %v2799_v59  ;;  %v7779_v43 = vpop.eup %7778  ;;  %v2801_v42 = vmul.f32 %v7777_v28, %v10446_v46  ;;  %v3231_v46 = vpop.f32.mrf.mxu1 }
 0x6be   : > { %v3423_v62 = vunpack.c.l.b16 %v3391_v14  ;;  %v3735_v36 = vpop.f32.mrf.mxu0  ;;  %v2814_v4 = vpack.c.bf16 %v2798_v31, %v2798_v31  ;;  %v2800_v15 = vmul.f32 %v7779_v43, %v10443_v56  ;;  %v3282_v56 = vsub.f32 %v10372_v19, %v10494_v57 }
 0x6bf   : > { %v10558_v23 = vadd.f32 %v10274_v22, %v3735_v36 }
 0x6c0   : > { %v3438_v6 = vpack.c.b16 %v3423_v62, %v3422_v44  ;;  %v2846_v2 = vunpack.c.l.b16 %v2814_v4  ;;  %v2817_v44 = vpack.c.bf16 %v2801_v42, %v2801_v42  ;;  %v2816_v62 = vpack.c.bf16 %v2800_v15, %v2800_v15 }
 0x6c1   : > { %3977 = vrot.lane.b32.xlu2 %v10004_v39, %s8693_s21  ;;  %v2847_v39 = vunpack.c.l.b16 %v2815_v49  ;;  %v3302_v48 = vmul.f32 1.442695, %v3282_v56  ;;  %v3331_v36 = vpop.xlane.xlu0 %3330 }
 0x6c2   : > { %3486 = vmatmul.bf16.vlgmr.msrb.gmra.mxu1 %v3438_v6  ;;  %v2849_v3 = vunpack.c.l.b16 %v2817_v44  ;;  %v2848_v6 = vunpack.c.l.b16 %v2816_v62 }
 0x6c3   : > { %v2856_v29 = vpack.c.b16 %v2847_v39, %v2846_v2  ;;  %7780 = vpow2.f32 %v3302_v48  ;;  %v3283_v48 = vsub.f32 %v10387_v41, %v10501_v21 }
 0x6c4   : > { %v2857_v9 = vpack.c.b16 %v2849_v3, %v2848_v6  ;;  %7782 = vrcp.f32 %v3331_v36 }
 0x6c5   : > { %v3233_v57 = vpop.f32.mrf.mxu1 }
 0x6c6   : > { %v3737_v50 = vpop.f32.mrf.mxu0  ;;  %v10580_v59 = vadd.f32 %v10274_v22, %v3233_v57 }
 0x6c7   : > { %v10561_v58 = vadd.f32 %v10274_v22, %v3737_v50 }
 0x6c8   : > { %2923 = vmatmul.bf16.gmra.mxu2 %v2855_v38  ;;  %v10570_v38 = vadd.f32 %v10274_v22, %v3231_v46 }
 0x6c9   : > { %v10577_v50 = vpop.eup %7780 }
 0x6ce   : > { %v3740_v12 = vpop.f32.mrf.mxu0 }
 0x6cf   : > { %v10573_v25 = vadd.f32 %v10274_v22, %v3740_v12 }
 0x6d6   : > { %v3742_v10 = vpop.f32.mrf.mxu0 }
 0x6d7   : > { %v10547_v14 = vadd.f32 %v10274_v22, %v3742_v10 }
 0x6d8   : > { %2928 = vmatmul.bf16.gmra.mxu2 %v2856_v29 }
 0x6d9   : > { %3779 = vmax.xlane.f32.xlu0 %v10547_v14 }
 0x6de   : > { %v3745_v19 = vpop.f32.mrf.mxu0 }
 0x6df   : > { %v10586_v53 = vadd.f32 %v10274_v22, %v3745_v19 }
 0x6e4   : > { %3769 = vmax.xlane.f32.xlu1 %v10554_v63 }
 0x6e6   : > { %v3747_v12 = vpop.f32.mrf.mxu0 }
 0x6e7   : > { %v10590_v2 = vadd.f32 %v10274_v22, %v3747_v12 }
 0x6e8   : > { %2933 = vmatmul.bf16.gmra.mxu2 %v2857_v9 }
 0x6ea   : > { %3773 = vmax.xlane.f32.xlu2 %v10558_v23 }
 0x6ec   : > { %3775 = vmax.xlane.f32.xlu1 %v10561_v58 }
 0x6ed   : > { %3973 = vrot.lane.b32.xlu0 %v10015_v35, %s8693_s21  ;;  %v7783_v35 = vpop.eup %7782 }
 0x6ee   : > { %v3376_v31 = vmul.f32 %v7783_v35, %v10463_v52  ;;  %v3750_v36 = vpop.f32.mrf.mxu0 }
 0x6ef   : > { %v10603_v35 = vadd.f32 %v10274_v22, %v3750_v36 }
 0x6f0   : > { %v3392_v39 = vpack.c.bf16 %v3376_v31, %v3376_v31 }
 0x6f2   : > { %3266 = vmax.xlane.f32.xlu2 %v10570_v38  ;;  %v3424_v28 = vunpack.c.l.b16 %v3392_v39  ;;  %v3236_v39 = vpop.f32.mrf.mxu1 }
 0x6f4   : > { %3777 = vmax.xlane.f32.xlu1 %v10573_v25 }
 0x6f9   : > { %v3333_v61 = vpop.xlane.xlu0 %3332 }
 0x6fa   : > { %7784 = vrcp.f32 %v3333_v61  ;;  %3334 = vadd.xlane.f32.xlu2 %v10577_v50 }
 0x6fc   : > { %3268 = vmax.xlane.f32.xlu1 %v10580_v59 }
 0x700   : > { %v7785_v49 = vpop.eup %7784 }
 0x701   : > { %v3377_v4 = vmul.f32 %v7785_v49, %v10496_v45 }
 0x702   : > { %3781 = vmax.xlane.f32.xlu2 %v10586_v53 }
 0x703   : > { %v3393_v10 = vpack.c.bf16 %v3377_v4, %v3377_v4 }
 0x704   : > { %3783 = vmax.xlane.f32.xlu1 %v10590_v2 }
 0x705   : > { %v2904_v29 = vpop.f32.mrf.mxu2  ;;  %v3425_v43 = vunpack.c.l.b16 %v3393_v10  ;;  %v3284_v10 = vsub.f32 %v10316_v7, %v10481_v13 }
 0x707   : > { %v3439_v52 = vpack.c.b16 %v3425_v43, %v3424_v28 }
 0x709   : > { %3491 = vmatmul.bf16.gmra.mxu1 %v3439_v52  ;;  %v3306_v52 = vmul.f32 1.442695, %v3284_v10 }
 0x70d   : > { %v2906_v42 = vpop.f32.mrf.mxu2 }
 0x70e   : > { %v2940_v15 = vpack.c.bf16 %v2906_v42, %v2904_v29  ;;  %v3752_v29 = vpop.f32.mrf.mxu0 }
 0x70f   : > { %v10617_v42 = vadd.f32 %v10274_v22, %v3752_v29 }
 0x710   : > { %6980 = vmatmul.msk.bf16.gmra.mxu3 %vm2118_vm1, %v2940_v15  ;;  %v3238_v15 = vpop.f32.mrf.mxu1 }
 0x711   : > { %v10625_v7 = vadd.f32 %v10274_v22, %v3238_v15 }
 0x714   : > { %v3766_v44 = vpop.xlane.xlu1 %3765 }
 0x715   : > { %v3797_v45 = vsub.f32 %v10518_v51, %v3766_v44  ;;  %v3304_v51 = vmul.f32 1.442695, %v3283_v48 }
 0x717   : > { %v3813_v62 = vmul.f32 1.442695, %v3797_v45 }
 0x718   : > { %v3241_v29 = vpop.f32.mrf.mxu1 }
 0x719   : > { %7786 = vpow2.f32 %v3813_v62 }
 0x71b   : > { %v2909_v3 = vpop.f32.mrf.mxu2 }
 0x71c   : > { %v3768_v6 = vpop.xlane.xlu2 %3767 }
 0x71d   : > { %v3798_v9 = vsub.f32 %v10524_v60, %v3768_v6 }
 0x71f   : > { %v10597_v56 = vpop.eup %7786  ;;  %v3815_v46 = vmul.f32 1.442695, %v3798_v9 }
 0x720   : > { %3845 = vadd.xlane.f32.xlu2 %v10597_v56 }
 0x721   : > { %7788 = vpow2.f32 %v3815_v46 }
 0x722   : > { %7790 = vpow2.f32 %v3304_v51 }
 0x723   : > { %v2911_v19 = vpop.f32.mrf.mxu2 }
 0x724   : > { %v2941_v57 = vpack.c.bf16 %v2911_v19, %v2909_v3  ;;  %v3978_v61 = vpop.permute.xlu2 %3977 }
 0x725   : > { %4002 = vmatpush.bf16.msra.mxu1 %v3978_v61 }
 0x726   : > { %6981 = vmatmul.msk.bf16.gmra.mxu3 %vm2118_vm1, %v2941_v57  ;;  %v7349_v57 = vld [vmem:[%s9134_s20 + $0x28] sm:$0xff] }
 0x727   : > { %v10606_v60 = vpop.eup %7788  ;;  %3577 = vmatpush.bf16.msrb.mxu3 %v7349_v57  ;;  %v3287_v57 = vsub.f32 %v10413_v34, %v10521_v24 }
 0x728   : > { %3847 = vadd.xlane.f32.xlu1 %v10606_v60  ;;  %3785 = vmax.xlane.f32.xlu2 %v10603_v35  ;;  %v10611_v49 = vpop.eup %7790 }
 0x72b   : > { %v2914_v41 = vpop.f32.mrf.mxu2 }
 0x72c   : > { %v3976_v21 = vpop.permute.xlu1 %3975  ;;  %v3772_v31 = vpop.xlane.xlu0 %3771 }
 0x72d   : > { %v3800_v12 = vsub.f32 %v10533_v30, %v3772_v31  ;;  %4003 = vmatpush.bf16.msra.mxu1 %v3976_v21 }
 0x72f   : > { %v3819_v4 = vmul.f32 1.442695, %v3800_v12 }
 0x730   : > { %3336 = vadd.xlane.f32.xlu1 %v10611_v49 }
 0x731   : > { %7792 = vpow2.f32 %v3819_v4  ;;  %v7348_v4 = vld [vmem:[%s9134_s20 + $0x20] sm:$0xff] }
 0x732   : > { %7794 = vpow2.f32 %v3306_v52  ;;  %3578 = vmatpush.bf16.msrb.mxu3 %v7348_v4 }
 0x733   : > { %v2916_v28 = vpop.f32.mrf.mxu2 }
 0x734   : > { %v2942_v43 = vpack.c.bf16 %v2916_v28, %v2914_v41 }
 0x736   : > { %6982 = vmatmul.msk.bf16.gmra.mxu3 %vm2118_vm1, %v2942_v43  ;;  %v3755_v43 = vpop.f32.mrf.mxu0 }
 0x737   : > { %v10620_v30 = vpop.eup %7792 }
 0x738   : > { %3787 = vmax.xlane.f32.xlu1 %v10617_v42  ;;  %3851 = vadd.xlane.f32.xlu2 %v10620_v30  ;;  %v10627_v13 = vpop.eup %7794 }
 0x73b   : > { %v2919_v44 = vpop.f32.mrf.mxu2 }
 0x740   : > { %3338 = vadd.xlane.f32.xlu1 %v10627_v13  ;;  %3272 = vmax.xlane.f32.xlu2 %v10625_v7 }
 0x743   : > { %v2921_v45 = vpop.f32.mrf.mxu2 }
 0x744   : > { %v2943_v62 = vpack.c.bf16 %v2921_v45, %v2919_v44  ;;  %v10649_v45 = vld [vmem:[%s9090_s10] ss:$0 sm:$0xff]  ;;  %s12666_s10 = sld [smem:[#allocation57_spill]] }
 0x746   : > { %6983 = vmatmul.msk.bf16.gmra.mxu3 %vm2118_vm1, %v2943_v62  ;;  %v10652_v62 = vadd.f32 %v10649_v45, %v3236_v39 }
 0x74b   : > { %v2924_v3 = vpop.f32.mrf.mxu2 }
 0x74c   : > { %v3780_v46 = vpop.xlane.xlu0 %3779 }
 0x753   : > { %v2926_v6 = vpop.f32.mrf.mxu2 }
 0x754   : > { %v2944_v9 = vpack.c.bf16 %v2926_v6, %v2924_v3  ;;  %v3243_v6 = vpop.f32.mrf.mxu1 }
 0x755   : > { %v10685_v34 = vadd.f32 %v10649_v45, %v3243_v6 }
 0x756   : > { %6984 = vmatmul.msk.bf16.gmra.mxu3 %vm2118_vm1, %v2944_v9 }
 0x757   : > { %v3770_v22 = vpop.xlane.xlu1 %3769 }
 0x758   : > { %v3799_v48 = vsub.f32 %v10554_v63, %v3770_v22  ;;  %v3757_v22 = vpop.f32.mrf.mxu0 }
 0x75a   : > { %v3817_v36 = vmul.f32 1.442695, %v3799_v48 }
 0x75b   : > { %v2929_v19 = vpop.f32.mrf.mxu2 }
 0x75c   : > { %7796 = vpow2.f32 %v3817_v36  ;;  %v10661_v36 = vadd.f32 %v10649_v45, %v3755_v43 }
 0x75d   : > { %v3774_v61 = vpop.xlane.xlu2 %3773 }
 0x75e   : > { %v3801_v51 = vsub.f32 %v10558_v23, %v3774_v61  ;;  %v3285_v23 = vsub.f32 %v10418_v40, %v10513_v55  ;;  %v3804_v40 = vsub.f32 %v10547_v14, %v3780_v46  ;;  %v3286_v46 = vsub.f32 %v10325_v54, %v10488_v47 }
 0x75f   : > { %v3776_v41 = vpop.xlane.xlu1 %3775  ;;  %v3974_v21 = vpop.permute.xlu0 %3973  ;;  %v10682_v47 = vadd.f32 %v10649_v45, %v3241_v29 }
 0x760   : > { %v3821_v31 = vmul.f32 1.442695, %v3801_v51  ;;  %v3802_v12 = vsub.f32 %v10561_v58, %v3776_v41  ;;  %4004 = vmatpush.bf16.msra.mxu1 %v3974_v21  ;;  %v3308_v44 = vmul.f32 1.442695, %v3285_v23  ;;  %v3827_v48 = vmul.f32 1.442695, %v3804_v40  ;;  %v3487_v21 = vpop.f32.mrf.mxu1 }
 0x762   : > { %v10638_v10 = vpop.eup %7796  ;;  %7798 = vpow2.f32 %v3821_v31  ;;  %v3823_v63 = vmul.f32 1.442695, %v3802_v12  ;;  %v3310_v31 = vmul.f32 1.442695, %v3286_v46  ;;  %v3312_v12 = vmul.f32 1.442695, %v3287_v57 }
 0x763   : > { %v2931_v28 = vpop.f32.mrf.mxu2  ;;  %3849 = vadd.xlane.f32.xlu0 %v10638_v10 }
 0x764   : > { %7800 = vpow2.f32 %v3823_v63  ;;  %v2945_v52 = vpack.c.bf16 %v2931_v28, %v2929_v19  ;;  %v10666_v19 = vadd.f32 %v10649_v45, %v3757_v22 }
 0x765   : > { %v10643_v15 = vpop.xlane.xlu2 %3266  ;;  %7802 = vpow2.f32 %v3308_v44 }
 0x766   : > { %6985 = vmatmul.msk.bf16.gmra.mxu3 %vm2118_vm1, %v2945_v52  ;;  %7804 = vpow2.f32 %v3827_v48 }
 0x767   : > { %v3778_v9 = vpop.xlane.xlu1 %3777  ;;  %7806 = vpow2.f32 %v3310_v31 }
 0x768   : > { %v10646_v58 = vpop.eup %7798  ;;  %v3803_v51 = vsub.f32 %v10573_v25, %v3778_v9  ;;  %v3760_v25 = vpop.f32.mrf.mxu0  ;;  %7808 = vpow2.f32 %v3312_v12 }
 0x769   : > { %3853 = vadd.xlane.f32.xlu2 %v10646_v58  ;;  %v3489_v23 = vpop.f32.mrf.mxu1 }
 0x76a   : > { %v10655_v3 = vpop.eup %7800  ;;  %v3825_v54 = vmul.f32 1.442695, %v3803_v51  ;;  %v3527_v9 = vpack.c.bf16 %v3489_v23, %v3487_v21 }
 0x76b   : > { %v2934_v55 = vpop.f32.mrf.mxu2  ;;  %3855 = vadd.xlane.f32.xlu1 %v10655_v3  ;;  %3270 = vmax.xlane.f32.xlu0 %v10652_v62  ;;  %v10669_v14 = vpop.eup %7802 }
 0x76c   : > { %v10679_v63 = vpop.eup %7804  ;;  %7810 = vpow2.f32 %v3825_v54 }
 0x76d   : > { %v10663_v39 = vpop.xlane.xlu2 %3334  ;;  %v10691_v43 = vpop.eup %7806 }
 0x76e   : > { %v10693_v52 = vpop.eup %7808 }
 0x76f   : > { %v3269_v4 = vpop.xlane.xlu1 %3268 }
 0x770   : > { %v3289_v6 = vsub.f32 %v10580_v59, %v3269_v4  ;;  %v10709_v59 = vadd.f32 %v10649_v45, %v3760_v25 }
 0x771   : > { %3789 = vmax.xlane.f32.xlu2 %v10661_v36 }
 0x772   : > { %v10696_v40 = vpop.eup %7810  ;;  %v3316_v57 = vmul.f32 1.442695, %v3289_v6 }
 0x773   : > { %v2936_v61 = vpop.f32.mrf.mxu2  ;;  %3791 = vmax.xlane.f32.xlu1 %v10666_v19  ;;  %3340 = vadd.xlane.f32.xlu0 %v10669_v14 }
 0x774   : > { %v2946_v41 = vpack.c.bf16 %v2936_v61, %v2934_v55  ;;  %v3288_v55 = vsub.f32 %v10570_v38, %v10643_v15 }
 0x775   : > { %v3782_v24 = vpop.xlane.xlu2 %3781 }
 0x776   : > { %6986 = vmatmul.msk.bf16.gmra.mxu3 %vm2118_vm1, %v2946_v41  ;;  %v3805_v28 = vsub.f32 %v10586_v53, %v3782_v24  ;;  %v3762_v53 = vpop.f32.mrf.mxu0  ;;  %v3314_v48 = vmul.f32 1.442695, %v3288_v55 }
 0x777   : > { %v3784_v44 = vpop.xlane.xlu1 %3783  ;;  %v10706_v46 = vadd.f32 %v10649_v45, %v3762_v53 }
 0x778   : > { %v3829_v29 = vmul.f32 1.442695, %v3805_v28  ;;  %v3806_v22 = vsub.f32 %v10590_v2, %v3784_v44 }
 0x779   : > { %3859 = vadd.xlane.f32.xlu2 %v10679_v63 }
 0x77a   : > { %7812 = vpow2.f32 %v3829_v29  ;;  %v3831_v38 = vmul.f32 1.442695, %v3806_v22 }
 0x77b   : > { %3274 = vmax.xlane.f32.xlu1 %v10682_v47  ;;  %3276 = vmax.xlane.f32.xlu0 %v10685_v34  ;;  %7814 = vpow2.f32 %v3314_v48 }
 0x77c   : > { %7816 = vpow2.f32 %v3316_v57 }
 0x77d   : > { %7818 = vpow2.f32 %v3831_v38 }
 0x780   : > { %v10712_v15 = vpop.eup %7812 }
 0x781   : > { %3342 = vadd.xlane.f32.xlu2 %v10691_v43  ;;  %v10716_v2 = vpop.eup %7814 }
 0x782   : > { %v10718_v51 = vpop.eup %7816 }
 0x783   : > { %3857 = vadd.xlane.f32.xlu0 %v10696_v40  ;;  %3344 = vadd.xlane.f32.xlu1 %v10693_v52  ;;  %v10721_v45 = vpop.eup %7818 }
 0x786   : > { %7019 = vmatmul.msk.bf16.vlgmr.msrb.gmra.mxu3 %vm2118_vm1, %v3527_v9  ;;  %v3492_v61 = vpop.f32.mrf.mxu1 }
 0x789   : > { %3795 = vmax.xlane.f32.xlu2 %v10706_v46 }
 0x78b   : > { %3793 = vmax.xlane.f32.xlu0 %v10709_v59  ;;  %3861 = vadd.xlane.f32.xlu1 %v10712_v15 }
 0x78e   : > { %v3494_v41 = vpop.f32.mrf.mxu1 }
 0x78f   : > { %v3528_v31 = vpack.c.bf16 %v3494_v41, %v3492_v61 }
 0x791   : > { %3346 = vadd.xlane.f32.xlu2 %v10716_v2 }
 0x793   : > { %v3846_v21 = vpop.xlane.xlu2 %3845  ;;  %3863 = vadd.xlane.f32.xlu0 %v10721_v45  ;;  %3348 = vadd.xlane.f32.xlu1 %v10718_v51 }
 0x794   : > { %7820 = vrcp.f32 %v3846_v21 }
 0x796   : > { %7020 = vmatmul.msk.bf16.gmra.mxu3 %vm2118_vm1, %v3528_v31 }
 0x79a   : > { %v7821_v54 = vpop.eup %7820 }
 0x79b   : > { %v3786_v12 = vpop.xlane.xlu2 %3785  ;;  %v3848_v4 = vpop.xlane.xlu1 %3847  ;;  %v3893_v28 = vmul.f32 %v7821_v54, %v10597_v56 }
 0x79c   : > { %v3807_v24 = vsub.f32 %v10603_v35, %v3786_v12  ;;  %7822 = vrcp.f32 %v3848_v4 }
 0x79d   : > { %7824 = vrcp.f32 %v10663_v39  ;;  %v3909_v29 = vpack.c.bf16 %v3893_v28, %v3893_v28 }
 0x79e   : > { %v3833_v25 = vmul.f32 1.442695, %v3807_v24 }
 0x79f   : > { %v3941_v35 = vunpack.c.l.b16 %v3909_v29 }
 0x7a0   : > { %7826 = vpow2.f32 %v3833_v25 }
 0x7a2   : > { %v7823_v23 = vpop.eup %7822 }
 0x7a3   : > { %v3894_v44 = vmul.f32 %v7823_v23, %v10606_v60  ;;  %v3337_v55 = vpop.xlane.xlu1 %3336  ;;  %v7825_v6 = vpop.eup %7824 }
 0x7a4   : > { %7828 = vrcp.f32 %v3337_v55  ;;  %v3378_v22 = vmul.f32 %v7825_v6, %v10577_v50 }
 0x7a5   : > { %v3910_v53 = vpack.c.bf16 %v3894_v44, %v3894_v44 }
 0x7a6   : > { %v10730_v9 = vpop.eup %7826  ;;  %v3394_v56 = vpack.c.bf16 %v3378_v22, %v3378_v22 }
 0x7a7   : > { %v3942_v48 = vunpack.c.l.b16 %v3910_v53  ;;  %3865 = vadd.xlane.f32.xlu0 %v10730_v9 }
 0x7a8   : > { %v3426_v12 = vunpack.c.l.b16 %v3394_v56 }
 0x7a9   : > { %v3957_v39 = vpack.c.b16 %v3942_v48, %v3941_v35 }
 0x7aa   : > { %v7829_v57 = vpop.eup %7828 }
 0x7ab   : > { %v3379_v61 = vmul.f32 %v7829_v57, %v10611_v49  ;;  %v3788_v38 = vpop.xlane.xlu1 %3787  ;;  %v3852_v41 = vpop.xlane.xlu2 %3851  ;;  %4005 = vmatmul.bf16.vlgmr.msra.gmra.mxu1 %v3957_v39 }
 0x7ac   : > { %v3808_v60 = vsub.f32 %v10617_v42, %v3788_v38 }
 0x7ad   : > { %v3395_v21 = vpack.c.bf16 %v3379_v61, %v3379_v61 }
 0x7ae   : > { %v3835_v31 = vmul.f32 1.442695, %v3808_v60 }
 0x7af   : > { %v3427_v4 = vunpack.c.l.b16 %v3395_v21 }
 0x7b0   : > { %7830 = vpow2.f32 %v3835_v31 }
 0x7b1   : > { %v3440_v50 = vpack.c.b16 %v3427_v4, %v3426_v12 }
 0x7b3   : > { %3496 = vmatmul.bf16.vlgmr.msra.gmra.mxu2 %v3440_v50  ;;  %v3273_v54 = vpop.xlane.xlu2 %3272  ;;  %v3339_v42 = vpop.xlane.xlu1 %3338 }
 0x7b4   : > { %v3291_v24 = vsub.f32 %v10625_v7, %v3273_v54 }
 0x7b6   : > { %v10737_v25 = vpop.eup %7830  ;;  %v3320_v28 = vmul.f32 1.442695, %v3291_v24 }
 0x7b7   : > { %3867 = vadd.xlane.f32.xlu2 %v10737_v25 }
 0x7b8   : > { %7832 = vpow2.f32 %v3320_v28 }
 0x7b9   : > { %7834 = vrcp.f32 %v3852_v41 }
 0x7be   : > { %v10740_v49 = vpop.eup %7832 }
 0x7bf   : > { %3352 = vadd.xlane.f32.xlu0 %v10740_v49  ;;  %v7835_v29 = vpop.eup %7834 }
 0x7c0   : > { %v3896_v44 = vmul.f32 %v7835_v29, %v10620_v30 }
 0x7c2   : > { %v3912_v35 = vpack.c.bf16 %v3896_v44, %v3896_v44 }
 0x7c4   : > { %v3944_v61 = vunpack.c.l.b16 %v3912_v35 }
 0x7d6   : > { %v3850_v23 = vpop.xlane.xlu0 %3849 }
 0x7d7   : > { %7836 = vrcp.f32 %v3850_v23 }
 0x7dc   : > { %v3854_v55 = vpop.xlane.xlu2 %3853 }
 0x7dd   : > { %v7837_v6 = vpop.eup %7836 }
 0x7de   : > { %v3856_v7 = vpop.xlane.xlu1 %3855  ;;  %v3271_v53 = vpop.xlane.xlu0 %3270  ;;  %v3895_v22 = vmul.f32 %v7837_v6, %v10638_v10 }
 0x7df   : > { %7838 = vrcp.f32 %v3856_v7  ;;  %v3290_v48 = vsub.f32 %v10652_v62, %v3271_v53 }
 0x7e0   : > { %7840 = vrcp.f32 %v3339_v42  ;;  %v3911_v39 = vpack.c.bf16 %v3895_v22, %v3895_v22 }
 0x7e1   : > { %7842 = vrcp.f32 %v3854_v55  ;;  %v3318_v57 = vmul.f32 1.442695, %v3290_v48 }
 0x7e2   : > { %v3943_v56 = vunpack.c.l.b16 %v3911_v39 }
 0x7e3   : > { %7844 = vpow2.f32 %v3318_v57 }
 0x7e4   : > { %v3790_v38 = vpop.xlane.xlu2 %3789  ;;  %v3958_v41 = vpack.c.b16 %v3944_v61, %v3943_v56 }
 0x7e5   : > { %v7839_v30 = vpop.eup %7838  ;;  %v3809_v60 = vsub.f32 %v10661_v36, %v3790_v38 }
 0x7e6   : > { %v7841_v21 = vpop.eup %7840  ;;  %v3792_v31 = vpop.xlane.xlu1 %3791  ;;  %4010 = vmatmul.bf16.gmra.mxu1 %v3958_v41  ;;  %v3898_v50 = vmul.f32 %v7839_v30, %v10655_v3 }
 0x7e7   : > { %v3341_v10 = vpop.xlane.xlu0 %3340  ;;  %v7843_v12 = vpop.eup %7842  ;;  %v3837_v4 = vmul.f32 1.442695, %v3809_v60  ;;  %v3810_v62 = vsub.f32 %v10666_v19, %v3792_v31  ;;  %v3380_v28 = vmul.f32 %v7841_v21, %v10627_v13 }
 0x7e8   : > { %7846 = vrcp.f32 %v3341_v10  ;;  %v3897_v36 = vmul.f32 %v7843_v12, %v10646_v58  ;;  %v3914_v23 = vpack.c.bf16 %v3898_v50, %v3898_v50 }
 0x7e9   : > { %v10749_v54 = vpop.eup %7844  ;;  %7848 = vpow2.f32 %v3837_v4  ;;  %v3839_v24 = vmul.f32 1.442695, %v3810_v62  ;;  %v3396_v6 = vpack.c.bf16 %v3380_v28, %v3380_v28 }
 0x7ea   : > { %3350 = vadd.xlane.f32.xlu1 %v10749_v54  ;;  %v3913_v3 = vpack.c.bf16 %v3897_v36, %v3897_v36  ;;  %v3946_v58 = vunpack.c.l.b16 %v3914_v23 }
 0x7eb   : > { %7850 = vpow2.f32 %v3839_v24 }
 0x7ec   : > { %v3860_v42 = vpop.xlane.xlu2 %3859  ;;  %v3945_v56 = vunpack.c.l.b16 %v3913_v3 }
 0x7ed   : > { %7852 = vrcp.f32 %v3860_v42 }
 0x7ee   : > { %v7847_v29 = vpop.eup %7846  ;;  %v3275_v44 = vpop.xlane.xlu1 %3274  ;;  %v3959_v38 = vpack.c.b16 %v3946_v58, %v3945_v56 }
 0x7ef   : > { %v3277_v55 = vpop.xlane.xlu0 %3276  ;;  %v3381_v19 = vmul.f32 %v7847_v29, %v10669_v14  ;;  %v10755_v7 = vpop.eup %7848  ;;  %v3292_v53 = vsub.f32 %v10682_v47, %v3275_v44  ;;  %v3428_v14 = vunpack.c.l.b16 %v3396_v6 }
 0x7f0   : > { %v3293_v22 = vsub.f32 %v10685_v34, %v3277_v55  ;;  %3869 = vadd.xlane.f32.xlu2 %v10755_v7 }
 0x7f1   : > { %v3397_v13 = vpack.c.bf16 %v3381_v19, %v3381_v19  ;;  %v10760_v35 = vpop.eup %7850  ;;  %v3322_v48 = vmul.f32 1.442695, %v3292_v53 }
 0x7f2   : > { %v3324_v39 = vmul.f32 1.442695, %v3293_v22  ;;  %3871 = vadd.xlane.f32.xlu1 %v10760_v35 }
 0x7f3   : > { %v3429_v57 = vunpack.c.l.b16 %v3397_v13  ;;  %7854 = vpow2.f32 %v3322_v48  ;;  %v7853_v30 = vpop.eup %7852 }
 0x7f4   : > { %7856 = vpow2.f32 %v3324_v39  ;;  %v3343_v61 = vpop.xlane.xlu2 %3342  ;;  %v3900_v10 = vmul.f32 %v7853_v30, %v10679_v63 }
 0x7f5   : > { %v3441_v47 = vpack.c.b16 %v3429_v57, %v3428_v14  ;;  %7858 = vrcp.f32 %v3343_v61 }
 0x7f6   : > { %v3345_v34 = vpop.xlane.xlu1 %3344  ;;  %4015 = vmatmul.bf16.gmra.mxu1 %v3959_v38  ;;  %v3916_v19 = vpack.c.bf16 %v3900_v10, %v3900_v10 }
 0x7f7   : > { %3501 = vmatmul.bf16.gmra.mxu2 %v3441_v47  ;;  %v3858_v41 = vpop.xlane.xlu0 %3857  ;;  %7860 = vrcp.f32 %v3345_v34 }
 0x7f8   : > { %7862 = vrcp.f32 %v3858_v41  ;;  %v3948_v22 = vunpack.c.l.b16 %v3916_v19 }
 0x7f9   : > { %v10763_v60 = vpop.eup %7854 }
 0x7fa   : > { %v10765_v21 = vpop.eup %7856  ;;  %3354 = vadd.xlane.f32.xlu0 %v10763_v60 }
 0x7fb   : > { %v7859_v31 = vpop.eup %7858  ;;  %3356 = vadd.xlane.f32.xlu2 %v10765_v21 }
 0x7fc   : > { %v3796_v12 = vpop.xlane.xlu2 %3795  ;;  %v3382_v4 = vmul.f32 %v7859_v31, %v10691_v43 }
 0x7fd   : > { %v7861_v62 = vpop.eup %7860  ;;  %v3812_v50 = vsub.f32 %v10706_v46, %v3796_v12 }
 0x7fe   : > { %v7863_v24 = vpop.eup %7862  ;;  %v3862_v28 = vpop.xlane.xlu1 %3861  ;;  %v3383_v42 = vmul.f32 %v7861_v62, %v10693_v52  ;;  %v3398_v23 = vpack.c.bf16 %v3382_v4, %v3382_v4 }
 0x7ff   : > { %v3794_v36 = vpop.xlane.xlu0 %3793  ;;  %v3843_v29 = vmul.f32 1.442695, %v3812_v50  ;;  %v3899_v55 = vmul.f32 %v7863_v24, %v10696_v40 }
 0x800   : > { %v3811_v44 = vsub.f32 %v10709_v59, %v3794_v36  ;;  %v3399_v6 = vpack.c.bf16 %v3383_v42, %v3383_v42  ;;  %v3430_v43 = vunpack.c.l.b16 %v3398_v23 }
 0x801   : > { %7864 = vpow2.f32 %v3843_v29  ;;  %v3915_v3 = vpack.c.bf16 %v3899_v55, %v3899_v55 }
 0x802   : > { %v3841_v63 = vmul.f32 1.442695, %v3811_v44  ;;  %7866 = vrcp.f32 %v3862_v28  ;;  %v3431_v53 = vunpack.c.l.b16 %v3399_v6 }
 0x803   : > { %v3947_v46 = vunpack.c.l.b16 %v3915_v3 }
 0x804   : > { %7868 = vpow2.f32 %v3841_v63  ;;  %v3347_v13 = vpop.xlane.xlu2 %3346  ;;  %v3442_v58 = vpack.c.b16 %v3431_v53, %v3430_v43 }
 0x805   : > { %7870 = vrcp.f32 %v3347_v13  ;;  %v3960_v52 = vpack.c.b16 %v3948_v22, %v3947_v46 }
 0x806   : > { %v3349_v48 = vpop.xlane.xlu1 %3348 }
 0x807   : > { %3506 = vmatmul.bf16.gmra.mxu2 %v3442_v58  ;;  %v3864_v59 = vpop.xlane.xlu0 %3863  ;;  %v10775_v39 = vpop.eup %7864  ;;  %7872 = vrcp.f32 %v3349_v48  ;;  %4020 = vmatmul.bf16.gmra.mxu1 %v3960_v52 }
 0x808   : > { %v7867_v40 = vpop.eup %7866  ;;  %7874 = vrcp.f32 %v3864_v59  ;;  %3875 = vadd.xlane.f32.xlu0 %v10775_v39 }
 0x809   : > { %v3901_v56 = vmul.f32 %v7867_v40, %v10712_v15  ;;  %v7351_v15 = vld [vmem:[%s9134_s20 + $0x38] sm:$0xff] }
 0x80a   : > { %v10778_v14 = vpop.eup %7868  ;;  %4096 = vmatpush.bf16.msrb.mxu2 %v7351_v15 }
 0x80b   : > { %3873 = vadd.xlane.f32.xlu1 %v10778_v14  ;;  %v7871_v57 = vpop.eup %7870  ;;  %v3917_v31 = vpack.c.bf16 %v3901_v56, %v3901_v56  ;;  %v10792_v56 = vpop.f32.mrf.mxu3 }
 0x80c   : > { %v3384_v61 = vmul.f32 %v7871_v57, %v10716_v2 }
 0x80d   : > { %v7873_v47 = vpop.eup %7872  ;;  %v3949_v50 = vunpack.c.l.b16 %v3917_v31 }
 0x80e   : > { %v7875_v38 = vpop.eup %7874  ;;  %v3385_v34 = vmul.f32 %v7873_v47, %v10718_v51  ;;  %v3400_v41 = vpack.c.bf16 %v3384_v61, %v3384_v61 }
 0x80f   : > { %v3902_v30 = vmul.f32 %v7875_v38, %v10721_v45 }
 0x810   : > { %v3401_v10 = vpack.c.bf16 %v3385_v34, %v3385_v34  ;;  %v3432_v4 = vunpack.c.l.b16 %v3400_v41 }
 0x811   : > { %v3918_v12 = vpack.c.bf16 %v3902_v30, %v3902_v30 }
 0x812   : > { %v3433_v62 = vunpack.c.l.b16 %v3401_v10 }
 0x813   : > { %v3950_v24 = vunpack.c.l.b16 %v3918_v12 }
 0x814   : > { %v3443_v28 = vpack.c.b16 %v3433_v62, %v3432_v4 }
 0x815   : > { %v3961_v36 = vpack.c.b16 %v3950_v24, %v3949_v50  ;;  %v10796_v24 = vpop.f32.mrf.mxu3 }
 0x817   : > { %3511 = vmatmul.bf16.gmra.mxu2 %v3443_v28  ;;  %4025 = vmatmul.bf16.gmra.mxu1 %v3961_v36 }
 0x81a   : > { %v3866_v2 = vpop.xlane.xlu0 %3865 }
 0x81b   : > { %7876 = vrcp.f32 %v3866_v2 }
 0x821   : > { %v7877_v51 = vpop.eup %7876 }
 0x822   : > { %v3903_v45 = vmul.f32 %v7877_v51, %v10730_v9  ;;  %v7350_v9 = vld [vmem:[%s9134_s20 + $0x30] sm:$0xff]  ;;  %s12669_s20 = scalar_lea.vmem [#allocation16], %s9107_s30 }
 0x823   : > { %4097 = vmatpush.bf16.msrb.mxu2 %v7350_v9 }
 0x824   : > { %v3919_v44 = vpack.c.bf16 %v3903_v45, %v3903_v45 }
 0x826   : > { %v3951_v6 = vunpack.c.l.b16 %v3919_v44  ;;  %v10800_v44 = vpop.f32.mrf.mxu3 }
 0x82a   : > { %v3868_v42 = vpop.xlane.xlu2 %3867 }
 0x82b   : > { %7878 = vrcp.f32 %v3868_v42 }
 0x831   : > { %v7879_v23 = vpop.eup %7878 }
 0x832   : > { %v3904_v29 = vmul.f32 %v7879_v23, %v10737_v25  ;;  %v3353_v46 = vpop.xlane.xlu0 %3352 }
 0x833   : > { %7880 = vrcp.f32 %v3353_v46  ;;  %v10804_v46 = vpop.f32.mrf.mxu3 }
 0x834   : > { %v3920_v55 = vpack.c.bf16 %v3904_v29, %v3904_v29 }
 0x836   : > { %v3497_v19 = vpop.f32.mrf.mxu2  ;;  %v3952_v63 = vunpack.c.l.b16 %v3920_v55 }
 0x838   : > { %v3962_v3 = vpack.c.b16 %v3952_v63, %v3951_v6 }
 0x839   : > { %v7881_v13 = vpop.eup %7880 }
 0x83a   : > { %4030 = vmatmul.bf16.gmra.mxu1 %v3962_v3  ;;  %v3387_v25 = vmul.f32 %v7881_v13, %v10740_v49 }
 0x83c   : > { %v3403_v40 = vpack.c.bf16 %v3387_v25, %v3387_v25 }
 0x83e   : > { %v3499_v43 = vpop.f32.mrf.mxu2  ;;  %v3435_v47 = vunpack.c.l.b16 %v3403_v40 }
 0x83f   : > { %v3529_v53 = vpack.c.bf16 %v3499_v43, %v3497_v19 }
 0x841   : > { %7021 = vmatmul.msk.bf16.gmra.mxu3 %vm2118_vm1, %v3529_v53 }
 0x85d   : > { %v3351_v22 = vpop.xlane.xlu1 %3350 }
 0x85e   : > { %7882 = vrcp.f32 %v3351_v22 }
 0x863   : > { %v3870_v58 = vpop.xlane.xlu2 %3869 }
 0x864   : > { %v7883_v52 = vpop.eup %7882  ;;  %7884 = vrcp.f32 %v3870_v58 }
 0x865   : > { %v3872_v48 = vpop.xlane.xlu1 %3871  ;;  %v3386_v59 = vmul.f32 %v7883_v52, %v10749_v54  ;;  %v4006_v54 = vpop.f32.mrf.mxu1 }
 0x866   : > { %7886 = vrcp.f32 %v3872_v48 }
 0x867   : > { %v3402_v57 = vpack.c.bf16 %v3386_v59, %v3386_v59 }
 0x869   : > { %v3434_v61 = vunpack.c.l.b16 %v3402_v57  ;;  %v10807_v57 = vpop.f32.mrf.mxu3 }
 0x86a   : > { %v7885_v38 = vpop.eup %7884 }
 0x86b   : > { %v3444_v34 = vpack.c.b16 %v3435_v47, %v3434_v61  ;;  %v3905_v41 = vmul.f32 %v7885_v38, %v10755_v7 }
 0x86c   : > { %v7887_v30 = vpop.eup %7886 }
 0x86d   : > { %3516 = vmatmul.bf16.gmra.mxu2 %v3444_v34  ;;  %v3355_v49 = vpop.xlane.xlu0 %3354  ;;  %v3906_v31 = vmul.f32 %v7887_v30, %v10760_v35  ;;  %v3921_v10 = vpack.c.bf16 %v3905_v41, %v3905_v41  ;;  %v4008_v51 = vpop.f32.mrf.mxu1 }
 0x86e   : > { %v3357_v12 = vpop.xlane.xlu2 %3356  ;;  %7888 = vrcp.f32 %v3355_v49  ;;  %v4046_v40 = vpack.c.bf16 %v4008_v51, %v4006_v54 }
 0x86f   : > { %7890 = vrcp.f32 %v3357_v12  ;;  %v3922_v4 = vpack.c.bf16 %v3906_v31, %v3906_v31  ;;  %v3953_v62 = vunpack.c.l.b16 %v3921_v10 }
 0x871   : > { %v3954_v50 = vunpack.c.l.b16 %v3922_v4  ;;  %v10811_v38 = vpop.f32.mrf.mxu3 }
 0x873   : > { %v3963_v28 = vpack.c.b16 %v3954_v50, %v3953_v62 }
 0x874   : > { %v7889_v36 = vpop.eup %7888 }
 0x875   : > { %v7891_v15 = vpop.eup %7890  ;;  %4035 = vmatmul.bf16.gmra.mxu1 %v3963_v28  ;;  %v3388_v7 = vmul.f32 %v7889_v36, %v10763_v60  ;;  %v4011_v63 = vpop.f32.mrf.mxu1 }
 0x876   : > { %v3389_v2 = vmul.f32 %v7891_v15, %v10765_v21 }
 0x877   : > { %v3404_v42 = vpack.c.bf16 %v3388_v7, %v3388_v7 }
 0x878   : > { %v3405_v35 = vpack.c.bf16 %v3389_v2, %v3389_v2 }
 0x879   : > { %v3436_v23 = vunpack.c.l.b16 %v3404_v42  ;;  %v10814_v30 = vpop.f32.mrf.mxu3 }
 0x87a   : > { %v3502_v45 = vpop.f32.mrf.mxu2  ;;  %v3437_v29 = vunpack.c.l.b16 %v3405_v35 }
 0x87b   : > { %v3876_v55 = vpop.xlane.xlu0 %3875 }
 0x87c   : > { %7892 = vrcp.f32 %v3876_v55  ;;  %v3445_v19 = vpack.c.b16 %v3437_v29, %v3436_v23 }
 0x87d   : > { %v4013_v48 = vpop.f32.mrf.mxu1 }
 0x87e   : > { %v3874_v6 = vpop.xlane.xlu1 %3873  ;;  %3521 = vmatmul.bf16.gmra.mxu2 %v3445_v19  ;;  %v4047_v34 = vpack.c.bf16 %v4013_v48, %v4011_v63 }
 0x87f   : > { %7894 = vrcp.f32 %v3874_v6 }
 0x881   : > { %v10817_v12 = vpop.f32.mrf.mxu3 }
 0x882   : > { %v3504_v3 = vpop.f32.mrf.mxu2  ;;  %v7893_v43 = vpop.eup %7892 }
 0x883   : > { %v3530_v60 = vpack.c.bf16 %v3504_v3, %v3502_v45  ;;  %v3908_v21 = vmul.f32 %v7893_v43, %v10775_v39 }
 0x885   : > { %v7895_v53 = vpop.eup %7894  ;;  %7022 = vmatmul.msk.bf16.gmra.mxu3 %vm2118_vm1, %v3530_v60  ;;  %v3924_v13 = vpack.c.bf16 %v3908_v21, %v3908_v21  ;;  %v4016_v47 = vpop.f32.mrf.mxu1 }
 0x886   : > { %v3907_v22 = vmul.f32 %v7895_v53, %v10778_v14 }
 0x887   : > { %v3956_v52 = vunpack.c.l.b16 %v3924_v13 }
 0x888   : > { %v3923_v9 = vpack.c.bf16 %v3907_v22, %v3907_v22 }
 0x889   : > { %v10820_v62 = vpop.f32.mrf.mxu3 }
 0x88a   : > { %v3507_v25 = vpop.f32.mrf.mxu2  ;;  %v3955_v58 = vunpack.c.l.b16 %v3923_v9 }
 0x88c   : > { %v3964_v59 = vpack.c.b16 %v3956_v52, %v3955_v58  ;;  %v3078_v58 = vadd.f32 %v10389_v37, %v10792_v56 }
 0x88d   : > { %v4018_v41 = vpop.f32.mrf.mxu1 }
 0x88e   : > { %4040 = vmatmul.bf16.gmra.mxu1 %v3964_v59  ;;  %7043 = vmatmul.msk.bf16.vlgmr.msrb.gmra.mxu2 %vm2118_vm1, %v4046_v40  ;;  %v4048_v54 = vpack.c.bf16 %v4018_v41, %v4016_v47  ;;  %v10846_v59 = vld [vmem:[%s12664_s12] ss:$0 sm:$0xff]  ;;  %v8092_v41 = vld [vmem:[#allocation2 + $0x30] sm:$0xff] }
 0x891   : > { %v10823_v36 = vpop.f32.mrf.mxu3 }
 0x892   : > { %v3509_v39 = vpop.f32.mrf.mxu2 }
 0x893   : > { %v3531_v61 = vpack.c.bf16 %v3509_v39, %v3507_v25 }
 0x895   : > { %7023 = vmatmul.msk.bf16.gmra.mxu3 %vm2118_vm1, %v3531_v61  ;;  %v4021_v10 = vpop.f32.mrf.mxu1 }
 0x899   : > { %v10825_v7 = vpop.f32.mrf.mxu3 }
 0x89a   : > { %v3512_v14 = vpop.f32.mrf.mxu2 }
 0x89d   : > { %v4023_v4 = vpop.f32.mrf.mxu1 }
 0x89e   : > { %7044 = vmatmul.msk.bf16.gmra.mxu2 %vm2118_vm1, %v4047_v34  ;;  %v4049_v50 = vpack.c.bf16 %v4023_v4, %v4021_v10  ;;  %v3080_v34 = vadd.f32 %v10402_v0, %v10796_v24  ;;  %v3083_v4 = vadd.f32 %v10421_v5, %v10800_v44 }
 0x8a1   : > { %v10828_v35 = vpop.f32.mrf.mxu3 }
 0x8a2   : > { %v3514_v49 = vpop.f32.mrf.mxu2 }
 0x8a3   : > { %v3532_v31 = vpack.c.bf16 %v3514_v49, %v3512_v14 }
 0x8a5   : > { %7024 = vmatmul.msk.bf16.gmra.mxu3 %vm2118_vm1, %v3532_v31  ;;  %v4026_v28 = vpop.f32.mrf.mxu1 }
 0x8a9   : > { %v10830_v23 = vpop.f32.mrf.mxu3 }
 0x8ad   : > { %v4028_v15 = vpop.f32.mrf.mxu1 }
 0x8ae   : > { %7045 = vmatmul.msk.bf16.gmra.mxu2 %vm2118_vm1, %v4048_v54  ;;  %v4050_v2 = vpack.c.bf16 %v4028_v15, %v4026_v28 }
 0x8b1   : > { %v10833_v29 = vpop.f32.mrf.mxu3 }
 0x8b7   : > { %v4031_v42 = vpop.f32.mrf.mxu1 }
 0x8b9   : > { %v10835_v19 = vpop.f32.mrf.mxu3 }
 0x8be   : > { %7046 = vmatmul.msk.bf16.gmra.mxu2 %vm2118_vm1, %v4049_v50  ;;  %v8093_v50 = vld [vmem:[#allocation2] sm:$0xff] }
 0x8bf   : > { %v4033_v51 = vpop.f32.mrf.mxu1 }
 0x8c0   : > { %v4051_v45 = vpack.c.bf16 %v4033_v51, %v4031_v42  ;;  %v3085_v51 = vadd.f32 %v10434_v32, %v10804_v46 }
 0x8c1   : > { %v10837_v60 = vpop.f32.mrf.mxu3 }
 0x8c9   : > { %v3580_v22 = vpop.f32.mrf.mxu3 }
 0x8ca   : > { %v3620_v48 = vadd.f32 %v3580_v22, %v3078_v58  ;;  %v8096_v58 = vld [vmem:[#allocation2 + $0x50] sm:$0xff] }
 0x8ce   : > { %7047 = vmatmul.msk.bf16.gmra.mxu2 %vm2118_vm1, %v4050_v2 }
 0x8d1   : > { %v3582_v52 = vpop.f32.mrf.mxu3 }
 0x8d2   : > { %v3621_v37 = vadd.f32 %v3582_v52, %v3080_v34 }
 0x8d9   : > { %v3585_v56 = vpop.f32.mrf.mxu3 }
 0x8da   : > { %v3622_v15 = vadd.f32 %v3585_v56, %v3083_v4 }
 0x8de   : > { %7048 = vmatmul.msk.bf16.gmra.mxu2 %vm2118_vm1, %v4051_v45  ;;  %v8094_v45 = vld [vmem:[#allocation2 + $0x58] sm:$0xff] }
 0x8e1   : > { %v3587_v2 = vpop.f32.mrf.mxu3 }
 0x8f0   : > { %v3517_v55 = vpop.f32.mrf.mxu2 }
 0x8f2   : > { %v4036_v6 = vpop.f32.mrf.mxu1 }
 0x8f8   : > { %v3519_v63 = vpop.f32.mrf.mxu2 }
 0x8f9   : > { %v3533_v3 = vpack.c.bf16 %v3519_v63, %v3517_v55  ;;  %v3590_v63 = vpop.f32.mrf.mxu3 }
 0x8fa   : > { %v4038_v43 = vpop.f32.mrf.mxu1 }
 0x8fb   : > { %v4052_v21 = vpack.c.bf16 %v4038_v43, %v4036_v6  ;;  %7025 = vmatmul.msk.bf16.gmra.mxu3 %vm2118_vm1, %v3533_v3  ;;  %v3623_v6 = vadd.f32 %v3587_v2, %v3085_v51  ;;  %v3088_v43 = vadd.f32 %v10448_v17, %v10807_v57 }
 0x8fd   : > { %7049 = vmatmul.msk.bf16.gmra.mxu2 %vm2118_vm1, %v4052_v21  ;;  %v8095_v21 = vld [vmem:[#allocation2 + $0x18] sm:$0xff]  ;;  %v3624_v22 = vadd.f32 %v3590_v63, %v3088_v43 }
 0x901   : > { %v3522_v53 = vpop.f32.mrf.mxu2 }
 0x909   : > { %v3524_v13 = vpop.f32.mrf.mxu2 }
 0x90a   : > { %v3534_v9 = vpack.c.bf16 %v3524_v13, %v3522_v53 }
 0x90b   : > { %v4041_v25 = vpop.f32.mrf.mxu1 }
 0x90c   : > { %7026 = vmatmul.msk.bf16.gmra.mxu3 %vm2118_vm1, %v3534_v9  ;;  %v3592_v9 = vpop.f32.mrf.mxu3 }
 0x911   : > { %v4099_v40 = vpop.f32.mrf.mxu2 }
 0x912   : > { %v4139_v39 = vadd.f32 %v4099_v40, %v3620_v48 }
 0x913   : > { %v4043_v61 = vpop.f32.mrf.mxu1 }
 0x914   : > { %v4053_v47 = vpack.c.bf16 %v4043_v61, %v4041_v25  ;;  %v4159_v14 = vadd.f32 %v10846_v59, %v4139_v39  ;;  %v3090_v25 = vadd.f32 %v10453_v1, %v10811_v38  ;;  %v3595_v39 = vpop.f32.mrf.mxu3  ;;  %v3093_v61 = vadd.f32 %v10461_v8, %v10814_v30 }
 0x916   : > { %7050 = vmatmul.msk.bf16.gmra.mxu2 %vm2118_vm1, %v4053_v47  ;;  %v10852_v49 = vadd.f32 %v8092_v41, %v4159_v14  ;;  %v3625_v48 = vadd.f32 %v3592_v9, %v3090_v25  ;;  %v8097_v47 = vld [vmem:[#allocation2 + $0x68] sm:$0xff]  ;;  %v3626_v34 = vadd.f32 %v3595_v39, %v3093_v61  ;;  %v8100_v39 = vld [vmem:[#allocation2 + $0x40] sm:$0xff] }
 0x917   : > { %v8099_v9 = vld [vmem:[#allocation2 + $0x48] sm:$0xff] }
 0x918   : > { %4193 = vadd.xlane.f32.xlu2 %v10852_v49 }
 0x919   : > { %v4101_v31 = vpop.f32.mrf.mxu2 }
 0x91a   : > { %v4140_v10 = vadd.f32 %v4101_v31, %v3621_v37  ;;  %v8098_v37 = vld [vmem:[#allocation2 + $0x8] sm:$0xff]  ;;  %v8694_v31 = vmov 128.0  }
 0x91b   : > { %7896 = vrcp.f32 %v8694_v31 }
 0x91c   : > { %v4160_v54 = vadd.f32 %v10846_v59, %v4140_v10  ;;  %v3597_v30 = vpop.f32.mrf.mxu3 }
 0x91e   : > { %v10858_v28 = vadd.f32 %v8093_v50, %v4160_v54 }
 0x920   : > { %4195 = vadd.xlane.f32.xlu1 %v10858_v28 }
 0x921   : > { %v4104_v0 = vpop.f32.mrf.mxu2  ;;  %v7897_v10 = vpop.eup %7896 }
 0x922   : > { %v4141_v24 = vadd.f32 %v4104_v0, %v3622_v15  ;;  %v4226_v54 = vmul.f32 128.0, %v7897_v10  ;;  %vm4230_vm2 = vweird.f32 %v7897_v10 }
 0x924   : > { %v4161_v42 = vadd.f32 %v10846_v59, %v4141_v24  ;;  %v4227_v8 = vsub.f32 1.0, %v4226_v54  ;;  %v3600_v0 = vpop.f32.mrf.mxu3  ;;  %v8101_v54 = vld [vmem:[#allocation2 + $0x20] sm:$0xff] }
 0x926   : > { %v10864_v55 = vadd.f32 %v8094_v45, %v4161_v42  ;;  %v4228_v4 = vmul.f32 %v7897_v10, %v4227_v8  ;;  %v3095_v42 = vadd.f32 %v10466_v11, %v10817_v12 }
 0x928   : > { %4197 = vadd.xlane.f32.xlu0 %v10864_v55  ;;  %v4229_v15 = vadd.f32 %v7897_v10, %v4228_v4 }
 0x929   : > { %v4106_v5 = vpop.f32.mrf.mxu2 }
 0x92a   : > { %v4142_v44 = vadd.f32 %v4106_v5, %v3623_v6  ;;  %v10889_v24 = vsel %vm4230_vm2, %v7897_v10, %v4229_v15  ;;  %v3627_v6 = vadd.f32 %v3597_v30, %v3095_v42  ;;  %v3105_v30 = vadd.f32 %v10483_v16, %v10828_v35 }
 0x92b   : > { %12665 = vst [vmem:[#allocation61_spill] sm:$0xff] %v10889_v24 }
 0x92c   : > { %v4162_v3 = vadd.f32 %v10846_v59, %v4142_v44 }
 0x92e   : > { %v10870_v53 = vadd.f32 %v8095_v21, %v4162_v3  ;;  %v3602_v3 = vpop.f32.mrf.mxu3  ;;  %v3098_v21 = vadd.f32 %v10470_v20, %v10820_v62  ;;  %v3100_v62 = vadd.f32 %v10474_v18, %v10823_v36  ;;  %v3103_v36 = vadd.f32 %v10477_v26, %v10825_v7 }
 0x930   : > { %4199 = vadd.xlane.f32.xlu2 %v10870_v53  ;;  %v3628_v12 = vadd.f32 %v3600_v0, %v3098_v21  ;;  %v8103_v21 = vld [vmem:[#allocation2 + $0x38] sm:$0xff] }
 0x931   : > { %v4109_v32 = vpop.f32.mrf.mxu2 }
 0x932   : > { %v4143_v46 = vadd.f32 %v4109_v32, %v3624_v22 }
 0x934   : > { %v4163_v13 = vadd.f32 %v10846_v59, %v4143_v46 }
 0x936   : > { %v10876_v52 = vadd.f32 %v8096_v58, %v4163_v13 }
 0x938   : > { %4201 = vadd.xlane.f32.xlu1 %v10876_v52 }
 0x939   : > { %v4111_v17 = vpop.f32.mrf.mxu2 }
 0x93a   : > { %v4144_v57 = vadd.f32 %v4111_v17, %v3625_v48  ;;  %v3605_v48 = vpop.f32.mrf.mxu3  ;;  %v3629_v17 = vadd.f32 %v3602_v3, %v3100_v62  ;;  %v8104_v62 = vld [vmem:[#allocation2 + $0x60] sm:$0xff] }
 0x93c   : > { %v4164_v40 = vadd.f32 %v10846_v59, %v4144_v57 }
 0x93e   : > { %v10882_v14 = vadd.f32 %v8097_v47, %v4164_v40 }
 0x940   : > { %4203 = vadd.xlane.f32.xlu0 %v10882_v14 }
 0x941   : > { %v4114_v1 = vpop.f32.mrf.mxu2 }
 0x942   : > { %v4145_v38 = vadd.f32 %v4114_v1, %v3626_v34 }
 0x944   : > { %v4165_v41 = vadd.f32 %v10846_v59, %v4145_v38  ;;  %v3630_v38 = vadd.f32 %v3605_v48, %v3103_v36  ;;  %v8106_v36 = vld [vmem:[#allocation2 + $0x78] sm:$0xff] }
 0x946   : > { %v10886_v56 = vadd.f32 %v8098_v37, %v4165_v41  ;;  %v3607_v37 = vpop.f32.mrf.mxu3 }
 0x948   : > { %4205 = vadd.xlane.f32.xlu0 %v10886_v56 }
 0x949   : > { %v4116_v50 = vpop.f32.mrf.mxu2 }
 0x94a   : > { %v4146_v44 = vadd.f32 %v4116_v50, %v3627_v6  ;;  %v3631_v50 = vadd.f32 %v3607_v37, %v3105_v30  ;;  %v3108_v6 = vadd.f32 %v10490_v27, %v10830_v23  ;;  %v7381_v30 = vld [vmem:[%s12666_s10 + $0xec] sm:$0xf] }
 0x94c   : > { %v4166_v22 = vadd.f32 %v10846_v59, %v4146_v44 }
 0x94e   : > { %v10908_v25 = vadd.f32 %v8099_v9, %v4166_v22 }
 0x951   : > { %v4119_v45 = vpop.f32.mrf.mxu2 }
 0x952   : > { %v4147_v46 = vadd.f32 %v4119_v45, %v3628_v12 }
 0x954   : > { %v4167_v58 = vadd.f32 %v10846_v59, %v4147_v46 }
 0x956   : > { %v10918_v61 = vadd.f32 %v8100_v39, %v4167_v58 }
 0x97e   : > { %v3610_v0 = vpop.f32.mrf.mxu3 }
 0x986   : > { %v3612_v23 = vpop.f32.mrf.mxu3 }
 0x98b   : > { %v4194_v2 = vpop.xlane.xlu2 %4193 }
 0x98c   : > { %v4232_v51 = vmul.f32 %v10889_v24, %v4194_v2 }
 0x98e   : > { %v10895_v5 = vsub.f32 %v10852_v49, %v4232_v51  ;;  %v4121_v49 = vpop.f32.mrf.mxu2  ;;  %v8102_v51 = vld [vmem:[#allocation2 + $0x10] sm:$0xff] }
 0x98f   : > { %v4148_v40 = vadd.f32 %v4121_v49, %v3629_v17 }
 0x990   : > { %v4264_v63 = vmul.f32 %v10895_v5, %v10895_v5 }
 0x991   : > { %v4168_v1 = vadd.f32 %v10846_v59, %v4148_v40 }
 0x992   : > { %4280 = vadd.xlane.f32.xlu2 %v4264_v63 }
 0x993   : > { %v4196_v43 = vpop.xlane.xlu1 %4195  ;;  %v10932_v8 = vadd.f32 %v8101_v54, %v4168_v1  ;;  %v7383_v54 = vld [vmem:[%s12666_s10 + $0xf4] sm:$0xf0] }
 0x994   : > { %v4233_v11 = vmul.f32 %v10889_v24, %v4196_v43 }
 0x996   : > { %v10904_v32 = vsub.f32 %v10858_v28, %v4233_v11  ;;  %v4124_v34 = vpop.f32.mrf.mxu2  ;;  %v3110_v11 = vadd.f32 %v10498_v33, %v10833_v29  ;;  %v3615_v29 = vpop.f32.mrf.mxu3 }
 0x997   : > { %v4149_v31 = vadd.f32 %v4124_v34, %v3630_v38  ;;  %v7380_v38 = vld [vmem:[%s12666_s10 + $0xe4] sm:$0xf] }
 0x998   : > { %v4265_v13 = vmul.f32 %v10904_v32, %v10904_v32  ;;  %v3633_v46 = vadd.f32 %v3612_v23, %v3110_v11  ;;  %v7372_v23 = vld [vmem:[%s12666_s10 + $0xa4] sm:$0xf] }
 0x999   : > { %v4169_v4 = vadd.f32 %v10846_v59, %v4149_v31  ;;  %v7167_v31 = vld [vmem:[%s12666_s10 + $0xf0] sm:$0xf0] }
 0x99a   : > { %4282 = vadd.xlane.f32.xlu1 %v4265_v13  ;;  %4207 = vadd.xlane.f32.xlu2 %v10908_v25 }
 0x99b   : > { %v4198_v20 = vpop.xlane.xlu0 %4197  ;;  %v10944_v45 = vadd.f32 %v8102_v51, %v4169_v4  ;;  %v7175_v4 = vld [vmem:[%s12666_s10 + $0xf8] sm:$0xf0]  ;;  %v7151_v51 = vld [vmem:[%s12666_s10 + $0xd0] sm:$0xf0] }
 0x99c   : > { %v4234_v28 = vmul.f32 %v10889_v24, %v4198_v20 }
 0x99e   : > { %v10916_v57 = vsub.f32 %v10864_v55, %v4234_v28  ;;  %v4126_v26 = vpop.f32.mrf.mxu2  ;;  %v12667_v28 = vld [vmem:[#allocation59_spill] sm:$0xff] }
 0x99f   : > { %v4150_v2 = vadd.f32 %v4126_v26, %v3631_v50  ;;  %v3113_v48 = vadd.f32 %v12667_v28, %v10835_v19  ;;  %v7165_v19 = vld [vmem:[%s12666_s10 + $0xe0] sm:$0xf]  ;;  %v7170_v26 = vor.u32 %v7380_v38, %v7167_v31  ;;  %v7370_v28 = vld [vmem:[%s12666_s10 + $0x8c] sm:$0xf0]  ;;  %v7364_v31 = vld [vmem:[%s12666_s10 + $0x64] sm:$0xf] }
 0x9a0   : > { %v4266_v47 = vmul.f32 %v10916_v57, %v10916_v57  ;;  %v7149_v50 = vld [vmem:[%s12666_s10 + $0xc0] sm:$0xf] }
 0x9a1   : > { %v4170_v44 = vadd.f32 %v10846_v59, %v4150_v2  ;;  %v3634_v40 = vadd.f32 %v3615_v29, %v3113_v48  ;;  %4817 = vmatpush.bf16.msrb.mxu0 %v7170_v26  ;;  %v7376_v2 = vld [vmem:[%s12666_s10 + $0xc4] sm:$0xf]  ;;  %v7117_v29 = vld [vmem:[%s12666_s10 + $0x80] sm:$0xf]  ;;  %v7109_v26 = vld [vmem:[%s12666_s10 + $0x68] sm:$0xf] }
 0x9a2   : > { %4209 = vadd.xlane.f32.xlu2 %v10918_v61  ;;  %4284 = vadd.xlane.f32.xlu1 %v4266_v47  ;;  %v8105_v47 = vld [vmem:[#allocation2 + $0x70] sm:$0xff]  ;;  %v7368_v48 = vld [vmem:[%s12666_s10 + $0x84] sm:$0xf]  ;;  %v7101_v38 = vld [vmem:[%s12666_s10 + $0x60] sm:$0xf] }
 0x9a3   : > { %v4200_v18 = vpop.xlane.xlu2 %4199  ;;  %v10954_v22 = vadd.f32 %v8103_v21, %v4170_v44  ;;  %v7133_v21 = vld [vmem:[%s12666_s10 + $0xa0] sm:$0xf] }
 0x9a4   : > { %v4235_v55 = vmul.f32 %v10889_v24, %v4200_v18 }
 0x9a6   : > { %v10928_v41 = vsub.f32 %v10870_v53, %v4235_v55  ;;  %v4129_v16 = vpop.f32.mrf.mxu2  ;;  %v7382_v55 = vld [vmem:[%s12666_s10 + $0xec] sm:$0xf0] }
 0x9a7   : > { %v7166_v37 = vor.u32 %v7382_v55, %v7165_v19  ;;  %v7127_v19 = vld [vmem:[%s12666_s10 + $0x98] sm:$0xf0] }
 0x9a8   : > { %v4267_v10 = vmul.f32 %v10928_v41, %v10928_v41 }
 0x9a9   : > { %4768 = vmatpush.bf16.msra.mxu3 %v7166_v37  ;;  %v7366_v37 = vld [vmem:[%s12666_s10 + $0x6c] sm:$0xf0] }
 0x9aa   : > { %4286 = vadd.xlane.f32.xlu0 %v4267_v10  ;;  %4211 = vadd.xlane.f32.xlu1 %v10932_v8  ;;  %v7173_v10 = vld [vmem:[%s12666_s10 + $0xe8] sm:$0xf] }
 0x9ab   : > { %v4202_v7 = vpop.xlane.xlu1 %4201 }
 0x9ac   : > { %v4236_v53 = vmul.f32 %v10889_v24, %v4202_v7  ;;  %v7174_v7 = vor.u32 %v7383_v54, %v7173_v10  ;;  %v7102_v10 = vor.u32 %v7366_v37, %v7101_v38  ;;  %v7103_v54 = vld [vmem:[%s12666_s10 + $0x70] sm:$0xf0]  ;;  %v7355_v38 = vld [vmem:[%s12666_s10 + $0x14] sm:$0xf0]  ;;  %v7353_v37 = vld [vmem:[%s12666_s10 + $0xc] sm:$0xf] }
 0x9ae   : > { %v10940_v15 = vsub.f32 %v10876_v52, %v4236_v53  ;;  %v3632_v52 = vadd.f32 %v3610_v0, %v3108_v6  ;;  %v4131_v13 = vpop.f32.mrf.mxu2  ;;  %v7178_v53 = vor.u32 %v7381_v30, %v7175_v4  ;;  %4866 = vmatpush.bf16.msrb.mxu1 %v7174_v7  ;;  %v7378_v0 = vld [vmem:[%s12666_s10 + $0xcc] sm:$0xf0]  ;;  %v7157_v6 = vld [vmem:[%s12666_s10 + $0xc8] sm:$0xf]  ;;  %v7367_v7 = vld [vmem:[%s12666_s10 + $0x74] sm:$0xf0]  ;;  %v7106_v30 = vor.u32 %v7364_v31, %v7103_v54 }
 0x9af   : > { %v4152_v20 = vadd.f32 %v4131_v13, %v3633_v46  ;;  %v7375_v46 = vld [vmem:[%s12666_s10 + $0xb4] sm:$0xf0]  ;;  %v7110_v4 = vor.u32 %v7367_v7, %v7109_v26  ;;  %v7063_v31 = vld [vmem:[%s12666_s10 + $0x18] sm:$0xf0] }
 0x9b0   : > { %v4268_v42 = vmul.f32 %v10940_v15, %v10940_v15  ;;  %v4151_v43 = vadd.f32 %v4129_v16, %v3632_v52  ;;  %4915 = vmatpush.bf16.msra.mxu2 %v7178_v53  ;;  %v7379_v16 = vld [vmem:[%s12666_s10 + $0xd4] sm:$0xf0]  ;;  %v7377_v52 = vld [vmem:[%s12666_s10 + $0xcc] sm:$0xf]  ;;  %v7066_v54 = vor.u32 %v7353_v37, %v7063_v31 }
 0x9b1   : > { %v7158_v44 = vor.u32 %v7379_v16, %v7157_v6  ;;  %v7365_v53 = vld [vmem:[%s12666_s10 + $0x6c] sm:$0xf]  ;;  %v7087_v16 = vld [vmem:[%s12666_s10 + $0x50] sm:$0xf0] }
 0x9b2   : > { %4288 = vadd.xlane.f32.xlu0 %v4268_v42  ;;  %4213 = vadd.xlane.f32.xlu1 %v10944_v45  ;;  %v4171_v49 = vadd.f32 %v10846_v59, %v4151_v43  ;;  %v7150_v42 = vor.u32 %v7378_v0, %v7149_v50  ;;  %v7111_v50 = vld [vmem:[%s12666_s10 + $0x78] sm:$0xf0] }
 0x9b3   : > { %v4204_v35 = vpop.xlane.xlu0 %4203  ;;  %4867 = vmatpush.bf16.msrb.mxu1 %v7158_v44  ;;  %v7114_v0 = vor.u32 %v7365_v53, %v7111_v50  ;;  %v7363_v44 = vld [vmem:[%s12666_s10 + $0x54] sm:$0xf0] }
 0x9b4   : > { %v4237_v63 = vmul.f32 %v10889_v24, %v4204_v35  ;;  %v10966_v58 = vadd.f32 %v8104_v62, %v4171_v49  ;;  %v7154_v35 = vor.u32 %v7376_v2, %v7151_v51  ;;  %4769 = vmatpush.bf16.msra.mxu3 %v7150_v42  ;;  %v7141_v49 = vld [vmem:[%s12666_s10 + $0xa8] sm:$0xf]  ;;  %v7143_v62 = vld [vmem:[%s12666_s10 + $0xb8] sm:$0xf0]  ;;  %v7085_v2 = vld [vmem:[%s12666_s10 + $0x40] sm:$0xf] }
 0x9b5   : > { %v7142_v13 = vor.u32 %v7375_v46, %v7141_v49  ;;  %v7362_v42 = vld [vmem:[%s12666_s10 + $0x4c] sm:$0xf0]  ;;  %v7360_v51 = vld [vmem:[%s12666_s10 + $0x44] sm:$0xf]  ;;  %v7071_v46 = vld [vmem:[%s12666_s10 + $0x30] sm:$0xf0] }
 0x9b6   : > { %v10952_v3 = vsub.f32 %v10882_v14, %v4237_v63  ;;  %v4134_v17 = vpop.f32.mrf.mxu2  ;;  %v7159_v63 = vld [vmem:[%s12666_s10 + $0xd8] sm:$0xf0]  ;;  %4818 = vmatpush.bf16.msrb.mxu0 %v7154_v35  ;;  %v7086_v6 = vor.u32 %v7362_v42, %v7085_v2  ;;  %v7093_v35 = vld [vmem:[%s12666_s10 + $0x48] sm:$0xf] }
 0x9b7   : > { %v4153_v39 = vadd.f32 %v4134_v17, %v3634_v40  ;;  %v7162_v43 = vor.u32 %v7377_v52, %v7159_v63  ;;  %4868 = vmatpush.bf16.msrb.mxu1 %v7142_v13  ;;  %v7119_v17 = vld [vmem:[%s12666_s10 + $0x90] sm:$0xf0]  ;;  %v7125_v40 = vld [vmem:[%s12666_s10 + $0x88] sm:$0xf]  ;;  %v7090_v52 = vor.u32 %v7360_v51, %v7087_v16  ;;  %v7094_v63 = vor.u32 %v7363_v44, %v7093_v35  ;;  %v7359_v13 = vld [vmem:[%s12666_s10 + $0x34] sm:$0xf0] }
 0x9b8   : > { %v4269_v27 = vmul.f32 %v10952_v3, %v10952_v3 }
 0x9b9   : > { %v4173_v18 = vadd.f32 %v10846_v59, %v4153_v39  ;;  %4916 = vmatpush.bf16.msra.mxu2 %v7162_v43  ;;  %v7371_v39 = vld [vmem:[%s12666_s10 + $0x94] sm:$0xf0]  ;;  %v7361_v43 = vld [vmem:[%s12666_s10 + $0x4c] sm:$0xf] }
 0x9ba   : > { %4215 = vadd.xlane.f32.xlu0 %v10954_v22  ;;  %4290 = vadd.xlane.f32.xlu2 %v4269_v27  ;;  %v7374_v27 = vld [vmem:[%s12666_s10 + $0xac] sm:$0xf0] }
 0x9bb   : > { %v4206_v12 = vpop.xlane.xlu0 %4205  ;;  %v10978_v1 = vadd.f32 %v8106_v36, %v4173_v18  ;;  %v7134_v11 = vor.u32 %v7374_v27, %v7133_v21  ;;  %v7126_v18 = vor.u32 %v7371_v39, %v7125_v40  ;;  %v7369_v36 = vld [vmem:[%s12666_s10 + $0x8c] sm:$0xf]  ;;  %v7095_v21 = vld [vmem:[%s12666_s10 + $0x58] sm:$0xf0]  ;;  %v7354_v40 = vld [vmem:[%s12666_s10 + $0xc] sm:$0xf0] }
 0x9bc   : > { %v4238_v14 = vmul.f32 %v10889_v24, %v4206_v12  ;;  %v7135_v12 = vld [vmem:[%s12666_s10 + $0xb0] sm:$0xf0]  ;;  %v7130_v55 = vor.u32 %v7369_v36, %v7127_v19  ;;  %v7098_v27 = vor.u32 %v7361_v43, %v7095_v21  ;;  %v7352_v39 = vld [vmem:[%s12666_s10 + $0x4] sm:$0xf]  ;;  %v7061_v19 = vld [vmem:[%s12666_s10 + $0x8] sm:$0xf] }
 0x9bd   : > { %4770 = vmatpush.bf16.msra.mxu3 %v7134_v11  ;;  %4869 = vmatpush.bf16.msrb.mxu1 %v7126_v18  ;;  %v7358_v11 = vld [vmem:[%s12666_s10 + $0x2c] sm:$0xf0]  ;;  %v7055_v36 = vld [vmem:[%s12666_s10 + $0x10] sm:$0xf0] }
 0x9be   : > { %v10964_v9 = vsub.f32 %v10886_v56, %v4238_v14  ;;  %v4172_v56 = vadd.f32 %v10846_v59, %v4152_v20  ;;  %v7138_v14 = vor.u32 %v7372_v23, %v7135_v12  ;;  %v7373_v20 = vld [vmem:[%s12666_s10 + $0xac] sm:$0xf]  ;;  %v7069_v23 = vld [vmem:[%s12666_s10 + $0x20] sm:$0xf]  ;;  %v7356_v12 = vld [vmem:[%s12666_s10 + $0x24] sm:$0xf] }
 0x9bf   : > { %v7070_v49 = vor.u32 %v7358_v11, %v7069_v23 }
 0x9c0   : > { %v4270_v33 = vmul.f32 %v10964_v9, %v10964_v9  ;;  %v10974_v34 = vadd.f32 %v8105_v47, %v4172_v56  ;;  %4819 = vmatpush.bf16.msrb.mxu0 %v7138_v14  ;;  %v7118_v56 = vor.u32 %v7370_v28, %v7117_v29  ;;  %v7122_v47 = vor.u32 %v7368_v48, %v7119_v17  ;;  %v7077_v14 = vld [vmem:[%s12666_s10 + $0x28] sm:$0xf]  ;;  %v7357_v29 = vld [vmem:[%s12666_s10 + $0x2c] sm:$0xf]  ;;  %v7079_v28 = vld [vmem:[%s12666_s10 + $0x38] sm:$0xf0] }
 0x9c1   : > { %4870 = vmatpush.bf16.msrb.mxu1 %v7110_v4  ;;  %v7053_v17 = vld [vmem:[%s12666_s10] sm:$0xf] }
 0x9c2   : > { %4217 = vadd.xlane.f32.xlu0 %v10966_v58  ;;  %4292 = vadd.xlane.f32.xlu2 %v4270_v33  ;;  %v7146_v33 = vor.u32 %v7373_v20, %v7143_v62  ;;  %v7074_v62 = vor.u32 %v7356_v12, %v7071_v46  ;;  %v7054_v18 = vor.u32 %v7354_v40, %v7053_v17 }
 0x9c3   : > { %4771 = vmatpush.bf16.msra.mxu3 %v7118_v56  ;;  %v7082_v56 = vor.u32 %v7357_v29, %v7079_v28 }
 0x9c4   : > { %4917 = vmatpush.bf16.msra.mxu2 %v7146_v33  ;;  %4820 = vmatpush.bf16.msrb.mxu0 %v7122_v47  ;;  %v7078_v33 = vor.u32 %v7359_v13, %v7077_v14 }
 0x9c5   : > { %4871 = vmatpush.bf16.msrb.mxu1 %v7094_v63 }
 0x9c7   : > { %4772 = vmatpush.bf16.msra.mxu3 %v7102_v10  ;;  %v7062_v10 = vor.u32 %v7355_v38, %v7061_v19 }
 0x9c8   : > { %4918 = vmatpush.bf16.msra.mxu2 %v7130_v55  ;;  %4821 = vmatpush.bf16.msrb.mxu0 %v7106_v30  ;;  %v7058_v55 = vor.u32 %v7352_v39, %v7055_v36  ;;  %v11067_v39 = vld [vmem:[%s12669_s20] ss:$0 sm:$0xff] }
 0x9c9   : > { %4872 = vmatpush.bf16.msrb.mxu1 %v7078_v33 }
 0x9ca   : > { %4219 = vadd.xlane.f32.xlu2 %v10974_v34 }
 0x9cb   : > { %4773 = vmatpush.bf16.msra.mxu3 %v7086_v6  ;;  %v3617_v6 = vpop.f32.mrf.mxu3 }
 0x9cc   : > { %4919 = vmatpush.bf16.msra.mxu2 %v7114_v0  ;;  %4822 = vmatpush.bf16.msrb.mxu0 %v7090_v52  ;;  %v12668_v52 = vld [vmem:[#allocation60_spill] sm:$0xff] }
 0x9cd   : > { %4873 = vmatpush.bf16.msrb.mxu1 %v7062_v10  ;;  %v3115_v63 = vadd.f32 %v12668_v52, %v10837_v60 }
 0x9cf   : > { %4774 = vmatpush.bf16.msra.mxu3 %v7070_v49  ;;  %v3635_v11 = vadd.f32 %v3617_v6, %v3115_v63 }
 0x9d0   : > { %4920 = vmatpush.bf16.msra.mxu2 %v7098_v27  ;;  %4823 = vmatpush.bf16.msrb.mxu0 %v7074_v62 }
 0x9d2   : > { %4221 = vadd.xlane.f32.xlu2 %v10978_v1 }
 0x9d3   : > { %4775 = vmatpush.bf16.msra.mxu3 %v7054_v18 }
 0x9d4   : > { %4921 = vmatpush.bf16.msra.mxu2 %v7082_v56  ;;  %4824 = vmatpush.bf16.msrb.mxu0 %v7058_v55  ;;  %v8107_v55 = vld [vmem:[#allocation2 + $0x28] sm:$0xff] }
 0x9d8   : > { %4922 = vmatpush.bf16.msra.mxu2 %v7066_v54  ;;  %v11079_v54 = vld [vmem:[%s12670_s7] ss:$0 sm:$0xff] }
 0xa05   : > { %v4281_v20 = vpop.xlane.xlu2 %4280 }
 0xa06   : > { %v4312_v48 = vmul.f32 %v4281_v20, %v10889_v24 }
 0xa08   : > { %v4328_v47 = vadd.f32 1e-12, %v4312_v48 }
 0xa0a   : > { %7898 = vrsqrt.f32 %v4328_v47  ;;  %vm4350_vm4 = vweird.f32 %v4328_v47 }
 0xa0d   : > { %v4283_v26 = vpop.xlane.xlu1 %4282  ;;  %v4208_v7 = vpop.xlane.xlu2 %4207 }
 0xa0e   : > { %v4313_v30 = vmul.f32 %v4283_v26, %v10889_v24  ;;  %v4239_v4 = vmul.f32 %v10889_v24, %v4208_v7 }
 0xa10   : > { %v7899_v53 = vpop.eup %7898  ;;  %v4329_v50 = vadd.f32 1e-12, %v4313_v30  ;;  %v11049_v0 = vsub.f32 %v10908_v25, %v4239_v4  ;;  %v4136_v25 = vpop.f32.mrf.mxu2 }
 0xa11   : > { %v4345_v2 = vmul.f32 %v7899_v53, %v4328_v47  ;;  %vm4351_vm3 = vweird.f32 %v7899_v53  ;;  %v4154_v13 = vadd.f32 %v4136_v25, %v3635_v11 }
 0xa12   : > { %7900 = vrsqrt.f32 %v4329_v50  ;;  %v4271_v42 = vmul.f32 %v11049_v0, %v11049_v0  ;;  %vm4352_vm5 = vmor %vm4350_vm4, %vm4351_vm3  ;;  %vm4360_vm7 = vweird.f32 %v4329_v50 }
 0xa13   : > { %v4346_v51 = vmul.f32 %v7899_v53, %v4345_v2 }
 0xa14   : > { %4294 = vadd.xlane.f32.xlu1 %v4271_v42 }
 0xa15   : > { %v4347_v16 = vmul.f32 0.5, %v4346_v51  ;;  %v4210_v35 = vpop.xlane.xlu2 %4209  ;;  %v4285_v44 = vpop.xlane.xlu1 %4284 }
 0xa16   : > { %v4240_v43 = vmul.f32 %v10889_v24, %v4210_v35  ;;  %v4314_v21 = vmul.f32 %v4285_v44, %v10889_v24 }
 0xa17   : > { %v4348_v27 = vsub.f32 1.5, %v4347_v16 }
 0xa18   : > { %v7901_v23 = vpop.eup %7900  ;;  %v11058_v12 = vsub.f32 %v10918_v61, %v4240_v43  ;;  %v4330_v49 = vadd.f32 1e-12, %v4314_v21  ;;  %v4174_v61 = vadd.f32 %v10846_v59, %v4154_v13 }
 0xa19   : > { %v4349_v46 = vmul.f32 %v7899_v53, %v4348_v27  ;;  %v4355_v14 = vmul.f32 %v7901_v23, %v4329_v50  ;;  %vm4361_vm6 = vweird.f32 %v7901_v23 }
 0xa1a   : > { %7902 = vrsqrt.f32 %v4330_v49  ;;  %v4272_v60 = vmul.f32 %v11058_v12, %v11058_v12  ;;  %vm4362_vm8 = vmor %vm4360_vm7, %vm4361_vm6  ;;  %v11073_v38 = vadd.f32 %v8107_v55, %v4174_v61  ;;  %vm4370_vm10 = vweird.f32 %v4330_v49 }
 0xa1b   : > { %v4356_v20 = vmul.f32 %v7901_v23, %v4355_v14  ;;  %v4353_v62 = vsel %vm4352_vm5, %v7899_v53, %v4349_v46 }
 0xa1c   : > { %4296 = vadd.xlane.f32.xlu1 %v4272_v60  ;;  %v4504_v47 = vmul.f32 %v4353_v62, %v10895_v5 }
 0xa1d   : > { %v4357_v33 = vmul.f32 0.5, %v4356_v20  ;;  %v4212_v29 = vpop.xlane.xlu1 %4211  ;;  %v4287_v28 = vpop.xlane.xlu0 %4286 }
 0xa1e   : > { %v4241_v48 = vmul.f32 %v10889_v24, %v4212_v29  ;;  %v4315_v56 = vmul.f32 %v4287_v28, %v10889_v24  ;;  %v4523_v5 = vmul.f32 %v11067_v39, %v4504_v47 }
 0xa1f   : > { %v4358_v17 = vsub.f32 1.5, %v4357_v33 }
 0xa20   : > { %v7903_v40 = vpop.eup %7902  ;;  %v11071_v18 = vsub.f32 %v10932_v8, %v4241_v48  ;;  %v4331_v36 = vadd.f32 1e-12, %v4315_v56  ;;  %v11088_v51 = vadd.f32 %v11079_v54, %v4523_v5 }
 0xa21   : > { %v4359_v19 = vmul.f32 %v7901_v23, %v4358_v17  ;;  %v4365_v59 = vmul.f32 %v7903_v40, %v4330_v49  ;;  %vm4371_vm9 = vweird.f32 %v7903_v40 }
 0xa22   : > { %7904 = vrsqrt.f32 %v4331_v36  ;;  %v4273_v37 = vmul.f32 %v11071_v18, %v11071_v18  ;;  %12671 = vst [vmem:[#allocation59_spill] sm:$0xff] %v11088_v51  ;;  %vm4372_vm11 = vmor %vm4370_vm10, %vm4371_vm9  ;;  %vm4380_vm13 = vweird.f32 %v4331_v36 }
 0xa23   : > { %v4363_v31 = vsel %vm4362_vm8, %v7901_v23, %v4359_v19  ;;  %v4366_v10 = vmul.f32 %v7903_v40, %v4365_v59 }
 0xa24   : > { %v4505_v8 = vmul.f32 %v4363_v31, %v10904_v32  ;;  %4223 = vadd.xlane.f32.xlu1 %v11073_v38  ;;  %4298 = vadd.xlane.f32.xlu0 %v4273_v37 }
 0xa25   : > { %v4367_v26 = vmul.f32 0.5, %v4366_v10  ;;  %v4214_v7 = vpop.xlane.xlu1 %4213  ;;  %v4289_v30 = vpop.xlane.xlu0 %4288 }
 0xa26   : > { %v4524_v4 = vmul.f32 %v11067_v39, %v4505_v8  ;;  %v4242_v53 = vmul.f32 %v10889_v24, %v4214_v7  ;;  %v4316_v50 = vmul.f32 %v4289_v30, %v10889_v24 }
 0xa27   : > { %v4368_v2 = vsub.f32 1.5, %v4367_v26 }
 0xa28   : > { %v7905_v42 = vpop.eup %7904  ;;  %v11091_v6 = vadd.f32 %v11079_v54, %v4524_v4  ;;  %v11094_v32 = vsub.f32 %v10944_v45, %v4242_v53  ;;  %v4332_v16 = vadd.f32 1e-12, %v4316_v50 }
 0xa29   : > { %v4369_v35 = vmul.f32 %v7903_v40, %v4368_v2  ;;  %v4375_v44 = vmul.f32 %v7905_v42, %v4331_v36  ;;  %vm4381_vm12 = vweird.f32 %v7905_v42 }
 0xa2a   : > { %12672 = vst [vmem:[#allocation60_spill] sm:$0xff] %v11091_v6  ;;  %7906 = vrsqrt.f32 %v4332_v16  ;;  %v4558_v52 = vpack.c.bf16 %v11091_v6, %v11088_v51  ;;  %v4274_v63 = vmul.f32 %v11094_v32, %v11094_v32  ;;  %vm4382_vm14 = vmor %vm4380_vm13, %vm4381_vm12  ;;  %vm4390_vm0 = vweird.f32 %v4332_v16  ;;  %v7403_v6 = vld [vmem:[%s12681_s26 + $0x98] sm:$0xff] }
 0xa2b   : > { %v4376_v43 = vmul.f32 %v7905_v42, %v4375_v44  ;;  %v4373_v21 = vsel %vm4372_vm11, %v7903_v40, %v4369_v35 }
 0xa2c   : > { %4776 = vmatmul.bf16.vlgmr.msra.gmra.mxu3 %v4558_v52  ;;  %4825 = vmatmul.bf16.vlgmr.msrb.gmra.mxu0 %v4558_v52  ;;  %v4506_v49 = vmul.f32 %v4373_v21, %v10916_v57 }
 0xa2d   : > { %v4377_v25 = vmul.f32 0.5, %v4376_v43  ;;  %4874 = vmatmul.bf16.vlgmr.msrb.gmra.mxu1 %v4558_v52  ;;  %4923 = vmatmul.bf16.vlgmr.msra.gmra.mxu2 %v4558_v52  ;;  %v4291_v45 = vpop.xlane.xlu2 %4290  ;;  %v4216_v27 = vpop.xlane.xlu0 %4215 }
 0xa2e   : > { %4300 = vadd.xlane.f32.xlu0 %v4274_v63  ;;  %v4317_v23 = vmul.f32 %v4291_v45, %v10889_v24  ;;  %v4243_v11 = vmul.f32 %v10889_v24, %v4216_v27  ;;  %v4525_v48 = vmul.f32 %v11067_v39, %v4506_v49 }
 0xa2f   : > { %v4378_v46 = vsub.f32 1.5, %v4377_v25 }
 0xa30   : > { %v7907_v14 = vpop.eup %7906  ;;  %v4333_v13 = vadd.f32 1e-12, %v4317_v23  ;;  %v11104_v60 = vsub.f32 %v10954_v22, %v4243_v11  ;;  %v11116_v59 = vadd.f32 %v11079_v54, %v4525_v48 }
 0xa31   : > { %v4379_v20 = vmul.f32 %v7905_v42, %v4378_v46  ;;  %v4385_v62 = vmul.f32 %v7907_v14, %v4332_v16  ;;  %vm4391_vm15 = vweird.f32 %v7907_v14 }
 0xa32   : > { %7908 = vrsqrt.f32 %v4333_v13  ;;  %v4275_v33 = vmul.f32 %v11104_v60, %v11104_v60  ;;  %12673 = vst [vmem:[#allocation62_spill] sm:$0xff] %v11116_v59  ;;  %vm4392_vm1 = vmor %vm4390_vm0, %vm4391_vm15  ;;  %vm4400_vm3 = vweird.f32 %v4333_v13 }
 0xa33   : > { %v4383_v29 = vsel %vm4382_vm14, %v7905_v42, %v4379_v20  ;;  %v4386_v28 = vmul.f32 %v7907_v14, %v4385_v62 }
 0xa34   : > { %v4507_v61 = vmul.f32 %v4383_v29, %v10928_v41  ;;  %4302 = vadd.xlane.f32.xlu2 %v4275_v33 }
 0xa35   : > { %v4387_v57 = vmul.f32 0.5, %v4386_v28  ;;  %v4293_v56 = vpop.xlane.xlu2 %4292  ;;  %v4218_v17 = vpop.xlane.xlu0 %4217 }
 0xa36   : > { %v4244_v22 = vmul.f32 %v10889_v24, %v4218_v17  ;;  %v4526_v40 = vmul.f32 %v11067_v39, %v4507_v61 }
 0xa37   : > { %v4388_v47 = vsub.f32 1.5, %v4387_v57 }
 0xa38   : > { %v7909_v36 = vpop.eup %7908  ;;  %v11113_v19 = vsub.f32 %v10966_v58, %v4244_v22  ;;  %v11119_v41 = vadd.f32 %v11079_v54, %v4526_v40 }
 0xa39   : > { %v4389_v55 = vmul.f32 %v7907_v14, %v4388_v47  ;;  %v4395_v37 = vmul.f32 %v7909_v36, %v4333_v13  ;;  %vm4401_vm2 = vweird.f32 %v7909_v36 }
 0xa3a   : > { %12674 = vst [vmem:[#allocation63_spill] sm:$0xff] %v11119_v41  ;;  %v4559_v31 = vpack.c.bf16 %v11119_v41, %v11116_v59  ;;  %v4276_v10 = vmul.f32 %v11113_v19, %v11113_v19  ;;  %vm4402_vm4 = vmor %vm4400_vm3, %vm4401_vm2 }
 0xa3b   : > { %v4396_v5 = vmul.f32 %v7909_v36, %v4395_v37  ;;  %v4393_v58 = vsel %vm4392_vm1, %v7907_v14, %v4389_v55 }
 0xa3c   : > { %4781 = vmatmul.bf16.gmra.mxu3 %v4559_v31  ;;  %4830 = vmatmul.bf16.gmra.mxu0 %v4559_v31  ;;  %v4508_v4 = vmul.f32 %v4393_v58, %v10940_v15 }
 0xa3d   : > { %v4397_v8 = vmul.f32 0.5, %v4396_v5  ;;  %4879 = vmatmul.bf16.gmra.mxu1 %v4559_v31  ;;  %4928 = vmatmul.bf16.gmra.mxu2 %v4559_v31  ;;  %v4220_v26 = vpop.xlane.xlu2 %4219 }
 0xa3e   : > { %4304 = vadd.xlane.f32.xlu1 %v4276_v10  ;;  %v4245_v7 = vmul.f32 %v10889_v24, %v4220_v26  ;;  %v4527_v35 = vmul.f32 %v11067_v39, %v4508_v4 }
 0xa3f   : > { %v4398_v30 = vsub.f32 1.5, %v4397_v8 }
 0xa40   : > { %v11128_v53 = vsub.f32 %v10974_v34, %v4245_v7  ;;  %v11140_v63 = vadd.f32 %v11079_v54, %v4527_v35 }
 0xa41   : > { %v4399_v50 = vmul.f32 %v7909_v36, %v4398_v30 }
 0xa42   : > { %v4277_v2 = vmul.f32 %v11128_v53, %v11128_v53  ;;  %12675 = vst [vmem:[#allocation64_spill] sm:$0xff] %v11140_v63 }
 0xa43   : > { %v4403_v42 = vsel %vm4402_vm4, %v7909_v36, %v4399_v50 }
 0xa44   : > { %v4509_v16 = vmul.f32 %v4403_v42, %v10952_v3  ;;  %4306 = vadd.xlane.f32.xlu0 %v4277_v2 }
 0xa45   : > { %v4222_v44 = vpop.xlane.xlu2 %4221 }
 0xa46   : > { %v4246_v52 = vmul.f32 %v10889_v24, %v4222_v44  ;;  %v4528_v15 = vmul.f32 %v11067_v39, %v4509_v16 }
 0xa48   : > { %v11137_v34 = vsub.f32 %v10978_v1, %v4246_v52  ;;  %v11143_v43 = vadd.f32 %v11079_v54, %v4528_v15  ;;  %v4318_v1 = vmul.f32 %v4293_v56, %v10889_v24 }
 0xa4a   : > { %12676 = vst [vmem:[#allocation65_spill] sm:$0xff] %v11143_v43  ;;  %v4560_v3 = vpack.c.bf16 %v11143_v43, %v11140_v63  ;;  %v4278_v21 = vmul.f32 %v11137_v34, %v11137_v34  ;;  %v4334_v25 = vadd.f32 1e-12, %v4318_v1 }
 0xa4c   : > { %4786 = vmatmul.bf16.gmra.mxu3 %v4560_v3  ;;  %4835 = vmatmul.bf16.gmra.mxu0 %v4560_v3  ;;  %7910 = vrsqrt.f32 %v4334_v25  ;;  %vm4410_vm6 = vweird.f32 %v4334_v25 }
 0xa4d   : > { %4884 = vmatmul.bf16.gmra.mxu1 %v4560_v3  ;;  %4933 = vmatmul.bf16.gmra.mxu2 %v4560_v3 }
 0xa4e   : > { %4308 = vadd.xlane.f32.xlu2 %v4278_v21 }
 0xa52   : > { %v7911_v45 = vpop.eup %7910 }
 0xa53   : > { %v4405_v27 = vmul.f32 %v7911_v45, %v4334_v25  ;;  %vm4411_vm5 = vweird.f32 %v7911_v45 }
 0xa54   : > { %vm4412_vm7 = vmor %vm4410_vm6, %vm4411_vm5 }
 0xa55   : > { %v4406_v23 = vmul.f32 %v7911_v45, %v4405_v27 }
 0xa57   : > { %v4407_v49 = vmul.f32 0.5, %v4406_v23 }
 0xa59   : > { %v4408_v13 = vsub.f32 1.5, %v4407_v49 }
 0xa5b   : > { %v4409_v28 = vmul.f32 %v7911_v45, %v4408_v13 }
 0xa5d   : > { %v4413_v57 = vsel %vm4412_vm7, %v7911_v45, %v4409_v28 }
 0xa5e   : > { %v4510_v37 = vmul.f32 %v4413_v57, %v10964_v9 }
 0xa60   : > { %v4529_v30 = vmul.f32 %v11067_v39, %v4510_v37 }
 0xa62   : > { %v11165_v42 = vadd.f32 %v11079_v54, %v4529_v30 }
 0xa64   : > { %12677 = vst [vmem:[#allocation66_spill] sm:$0xff] %v11165_v42 }
 0xa87   : > { %v4295_v11 = vpop.xlane.xlu1 %4294 }
 0xa88   : > { %v4319_v46 = vmul.f32 %v4295_v11, %v10889_v24 }
 0xa8a   : > { %v4335_v14 = vadd.f32 1e-12, %v4319_v46 }
 0xa8c   : > { %7912 = vrsqrt.f32 %v4335_v14  ;;  %vm4420_vm9 = vweird.f32 %v4335_v14 }
 0xa8f   : > { %v4297_v20 = vpop.xlane.xlu1 %4296 }
 0xa90   : > { %v4320_v62 = vmul.f32 %v4297_v20, %v10889_v24 }
 0xa92   : > { %v7913_v33 = vpop.eup %7912  ;;  %v4336_v29 = vadd.f32 1e-12, %v4320_v62 }
 0xa93   : > { %v4415_v61 = vmul.f32 %v7913_v33, %v4335_v14  ;;  %vm4421_vm8 = vweird.f32 %v7913_v33 }
 0xa94   : > { %7914 = vrsqrt.f32 %v4336_v29  ;;  %vm4422_vm10 = vmor %vm4420_vm9, %vm4421_vm8  ;;  %vm4430_vm14 = vweird.f32 %v4336_v29 }
 0xa95   : > { %v4416_v48 = vmul.f32 %v7913_v33, %v4415_v61 }
 0xa97   : > { %v4417_v56 = vmul.f32 0.5, %v4416_v48  ;;  %v4224_v17 = vpop.xlane.xlu1 %4223  ;;  %v4299_v22 = vpop.xlane.xlu0 %4298 }
 0xa98   : > { %v4247_v40 = vmul.f32 %v10889_v24, %v4224_v17  ;;  %v4321_v47 = vmul.f32 %v4299_v22, %v10889_v24 }
 0xa99   : > { %v4418_v36 = vsub.f32 1.5, %v4417_v56 }
 0xa9a   : > { %v7915_v55 = vpop.eup %7914  ;;  %v11156_v31 = vsub.f32 %v11073_v38, %v4247_v40  ;;  %v4337_v10 = vadd.f32 1e-12, %v4321_v47 }
 0xa9b   : > { %v4419_v5 = vmul.f32 %v7913_v33, %v4418_v36  ;;  %v4425_v58 = vmul.f32 %v7915_v55, %v4336_v29  ;;  %vm4431_vm12 = vweird.f32 %v7915_v55 }
 0xa9c   : > { %7916 = vrsqrt.f32 %v4337_v10  ;;  %v4279_v8 = vmul.f32 %v11156_v31, %v11156_v31  ;;  %vm4440_vm13 = vweird.f32 %v4337_v10  ;;  %vm4432_vm0 = vmor %vm4430_vm14, %vm4431_vm12 }
 0xa9d   : > { %v4423_v26 = vsel %vm4422_vm10, %v7913_v33, %v4419_v5  ;;  %v4426_v4 = vmul.f32 %v7915_v55, %v4425_v58 }
 0xa9e   : > { %v4511_v7 = vmul.f32 %v4423_v26, %v11049_v0  ;;  %4310 = vadd.xlane.f32.xlu1 %v4279_v8 }
 0xa9f   : > { %v4427_v44 = vmul.f32 0.5, %v4426_v4 }
 0xaa0   : > { %v4530_v9 = vmul.f32 %v11067_v39, %v4511_v7 }
 0xaa1   : > { %v4301_v38 = vpop.xlane.xlu0 %4300  ;;  %v4428_v1 = vsub.f32 1.5, %v4427_v44 }
 0xaa2   : > { %v7917_v50 = vpop.eup %7916  ;;  %v4322_v2 = vmul.f32 %v4301_v38, %v10889_v24  ;;  %v11168_v16 = vadd.f32 %v11079_v54, %v4530_v9  ;;  %v7391_v38 = vld [vmem:[%s12681_s26 + $0x38] sm:$0xff] }
 0xaa3   : > { %v4435_v35 = vmul.f32 %v7917_v50, %v4337_v10  ;;  %vm4441_vm11 = vweird.f32 %v7917_v50  ;;  %v4429_v11 = vmul.f32 %v7915_v55, %v4428_v1  ;;  %5832 = vmatpush.bf16.msrb.mxu3 %v7391_v38 }
 0xaa4   : > { %12678 = vst [vmem:[#allocation67_spill] sm:$0xff] %v11168_v16  ;;  %v4561_v0 = vpack.c.bf16 %v11168_v16, %v11165_v42  ;;  %v4338_v15 = vadd.f32 1e-12, %v4322_v2  ;;  %vm4442_vm15 = vmor %vm4440_vm13, %vm4441_vm11  ;;  %v7399_v2 = vld [vmem:[%s12681_s26 + $0x78] sm:$0xff] }
 0xaa5   : > { %v4436_v52 = vmul.f32 %v7917_v50, %v4435_v35  ;;  %v4433_v49 = vsel %vm4432_vm0, %v7915_v55, %v4429_v11  ;;  %v7407_v35 = vld [vmem:[%s12681_s26 + $0xb8] sm:$0xff]  ;;  %5881 = vmatpush.bf16.msra.mxu0 %v7399_v2 }
 0xaa6   : > { %4791 = vmatmul.bf16.gmra.mxu3 %v4561_v0  ;;  %4840 = vmatmul.bf16.gmra.mxu0 %v4561_v0  ;;  %7918 = vrsqrt.f32 %v4338_v15  ;;  %v4512_v28 = vmul.f32 %v4433_v49, %v11058_v12  ;;  %vm4450_vm3 = vweird.f32 %v4338_v15 }
 0xaa7   : > { %v4437_v3 = vmul.f32 0.5, %v4436_v52  ;;  %4889 = vmatmul.bf16.gmra.mxu1 %v4561_v0  ;;  %4938 = vmatmul.bf16.gmra.mxu2 %v4561_v0  ;;  %v4303_v21 = vpop.xlane.xlu2 %4302 }
 0xaa8   : > { %v4323_v25 = vmul.f32 %v4303_v21, %v10889_v24  ;;  %v4531_v22 = vmul.f32 %v11067_v39, %v4512_v28  ;;  %5930 = vmatpush.bf16.msra.mxu1 %v7407_v35 }
 0xaa9   : > { %v4438_v45 = vsub.f32 1.5, %v4437_v3 }
 0xaaa   : > { %v4339_v27 = vadd.f32 1e-12, %v4323_v25 }
 0xaab   : > { %v4439_v23 = vmul.f32 %v7917_v50, %v4438_v45 }
 0xaac   : > { %7920 = vrsqrt.f32 %v4339_v27  ;;  %v7919_v46 = vpop.eup %7918  ;;  %vm4460_vm5 = vweird.f32 %v4339_v27 }
 0xaad   : > { %v4443_v14 = vsel %vm4442_vm15, %v7917_v50, %v4439_v23  ;;  %v4445_v62 = vmul.f32 %v7919_v46, %v4338_v15  ;;  %vm4451_vm1 = vweird.f32 %v7919_v46  ;;  %v7415_v50 = vld [vmem:[%s12681_s26 + $0xf8] sm:$0xff] }
 0xaae   : > { %v4513_v20 = vmul.f32 %v4443_v14, %v11071_v18  ;;  %v11182_v18 = vadd.f32 %v11079_v54, %v4531_v22  ;;  %vm11187_vm4 = vmor %vm4450_vm3, %vm4451_vm1  ;;  %5979 = vmatpush.bf16.msrb.mxu2 %v7415_v50 }
 0xaaf   : > { %v4446_v57 = vmul.f32 %v7919_v46, %v4445_v62 }
 0xab0   : > { %v4532_v17 = vmul.f32 %v11067_v39, %v4513_v20  ;;  %12680 = vst [vmem:[#allocation69_spill] sm:$0xff] %v11182_v18 }
 0xab1   : > { %v4305_v33 = vpop.xlane.xlu1 %4304  ;;  %v4447_v40 = vmul.f32 0.5, %v4446_v57 }
 0xab2   : > { %v7921_v13 = vpop.eup %7920  ;;  %v4324_v48 = vmul.f32 %v4305_v33, %v10889_v24  ;;  %v11179_v36 = vadd.f32 %v11079_v54, %v4532_v17  ;;  %v4826_v17 = vpop.f32.mrf.mxu0 }
 0xab3   : > { %v4455_v61 = vmul.f32 %v7921_v13, %v4339_v27  ;;  %v4448_v55 = vsub.f32 1.5, %v4447_v40  ;;  %vm4461_vm2 = vweird.f32 %v7921_v13  ;;  %v4777_v40 = vpop.f32.mrf.mxu3 }
 0xab4   : > { %v4340_v29 = vadd.f32 1e-12, %v4324_v48  ;;  %12679 = vst [vmem:[#allocation68_spill] sm:$0xff] %v11179_v36  ;;  %v4562_v12 = vpack.c.bf16 %v11179_v36, %v11182_v18  ;;  %vm4462_vm6 = vmor %vm4460_vm5, %vm4461_vm2 }
 0xab5   : > { %v4456_v56 = vmul.f32 %v7921_v13, %v4455_v61  ;;  %v4449_v26 = vmul.f32 %v7919_v46, %v4448_v55 }
 0xab6   : > { %7922 = vrsqrt.f32 %v4340_v29  ;;  %4796 = vmatmul.bf16.gmra.mxu3 %v4562_v12  ;;  %4845 = vmatmul.bf16.gmra.mxu0 %v4562_v12  ;;  %vm4470_vm8 = vweird.f32 %v4340_v29 }
 0xab7   : > { %v4457_v47 = vmul.f32 0.5, %v4456_v56  ;;  %v4307_v10 = vpop.xlane.xlu0 %4306  ;;  %4894 = vmatmul.bf16.gmra.mxu1 %v4562_v12  ;;  %4943 = vmatmul.bf16.gmra.mxu2 %v4562_v12  ;;  %v4453_v44 = vsel %vm11187_vm4, %v7919_v46, %v4449_v26 }
 0xab8   : > { %v4325_v8 = vmul.f32 %v4307_v10, %v10889_v24  ;;  %v4514_v15 = vmul.f32 %v4453_v44, %v11094_v32 }
 0xab9   : > { %v4458_v37 = vsub.f32 1.5, %v4457_v47  ;;  %v4924_v47 = vpop.f32.mrf.mxu2 }
 0xaba   : > { %v4341_v9 = vadd.f32 1e-12, %v4325_v8  ;;  %v4533_v45 = vmul.f32 %v11067_v39, %v4514_v15  ;;  %v4828_v55 = vpop.f32.mrf.mxu0 }
 0xabb   : > { %v4459_v7 = vmul.f32 %v7921_v13, %v4458_v37 }
 0xabc   : > { %v7923_v5 = vpop.eup %7922  ;;  %7924 = vrsqrt.f32 %v4341_v9  ;;  %v11202_v46 = vadd.f32 %v11079_v54, %v4533_v45  ;;  %vm4480_vm11 = vweird.f32 %v4341_v9 }
 0xabd   : > { %v4465_v58 = vmul.f32 %v7923_v5, %v4340_v29  ;;  %v4463_v0 = vsel %vm4462_vm6, %v7921_v13, %v4459_v7  ;;  %vm4471_vm7 = vweird.f32 %v7923_v5  ;;  %v4875_v29 = vpop.f32.mrf.mxu1 }
 0xabe   : > { %v4515_v3 = vmul.f32 %v4463_v0, %v11104_v60  ;;  %12684 = vst [vmem:[#allocation70_spill] sm:$0xff] %v11202_v46  ;;  %vm4472_vm9 = vmor %vm4470_vm8, %vm4471_vm7 }
 0xabf   : > { %v4466_v30 = vmul.f32 %v7923_v5, %v4465_v58  ;;  %v4779_v58 = vpop.f32.mrf.mxu3 }
 0xac0   : > { %v4534_v27 = vmul.f32 %v11067_v39, %v4515_v3 }
 0xac1   : > { %v4467_v52 = vmul.f32 0.5, %v4466_v30  ;;  %v4926_v4 = vpop.f32.mrf.mxu2  ;;  %v4309_v45 = vpop.xlane.xlu2 %4308 }
 0xac2   : > { %v7925_v1 = vpop.eup %7924  ;;  %v11205_v14 = vadd.f32 %v11079_v54, %v4534_v27  ;;  %v4831_v35 = vpop.f32.mrf.mxu0 }
 0xac3   : > { %v4468_v21 = vsub.f32 1.5, %v4467_v52  ;;  %v4475_v25 = vmul.f32 %v7925_v1, %v4341_v9  ;;  %vm4481_vm10 = vweird.f32 %v7925_v1 }
 0xac4   : > { %12685 = vst [vmem:[#allocation71_spill] sm:$0xff] %v11205_v14  ;;  %v4563_v60 = vpack.c.bf16 %v11205_v14, %v11202_v46  ;;  %vm4482_vm12 = vmor %vm4480_vm11, %vm4481_vm10  ;;  %v7412_v14 = vld [vmem:[%s12681_s26 + $0xe0] sm:$0xff] }
 0xac5   : > { %v4469_v23 = vmul.f32 %v7923_v5, %v4468_v21  ;;  %v4476_v11 = vmul.f32 %v7925_v1, %v4475_v25 }
 0xac6   : > { %4801 = vmatmul.bf16.gmra.mxu3 %v4563_v60  ;;  %4850 = vmatmul.bf16.gmra.mxu0 %v4563_v60 }
 0xac7   : > { %v4477_v32 = vmul.f32 0.5, %v4476_v11  ;;  %v4473_v49 = vsel %vm4472_vm9, %v7923_v5, %v4469_v23  ;;  %4899 = vmatmul.bf16.gmra.mxu1 %v4563_v60  ;;  %4948 = vmatmul.bf16.gmra.mxu2 %v4563_v60  ;;  %v4877_v5 = vpop.f32.mrf.mxu1 }
 0xac8   : > { %v4516_v62 = vmul.f32 %v4473_v49, %v11113_v19  ;;  %v4598_v19 = vld [vmem:[%s9207_s28] sm:$0xf]  ;;  %s12693_s28 = smov %s12669_s20 }
 0xac9   : > { %v4478_v13 = vsub.f32 1.5, %v4477_v32  ;;  %v11234_v10 = vperm.slane %v4598_v19, 3  ;;  %v11256_v32 = vpop.f32.mrf.mxu2 }
 0xaca   : > { %v4535_v61 = vmul.f32 %v11067_v39, %v4516_v62 }
 0xacb   : > { %v4479_v20 = vmul.f32 %v7925_v1, %v4478_v13  ;;  %v11240_v30 = vadd.f32 %v4924_v47, %v11234_v10 }
 0xacc   : > { %v11217_v56 = vadd.f32 %v11079_v54, %v4535_v61 }
 0xacd   : > { %v4483_v33 = vsel %vm4482_vm12, %v7925_v1, %v4479_v20  ;;  %v5031_v2 = vmul.f32 0.044715, %v11240_v30  ;;  %v11251_v1 = vpop.f32.mrf.mxu3  ;;  %v11262_v20 = vadd.f32 %v4926_v4, %v11234_v10 }
 0xace   : > { %v4517_v28 = vmul.f32 %v4483_v33, %v11128_v53  ;;  %12687 = vst [vmem:[#allocation73_spill] sm:$0xff] %v11217_v56  ;;  %v11222_v53 = vperm.slane %v4598_v19, 1  ;;  %v4326_v33 = vmul.f32 %v4309_v45, %v10889_v24 }
 0xacf   : > { %v4880_v44 = vpop.f32.mrf.mxu1  ;;  %v5095_v3 = vmul.f32 %v5031_v2, %v11240_v30 }
 0xad0   : > { %v4536_v48 = vmul.f32 %v11067_v39, %v4517_v28  ;;  %12688 = vst [vmem:[#allocation74_spill] sm:$0xff] %v11222_v53  ;;  %v11224_v39 = vperm.slane %v4598_v19, 2  ;;  %v11227_v12 = vadd.f32 %v4826_v17, %v11222_v53  ;;  %v4829_v25 = vadd.f32 %v4828_v55, %v11222_v53  ;;  %v11265_v17 = vpop.f32.mrf.mxu0 }
 0xad1   : > { %v5159_v49 = vmul.f32 %v5095_v3, %v11240_v30  ;;  %v11279_v2 = vpop.f32.mrf.mxu2 }
 0xad2   : > { %v11214_v57 = vadd.f32 %v11079_v54, %v4536_v48  ;;  %12689 = vst [vmem:[#allocation75_spill] sm:$0xff] %v11224_v39  ;;  %v11229_v54 = vperm.slane %v4598_v19, 0  ;;  %v11232_v37 = vadd.f32 %v4875_v29, %v11224_v39  ;;  %v5029_v8 = vmul.f32 0.044715, %v11227_v12 }
 0xad3   : > { %v4878_v11 = vadd.f32 %v4877_v5, %v11224_v39  ;;  %v5033_v62 = vmul.f32 0.044715, %v4829_v25  ;;  %v11272_v5 = vadd.f32 1e-12, %v4326_v33 }
 0xad4   : > { %12686 = vst [vmem:[#allocation72_spill] sm:$0xff] %v11214_v57  ;;  %v4564_v22 = vpack.c.bf16 %v11214_v57, %v11217_v56  ;;  %v4778_v26 = vadd.f32 %v4777_v40, %v11229_v54  ;;  %v5030_v7 = vmul.f32 0.044715, %v11232_v37  ;;  %v5093_v9 = vmul.f32 %v5029_v8, %v11227_v12  ;;  %v7396_v57 = vld [vmem:[%s12681_s26 + $0x60] sm:$0xff] }
 0xad5   : > { %12690 = vst [vmem:[#allocation76_spill] sm:$0xff] %v11229_v54  ;;  %v11249_v21 = vadd.f32 %v4779_v58, %v11229_v54  ;;  %v5034_v48 = vmul.f32 0.044715, %v4878_v11  ;;  %v5035_v40 = vmul.f32 0.044715, %v11262_v20  ;;  %v5097_v55 = vmul.f32 %v5033_v62, %v4829_v25  ;;  %v11274_v58 = vpop.f32.mrf.mxu3 }
 0xad6   : > { %4806 = vmatmul.bf16.gmra.mxu3 %v4564_v22  ;;  %4855 = vmatmul.bf16.gmra.mxu0 %v4564_v22  ;;  %v5028_v38 = vmul.f32 0.044715, %v4778_v26  ;;  %v5094_v50 = vmul.f32 %v5030_v7, %v11232_v37  ;;  %v5157_v0 = vmul.f32 %v5093_v9, %v11227_v12  ;;  %v11291_v33 = vmul.f32 0.5, %v4778_v26 }
 0xad7   : > { %4904 = vmatmul.bf16.gmra.mxu1 %v4564_v22  ;;  %4953 = vmatmul.bf16.gmra.mxu2 %v4564_v22  ;;  %v5032_v13 = vmul.f32 0.044715, %v11249_v21  ;;  %v5223_v22 = vadd.f32 %v5159_v49, %v11240_v30  ;;  %v11270_v47 = vpop.f32.mrf.mxu1  ;;  %v5098_v7 = vmul.f32 %v5034_v48, %v4878_v11  ;;  %v11287_v49 = vmul.f32 0.5, %v11232_v37 }
 0xad8   : > { %v5092_v52 = vmul.f32 %v5028_v38, %v4778_v26  ;;  %v5158_v15 = vmul.f32 %v5094_v50, %v11232_v37  ;;  %v5221_v27 = vadd.f32 %v5157_v0, %v11227_v12  ;;  %v5099_v38 = vmul.f32 %v5035_v40, %v11262_v20 }
 0xad9   : > { %v5096_v19 = vmul.f32 %v5032_v13, %v11249_v21  ;;  %v5287_v4 = vmul.f32 0.7978846, %v5223_v22  ;;  %v5161_v50 = vmul.f32 %v5097_v55, %v4829_v25  ;;  %v5162_v0 = vmul.f32 %v5098_v7, %v4878_v11  ;;  %v7398_v22 = vld [vmem:[%s12681_s26 + $0x70] sm:$0xff] }
 0xada   : > { %v5156_v23 = vmul.f32 %v5092_v52, %v4778_v26  ;;  %v5222_v60 = vadd.f32 %v5158_v15, %v11232_v37  ;;  %v5285_v28 = vmul.f32 0.7978846, %v5221_v27  ;;  %v5163_v15 = vmul.f32 %v5099_v38, %v11262_v20  ;;  %v4836_v27 = vpop.f32.mrf.mxu0  ;;  %5882 = vmatpush.bf16.msra.mxu0 %v7398_v22 }
 0xadb   : > { %v5160_v9 = vmul.f32 %v5096_v19, %v11249_v21  ;;  %v5225_v45 = vadd.f32 %v5161_v50, %v4829_v25  ;;  %v11297_v48 = vadd.f32 %v4880_v44, %v11224_v39  ;;  %v11303_v19 = vmul.f32 0.5, %v11240_v30  ;;  %v7389_v30 = vld [vmem:[%s12681_s26 + $0x28] sm:$0xff] }
 0xadc   : > { %v5220_v61 = vadd.f32 %v5156_v23, %v4778_v26  ;;  %v5286_v29 = vmul.f32 0.7978846, %v5222_v60  ;;  %7926 = vtanh.f32 %v5285_v28  ;;  %v11284_v60 = vmul.f32 0.5, %v11227_v12  ;;  %v7414_v12 = vld [vmem:[%s12681_s26 + $0xf0] sm:$0xff] }
 0xadd   : > { %v5224_v52 = vadd.f32 %v5160_v9, %v11249_v21  ;;  %v5226_v28 = vadd.f32 %v5162_v0, %v4878_v11  ;;  %v11305_v37 = vmul.f32 0.5, %v4829_v25  ;;  %v5227_v26 = vadd.f32 %v5163_v15, %v11262_v20  ;;  %v4787_v55 = vpop.f32.mrf.mxu3  ;;  %5980 = vmatpush.bf16.msrb.mxu2 %v7414_v12 }
 0xade   : > { %v5284_v8 = vmul.f32 0.7978846, %v5220_v61  ;;  %7928 = vtanh.f32 %v5286_v29  ;;  %v11294_v61 = vadd.f32 %v4831_v35, %v11222_v53  ;;  %v7390_v29 = vld [vmem:[%s12681_s26 + $0x30] sm:$0xff]  ;;  %v11311_v44 = vmul.f32 0.5, %v4878_v11 }
 0xadf   : > { %7930 = vrsqrt.f32 %v11272_v5  ;;  %v4885_v13 = vpop.f32.mrf.mxu1  ;;  %v5288_v40 = vmul.f32 0.7978846, %v5224_v52  ;;  %v11315_v9 = vadd.f32 %v11251_v1, %v11229_v54  ;;  %5833 = vmatpush.bf16.msrb.mxu3 %v7390_v29  ;;  %v11321_v50 = vmul.f32 0.5, %v11249_v21 }
 0xae0   : > { %7932 = vtanh.f32 %v5284_v8  ;;  %v7406_v8 = vld [vmem:[%s12681_s26 + $0xb0] sm:$0xff]  ;;  %v11325_v0 = vadd.f32 %v11256_v32, %v11234_v10  ;;  %v5290_v1 = vmul.f32 0.7978846, %v5226_v28  ;;  %v5037_v52 = vmul.f32 0.044715, %v11294_v61 }
 0xae1   : > { %7934 = vtanh.f32 %v5287_v4  ;;  %v5289_v4 = vmul.f32 0.7978846, %v5225_v45  ;;  %5931 = vmatpush.bf16.msra.mxu1 %v7406_v8  ;;  %v5038_v15 = vmul.f32 0.044715, %v11297_v48  ;;  %v11334_v32 = vmul.f32 0.5, %v11262_v20  ;;  %v7405_v8 = vld [vmem:[%s12681_s26 + $0xa8] sm:$0xff] }
 0xae2   : > { %v7927_v3 = vpop.eup %7926  ;;  %7936 = vtanh.f32 %v5288_v40  ;;  %v5291_v45 = vmul.f32 0.7978846, %v5227_v26  ;;  %v5036_v28 = vmul.f32 0.044715, %v11315_v9  ;;  %v11341_v29 = vadd.f32 %v11265_v17, %v11222_v53  ;;  %v7397_v26 = vld [vmem:[%s12681_s26 + $0x68] sm:$0xff] }
 0xae3   : > { %v11309_v35 = vadd.f32 1.0, %v7927_v3  ;;  %v4934_v3 = vpop.f32.mrf.mxu2  ;;  %7938 = vtanh.f32 %v5289_v4  ;;  %5834 = vmatpush.bf16.msrb.mxu3 %v7389_v30  ;;  %v5039_v12 = vmul.f32 0.044715, %v11325_v0  ;;  %v11347_v40 = vadd.f32 %v11270_v47, %v11224_v39  ;;  %v4838_v30 = vpop.f32.mrf.mxu0  ;;  %5883 = vmatpush.bf16.msra.mxu0 %v7397_v26 }
 0xae4   : > { %v7929_v23 = vpop.eup %7928  ;;  %v11351_v20 = vadd.f32 %v11274_v58, %v11229_v54  ;;  %7940 = vtanh.f32 %v5290_v1  ;;  %v11357_v17 = vmul.f32 %v5037_v52, %v11294_v61  ;;  %v11360_v4 = vmul.f32 %v5038_v15, %v11297_v48  ;;  %v7388_v15 = vld [vmem:[%s12681_s26 + $0x20] sm:$0xff] }
 0xae5   : > { %v11289_v62 = vpop.eup %7930  ;;  %v11318_v38 = vadd.f32 1.0, %v7929_v23  ;;  %v11364_v47 = vadd.f32 %v11279_v2, %v11234_v10  ;;  %7942 = vtanh.f32 %v5291_v45  ;;  %v11367_v58 = vadd.f32 %v4836_v27, %v11222_v53  ;;  %5932 = vmatpush.bf16.msra.mxu1 %v7405_v8  ;;  %v7404_v2 = vld [vmem:[%s12681_s26 + $0xa0] sm:$0xff]  ;;  %v4789_v18 = vpop.f32.mrf.mxu3 }
 0xae6   : > { %v7933_v7 = vpop.eup %7932  ;;  %v4485_v11 = vmul.f32 %v11289_v62, %v11272_v5  ;;  %v5100_v56 = vmul.f32 %v5036_v28, %v11315_v9  ;;  %v5041_v45 = vmul.f32 0.044715, %v11341_v29  ;;  %v11381_v27 = vadd.f32 %v4934_v3, %v11234_v10 }
 0xae7   : > { %v7935_v25 = vpop.eup %7934  ;;  %v11331_v21 = vadd.f32 1.0, %v7933_v7  ;;  %v7413_v7 = vld [vmem:[%s12681_s26 + $0xe8] sm:$0xff]  ;;  %v4887_v1 = vpop.f32.mrf.mxu1  ;;  %v11386_v46 = vmul.f32 %v5039_v12, %v11325_v0  ;;  %v5042_v8 = vmul.f32 0.044715, %v11347_v40  ;;  %v5040_v36 = vmul.f32 0.044715, %v11351_v20  ;;  %5835 = vmatpush.bf16.msrb.mxu3 %v7388_v15  ;;  %5884 = vmatpush.bf16.msra.mxu0 %v7396_v57 }
 0xae8   : > { %v11336_v23 = vadd.f32 1.0, %v7935_v25  ;;  %v4486_v22 = vmul.f32 %v11289_v62, %v4485_v11  ;;  %v11370_v25 = vadd.f32 %v4885_v13, %v11224_v39  ;;  %v11373_v11 = vadd.f32 %v4787_v55, %v11229_v54  ;;  %5981 = vmatpush.bf16.msrb.mxu2 %v7413_v7  ;;  %v7937_v55 = vpop.eup %7936  ;;  %v7387_v57 = vld [vmem:[%s12681_s26 + $0x18] sm:$0xff] }
 0xae9   : > { %v7939_v28 = vpop.eup %7938  ;;  %v5043_v16 = vmul.f32 0.044715, %v11364_v47  ;;  %v11392_v3 = vadd.f32 %v4838_v30, %v11222_v53  ;;  %v11395_v7 = vadd.f32 %v4887_v1, %v11224_v39  ;;  %vm4490_vm13 = vweird.f32 %v11272_v5  ;;  %5933 = vmatpush.bf16.msra.mxu1 %v7404_v2  ;;  %v7395_v2 = vld [vmem:[%s12681_s26 + $0x58] sm:$0xff] }
 0xaea   : > { %v4487_v26 = vmul.f32 0.5, %v4486_v22  ;;  %v5045_v12 = vmul.f32 0.044715, %v11367_v58  ;;  %v5046_v22 = vmul.f32 0.044715, %v11370_v25  ;;  %v7941_v30 = vpop.eup %7940  ;;  %v11405_v1 = vadd.f32 %v4789_v18, %v11229_v54 }
 0xaeb   : > { %v5044_v15 = vmul.f32 0.044715, %v11373_v11  ;;  %v5416_v42 = vadd.f32 1.0, %v7937_v55  ;;  %v7943_v43 = vpop.eup %7942  ;;  %v5105_v41 = vmul.f32 %v5041_v45, %v11341_v29  ;;  %v5104_v59 = vmul.f32 %v5040_v36, %v11351_v20  ;;  %v7411_v55 = vld [vmem:[%s12681_s26 + $0xd8] sm:$0xff]  ;;  %5836 = vmatpush.bf16.msrb.mxu3 %v7387_v57  ;;  %5885 = vmatpush.bf16.msra.mxu0 %v7395_v2 }
 0xaec   : > { %5982 = vmatpush.bf16.msrb.mxu2 %v7412_v14  ;;  %v4488_v63 = vsub.f32 1.5, %v4487_v26  ;;  %v5417_v51 = vadd.f32 1.0, %v7939_v28  ;;  %v5106_v39 = vmul.f32 %v5042_v8, %v11347_v40  ;;  %v11415_v18 = vmul.f32 %v5043_v16, %v11364_v47 }
 0xaed   : > { %v5049_v54 = vmul.f32 0.044715, %v11392_v3  ;;  %v5050_v14 = vmul.f32 0.044715, %v11395_v7  ;;  %vm4491_vm14 = vweird.f32 %v11289_v62  ;;  %v11422_v45 = vmul.f32 %v5045_v12, %v11367_v58  ;;  %5934 = vmatpush.bf16.msra.mxu1 %v7403_v6 }
 0xaee   : > { %v11425_v36 = vmul.f32 %v5046_v22, %v11370_v25  ;;  %v11431_v16 = vmul.f32 %v5044_v15, %v11373_v11  ;;  %v5048_v8 = vmul.f32 0.044715, %v11405_v1  ;;  %v11435_v28 = vmul.f32 %v5416_v42, %v11321_v50  ;;  %vm11469_vm15 = vmor %vm4490_vm13, %vm4491_vm14 }
 0xaef   : > { %v5164_v12 = vmul.f32 %v5100_v56, %v11315_v9  ;;  %v4489_v22 = vmul.f32 %v11289_v62, %v4488_v63  ;;  %v5168_v15 = vmul.f32 %v5104_v59, %v11351_v20  ;;  %v11447_v2 = vmul.f32 %v5049_v54, %v11392_v3  ;;  %v7410_v54 = vld [vmem:[%s12681_s26 + $0xd0] sm:$0xff] }
 0xaf0   : > { %5983 = vmatpush.bf16.msrb.mxu2 %v7411_v55  ;;  %v11450_v6 = vmul.f32 %v5050_v14, %v11395_v7  ;;  %v11454_v42 = vmul.f32 %v11331_v21, %v11291_v33  ;;  %v5169_v63 = vmul.f32 %v5105_v41, %v11341_v29  ;;  %v11461_v59 = vmul.f32 %v11309_v35, %v11284_v60 }
 0xaf1   : > { %v5165_v56 = vmul.f32 %v11357_v17, %v11294_v61  ;;  %v5112_v41 = vmul.f32 %v5048_v8, %v11405_v1  ;;  %v5228_v60 = vadd.f32 %v5164_v12, %v11315_v9  ;;  %v4493_v35 = vsel %vm11469_vm15, %v11289_v62, %v4489_v22 }
 0xaf2   : > { %v5540_v33 = vpack.c.bf16 %v11435_v28, %v11454_v42  ;;  %v5232_v21 = vadd.f32 %v5168_v15, %v11351_v20  ;;  %v11485_v17 = vmul.f32 %v11318_v38, %v11287_v49  ;;  %v5419_v14 = vadd.f32 1.0, %v7943_v43  ;;  %v7394_v49 = vld [vmem:[%s12681_s26 + $0x50] sm:$0xff] }
 0xaf3   : > { %v5166_v55 = vmul.f32 %v11360_v4, %v11297_v48  ;;  %v5229_v12 = vadd.f32 %v5165_v56, %v11294_v61  ;;  %v5170_v22 = vmul.f32 %v5106_v39, %v11347_v40  ;;  %v4518_v15 = vmul.f32 %v4493_v35, %v11137_v34  ;;  %v7402_v38 = vld [vmem:[%s12681_s26 + $0x90] sm:$0xff]  ;;  %5886 = vmatpush.bf16.msra.mxu0 %v7394_v49 }
 0xaf4   : > { %v5292_v4 = vmul.f32 0.7978846, %v5228_v60  ;;  %v5296_v56 = vmul.f32 0.7978846, %v5232_v21  ;;  %v5167_v39 = vmul.f32 %v11386_v46, %v11325_v0  ;;  %v11510_v34 = vmul.f32 %v5419_v14, %v11334_v32  ;;  %5935 = vmatpush.bf16.msra.mxu1 %v7402_v38  ;;  %5984 = vmatpush.bf16.msrb.mxu2 %v7410_v54  ;;  %v8108_v32 = vld [vmem:[%s12693_s28] ss:$0 sm:$0xff] }
 0xaf5   : > { %v5293_v60 = vmul.f32 0.7978846, %v5229_v12  ;;  %v5234_v46 = vadd.f32 %v5170_v22, %v11347_v40  ;;  %v5172_v14 = vmul.f32 %v11431_v16, %v11373_v11  ;;  %v7393_v12 = vld [vmem:[%s12681_s26 + $0x48] sm:$0xff]  ;;  %v11539_v16 = vmul.f32 0.5, %v11351_v20 }
 0xaf6   : > { %v5231_v21 = vadd.f32 %v5167_v39, %v11325_v0  ;;  %v7401_v22 = vld [vmem:[%s12681_s26 + $0x88] sm:$0xff]  ;;  %v5177_v49 = vmul.f32 %v11447_v2, %v11392_v3  ;;  %v11548_v54 = vmul.f32 0.5, %v11294_v61  ;;  %v7408_v39 = vld [vmem:[%s12681_s26 + $0xc0] sm:$0xff]  ;;  %v4977_v2 = vmul.f32 0.5, %v11341_v29 }
 0xaf7   : > { %5887 = vmatpush.bf16.msra.mxu0 %v7393_v12 }
 0xaf8   : > { %5936 = vmatpush.bf16.msra.mxu1 %v7401_v22 }
 0xb11   : > { %v4311_v52 = vpop.xlane.xlu1 %4310 }
 0xb12   : > { %v4327_v13 = vmul.f32 %v4311_v52, %v10889_v24  ;;  %v5047_v24 = vmul.f32 0.044715, %v11381_v27 }
 0xb14   : > { %v11397_v52 = vadd.f32 1e-12, %v4327_v13  ;;  %v4936_v13 = vpop.f32.mrf.mxu2  ;;  %v11440_v53 = vmul.f32 %v5047_v24, %v11381_v27 }
 0xb15   : > { %v11428_v26 = vadd.f32 %v4936_v13, %v11234_v10  ;;  %v11443_v13 = vmul.f32 %v5417_v51, %v11305_v37  ;;  %v5418_v37 = vadd.f32 1.0, %v7941_v30  ;;  %v5233_v30 = vadd.f32 %v5169_v63, %v11341_v29 }
 0xb16   : > { %7944 = vrsqrt.f32 %v11397_v52  ;;  %v11504_v63 = vmul.f32 %v11336_v23, %v11303_v19  ;;  %v5230_v19 = vadd.f32 %v5166_v55, %v11297_v48  ;;  %vm4500_vm1 = vweird.f32 %v11397_v52 }
 0xb17   : > { %v5051_v24 = vmul.f32 0.044715, %v11428_v26  ;;  %v5541_v50 = vpack.c.bf16 %v11443_v13, %v11461_v59  ;;  %v11500_v43 = vmul.f32 %v5418_v37, %v11311_v44  ;;  %v11513_v44 = vmul.f32 0.5, %v11315_v9 }
 0xb18   : > { %v5297_v37 = vmul.f32 0.7978846, %v5233_v30  ;;  %v4537_v9 = vmul.f32 %v8108_v32, %v4518_v15  ;;  %7946 = vtanh.f32 %v5292_v4  ;;  %v5294_v15 = vmul.f32 0.7978846, %v5230_v19  ;;  %v7384_v4 = vld [vmem:[%s12681_s26] sm:$0xff] }
 0xb19   : > { %v11491_v8 = vmul.f32 %v5051_v24, %v11428_v26  ;;  %7948 = vtanh.f32 %v5296_v56  ;;  %v7400_v56 = vld [vmem:[%s12681_s26 + $0x80] sm:$0xff]  ;;  %v5236_v19 = vadd.f32 %v5172_v14, %v11373_v11  ;;  %v11568_v29 = vmul.f32 0.5, %v11347_v40 }
 0xb1a   : > { %7950 = vtanh.f32 %v5297_v37  ;;  %v5295_v37 = vmul.f32 0.7978846, %v5231_v21  ;;  %5937 = vmatpush.bf16.msra.mxu1 %v7400_v56  ;;  %v12699_v28 = vpack.c.bf16 %v11510_v34, %v11504_v63 }
 0xb1b   : > { %7952 = vtanh.f32 %v5293_v60 }
 0xb1c   : > { %v7945_v57 = vpop.eup %7944  ;;  %7954 = vtanh.f32 %v5294_v15  ;;  %v11583_v15 = vmul.f32 0.5, %v11364_v47 }
 0xb1d   : > { %v4495_v51 = vmul.f32 %v7945_v57, %v11397_v52  ;;  %vm4501_vm0 = vweird.f32 %v7945_v57  ;;  %v5171_v52 = vmul.f32 %v11415_v18, %v11364_v47  ;;  %v5176_v18 = vmul.f32 %v5112_v41, %v11405_v1 }
 0xb1e   : > { %vm4502_vm2 = vmor %vm4500_vm1, %vm4501_vm0  ;;  %v7947_v60 = vpop.eup %7946 }
 0xb1f   : > { %v4496_v5 = vmul.f32 %v7945_v57, %v4495_v51  ;;  %v7386_v51 = vld [vmem:[%s12681_s26 + $0x10] sm:$0xff]  ;;  %v5235_v20 = vadd.f32 %v5171_v52, %v11364_v47  ;;  %v5240_v52 = vadd.f32 %v5176_v18, %v11405_v1  ;;  %v5300_v18 = vmul.f32 0.7978846, %v5236_v19 }
 0xb20   : > { %5837 = vmatpush.bf16.msrb.mxu3 %v7386_v51  ;;  %v7409_v51 = vld [vmem:[%s12681_s26 + $0xc8] sm:$0xff]  ;;  %v11592_v47 = vmul.f32 0.5, %v11405_v1  ;;  %v5179_v1 = vmul.f32 %v11491_v8, %v11428_v26 }
 0xb21   : > { %v4497_v62 = vmul.f32 0.5, %v4496_v5  ;;  %5985 = vmatpush.bf16.msrb.mxu2 %v7409_v51  ;;  %v5299_v12 = vmul.f32 0.7978846, %v5235_v20 }
 0xb23   : > { %v4498_v24 = vsub.f32 1.5, %v4497_v62  ;;  %v11529_v55 = vpop.f32.mrf.mxu0  ;;  %v7385_v62 = vld [vmem:[%s12681_s26 + $0x8] sm:$0xff] }
 0xb24   : > { %5838 = vmatpush.bf16.msrb.mxu3 %v7385_v62  ;;  %v11576_v62 = vmul.f32 0.5, %v11325_v0  ;;  %v5420_v0 = vadd.f32 1.0, %v7947_v60 }
 0xb25   : > { %v4499_v23 = vmul.f32 %v7945_v57, %v4498_v24  ;;  %v7392_v24 = vld [vmem:[%s12681_s26 + $0x40] sm:$0xff]  ;;  %5986 = vmatpush.bf16.msrb.mxu2 %v7408_v39 }
 0xb26   : > { %5888 = vmatpush.bf16.msra.mxu0 %v7392_v24 }
 0xb27   : > { %v4503_v5 = vsel %vm4502_vm2, %v7945_v57, %v4499_v23  ;;  %v11535_v57 = vpop.f32.mrf.mxu1  ;;  %v5173_v23 = vmul.f32 %v11422_v45, %v11367_v58  ;;  %v5241_v45 = vadd.f32 %v5177_v49, %v11392_v3  ;;  %v5304_v49 = vmul.f32 0.7978846, %v5240_v52 }
 0xb28   : > { %v4519_v30 = vmul.f32 %v4503_v5, %v11156_v31  ;;  %v5298_v31 = vmul.f32 0.7978846, %v5234_v46  ;;  %v8109_v46 = vld [vmem:[%s12694_s15] ss:$0 sm:$0xff]  ;;  %v7949_v5 = vpop.eup %7948  ;;  %5839 = vmatpush.bf16.msrb.mxu3 %v7384_v4  ;;  %v11607_v52 = vmul.f32 0.5, %v11370_v25 }
 0xb29   : > { %v7951_v21 = vpop.eup %7950  ;;  %v11571_v14 = vpop.f32.mrf.mxu3  ;;  %v5237_v51 = vadd.f32 %v5173_v23, %v11367_v58  ;;  %v5305_v24 = vmul.f32 0.7978846, %v5241_v45 }
 0xb2a   : > { %v4538_v38 = vmul.f32 %v8108_v32, %v4519_v30  ;;  %v11559_v32 = vadd.f32 %v8109_v46, %v4537_v9  ;;  %v11565_v30 = vmul.f32 0.5, %v11297_v48  ;;  %7956 = vtanh.f32 %v5298_v31  ;;  %v7953_v40 = vpop.eup %7952  ;;  %v11580_v22 = vpop.f32.mrf.mxu2 }
 0xb2b   : > { %v5174_v48 = vmul.f32 %v11425_v36, %v11370_v25  ;;  %7958 = vtanh.f32 %v5295_v37  ;;  %v11587_v31 = vmul.f32 0.5, %v11373_v11  ;;  %v5178_v36 = vmul.f32 %v11450_v6, %v11395_v7  ;;  %v7955_v20 = vpop.eup %7954  ;;  %v4843_v56 = vpop.f32.mrf.mxu0 }
 0xb2c   : > { %v11561_v61 = vadd.f32 %v8109_v46, %v4538_v38  ;;  %v5424_v38 = vadd.f32 1.0, %v7949_v5  ;;  %v5425_v4 = vadd.f32 1.0, %v7951_v21  ;;  %v5421_v39 = vadd.f32 1.0, %v7953_v40 }
 0xb2d   : > { %7960 = vtanh.f32 %v5299_v12  ;;  %v11595_v37 = vmul.f32 0.5, %v11367_v58  ;;  %v5238_v11 = vadd.f32 %v5174_v48, %v11370_v25  ;;  %v11599_v6 = vmul.f32 0.5, %v11392_v3  ;;  %v12696_v48 = vld [vmem:[#allocation75_spill] sm:$0xff] }
 0xb2e   : > { %v4565_v9 = vpack.c.bf16 %v11561_v61, %v11559_v32  ;;  %7962 = vtanh.f32 %v5300_v18  ;;  %v5301_v60 = vmul.f32 0.7978846, %v5237_v51  ;;  %v11604_v46 = vmul.f32 %v5420_v0, %v11513_v44 }
 0xb2f   : > { %v4892_v23 = vpop.f32.mrf.mxu1  ;;  %7964 = vtanh.f32 %v5304_v49  ;;  %v5242_v58 = vadd.f32 %v5178_v36, %v11395_v7  ;;  %v11611_v45 = vmul.f32 %v5424_v38, %v11539_v16  ;;  %v11613_v21 = vmul.f32 %v5425_v4, %v4977_v2  ;;  %v12697_v38 = vld [vmem:[#allocation76_spill] sm:$0xff] }
 0xb30   : > { %4811 = vmatmul.bf16.gmra.mxu3 %v4565_v9  ;;  %4860 = vmatmul.bf16.gmra.mxu0 %v4565_v9  ;;  %v7957_v19 = vpop.eup %7956  ;;  %v5422_v3 = vadd.f32 1.0, %v7955_v20  ;;  %7966 = vtanh.f32 %v5305_v24  ;;  %v11620_v44 = vmul.f32 %v5421_v39, %v11548_v54  ;;  %v5302_v25 = vmul.f32 0.7978846, %v5238_v11 }
 0xb31   : > { %4909 = vmatmul.bf16.gmra.mxu1 %v4565_v9  ;;  %4958 = vmatmul.bf16.gmra.mxu2 %v4565_v9  ;;  %v7959_v5 = vpop.eup %7958  ;;  %v12695_v9 = vld [vmem:[#allocation74_spill] sm:$0xff]  ;;  %v5426_v12 = vadd.f32 1.0, %v7957_v19  ;;  %v11624_v40 = vadd.f32 %v11535_v57, %v12696_v48  ;;  %7968 = vtanh.f32 %v5301_v60  ;;  %v5175_v16 = vmul.f32 %v11440_v53, %v11381_v27 }
 0xb32   : > { %v11617_v8 = vadd.f32 %v11529_v55, %v12695_v9  ;;  %v5243_v2 = vadd.f32 %v5179_v1, %v11428_v26  ;;  %v11630_v51 = vadd.f32 %v4843_v56, %v12695_v9  ;;  %v4794_v55 = vpop.f32.mrf.mxu3  ;;  %v5423_v0 = vadd.f32 1.0, %v7959_v5  ;;  %v4941_v4 = vpop.f32.mrf.mxu2 }
 0xb33   : > { %v7961_v18 = vpop.eup %7960  ;;  %v11633_v54 = vmul.f32 0.5, %v11395_v7  ;;  %v5306_v49 = vmul.f32 0.7978846, %v5242_v58  ;;  %v11637_v57 = vadd.f32 %v11571_v14, %v12697_v38  ;;  %v11644_v20 = vmul.f32 %v5422_v3, %v11565_v30  ;;  %v4846_v5 = vpop.f32.mrf.mxu0 }
 0xb34   : > { %v7963_v36 = vpop.eup %7962  ;;  %v5053_v7 = vmul.f32 0.044715, %v11617_v8  ;;  %v11648_v39 = vadd.f32 %v4892_v23, %v12696_v48  ;;  %v11651_v11 = vmul.f32 %v5426_v12, %v11568_v29  ;;  %7970 = vtanh.f32 %v5302_v25 }
 0xb35   : > { %v7965_v56 = vpop.eup %7964  ;;  %v5054_v19 = vmul.f32 0.044715, %v11624_v40  ;;  %v11656_v60 = vadd.f32 %v11580_v22, %v11234_v10  ;;  %v5239_v30 = vadd.f32 %v5175_v16, %v11381_v27  ;;  %v5307_v1 = vmul.f32 0.7978846, %v5243_v2 }
 0xb36   : > { %v7967_v14 = vpop.eup %7966  ;;  %v5057_v58 = vmul.f32 0.044715, %v11630_v51  ;;  %v5427_v3 = vadd.f32 1.0, %v7961_v18  ;;  %v11661_v23 = vmul.f32 %v5423_v0, %v11576_v62  ;;  %7972 = vtanh.f32 %v5306_v49 }
 0xb37   : > { %v7969_v29 = vpop.eup %7968  ;;  %v5052_v12 = vmul.f32 0.044715, %v11637_v57  ;;  %v11665_v25 = vadd.f32 %v4794_v55, %v12697_v38  ;;  %v4895_v24 = vpop.f32.mrf.mxu1  ;;  %v5432_v22 = vadd.f32 1.0, %v7965_v56  ;;  %v11668_v53 = vmul.f32 0.5, %v11381_v27 }
 0xb38   : > { %v5117_v16 = vmul.f32 %v5053_v7, %v11617_v8  ;;  %v5058_v2 = vmul.f32 0.044715, %v11648_v39  ;;  %v5428_v18 = vadd.f32 1.0, %v7963_v36  ;;  %v5433_v41 = vadd.f32 1.0, %v7967_v14 }
 0xb39   : > { %v5118_v62 = vmul.f32 %v5054_v19, %v11624_v40  ;;  %v5055_v0 = vmul.f32 0.044715, %v11656_v60  ;;  %v5303_v49 = vmul.f32 0.7978846, %v5239_v30  ;;  %7974 = vtanh.f32 %v5307_v1 }
 0xb3a   : > { %v7971_v35 = vpop.eup %7970  ;;  %v5121_v55 = vmul.f32 %v5057_v58, %v11630_v51  ;;  %v11682_v27 = vmul.f32 %v5427_v3, %v11583_v15  ;;  %v5429_v36 = vadd.f32 1.0, %v7969_v29  ;;  %v4987_v56 = vmul.f32 0.5, %v11428_v26  ;;  %v11710_v15 = vpop.f32.mrf.mxu2 }
 0xb3b   : > { %v5116_v7 = vmul.f32 %v5052_v12, %v11637_v57  ;;  %v5056_v14 = vmul.f32 0.044715, %v11665_v25  ;;  %v12698_v19 = vpack.c.bf16 %v11500_v43, %v11485_v17  ;;  %v5546_v13 = vpack.c.bf16 %v11651_v11, %v11644_v20  ;;  %v4848_v30 = vpop.f32.mrf.mxu0 }
 0xb3c   : > { %v11696_v42 = vmul.f32 %v5432_v22, %v11592_v47  ;;  %v7973_v59 = vpop.eup %7972  ;;  %v5122_v26 = vmul.f32 %v5058_v2, %v11648_v39  ;;  %v11703_v17 = vmul.f32 %v5433_v41, %v11599_v6  ;;  %v5181_v43 = vmul.f32 %v5117_v16, %v11617_v8 }
 0xb3d   : > { %v5119_v63 = vmul.f32 %v5055_v0, %v11656_v60  ;;  %v11708_v34 = vadd.f32 %v4941_v4, %v11234_v10  ;;  %7976 = vtanh.f32 %v5303_v49  ;;  %v5182_v47 = vmul.f32 %v5118_v62, %v11624_v40 }
 0xb3e   : > { %v11716_v1 = vmul.f32 %v5429_v36, %v11595_v37  ;;  %v5430_v41 = vadd.f32 1.0, %v7971_v35  ;;  %v5185_v6 = vmul.f32 %v5121_v55, %v11630_v51  ;;  %v5120_v3 = vmul.f32 %v5056_v14, %v11665_v25 }
 0xb3f   : > { %v7975_v58 = vpop.eup %7974  ;;  %v4897_v4 = vpop.f32.mrf.mxu1  ;;  %v5434_v12 = vadd.f32 1.0, %v7973_v59  ;;  %v5180_v22 = vmul.f32 %v5116_v7, %v11637_v57  ;;  %v11724_v16 = vadd.f32 %v4848_v30, %v12695_v9  ;;  %v5245_v35 = vadd.f32 %v5181_v43, %v11617_v8 }
 0xb40   : > { %5840 = vmatmul.bf16.vlgmr.msrb.gmra.mxu3 %v5540_v33  ;;  %5889 = vmatmul.bf16.vlgmr.msra.gmra.mxu0 %v5541_v50  ;;  %v4797_v33 = vpop.f32.mrf.mxu3  ;;  %v11700_v50 = vmul.f32 %v5428_v18, %v11587_v31  ;;  %v5547_v31 = vpack.c.bf16 %v11682_v27, %v11661_v23  ;;  %v5186_v23 = vmul.f32 %v5122_v26, %v11648_v39  ;;  %v5059_v2 = vmul.f32 0.044715, %v11708_v34 }
 0xb41   : > { %5938 = vmatmul.bf16.vlgmr.msra.gmra.mxu1 %v12698_v19  ;;  %5987 = vmatmul.bf16.vlgmr.msrb.gmra.mxu2 %v12699_v28  ;;  %v11732_v18 = vadd.f32 %v4897_v4, %v12696_v48  ;;  %v5246_v62 = vadd.f32 %v5182_v47, %v11624_v40  ;;  %v5183_v0 = vmul.f32 %v5119_v63, %v11656_v60  ;;  %v5435_v27 = vadd.f32 1.0, %v7975_v58 }
 0xb42   : > { %v5548_v29 = vpack.c.bf16 %v11696_v42, %v11700_v50  ;;  %v11737_v49 = vadd.f32 %v4846_v5, %v12695_v9  ;;  %v11740_v55 = vmul.f32 %v5430_v41, %v11607_v52  ;;  %v5249_v36 = vadd.f32 %v5185_v6, %v11630_v51 }
 0xb43   : > { %v7977_v7 = vpop.eup %7976  ;;  %v11744_v14 = vadd.f32 %v4895_v24, %v12696_v48  ;;  %v11747_v19 = vmul.f32 %v5434_v12, %v11633_v54  ;;  %v5184_v28 = vmul.f32 %v5120_v3, %v11665_v25  ;;  %v5244_v59 = vadd.f32 %v5180_v22, %v11637_v57  ;;  %v4946_v12 = vpop.f32.mrf.mxu2 }
 0xb44   : > { %v11752_v5 = vadd.f32 %v4797_v33, %v12697_v38  ;;  %v5065_v52 = vmul.f32 0.044715, %v11724_v16  ;;  %v5309_v43 = vmul.f32 0.7978846, %v5245_v35  ;;  %v5250_v63 = vadd.f32 %v5186_v23, %v11648_v39 }
 0xb45   : > { %v5123_v47 = vmul.f32 %v5059_v2, %v11708_v34  ;;  %v5066_v24 = vmul.f32 0.044715, %v11732_v18  ;;  %v5310_v30 = vmul.f32 0.7978846, %v5246_v62  ;;  %v5247_v54 = vadd.f32 %v5183_v0, %v11656_v60 }
 0xb46   : > { %v5061_v41 = vmul.f32 0.044715, %v11737_v49  ;;  %v5431_v6 = vadd.f32 1.0, %v7977_v7  ;;  %v11760_v58 = vmul.f32 %v5435_v27, %v4987_v56  ;;  %v5313_v33 = vmul.f32 0.7978846, %v5249_v36 }
 0xb47   : > { %v5062_v3 = vmul.f32 0.044715, %v11744_v14  ;;  %v5248_v22 = vadd.f32 %v5184_v28, %v11665_v25  ;;  %v5308_v35 = vmul.f32 0.7978846, %v5244_v59  ;;  %v5060_v23 = vmul.f32 0.044715, %v11752_v5 }
 0xb48   : > { %v4799_v26 = vpop.f32.mrf.mxu3  ;;  %v5129_v2 = vmul.f32 %v5065_v52, %v11724_v16  ;;  %7978 = vtanh.f32 %v5309_v43  ;;  %v5314_v62 = vmul.f32 0.7978846, %v5250_v63  ;;  %v5130_v0 = vmul.f32 %v5066_v24, %v11732_v18 }
 0xb49   : > { %v11764_v4 = vadd.f32 %v4799_v26, %v12697_v38  ;;  %7980 = vtanh.f32 %v5310_v30  ;;  %v5187_v56 = vmul.f32 %v5123_v47, %v11708_v34  ;;  %v5311_v27 = vmul.f32 0.7978846, %v5247_v54 }
 0xb4a   : > { %v5125_v36 = vmul.f32 %v5061_v41, %v11737_v49  ;;  %v12700_v7 = vpack.c.bf16 %v11611_v45, %v11604_v46  ;;  %v12701_v28 = vpack.c.bf16 %v11613_v21, %v11620_v44  ;;  %v11781_v52 = vmul.f32 %v5431_v6, %v11668_v53  ;;  %v11794_v53 = vpop.f32.mrf.mxu0 }
 0xb4b   : > { %7982 = vtanh.f32 %v5313_v33  ;;  %v5126_v26 = vmul.f32 %v5062_v3, %v11744_v14  ;;  %v5064_v43 = vmul.f32 0.044715, %v11764_v4  ;;  %v5312_v46 = vmul.f32 0.7978846, %v5248_v22 }
 0xb4c   : > { %7984 = vtanh.f32 %v5308_v35  ;;  %v5124_v45 = vmul.f32 %v5060_v23, %v11752_v5  ;;  %v11791_v21 = vadd.f32 %v11710_v15, %v11234_v10  ;;  %v5193_v44 = vmul.f32 %v5129_v2, %v11724_v16  ;;  %v11817_v2 = vpop.f32.mrf.mxu2 }
 0xb4d   : > { %7986 = vtanh.f32 %v5314_v62  ;;  %v5251_v20 = vadd.f32 %v5187_v56, %v11708_v34  ;;  %v5194_v11 = vmul.f32 %v5130_v0, %v11732_v18  ;;  %v11803_v47 = vmul.f32 0.5, %v11637_v57 }
 0xb4e   : > { %7988 = vtanh.f32 %v5311_v27  ;;  %v4989_v15 = vmul.f32 0.5, %v11617_v8  ;;  %v4990_v24 = vmul.f32 0.5, %v11624_v40  ;;  %v5189_v30 = vmul.f32 %v5125_v36, %v11737_v49 }
 0xb4f   : > { %v5128_v41 = vmul.f32 %v5064_v43, %v11764_v4  ;;  %7990 = vtanh.f32 %v5312_v46  ;;  %v4991_v6 = vmul.f32 0.5, %v11656_v60  ;;  %v5190_v33 = vmul.f32 %v5126_v26, %v11744_v14 }
 0xb50   : > { %5845 = vmatmul.bf16.gmra.mxu3 %v12700_v7  ;;  %5894 = vmatmul.bf16.gmra.mxu0 %v12701_v28  ;;  %v5063_v22 = vmul.f32 0.044715, %v11791_v21  ;;  %v11813_v57 = vadd.f32 %v4946_v12, %v11234_v10  ;;  %v4802_v35 = vpop.f32.mrf.mxu3  ;;  %v5188_v8 = vmul.f32 %v5124_v45, %v11752_v5  ;;  %v5257_v40 = vadd.f32 %v5193_v44, %v11724_v16 }
 0xb51   : > { %5943 = vmatmul.bf16.gmra.mxu1 %v5546_v13  ;;  %5992 = vmatmul.bf16.gmra.mxu2 %v5547_v31  ;;  %v7979_v13 = vpop.eup %7978  ;;  %v11800_v31 = vpop.f32.mrf.mxu1  ;;  %v4993_v62 = vmul.f32 0.5, %v11630_v51  ;;  %v5315_v60 = vmul.f32 0.7978846, %v5251_v20  ;;  %v5258_v56 = vadd.f32 %v5194_v11, %v11732_v18  ;;  %v4992_v36 = vmul.f32 0.5, %v11665_v25 }
 0xb52   : > { %v7981_v54 = vpop.eup %7980  ;;  %v5437_v0 = vadd.f32 1.0, %v7979_v13  ;;  %v4994_v12 = vmul.f32 0.5, %v11648_v39  ;;  %v5253_v28 = vadd.f32 %v5189_v30, %v11737_v49  ;;  %v11825_v46 = vmul.f32 0.5, %v11708_v34  ;;  %v4853_v59 = vpop.f32.mrf.mxu0 }
 0xb53   : > { %v7983_v3 = vpop.eup %7982  ;;  %v5438_v7 = vadd.f32 1.0, %v7981_v54  ;;  %v5192_v45 = vmul.f32 %v5128_v41, %v11764_v4  ;;  %v5254_v51 = vadd.f32 %v5190_v33, %v11744_v14  ;;  %v5127_v44 = vmul.f32 %v5063_v22, %v11791_v21 }
 0xb54   : > { %v7985_v23 = vpop.eup %7984  ;;  %v5441_v43 = vadd.f32 1.0, %v7983_v3  ;;  %v5067_v20 = vmul.f32 0.044715, %v11813_v57  ;;  %v5252_v25 = vadd.f32 %v5188_v8, %v11752_v5  ;;  %v5321_v11 = vmul.f32 0.7978846, %v5257_v40 }
 0xb55   : > { %v7987_v27 = vpop.eup %7986  ;;  %v11832_v13 = vmul.f32 %v5437_v0, %v4989_v15  ;;  %7992 = vtanh.f32 %v5315_v60  ;;  %v5322_v54 = vmul.f32 0.7978846, %v5258_v56  ;;  %v5436_v3 = vadd.f32 1.0, %v7985_v23  ;;  %v4951_v23 = vpop.f32.mrf.mxu2 }
 0xb56   : > { %v7989_v26 = vpop.eup %7988  ;;  %v5442_v30 = vadd.f32 1.0, %v7987_v27  ;;  %v11834_v34 = vmul.f32 %v5438_v7, %v4990_v24  ;;  %v5317_v41 = vmul.f32 0.7978846, %v5253_v28  ;;  %v11836_v33 = vmul.f32 %v5441_v43, %v4993_v62 }
 0xb57   : > { %v7991_v39 = vpop.eup %7990  ;;  %v5439_v63 = vadd.f32 1.0, %v7989_v26  ;;  %v5256_v22 = vadd.f32 %v5192_v45, %v11764_v4  ;;  %v11840_v37 = vmul.f32 0.5, %v11737_v49  ;;  %v5318_v8 = vmul.f32 0.7978846, %v5254_v51 }
 0xb58   : > { %v5131_v15 = vmul.f32 %v5067_v20, %v11813_v57  ;;  %v4804_v0 = vpop.f32.mrf.mxu3  ;;  %v5316_v60 = vmul.f32 0.7978846, %v5252_v25  ;;  %7994 = vtanh.f32 %v5321_v11  ;;  %v5191_v24 = vmul.f32 %v5127_v44, %v11791_v21 }
 0xb59   : > { %v4902_v40 = vpop.f32.mrf.mxu1  ;;  %v5440_v56 = vadd.f32 1.0, %v7991_v39  ;;  %v11844_v27 = vmul.f32 %v5442_v30, %v4994_v12  ;;  %v11847_v62 = vmul.f32 0.5, %v11744_v14  ;;  %7996 = vtanh.f32 %v5322_v54 }
 0xb5a   : > { %v11850_v49 = vadd.f32 %v4802_v35, %v12697_v38  ;;  %v12702_v7 = vpack.c.bf16 %v11703_v17, %v11716_v1  ;;  %v11859_v28 = vmul.f32 %v5436_v3, %v11803_v47  ;;  %v11861_v12 = vmul.f32 %v5439_v63, %v4991_v6  ;;  %v4856_v54 = vpop.f32.mrf.mxu0 }
 0xb5b   : > { %7998 = vtanh.f32 %v5317_v41  ;;  %v7993_v14 = vpop.eup %7992  ;;  %v11865_v26 = vadd.f32 %v11794_v53, %v12695_v9  ;;  %v12703_v35 = vpack.c.bf16 %v11747_v19, %v11740_v55  ;;  %v12704_v42 = vpack.c.bf16 %v11760_v58, %v11781_v52 }
 0xb5c   : > { %v11874_v50 = vmul.f32 0.5, %v11752_v5  ;;  %v5320_v17 = vmul.f32 0.7978846, %v5256_v22  ;;  %8000 = vtanh.f32 %v5318_v8  ;;  %v5553_v1 = vpack.c.bf16 %v11836_v33, %v11832_v13 }
 0xb5d   : > { %8002 = vtanh.f32 %v5316_v60  ;;  %v5255_v53 = vadd.f32 %v5191_v24, %v11791_v21  ;;  %v11881_v55 = vadd.f32 %v4853_v59, %v12695_v9  ;;  %v11883_v19 = vmul.f32 %v5440_v56, %v4992_v36 }
 0xb5e   : > { %v5554_v58 = vpack.c.bf16 %v11844_v27, %v11834_v34  ;;  %v5001_v5 = vmul.f32 0.5, %v11724_v16  ;;  %v7995_v52 = vpop.eup %7994  ;;  %v5068_v63 = vmul.f32 0.044715, %v11850_v49  ;;  %v11890_v47 = vadd.f32 %v4804_v0, %v12697_v38 }
 0xb5f   : > { %v5443_v6 = vadd.f32 1.0, %v7993_v14  ;;  %v5002_v43 = vmul.f32 0.5, %v11732_v18  ;;  %v7997_v45 = vpop.eup %7996  ;;  %v5069_v59 = vmul.f32 0.044715, %v11865_v26  ;;  %v11896_v36 = vadd.f32 %v11800_v31, %v12696_v48 }
 0xb60   : > { %5850 = vmatmul.bf16.gmra.mxu3 %v5548_v29  ;;  %5899 = vmatmul.bf16.gmra.mxu0 %v12702_v7  ;;  %v5195_v29 = vmul.f32 %v5131_v15, %v11813_v57  ;;  %v11899_v51 = vadd.f32 %v4902_v40, %v12696_v48  ;;  %8004 = vtanh.f32 %v5320_v17  ;;  %v11902_v44 = vadd.f32 %v4951_v23, %v11234_v10  ;;  %v4807_v20 = vpop.f32.mrf.mxu3  ;;  %v11919_v23 = vpop.f32.mrf.mxu2 }
 0xb61   : > { %5948 = vmatmul.bf16.gmra.mxu1 %v12703_v35  ;;  %5997 = vmatmul.bf16.gmra.mxu2 %v12704_v42  ;;  %v7999_v16 = vpop.eup %7998  ;;  %v5000_v25 = vmul.f32 0.5, %v11764_v4  ;;  %v5319_v11 = vmul.f32 0.7978846, %v5255_v53  ;;  %v11908_v30 = vadd.f32 %v11817_v2, %v11234_v10  ;;  %v5073_v31 = vmul.f32 0.044715, %v11881_v55  ;;  %v4905_v15 = vpop.f32.mrf.mxu1 }
 0xb62   : > { %v5259_v18 = vadd.f32 %v5195_v29, %v11813_v57  ;;  %v8001_v39 = vpop.eup %8000  ;;  %v5552_v3 = vpack.c.bf16 %v11883_v19, %v11859_v28  ;;  %v5449_v41 = vadd.f32 1.0, %v7995_v52  ;;  %v5132_v8 = vmul.f32 %v5068_v63, %v11850_v49 }
 0xb63   : > { %v8003_v22 = vpop.eup %8002  ;;  %v5072_v4 = vmul.f32 0.044715, %v11890_v47  ;;  %v5507_v40 = vmul.f32 %v5443_v6, %v11825_v46  ;;  %v5450_v0 = vadd.f32 1.0, %v7997_v45  ;;  %v5133_v60 = vmul.f32 %v5069_v59, %v11865_v26 }
 0xb64   : > { %v5070_v2 = vmul.f32 0.044715, %v11896_v36  ;;  %v5074_v24 = vmul.f32 0.044715, %v11899_v51  ;;  %v5445_v56 = vadd.f32 1.0, %v7999_v16  ;;  %v5446_v28 = vadd.f32 1.0, %v8001_v39 }
 0xb65   : > { %v5075_v7 = vmul.f32 0.044715, %v11902_v44  ;;  %v5323_v14 = vmul.f32 0.7978846, %v5259_v18  ;;  %8006 = vtanh.f32 %v5319_v11  ;;  %v5071_v42 = vmul.f32 0.044715, %v11908_v30 }
 0xb66   : > { %v8005_v35 = vpop.eup %8004  ;;  %v5137_v46 = vmul.f32 %v5073_v31, %v11881_v55  ;;  %v5444_v17 = vadd.f32 1.0, %v8003_v22  ;;  %v11924_v29 = vmul.f32 %v5449_v41, %v5001_v5  ;;  %v5136_v53 = vmul.f32 %v5072_v4, %v11890_v47 }
 0xb67   : > { %v5555_v19 = vpack.c.bf16 %v5507_v40, %v11861_v12  ;;  %v11928_v52 = vmul.f32 %v5450_v0, %v5002_v43  ;;  %v5196_v63 = vmul.f32 %v5132_v8, %v11850_v49  ;;  %v5134_v6 = vmul.f32 %v5070_v2, %v11896_v36 }
 0xb68   : > { %v5138_v45 = vmul.f32 %v5074_v24, %v11899_v51  ;;  %v11934_v59 = vmul.f32 %v5445_v56, %v11840_v37  ;;  %v5197_v16 = vmul.f32 %v5133_v60, %v11865_v26  ;;  %v5139_v5 = vmul.f32 %v5075_v7, %v11902_v44  ;;  %v4809_v43 = vpop.f32.mrf.mxu3  ;;  %v4956_v2 = vpop.f32.mrf.mxu2 }
 0xb69   : > { %v5448_v18 = vadd.f32 1.0, %v8005_v35  ;;  %v11939_v11 = vmul.f32 %v5446_v28, %v11847_v62  ;;  %8008 = vtanh.f32 %v5323_v14  ;;  %v5135_v12 = vmul.f32 %v5071_v42, %v11908_v30  ;;  %v4907_v33 = vpop.f32.mrf.mxu1 }
 0xb6a   : > { %v11943_v39 = vmul.f32 %v5444_v17, %v11874_v50  ;;  %v5557_v31 = vpack.c.bf16 %v11924_v29, %v11934_v59  ;;  %v5201_v37 = vmul.f32 %v5137_v46, %v11881_v55  ;;  %v4999_v22 = vmul.f32 0.5, %v11791_v21 }
 0xb6b   : > { %v8007_v41 = vpop.eup %8006  ;;  %v5558_v62 = vpack.c.bf16 %v11928_v52, %v11939_v11  ;;  %v5200_v8 = vmul.f32 %v5136_v53, %v11890_v47  ;;  %v5260_v50 = vadd.f32 %v5196_v63, %v11850_v49  ;;  %v11957_v4 = vadd.f32 %v4856_v54, %v12695_v9 }
 0xb6c   : > { %v11960_v40 = vadd.f32 %v4807_v20, %v12697_v38  ;;  %v5003_v13 = vmul.f32 0.5, %v11813_v57  ;;  %v5202_v21 = vmul.f32 %v5138_v45, %v11899_v51  ;;  %v5512_v0 = vmul.f32 %v5448_v18, %v5000_v25 }
 0xb6d   : > { %v5261_v54 = vadd.f32 %v5197_v16, %v11865_v26  ;;  %v5203_v20 = vmul.f32 %v5139_v5, %v11902_v44  ;;  %v11973_v60 = vadd.f32 %v4905_v15, %v12696_v48  ;;  %v5447_v34 = vadd.f32 1.0, %v8007_v41 }
 0xb6e   : > { %v5265_v27 = vadd.f32 %v5201_v37, %v11881_v55  ;;  %v5198_v57 = vmul.f32 %v5134_v6, %v11896_v36  ;;  %v5264_v56 = vadd.f32 %v5200_v8, %v11890_v47  ;;  %v5324_v25 = vmul.f32 0.7978846, %v5260_v50 }
 0xb6f   : > { %v5199_v7 = vmul.f32 %v5135_v12, %v11908_v30  ;;  %v5077_v28 = vmul.f32 0.044715, %v11957_v4  ;;  %v5076_v15 = vmul.f32 0.044715, %v11960_v40  ;;  %v11985_v14 = vadd.f32 %v4907_v33, %v12696_v48 }
 0xb70   : > { %5855 = vmatmul.bf16.gmra.mxu3 %v5552_v3  ;;  %5904 = vmatmul.bf16.gmra.mxu0 %v5553_v1  ;;  %v4858_v3 = vpop.f32.mrf.mxu0  ;;  %v11968_v1 = vadd.f32 %v4809_v43, %v12697_v38  ;;  %v5266_v35 = vadd.f32 %v5202_v21, %v11899_v51  ;;  %v11990_v46 = vadd.f32 %v4956_v2, %v11234_v10  ;;  %v5325_v17 = vmul.f32 0.7978846, %v5261_v54 }
 0xb71   : > { %5953 = vmatmul.bf16.gmra.mxu1 %v5554_v58  ;;  %6002 = vmatmul.bf16.gmra.mxu2 %v5555_v19  ;;  %v8009_v58 = vpop.eup %8008  ;;  %v11978_v24 = vadd.f32 %v4858_v3, %v12695_v9  ;;  %v5267_v53 = vadd.f32 %v5203_v20, %v11902_v44  ;;  %v5078_v19 = vmul.f32 0.044715, %v11973_v60  ;;  %v5329_v6 = vmul.f32 0.7978846, %v5265_v27 }
 0xb72   : > { %v5080_v42 = vmul.f32 0.044715, %v11968_v1  ;;  %v5451_v63 = vadd.f32 1.0, %v8009_v58  ;;  %v5262_v45 = vadd.f32 %v5198_v57, %v11896_v36  ;;  %v11997_v16 = vadd.f32 %v11919_v23, %v11234_v10 }
 0xb73   : > { %v5081_v5 = vmul.f32 0.044715, %v11978_v24  ;;  %v5328_v18 = vmul.f32 0.7978846, %v5264_v56  ;;  %v5263_v12 = vadd.f32 %v5199_v7, %v11908_v30  ;;  %v5140_v43 = vmul.f32 %v5076_v15, %v11960_v40 }
 0xb74   : > { %v5082_v37 = vmul.f32 0.044715, %v11985_v14  ;;  %8010 = vtanh.f32 %v5324_v25  ;;  %v5330_v41 = vmul.f32 0.7978846, %v5266_v35  ;;  %v5144_v8 = vmul.f32 %v5080_v42, %v11968_v1 }
 0xb75   : > { %v5083_v50 = vmul.f32 0.044715, %v11990_v46  ;;  %8012 = vtanh.f32 %v5325_v17  ;;  %v5331_v3 = vmul.f32 0.7978846, %v5267_v53  ;;  %v5141_v23 = vmul.f32 %v5077_v28, %v11957_v4 }
 0xb76   : > { %v5515_v21 = vmul.f32 %v5451_v63, %v5003_v13  ;;  %8014 = vtanh.f32 %v5329_v6  ;;  %v5326_v33 = vmul.f32 0.7978846, %v5262_v45  ;;  %v5079_v54 = vmul.f32 0.044715, %v11997_v16 }
 0xb77   : > { %v5145_v20 = vmul.f32 %v5081_v5, %v11978_v24  ;;  %8016 = vtanh.f32 %v5328_v18  ;;  %v5327_v2 = vmul.f32 0.7978846, %v5263_v12  ;;  %v5146_v27 = vmul.f32 %v5082_v37, %v11985_v14 }
 0xb78   : > { %v5511_v57 = vmul.f32 %v5447_v34, %v4999_v22  ;;  %8018 = vtanh.f32 %v5330_v41  ;;  %v5204_v58 = vmul.f32 %v5140_v43, %v11960_v40  ;;  %v5147_v56 = vmul.f32 %v5083_v50, %v11990_v46 }
 0xb79   : > { %v5556_v25 = vpack.c.bf16 %v5512_v0, %v11943_v39  ;;  %8020 = vtanh.f32 %v5331_v3  ;;  %v5208_v13 = vmul.f32 %v5144_v8, %v11968_v1  ;;  %v5142_v28 = vmul.f32 %v5078_v19, %v11973_v60 }
 0xb7a   : > { %v8011_v7 = vpop.eup %8010  ;;  %v5559_v15 = vpack.c.bf16 %v5515_v21, %v5511_v57  ;;  %8022 = vtanh.f32 %v5326_v33  ;;  %v5205_v35 = vmul.f32 %v5141_v23, %v11957_v4  ;;  %v5143_v22 = vmul.f32 %v5079_v54, %v11997_v16 }
 0xb7b   : > { %v8013_v42 = vpop.eup %8012  ;;  %8024 = vtanh.f32 %v5327_v2  ;;  %v5209_v39 = vmul.f32 %v5145_v20, %v11978_v24  ;;  %v5268_v34 = vadd.f32 %v5204_v58, %v11960_v40  ;;  %v5210_v17 = vmul.f32 %v5146_v27, %v11985_v14 }
 0xb7c   : > { %v8015_v0 = vpop.eup %8014  ;;  %v5005_v19 = vmul.f32 0.5, %v11865_v26  ;;  %v5006_v63 = vmul.f32 0.5, %v11896_v36  ;;  %v5272_v29 = vadd.f32 %v5208_v13, %v11968_v1  ;;  %v5211_v59 = vmul.f32 %v5147_v56, %v11990_v46 }
 0xb7d   : > { %v8017_v53 = vpop.eup %8016  ;;  %v5004_v6 = vmul.f32 0.5, %v11850_v49  ;;  %v5009_v52 = vmul.f32 0.5, %v11881_v55  ;;  %v5269_v11 = vadd.f32 %v5205_v35, %v11957_v4  ;;  %v5008_v5 = vmul.f32 0.5, %v11890_v47 }
 0xb7e   : > { %v5010_v26 = vmul.f32 0.5, %v11899_v51  ;;  %v5273_v36 = vadd.f32 %v5209_v39, %v11978_v24  ;;  %v5207_v18 = vmul.f32 %v5143_v22, %v11997_v16  ;;  %v5452_v43 = vadd.f32 1.0, %v8011_v7 }
 0xb7f   : > { %v5007_v37 = vmul.f32 0.5, %v11908_v30  ;;  %v5332_v49 = vmul.f32 0.7978846, %v5268_v34  ;;  %v5274_v55 = vadd.f32 %v5210_v17, %v11985_v14  ;;  %v5456_v8 = vadd.f32 1.0, %v8017_v53 }
 0xb80   : > { %5860 = vmatmul.bf16.gmra.mxu3 %v5556_v25  ;;  %5909 = vmatmul.bf16.gmra.mxu0 %v5557_v31  ;;  %v8019_v31 = vpop.eup %8018  ;;  %v5457_v50 = vadd.f32 1.0, %v8015_v0  ;;  %v5336_v3 = vmul.f32 0.7978846, %v5272_v29  ;;  %v5275_v23 = vadd.f32 %v5211_v59, %v11990_v46  ;;  %v5333_v51 = vmul.f32 0.7978846, %v5269_v11 }
 0xb81   : > { %5958 = vmatmul.bf16.gmra.mxu1 %v5558_v62  ;;  %6007 = vmatmul.bf16.gmra.mxu2 %v5559_v15  ;;  %v5206_v62 = vmul.f32 %v5142_v28, %v11973_v60  ;;  %v8021_v45 = vpop.eup %8020  ;;  %v5458_v47 = vadd.f32 1.0, %v8019_v31  ;;  %v5453_v54 = vadd.f32 1.0, %v8013_v42  ;;  %v5011_v20 = vmul.f32 0.5, %v11902_v44 }
 0xb82   : > { %v8023_v12 = vpop.eup %8022  ;;  %v5459_v21 = vadd.f32 1.0, %v8021_v45  ;;  %v5337_v2 = vmul.f32 0.7978846, %v5273_v36  ;;  %v5271_v30 = vadd.f32 %v5207_v18, %v11997_v16  ;;  %8026 = vtanh.f32 %v5332_v49 }
 0xb83   : > { %v8025_v41 = vpop.eup %8024  ;;  %v5270_v33 = vadd.f32 %v5206_v62, %v11973_v60  ;;  %v5454_v27 = vadd.f32 1.0, %v8023_v12  ;;  %v5338_v58 = vmul.f32 0.7978846, %v5274_v55  ;;  %v5520_v56 = vmul.f32 %v5456_v8, %v5008_v5 }
 0xb84   : > { %v5455_v57 = vadd.f32 1.0, %v8025_v41  ;;  %v5521_v25 = vmul.f32 %v5457_v50, %v5009_v52  ;;  %8028 = vtanh.f32 %v5336_v3  ;;  %v5339_v13 = vmul.f32 0.7978846, %v5275_v23 }
 0xb85   : > { %v5522_v7 = vmul.f32 %v5458_v47, %v5010_v26  ;;  %v5523_v28 = vmul.f32 %v5459_v21, %v5011_v20  ;;  %8030 = vtanh.f32 %v5333_v51  ;;  %v5334_v15 = vmul.f32 0.7978846, %v5270_v33 }
 0xb86   : > { %v5516_v35 = vmul.f32 %v5452_v43, %v5004_v6  ;;  %v5517_v22 = vmul.f32 %v5453_v54, %v5005_v19  ;;  %8032 = vtanh.f32 %v5337_v2  ;;  %v5335_v42 = vmul.f32 0.7978846, %v5271_v30 }
 0xb87   : > { %v5518_v44 = vmul.f32 %v5454_v27, %v5006_v63  ;;  %v5519_v39 = vmul.f32 %v5455_v57, %v5007_v37  ;;  %8034 = vtanh.f32 %v5338_v58  ;;  %v5016_v36 = vmul.f32 0.5, %v11968_v1 }
 0xb88   : > { %v5560_v0 = vpack.c.bf16 %v5520_v56, %v5516_v35  ;;  %v5561_v34 = vpack.c.bf16 %v5521_v25, %v5517_v22  ;;  %8036 = vtanh.f32 %v5339_v13  ;;  %v8027_v17 = vpop.eup %8026  ;;  %v5017_v12 = vmul.f32 0.5, %v11978_v24 }
 0xb89   : > { %v5562_v53 = vpack.c.bf16 %v5522_v7, %v5518_v44  ;;  %v5563_v29 = vpack.c.bf16 %v5523_v28, %v5519_v39  ;;  %8038 = vtanh.f32 %v5334_v15  ;;  %v5460_v18 = vadd.f32 1.0, %v8027_v17 }
 0xb8a   : > { %v8029_v59 = vpop.eup %8028  ;;  %8040 = vtanh.f32 %v5335_v42  ;;  %v5018_v37 = vmul.f32 0.5, %v11985_v14  ;;  %v5019_v55 = vmul.f32 0.5, %v11990_v46  ;;  %v5012_v8 = vmul.f32 0.5, %v11960_v40 }
 0xb8b   : > { %v8031_v31 = vpop.eup %8030  ;;  %v5464_v62 = vadd.f32 1.0, %v8029_v59  ;;  %v5013_v3 = vmul.f32 0.5, %v11957_v4  ;;  %v5014_v47 = vmul.f32 0.5, %v11973_v60  ;;  %v5015_v1 = vmul.f32 0.5, %v11997_v16 }
 0xb8c   : > { %v8033_v19 = vpop.eup %8032  ;;  %v5461_v43 = vadd.f32 1.0, %v8031_v31  ;;  %v5524_v24 = vmul.f32 %v5460_v18, %v5012_v8 }
 0xb8d   : > { %v8035_v6 = vpop.eup %8034  ;;  %v5465_v45 = vadd.f32 1.0, %v8033_v19  ;;  %v5528_v50 = vmul.f32 %v5464_v62, %v5016_v36 }
 0xb8e   : > { %v8037_v52 = vpop.eup %8036  ;;  %v5466_v5 = vadd.f32 1.0, %v8035_v6  ;;  %v5525_v33 = vmul.f32 %v5461_v43, %v5013_v3 }
 0xb8f   : > { %v8039_v63 = vpop.eup %8038  ;;  %v5467_v26 = vadd.f32 1.0, %v8037_v52  ;;  %v5529_v23 = vmul.f32 %v5465_v45, %v5017_v12  ;;  %v5564_v20 = vpack.c.bf16 %v5528_v50, %v5524_v24  ;;  %v12107_v50 = vld [vmem:[%s1171_s23] ss:$0 sm:$0xff]  ;;  %s12721_s23 = scalar_lea.vmem [#allocation20], %s9107_s30  ;;  %s12723_s30 = sld [smem:[#allocation42_spill]] }
 0xb90   : > { %5865 = vmatmul.bf16.gmra.mxu3 %v5560_v0  ;;  %5914 = vmatmul.bf16.gmra.mxu0 %v5561_v34  ;;  %v8041_v11 = vpop.eup %8040  ;;  %v5462_v49 = vadd.f32 1.0, %v8039_v63  ;;  %v5530_v21 = vmul.f32 %v5466_v5, %v5018_v37 }
 0xb91   : > { %5963 = vmatmul.bf16.gmra.mxu1 %v5562_v53  ;;  %6012 = vmatmul.bf16.gmra.mxu2 %v5563_v29  ;;  %v5463_v41 = vadd.f32 1.0, %v8041_v11  ;;  %v5531_v51 = vmul.f32 %v5467_v26, %v5019_v55  ;;  %v5565_v2 = vpack.c.bf16 %v5529_v23, %v5525_v33 }
 0xb92   : > { %v5526_v54 = vmul.f32 %v5462_v49, %v5014_v47 }
 0xb93   : > { %v5527_v14 = vmul.f32 %v5463_v41, %v5015_v1 }
 0xb94   : > { %v5566_v46 = vpack.c.bf16 %v5530_v21, %v5526_v54 }
 0xb95   : > { %v5567_v30 = vpack.c.bf16 %v5531_v51, %v5527_v14  ;;  %p7307_p12 = scmp.ne.s32.totalorder %s12723_s30, 1 }
 0xba0   : > { %5870 = vmatmul.bf16.gmra.mxu3 %v5564_v20  ;;  %5919 = vmatmul.bf16.gmra.mxu0 %v5565_v2 }
 0xba1   : > { %5968 = vmatmul.bf16.gmra.mxu1 %v5566_v46  ;;  %6017 = vmatmul.bf16.gmra.mxu2 %v5567_v30 }
 0xbad   : > { %v4861_v4 = vpop.f32.mrf.mxu0 }
 0xbae   : > { %v12052_v40 = vadd.f32 %v4861_v4, %v12695_v9  ;;  %v4910_v60 = vpop.f32.mrf.mxu1 }
 0xbaf   : > { %v12055_v16 = vadd.f32 %v4910_v60, %v12696_v48 }
 0xbb0   : > { %v5085_v27 = vmul.f32 0.044715, %v12052_v40 }
 0xbb1   : > { %v5086_v57 = vmul.f32 0.044715, %v12055_v16 }
 0xbb2   : > { %v5149_v58 = vmul.f32 %v5085_v27, %v12052_v40 }
 0xbb3   : > { %v5150_v56 = vmul.f32 %v5086_v57, %v12055_v16  ;;  %v4812_v25 = vpop.f32.mrf.mxu3 }
 0xbb4   : > { %v12062_v13 = vadd.f32 %v4812_v25, %v12697_v38  ;;  %v4959_v7 = vpop.f32.mrf.mxu2  ;;  %v5213_v28 = vmul.f32 %v5149_v58, %v12052_v40 }
 0xbb5   : > { %v12066_v15 = vadd.f32 %v4959_v7, %v11234_v10  ;;  %v4863_v35 = vpop.f32.mrf.mxu0  ;;  %v5214_v22 = vmul.f32 %v5150_v56, %v12055_v16 }
 0xbb6   : > { %v5084_v42 = vmul.f32 0.044715, %v12062_v13  ;;  %v12071_v44 = vadd.f32 %v4863_v35, %v12695_v9  ;;  %v4912_v39 = vpop.f32.mrf.mxu1  ;;  %v5277_v0 = vadd.f32 %v5213_v28, %v12052_v40 }
 0xbb7   : > { %v5087_v34 = vmul.f32 0.044715, %v12066_v15  ;;  %v12076_v17 = vadd.f32 %v4912_v39, %v12696_v48  ;;  %v5278_v53 = vadd.f32 %v5214_v22, %v12055_v16  ;;  %v5021_v22 = vmul.f32 0.5, %v12052_v40 }
 0xbb8   : > { %v5148_v29 = vmul.f32 %v5084_v42, %v12062_v13  ;;  %v5089_v59 = vmul.f32 0.044715, %v12071_v44  ;;  %v5341_v6 = vmul.f32 0.7978846, %v5277_v0  ;;  %v5025_v42 = vmul.f32 0.5, %v12071_v44 }
 0xbb9   : > { %v5151_v31 = vmul.f32 %v5087_v34, %v12066_v15  ;;  %v5090_v19 = vmul.f32 0.044715, %v12076_v17  ;;  %v5342_v11 = vmul.f32 0.7978846, %v5278_v53  ;;  %v5022_v53 = vmul.f32 0.5, %v12055_v16 }
 0xbba   : > { %v5153_v9 = vmul.f32 %v5089_v59, %v12071_v44  ;;  %v5212_v5 = vmul.f32 %v5148_v29, %v12062_v13  ;;  %8042 = vtanh.f32 %v5341_v6  ;;  %v5026_v29 = vmul.f32 0.5, %v12076_v17 }
 0xbbb   : > { %v5154_v52 = vmul.f32 %v5090_v19, %v12076_v17  ;;  %v4814_v63 = vpop.f32.mrf.mxu3  ;;  %v5215_v12 = vmul.f32 %v5151_v31, %v12066_v15  ;;  %8044 = vtanh.f32 %v5342_v11 }
 0xbbc   : > { %v12086_v48 = vadd.f32 %v4814_v63, %v12697_v38  ;;  %v4961_v62 = vpop.f32.mrf.mxu2  ;;  %v5217_v45 = vmul.f32 %v5153_v9, %v12071_v44  ;;  %v5276_v49 = vadd.f32 %v5212_v5, %v12062_v13 }
 0xbbd   : > { %v12091_v26 = vadd.f32 %v4961_v62, %v11234_v10  ;;  %v5890_v36 = vpop.f32.mrf.mxu0  ;;  %v5218_v18 = vmul.f32 %v5154_v52, %v12076_v17  ;;  %v5279_v10 = vadd.f32 %v5215_v12, %v12066_v15  ;;  %v12706_v52 = vld [vmem:[#allocation59_spill] sm:$0xff] }
 0xbbe   : > { %v5088_v43 = vmul.f32 0.044715, %v12086_v48  ;;  %v5939_v37 = vpop.f32.mrf.mxu1  ;;  %v5281_v38 = vadd.f32 %v5217_v45, %v12071_v44  ;;  %v5340_v23 = vmul.f32 0.7978846, %v5276_v49  ;;  %v5024_v49 = vmul.f32 0.5, %v12086_v48 }
 0xbbf   : > { %v5091_v55 = vmul.f32 0.044715, %v12091_v26  ;;  %v5282_v41 = vadd.f32 %v5218_v18, %v12076_v17  ;;  %v5343_v1 = vmul.f32 0.7978846, %v5279_v10  ;;  %v5023_v10 = vmul.f32 0.5, %v12066_v15 }
 0xbc0   : > { %v5152_v8 = vmul.f32 %v5088_v43, %v12086_v48  ;;  %v5345_v3 = vmul.f32 0.7978846, %v5281_v38  ;;  %v8043_v54 = vpop.eup %8042  ;;  %v5020_v38 = vmul.f32 0.5, %v12062_v13 }
 0xbc1   : > { %v5155_v47 = vmul.f32 %v5091_v55, %v12091_v26  ;;  %v5346_v21 = vmul.f32 0.7978846, %v5282_v41  ;;  %v8045_v46 = vpop.eup %8044  ;;  %v5469_v58 = vadd.f32 1.0, %v8043_v54  ;;  %v12707_v54 = vld [vmem:[#allocation60_spill] sm:$0xff] }
 0xbc2   : > { %8046 = vtanh.f32 %v5345_v3  ;;  %v5216_v51 = vmul.f32 %v5152_v8, %v12086_v48  ;;  %v5470_v28 = vadd.f32 1.0, %v8045_v46  ;;  %v5027_v8 = vmul.f32 0.5, %v12091_v26 }
 0xbc3   : > { %v5841_v24 = vpop.f32.mrf.mxu3  ;;  %8048 = vtanh.f32 %v5346_v21  ;;  %v5219_v33 = vmul.f32 %v5155_v47, %v12091_v26  ;;  %v5533_v9 = vmul.f32 %v5469_v58, %v5021_v22 }
 0xbc4   : > { %v5842_v14 = vadd.f32 %v12107_v50, %v5841_v24  ;;  %v5988_v20 = vpop.f32.mrf.mxu2  ;;  %v5280_v2 = vadd.f32 %v5216_v51, %v12086_v48  ;;  %8050 = vtanh.f32 %v5340_v23  ;;  %v5534_v44 = vmul.f32 %v5470_v28, %v5022_v53 }
 0xbc5   : > { %v5892_v30 = vpop.f32.mrf.mxu0  ;;  %v5283_v4 = vadd.f32 %v5219_v33, %v12091_v26  ;;  %8052 = vtanh.f32 %v5343_v1 }
 0xbc6   : > { %v5891_v60 = vadd.f32 %v5890_v36, %v5842_v14  ;;  %v5941_v27 = vpop.f32.mrf.mxu1  ;;  %v5344_v57 = vmul.f32 0.7978846, %v5280_v2 }
 0xbc7   : > { %v5347_v56 = vmul.f32 0.7978846, %v5283_v4 }
 0xbc8   : > { %v8047_v25 = vpop.eup %8046  ;;  %v5940_v7 = vadd.f32 %v5939_v37, %v5891_v60  ;;  %8054 = vtanh.f32 %v5344_v57  ;;  %v12708_v60 = vld [vmem:[#allocation62_spill] sm:$0xff] }
 0xbc9   : > { %v8049_v35 = vpop.eup %8048  ;;  %v5473_v39 = vadd.f32 1.0, %v8047_v25  ;;  %8056 = vtanh.f32 %v5347_v56 }
 0xbca   : > { %v8051_v0 = vpop.eup %8050  ;;  %v5989_v34 = vadd.f32 %v5988_v20, %v5940_v7  ;;  %v5474_v59 = vadd.f32 1.0, %v8049_v35 }
 0xbcb   : > { %v8053_v31 = vpop.eup %8052  ;;  %v5843_v19 = vpop.f32.mrf.mxu3  ;;  %v5537_v6 = vmul.f32 %v5473_v39, %v5025_v42  ;;  %v5468_v36 = vadd.f32 1.0, %v8051_v0  ;;  %v12709_v42 = vld [vmem:[#allocation63_spill] sm:$0xff] }
 0xbcc   : > { %v12120_v63 = vadd.f32 %v5989_v34, %v12706_v52  ;;  %v5844_v40 = vadd.f32 %v12107_v50, %v5843_v19  ;;  %v5990_v11 = vpop.f32.mrf.mxu2  ;;  %v5538_v62 = vmul.f32 %v5474_v59, %v5026_v29  ;;  %v5471_v43 = vadd.f32 1.0, %v8053_v31 }
 0xbcd   : > { %v5895_v45 = vpop.f32.mrf.mxu0  ;;  %v5569_v5 = vpack.c.bf16 %v5537_v6, %v5533_v9  ;;  %v5532_v23 = vmul.f32 %v5468_v36, %v5020_v38  ;;  %v12710_v6 = vld [vmem:[#allocation64_spill] sm:$0xff] }
 0xbce   : > { %v8055_v18 = vpop.eup %8054  ;;  %v5893_v16 = vadd.f32 %v5892_v30, %v5844_v40  ;;  %v5944_v12 = vpop.f32.mrf.mxu1  ;;  %6046 = vadd.xlane.f32.xlu0 %v12120_v63  ;;  %v5570_v17 = vpack.c.bf16 %v5538_v62, %v5534_v44  ;;  %v5535_v1 = vmul.f32 %v5471_v43, %v5023_v10 }
 0xbcf   : > { %v8057_v37 = vpop.eup %8056  ;;  %5924 = vmatmul.bf16.gmra.mxu0 %v5569_v5  ;;  %v5472_v55 = vadd.f32 1.0, %v8055_v18 }
 0xbd0   : > { %v5942_v41 = vadd.f32 %v5941_v27, %v5893_v16  ;;  %5973 = vmatmul.bf16.gmra.mxu1 %v5570_v17  ;;  %v5475_v3 = vadd.f32 1.0, %v8057_v37  ;;  %v12711_v16 = vld [vmem:[#allocation65_spill] sm:$0xff] }
 0xbd1   : > { %v5536_v47 = vmul.f32 %v5472_v55, %v5024_v49 }
 0xbd2   : > { %v5991_v21 = vadd.f32 %v5990_v11, %v5942_v41  ;;  %v5539_v51 = vmul.f32 %v5475_v3, %v5027_v8  ;;  %v12712_v8 = vld [vmem:[#allocation66_spill] sm:$0xff] }
 0xbd3   : > { %v5846_v24 = vpop.f32.mrf.mxu3  ;;  %v5568_v33 = vpack.c.bf16 %v5536_v47, %v5532_v23 }
 0xbd4   : > { %v12129_v14 = vadd.f32 %v5991_v21, %v12707_v54  ;;  %v5847_v13 = vadd.f32 %v12107_v50, %v5846_v24  ;;  %v5993_v48 = vpop.f32.mrf.mxu2  ;;  %v5571_v20 = vpack.c.bf16 %v5539_v51, %v5535_v1 }
 0xbd5   : > { %5875 = vmatmul.bf16.gmra.mxu3 %v5568_v33  ;;  %v5897_v2 = vpop.f32.mrf.mxu0 }
 0xbd6   : > { %v5896_v15 = vadd.f32 %v5895_v45, %v5847_v13  ;;  %v5946_v46 = vpop.f32.mrf.mxu1  ;;  %6022 = vmatmul.bf16.gmra.mxu2 %v5571_v20  ;;  %6048 = vadd.xlane.f32.xlu2 %v12129_v14  ;;  %v12713_v13 = vld [vmem:[#allocation67_spill] sm:$0xff] }
 0xbd8   : > { %v5945_v26 = vadd.f32 %v5944_v12, %v5896_v15 }
 0xbda   : > { %v5994_v30 = vadd.f32 %v5993_v48, %v5945_v26 }
 0xbdb   : > { %v5848_v4 = vpop.f32.mrf.mxu3 }
 0xbdc   : > { %v12134_v27 = vadd.f32 %v5994_v30, %v12708_v60  ;;  %v5849_v57 = vadd.f32 %v12107_v50, %v5848_v4  ;;  %v5995_v58 = vpop.f32.mrf.mxu2 }
 0xbdd   : > { %v5900_v56 = vpop.f32.mrf.mxu0 }
 0xbde   : > { %v5898_v25 = vadd.f32 %v5897_v2, %v5849_v57  ;;  %v5949_v7 = vpop.f32.mrf.mxu1  ;;  %6050 = vadd.xlane.f32.xlu1 %v12134_v27  ;;  %v12714_v57 = vld [vmem:[#allocation69_spill] sm:$0xff] }
 0xbe0   : > { %v5947_v28 = vadd.f32 %v5946_v46, %v5898_v25 }
 0xbe2   : > { %v5996_v35 = vadd.f32 %v5995_v58, %v5947_v28 }
 0xbe3   : > { %v5851_v22 = vpop.f32.mrf.mxu3 }
 0xbe4   : > { %v12139_v39 = vadd.f32 %v5996_v35, %v12709_v42  ;;  %v5852_v0 = vadd.f32 %v12107_v50, %v5851_v22  ;;  %v5998_v34 = vpop.f32.mrf.mxu2 }
 0xbe5   : > { %v5902_v53 = vpop.f32.mrf.mxu0 }
 0xbe6   : > { %v5901_v29 = vadd.f32 %v5900_v56, %v5852_v0  ;;  %v5951_v59 = vpop.f32.mrf.mxu1  ;;  %6052 = vadd.xlane.f32.xlu0 %v12139_v39 }
 0xbe8   : > { %v5950_v31 = vadd.f32 %v5949_v7, %v5901_v29 }
 0xbea   : > { %v5999_v19 = vadd.f32 %v5998_v34, %v5950_v31  ;;  %v12715_v34 = vld [vmem:[#allocation68_spill] sm:$0xff] }
 0xbeb   : > { %v5853_v9 = vpop.f32.mrf.mxu3 }
 0xbec   : > { %v12144_v52 = vadd.f32 %v5999_v19, %v12710_v6  ;;  %v5854_v40 = vadd.f32 %v12107_v50, %v5853_v9  ;;  %v6000_v11 = vpop.f32.mrf.mxu2 }
 0xbed   : > { %v5905_v44 = vpop.f32.mrf.mxu0 }
 0xbee   : > { %v5903_v62 = vadd.f32 %v5902_v53, %v5854_v40  ;;  %v5954_v45 = vpop.f32.mrf.mxu1  ;;  %6054 = vadd.xlane.f32.xlu2 %v12144_v52 }
 0xbf0   : > { %v5952_v5 = vadd.f32 %v5951_v59, %v5903_v62 }
 0xbf2   : > { %v6001_v36 = vadd.f32 %v6000_v11, %v5952_v5 }
 0xbf3   : > { %v5856_v18 = vpop.f32.mrf.mxu3 }
 0xbf4   : > { %v12149_v12 = vadd.f32 %v6001_v36, %v12711_v16  ;;  %v5857_v17 = vadd.f32 %v12107_v50, %v5856_v18  ;;  %v6003_v43 = vpop.f32.mrf.mxu2 }
 0xbf5   : > { %v5907_v37 = vpop.f32.mrf.mxu0 }
 0xbf6   : > { %v5906_v38 = vadd.f32 %v5905_v44, %v5857_v17  ;;  %v5956_v49 = vpop.f32.mrf.mxu1  ;;  %6056 = vadd.xlane.f32.xlu1 %v12149_v12  ;;  %v12716_v44 = vld [vmem:[#allocation70_spill] sm:$0xff] }
 0xbf8   : > { %v5955_v55 = vadd.f32 %v5954_v45, %v5906_v38 }
 0xbfa   : > { %v6004_v41 = vadd.f32 %v6003_v43, %v5955_v55 }
 0xbfb   : > { %v5858_v10 = vpop.f32.mrf.mxu3 }
 0xbfc   : > { %v12154_v3 = vadd.f32 %v6004_v41, %v12712_v8  ;;  %v5859_v23 = vadd.f32 %v12107_v50, %v5858_v10  ;;  %v6005_v47 = vpop.f32.mrf.mxu2 }
 0xbfd   : > { %v5910_v21 = vpop.f32.mrf.mxu0 }
 0xbfe   : > { %v5908_v1 = vadd.f32 %v5907_v37, %v5859_v23  ;;  %v5959_v51 = vpop.f32.mrf.mxu1  ;;  %6058 = vadd.xlane.f32.xlu0 %v12154_v3  ;;  %v12717_v37 = vld [vmem:[#allocation71_spill] sm:$0xff] }
 0xc00   : > { %v5957_v24 = vadd.f32 %v5956_v49, %v5908_v1 }
 0xc02   : > { %v6006_v33 = vadd.f32 %v6005_v47, %v5957_v24 }
 0xc03   : > { %v5861_v54 = vpop.f32.mrf.mxu3 }
 0xc04   : > { %v12159_v48 = vadd.f32 %v6006_v33, %v12713_v13  ;;  %v5862_v20 = vadd.f32 %v12107_v50, %v5861_v54  ;;  %v6008_v2 = vpop.f32.mrf.mxu2 }
 0xc05   : > { %v5912_v15 = vpop.f32.mrf.mxu0 }
 0xc06   : > { %v5911_v46 = vadd.f32 %v5910_v21, %v5862_v20  ;;  %6060 = vadd.xlane.f32.xlu2 %v12159_v48  ;;  %v5961_v26 = vpop.f32.mrf.mxu1  ;;  %v12718_v21 = vld [vmem:[#allocation73_spill] sm:$0xff] }
 0xc08   : > { %v5960_v30 = vadd.f32 %v5959_v51, %v5911_v46 }
 0xc0a   : > { %v6009_v4 = vadd.f32 %v6008_v2, %v5960_v30  ;;  %v12720_v30 = vld [vmem:[#allocation61_spill] sm:$0xff] }
 0xc0b   : > { %v5863_v60 = vpop.f32.mrf.mxu3 }
 0xc0c   : > { %v12164_v58 = vadd.f32 %v6009_v4, %v12714_v57  ;;  %v5864_v56 = vadd.f32 %v12107_v50, %v5863_v60  ;;  %v6010_v25 = vpop.f32.mrf.mxu2 }
 0xc0d   : > { %v5915_v28 = vpop.f32.mrf.mxu0 }
 0xc0e   : > { %v5913_v7 = vadd.f32 %v5912_v15, %v5864_v56  ;;  %6062 = vadd.xlane.f32.xlu1 %v12164_v58  ;;  %v5964_v22 = vpop.f32.mrf.mxu1  ;;  %v12719_v15 = vld [vmem:[#allocation72_spill] sm:$0xff] }
 0xc10   : > { %v5962_v35 = vadd.f32 %v5961_v26, %v5913_v7 }
 0xc12   : > { %v6011_v42 = vadd.f32 %v6010_v25, %v5962_v35 }
 0xc13   : > { %v5866_v0 = vpop.f32.mrf.mxu3 }
 0xc14   : > { %v12169_v53 = vadd.f32 %v6011_v42, %v12715_v34  ;;  %v5867_v29 = vadd.f32 %v12107_v50, %v5866_v0  ;;  %v6013_v59 = vpop.f32.mrf.mxu2 }
 0xc15   : > { %v5917_v9 = vpop.f32.mrf.mxu0 }
 0xc16   : > { %v5916_v31 = vadd.f32 %v5915_v28, %v5867_v29  ;;  %6064 = vadd.xlane.f32.xlu0 %v12169_v53  ;;  %v5966_v40 = vpop.f32.mrf.mxu1 }
 0xc18   : > { %v5965_v19 = vadd.f32 %v5964_v22, %v5916_v31 }
 0xc1a   : > { %v6014_v6 = vadd.f32 %v6013_v59, %v5965_v19 }
 0xc1b   : > { %v5868_v11 = vpop.f32.mrf.mxu3 }
 0xc1c   : > { %v12174_v62 = vadd.f32 %v6014_v6, %v12716_v44  ;;  %v5869_v45 = vadd.f32 %v12107_v50, %v5868_v11  ;;  %v6015_v5 = vpop.f32.mrf.mxu2 }
 0xc1d   : > { %v5920_v17 = vpop.f32.mrf.mxu0 }
 0xc1e   : > { %v5918_v36 = vadd.f32 %v5917_v9, %v5869_v45  ;;  %6066 = vadd.xlane.f32.xlu2 %v12174_v62  ;;  %v5969_v55 = vpop.f32.mrf.mxu1 }
 0xc20   : > { %v5967_v18 = vadd.f32 %v5966_v40, %v5918_v36 }
 0xc22   : > { %v6016_v16 = vadd.f32 %v6015_v5, %v5967_v18 }
 0xc23   : > { %v5871_v43 = vpop.f32.mrf.mxu3 }
 0xc24   : > { %v12179_v38 = vadd.f32 %v6016_v16, %v12717_v37  ;;  %v5872_v49 = vadd.f32 %v12107_v50, %v5871_v43  ;;  %v6018_v10 = vpop.f32.mrf.mxu2 }
 0xc25   : > { %v5922_v24 = vpop.f32.mrf.mxu0 }
 0xc26   : > { %v5921_v41 = vadd.f32 %v5920_v17, %v5872_v49  ;;  %6068 = vadd.xlane.f32.xlu1 %v12179_v38  ;;  %v5971_v54 = vpop.f32.mrf.mxu1 }
 0xc28   : > { %v5970_v8 = vadd.f32 %v5969_v55, %v5921_v41 }
 0xc2a   : > { %v6019_v23 = vadd.f32 %v6018_v10, %v5970_v8 }
 0xc2b   : > { %v5873_v47 = vpop.f32.mrf.mxu3 }
 0xc2c   : > { %v12184_v1 = vadd.f32 %v6019_v23, %v12718_v21  ;;  %v5874_v51 = vadd.f32 %v12107_v50, %v5873_v47  ;;  %v6020_v20 = vpop.f32.mrf.mxu2 }
 0xc2e   : > { %v5923_v33 = vadd.f32 %v5922_v24, %v5874_v51  ;;  %6070 = vadd.xlane.f32.xlu0 %v12184_v1 }
 0xc30   : > { %v5972_v13 = vadd.f32 %v5971_v54, %v5923_v33 }
 0xc32   : > { %v6021_v2 = vadd.f32 %v6020_v20, %v5972_v13 }
 0xc34   : > { %v12189_v46 = vadd.f32 %v6021_v2, %v12719_v15 }
 0xc36   : > { %6072 = vadd.xlane.f32.xlu2 %v12189_v46 }
 0xc41   : > { %v6047_v26 = vpop.xlane.xlu0 %6046 }
 0xc42   : > { %v6078_v4 = vmul.f32 %v6047_v26, %v12720_v30 }
 0xc44   : > { %v12194_v60 = vsub.f32 %v12120_v63, %v6078_v4 }
 0xc46   : > { %v6110_v57 = vmul.f32 %v12194_v60, %v12194_v60 }
 0xc48   : > { %6126 = vadd.xlane.f32.xlu2 %v6110_v57 }
 0xc49   : > { %v6049_v63 = vpop.xlane.xlu2 %6048 }
 0xc4a   : > { %v6079_v9 = vmul.f32 %v6049_v63, %v12720_v30 }
 0xc4c   : > { %v5925_v56 = vpop.f32.mrf.mxu0  ;;  %v12212_v45 = vsub.f32 %v12129_v14, %v6079_v9 }
 0xc4d   : > { %v5974_v35 = vpop.f32.mrf.mxu1 }
 0xc4e   : > { %v6111_v37 = vmul.f32 %v12212_v45, %v12212_v45 }
 0xc51   : > { %v6051_v5 = vpop.xlane.xlu1 %6050 }
 0xc52   : > { %v6080_v43 = vmul.f32 %v6051_v5, %v12720_v30 }
 0xc54   : > { %v5927_v11 = vpop.f32.mrf.mxu0  ;;  %v12223_v14 = vsub.f32 %v12134_v27, %v6080_v43 }
 0xc56   : > { %v6112_v8 = vmul.f32 %v12223_v14, %v12223_v14 }
 0xc58   : > { %v5876_v25 = vpop.f32.mrf.mxu3 }
 0xc59   : > { %v5877_v7 = vadd.f32 %v12107_v50, %v5876_v25  ;;  %v6053_v28 = vpop.xlane.xlu0 %6052  ;;  %v6023_v0 = vpop.f32.mrf.mxu2 }
 0xc5a   : > { %v6081_v22 = vmul.f32 %v6053_v28, %v12720_v30 }
 0xc5b   : > { %v5926_v42 = vadd.f32 %v5925_v56, %v5877_v7 }
 0xc5c   : > { %v12201_v34 = vsub.f32 %v12139_v39, %v6081_v22  ;;  %v5976_v39 = vpop.f32.mrf.mxu1 }
 0xc5d   : > { %v5975_v29 = vadd.f32 %v5974_v35, %v5926_v42 }
 0xc5e   : > { %v6113_v59 = vmul.f32 %v12201_v34, %v12201_v34 }
 0xc5f   : > { %v6024_v31 = vadd.f32 %v6023_v0, %v5975_v29 }
 0xc60   : > { %v5878_v19 = vpop.f32.mrf.mxu3  ;;  %6132 = vadd.xlane.f32.xlu2 %v6113_v59 }
 0xc61   : > { %v12207_v6 = vadd.f32 %v6024_v31, %v11559_v32  ;;  %v5879_v40 = vadd.f32 %v12107_v50, %v5878_v19  ;;  %v6025_v18 = vpop.f32.mrf.mxu2  ;;  %v6055_v16 = vpop.xlane.xlu2 %6054 }
 0xc62   : > { %v6082_v50 = vmul.f32 %v6055_v16, %v12720_v30 }
 0xc63   : > { %v5928_v44 = vadd.f32 %v5927_v11, %v5879_v40  ;;  %6074 = vadd.xlane.f32.xlu1 %v12207_v6 }
 0xc64   : > { %v12226_v49 = vsub.f32 %v12144_v52, %v6082_v50 }
 0xc65   : > { %v5977_v36 = vadd.f32 %v5976_v39, %v5928_v44 }
 0xc67   : > { %v6026_v17 = vadd.f32 %v6025_v18, %v5977_v36  ;;  %v12296_v36 = vld [vmem:[%s1174_s9] ss:$0 sm:$0xff] }
 0xc69   : > { %v12216_v32 = vadd.f32 %v6026_v17, %v11561_v61  ;;  %v6057_v55 = vpop.xlane.xlu1 %6056  ;;  %v6114_v61 = vmul.f32 %v12226_v49, %v12226_v49 }
 0xc6a   : > { %v6083_v41 = vmul.f32 %v6057_v55, %v12720_v30 }
 0xc6b   : > { %6128 = vadd.xlane.f32.xlu1 %v6111_v37  ;;  %6076 = vadd.xlane.f32.xlu0 %v12216_v32 }
 0xc6c   : > { %v12238_v52 = vsub.f32 %v12149_v12, %v6083_v41 }
 0xc6e   : > { %v6115_v51 = vmul.f32 %v12238_v52, %v12238_v52 }
 0xc71   : > { %v6059_v10 = vpop.xlane.xlu0 %6058 }
 0xc72   : > { %v6084_v23 = vmul.f32 %v6059_v10, %v12720_v30 }
 0xc73   : > { %6134 = vadd.xlane.f32.xlu1 %v6114_v61  ;;  %6130 = vadd.xlane.f32.xlu0 %v6112_v8 }
 0xc74   : > { %v12235_v27 = vsub.f32 %v12154_v3, %v6084_v23 }
 0xc76   : > { %v6116_v47 = vmul.f32 %v12235_v27, %v12235_v27 }
 0xc78   : > { %6138 = vadd.xlane.f32.xlu2 %v6116_v47 }
 0xc79   : > { %v6061_v21 = vpop.xlane.xlu2 %6060 }
 0xc7a   : > { %v6085_v24 = vmul.f32 %v6061_v21, %v12720_v30 }
 0xc7b   : > { %6136 = vadd.xlane.f32.xlu0 %v6115_v51 }
 0xc7c   : > { %v12246_v33 = vsub.f32 %v12159_v48, %v6085_v24 }
 0xc7e   : > { %v6117_v3 = vmul.f32 %v12246_v33, %v12246_v33 }
 0xc80   : > { %6140 = vadd.xlane.f32.xlu1 %v6117_v3 }
 0xc81   : > { %v6063_v12 = vpop.xlane.xlu1 %6062 }
 0xc82   : > { %v6086_v54 = vmul.f32 %v6063_v12, %v12720_v30 }
 0xc84   : > { %v12252_v13 = vsub.f32 %v12164_v58, %v6086_v54 }
 0xc86   : > { %v6118_v20 = vmul.f32 %v12252_v13, %v12252_v13 }
 0xc88   : > { %6142 = vadd.xlane.f32.xlu0 %v6118_v20 }
 0xc89   : > { %v6065_v2 = vpop.xlane.xlu0 %6064 }
 0xc8a   : > { %v6087_v15 = vmul.f32 %v6065_v2, %v12720_v30 }
 0xc8c   : > { %v12258_v48 = vsub.f32 %v12169_v53, %v6087_v15 }
 0xc8e   : > { %v6119_v26 = vmul.f32 %v12258_v48, %v12258_v48 }
 0xc90   : > { %6144 = vadd.xlane.f32.xlu2 %v6119_v26 }
 0xc91   : > { %v6067_v4 = vpop.xlane.xlu2 %6066 }
 0xc92   : > { %v6088_v57 = vmul.f32 %v6067_v4, %v12720_v30 }
 0xc94   : > { %v12264_v58 = vsub.f32 %v12174_v62, %v6088_v57 }
 0xc96   : > { %v6120_v56 = vmul.f32 %v12264_v58, %v12264_v58 }
 0xc98   : > { %6146 = vadd.xlane.f32.xlu1 %v6120_v56 }
 0xc99   : > { %v6069_v25 = vpop.xlane.xlu1 %6068 }
 0xc9a   : > { %v6089_v7 = vmul.f32 %v6069_v25, %v12720_v30 }
 0xc9c   : > { %v12270_v53 = vsub.f32 %v12179_v38, %v6089_v7 }
 0xc9e   : > { %v6121_v28 = vmul.f32 %v12270_v53, %v12270_v53 }
 0xca0   : > { %6148 = vadd.xlane.f32.xlu0 %v6121_v28 }
 0xca1   : > { %v6071_v35 = vpop.xlane.xlu0 %6070 }
 0xca2   : > { %v6090_v22 = vmul.f32 %v6071_v35, %v12720_v30 }
 0xca4   : > { %v12276_v62 = vsub.f32 %v12184_v1, %v6090_v22 }
 0xca6   : > { %v6122_v42 = vmul.f32 %v12276_v62, %v12276_v62 }
 0xca8   : > { %6150 = vadd.xlane.f32.xlu2 %v6122_v42 }
 0xca9   : > { %v6073_v0 = vpop.xlane.xlu2 %6072 }
 0xcaa   : > { %v6091_v29 = vmul.f32 %v6073_v0, %v12720_v30 }
 0xcac   : > { %v12282_v38 = vsub.f32 %v12189_v46, %v6091_v29  ;;  %v12289_v46 = vld [vmem:[%s12721_s23] ss:$0 sm:$0xff] }
 0xcae   : > { %v6123_v63 = vmul.f32 %v12282_v38, %v12282_v38 }
 0xcb0   : > { %6152 = vadd.xlane.f32.xlu1 %v6123_v63 }
 0xcbb   : > { %v6127_v59 = vpop.xlane.xlu2 %6126 }
 0xcbc   : > { %v6158_v1 = vmul.f32 %v6127_v59, %v12720_v30 }
 0xcbe   : > { %v6174_v31 = vadd.f32 1e-12, %v6158_v1 }
 0xcc0   : > { %8058 = vrsqrt.f32 %v6174_v31  ;;  %vm6196_vm4 = vweird.f32 %v6174_v31 }
 0xcc6   : > { %v8059_v19 = vpop.eup %8058 }
 0xcc7   : > { %v6191_v9 = vmul.f32 %v8059_v19, %v6174_v31  ;;  %vm6197_vm3 = vweird.f32 %v8059_v19 }
 0xcc8   : > { %vm6198_vm5 = vmor %vm6196_vm4, %vm6197_vm3 }
 0xcc9   : > { %v6192_v40 = vmul.f32 %v8059_v19, %v6191_v9 }
 0xccb   : > { %v6193_v11 = vmul.f32 0.5, %v6192_v40 }
 0xccd   : > { %v6194_v44 = vsub.f32 1.5, %v6193_v11 }
 0xccf   : > { %v6195_v39 = vmul.f32 %v8059_v19, %v6194_v44 }
 0xcd1   : > { %v6199_v5 = vsel %vm6198_vm5, %v8059_v19, %v6195_v39 }
 0xcd2   : > { %v6350_v18 = vmul.f32 %v6199_v5, %v12194_v60 }
 0xcd3   : > { %v6133_v16 = vpop.xlane.xlu2 %6132 }
 0xcd4   : > { %v6369_v17 = vmul.f32 %v12289_v46, %v6350_v18  ;;  %v6161_v43 = vmul.f32 %v6133_v16, %v12720_v30 }
 0xcd6   : > { %v12302_v50 = vadd.f32 %v12296_v36, %v6369_v17  ;;  %v6177_v37 = vadd.f32 1e-12, %v6161_v43  ;;  %v6075_v55 = vpop.xlane.xlu1 %6074 }
 0xcd7   : > { %v6092_v41 = vmul.f32 %v6075_v55, %v12720_v30 }
 0xcd8   : > { %6404 = vst [vmem:[#allocation2 + $0x30] sm:$0xff] %v12302_v50  ;;  %8060 = vrsqrt.f32 %v6177_v37  ;;  %vm6226_vm7 = vweird.f32 %v6177_v37 }
 0xcd9   : > { %v12307_v10 = vsub.f32 %v12207_v6, %v6092_v41 }
 0xcdb   : > { %v6124_v60 = vmul.f32 %v12307_v10, %v12307_v10 }
 0xcdd   : > { %6154 = vadd.xlane.f32.xlu0 %v6124_v60 }
 0xcde   : > { %v8061_v61 = vpop.eup %8060  ;;  %v6129_v8 = vpop.xlane.xlu1 %6128 }
 0xcdf   : > { %v6077_v23 = vpop.xlane.xlu0 %6076  ;;  %v6221_v47 = vmul.f32 %v8061_v61, %v6177_v37  ;;  %v6159_v21 = vmul.f32 %v6129_v8, %v12720_v30  ;;  %vm6227_vm6 = vweird.f32 %v8061_v61 }
 0xce0   : > { %v6093_v51 = vmul.f32 %v6077_v23, %v12720_v30  ;;  %vm6228_vm8 = vmor %vm6226_vm7, %vm6227_vm6 }
 0xce1   : > { %v6222_v24 = vmul.f32 %v8061_v61, %v6221_v47  ;;  %v6175_v3 = vadd.f32 1e-12, %v6159_v21 }
 0xce2   : > { %v12314_v12 = vsub.f32 %v12216_v32, %v6093_v51 }
 0xce3   : > { %v6223_v54 = vmul.f32 0.5, %v6222_v24  ;;  %8062 = vrsqrt.f32 %v6175_v3  ;;  %vm6206_vm10 = vweird.f32 %v6175_v3 }
 0xce4   : > { %v6125_v6 = vmul.f32 %v12314_v12, %v12314_v12 }
 0xce5   : > { %v6224_v20 = vsub.f32 1.5, %v6223_v54 }
 0xce6   : > { %6156 = vadd.xlane.f32.xlu2 %v6125_v6  ;;  %v6135_v2 = vpop.xlane.xlu1 %6134 }
 0xce7   : > { %v6131_v15 = vpop.xlane.xlu0 %6130  ;;  %v6225_v26 = vmul.f32 %v8061_v61, %v6224_v20  ;;  %v6162_v4 = vmul.f32 %v6135_v2, %v12720_v30 }
 0xce8   : > { %v6160_v57 = vmul.f32 %v6131_v15, %v12720_v30 }
 0xce9   : > { %v8063_v56 = vpop.eup %8062  ;;  %v6229_v32 = vsel %vm6228_vm8, %v8061_v61, %v6225_v26  ;;  %v6178_v25 = vadd.f32 1e-12, %v6162_v4 }
 0xcea   : > { %v6176_v7 = vadd.f32 1e-12, %v6160_v57  ;;  %v6353_v28 = vmul.f32 %v6229_v32, %v12201_v34  ;;  %v6201_v35 = vmul.f32 %v8063_v56, %v6175_v3  ;;  %vm6207_vm9 = vweird.f32 %v8063_v56 }
 0xceb   : > { %8064 = vrsqrt.f32 %v6178_v25  ;;  %v6139_v22 = vpop.xlane.xlu2 %6138  ;;  %vm6208_vm11 = vmor %vm6206_vm10, %vm6207_vm9  ;;  %vm6236_vm14 = vweird.f32 %v6178_v25 }
 0xcec   : > { %v6372_v42 = vmul.f32 %v12289_v46, %v6353_v28  ;;  %v6202_v0 = vmul.f32 %v8063_v56, %v6201_v35  ;;  %8066 = vrsqrt.f32 %v6176_v7  ;;  %v6164_v29 = vmul.f32 %v6139_v22, %v12720_v30 }
 0xced   : > { %vm6216_vm0 = vweird.f32 %v6176_v7 }
 0xcee   : > { %v12324_v63 = vadd.f32 %v12296_v36, %v6372_v42  ;;  %v6203_v59 = vmul.f32 0.5, %v6202_v0  ;;  %v6180_v1 = vadd.f32 1e-12, %v6164_v29 }
 0xcef   : > { %v6137_v31 = vpop.xlane.xlu0 %6136 }
 0xcf0   : > { %v6163_v19 = vmul.f32 %v6137_v31, %v12720_v30  ;;  %6407 = vst [vmem:[#allocation2 + $0x18] sm:$0xff] %v12324_v63  ;;  %v6204_v34 = vsub.f32 1.5, %v6203_v59  ;;  %8068 = vrsqrt.f32 %v6180_v1  ;;  %vm6256_vm3 = vweird.f32 %v6180_v1 }
 0xcf1   : > { %v8065_v9 = vpop.eup %8064 }
 0xcf2   : > { %v12328_v40 = vadd.f32 1e-12, %v6163_v19  ;;  %v8067_v11 = vpop.eup %8066  ;;  %v6205_v44 = vmul.f32 %v8063_v56, %v6204_v34  ;;  %v6231_v39 = vmul.f32 %v8065_v9, %v6178_v25  ;;  %vm6237_vm12 = vweird.f32 %v8065_v9 }
 0xcf3   : > { %v6211_v5 = vmul.f32 %v8067_v11, %v6176_v7  ;;  %v6141_v18 = vpop.xlane.xlu1 %6140  ;;  %vm6217_vm13 = vweird.f32 %v8067_v11  ;;  %vm6238_vm15 = vmor %vm6236_vm14, %vm6237_vm12 }
 0xcf4   : > { %8070 = vrsqrt.f32 %v12328_v40  ;;  %v6209_v16 = vsel %vm6208_vm11, %v8063_v56, %v6205_v44  ;;  %v6232_v17 = vmul.f32 %v8065_v9, %v6231_v39  ;;  %v6165_v43 = vmul.f32 %v6141_v18, %v12720_v30  ;;  %vm6218_vm1 = vmor %vm6216_vm0, %vm6217_vm13 }
 0xcf5   : > { %v6351_v37 = vmul.f32 %v6209_v16, %v12212_v45  ;;  %v6212_v55 = vmul.f32 %v8067_v11, %v6211_v5  ;;  %vm6246_vm6 = vweird.f32 %v12328_v40 }
 0xcf6   : > { %v8069_v41 = vpop.eup %8068  ;;  %v6233_v60 = vmul.f32 0.5, %v6232_v17  ;;  %v12333_v61 = vadd.f32 1e-12, %v6165_v43 }
 0xcf7   : > { %v6370_v8 = vmul.f32 %v12289_v46, %v6351_v37  ;;  %v6213_v23 = vmul.f32 0.5, %v6212_v55  ;;  %v6251_v47 = vmul.f32 %v8069_v41, %v6180_v1  ;;  %vm6257_vm2 = vweird.f32 %v8069_v41 }
 0xcf8   : > { %v6234_v21 = vsub.f32 1.5, %v6233_v60  ;;  %8072 = vrsqrt.f32 %v12333_v61  ;;  %vm6258_vm4 = vmor %vm6256_vm3, %vm6257_vm2  ;;  %vm6266_vm9 = vweird.f32 %v12333_v61 }
 0xcf9   : > { %v12338_v24 = vadd.f32 %v12296_v36, %v6370_v8  ;;  %v6214_v3 = vsub.f32 1.5, %v6213_v23  ;;  %v6252_v45 = vmul.f32 %v8069_v41, %v6251_v47 }
 0xcfa   : > { %v8071_v51 = vpop.eup %8070  ;;  %v6235_v54 = vmul.f32 %v8065_v9, %v6234_v21 }
 0xcfb   : > { %v6241_v6 = vmul.f32 %v8071_v51, %v12328_v40  ;;  %6405 = vst [vmem:[#allocation2] sm:$0xff] %v12338_v24  ;;  %v6215_v20 = vmul.f32 %v8067_v11, %v6214_v3  ;;  %v6253_v2 = vmul.f32 0.5, %v6252_v45  ;;  %v6143_v15 = vpop.xlane.xlu0 %6142  ;;  %vm6247_vm5 = vweird.f32 %v8071_v51 }
 0xcfc   : > { %v6239_v26 = vsel %vm6238_vm15, %v8065_v9, %v6235_v54  ;;  %v6166_v57 = vmul.f32 %v6143_v15, %v12720_v30  ;;  %vm6248_vm7 = vmor %vm6246_vm6, %vm6247_vm5 }
 0xcfd   : > { %v6242_v4 = vmul.f32 %v8071_v51, %v6241_v6  ;;  %v6354_v56 = vmul.f32 %v6239_v26, %v12226_v49  ;;  %v6219_v32 = vsel %vm6218_vm1, %v8067_v11, %v6215_v20  ;;  %v6254_v28 = vsub.f32 1.5, %v6253_v2 }
 0xcfe   : > { %v8073_v25 = vpop.eup %8072  ;;  %v6352_v35 = vmul.f32 %v6219_v32, %v12223_v14  ;;  %v6182_v42 = vadd.f32 1e-12, %v6166_v57 }
 0xcff   : > { %v6243_v22 = vmul.f32 0.5, %v6242_v4  ;;  %v6373_v0 = vmul.f32 %v12289_v46, %v6354_v56  ;;  %v6255_v7 = vmul.f32 %v8069_v41, %v6254_v28  ;;  %v6261_v29 = vmul.f32 %v8073_v25, %v12333_v61 }
 0xd00   : > { %v6371_v59 = vmul.f32 %v12289_v46, %v6352_v35  ;;  %8074 = vrsqrt.f32 %v6182_v42  ;;  %vm6267_vm8 = vweird.f32 %v8073_v25  ;;  %vm6276_vm12 = vweird.f32 %v6182_v42 }
 0xd01   : > { %v6244_v31 = vsub.f32 1.5, %v6243_v22  ;;  %v12349_v49 = vadd.f32 %v12296_v36, %v6373_v0  ;;  %v6259_v19 = vsel %vm6258_vm4, %v8069_v41, %v6255_v7  ;;  %v6262_v34 = vmul.f32 %v8073_v25, %v6261_v29  ;;  %vm6268_vm10 = vmor %vm6266_vm9, %vm6267_vm8 }
 0xd02   : > { %v12352_v14 = vadd.f32 %v12296_v36, %v6371_v59  ;;  %v6356_v9 = vmul.f32 %v6259_v19, %v12235_v27 }
 0xd03   : > { %v6245_v11 = vmul.f32 %v8071_v51, %v6244_v31  ;;  %6408 = vst [vmem:[#allocation2 + $0x50] sm:$0xff] %v12349_v49  ;;  %v6263_v1 = vmul.f32 0.5, %v6262_v34  ;;  %v6145_v44 = vpop.xlane.xlu2 %6144 }
 0xd04   : > { %6406 = vst [vmem:[#allocation2 + $0x58] sm:$0xff] %v12352_v14  ;;  %v6375_v39 = vmul.f32 %v12289_v46, %v6356_v9  ;;  %v6167_v18 = vmul.f32 %v6145_v44, %v12720_v30 }
 0xd05   : > { %v6249_v5 = vsel %vm6248_vm7, %v8071_v51, %v6245_v11  ;;  %v6264_v17 = vsub.f32 1.5, %v6263_v1 }
 0xd06   : > { %v6355_v16 = vmul.f32 %v6249_v5, %v12238_v52  ;;  %v8075_v27 = vpop.eup %8074  ;;  %v12362_v43 = vadd.f32 %v12296_v36, %v6375_v39  ;;  %v6183_v40 = vadd.f32 1e-12, %v6167_v18 }
 0xd07   : > { %v6265_v55 = vmul.f32 %v8073_v25, %v6264_v17  ;;  %v6271_v41 = vmul.f32 %v8075_v27, %v6182_v42  ;;  %vm6277_vm11 = vweird.f32 %v8075_v27 }
 0xd08   : > { %v6374_v37 = vmul.f32 %v12289_v46, %v6355_v16  ;;  %6410 = vst [vmem:[#allocation2 + $0x8] sm:$0xff] %v12362_v43  ;;  %8076 = vrsqrt.f32 %v6183_v40  ;;  %vm6278_vm13 = vmor %vm6276_vm12, %vm6277_vm11  ;;  %vm6286_vm15 = vweird.f32 %v6183_v40 }
 0xd09   : > { %v6269_v52 = vsel %vm6268_vm10, %v8073_v25, %v6265_v55  ;;  %v6272_v8 = vmul.f32 %v8075_v27, %v6271_v41 }
 0xd0a   : > { %v12368_v60 = vadd.f32 %v12296_v36, %v6374_v37  ;;  %v6357_v23 = vmul.f32 %v6269_v52, %v12246_v33 }
 0xd0b   : > { %v6273_v47 = vmul.f32 0.5, %v6272_v8  ;;  %v6147_v21 = vpop.xlane.xlu1 %6146 }
 0xd0c   : > { %6409 = vst [vmem:[#allocation2 + $0x68] sm:$0xff] %v12368_v60  ;;  %v6376_v51 = vmul.f32 %v12289_v46, %v6357_v23  ;;  %v6168_v61 = vmul.f32 %v6147_v21, %v12720_v30 }
 0xd0d   : > { %v6274_v3 = vsub.f32 1.5, %v6273_v47 }
 0xd0e   : > { %v8077_v45 = vpop.eup %8076  ;;  %v12375_v54 = vadd.f32 %v12296_v36, %v6376_v51  ;;  %v6184_v6 = vadd.f32 1e-12, %v6168_v61 }
 0xd0f   : > { %v6275_v20 = vmul.f32 %v8075_v27, %v6274_v3  ;;  %v6281_v2 = vmul.f32 %v8077_v45, %v6183_v40  ;;  %vm6287_vm14 = vweird.f32 %v8077_v45 }
 0xd10   : > { %6411 = vst [vmem:[#allocation2 + $0x48] sm:$0xff] %v12375_v54  ;;  %8078 = vrsqrt.f32 %v6184_v6  ;;  %vm6288_vm0 = vmor %vm6286_vm15, %vm6287_vm14  ;;  %vm6296_vm2 = vweird.f32 %v6184_v6 }
 0xd11   : > { %v6279_v33 = vsel %vm6278_vm13, %v8075_v27, %v6275_v20  ;;  %v6282_v15 = vmul.f32 %v8077_v45, %v6281_v2 }
 0xd12   : > { %v6358_v26 = vmul.f32 %v6279_v33, %v12252_v13 }
 0xd13   : > { %v6283_v4 = vmul.f32 0.5, %v6282_v15  ;;  %v6149_v57 = vpop.xlane.xlu0 %6148 }
 0xd14   : > { %v6377_v56 = vmul.f32 %v12289_v46, %v6358_v26  ;;  %v6169_v32 = vmul.f32 %v6149_v57, %v12720_v30 }
 0xd15   : > { %v6284_v28 = vsub.f32 1.5, %v6283_v4 }
 0xd16   : > { %v8079_v25 = vpop.eup %8078  ;;  %v12382_v35 = vadd.f32 %v12296_v36, %v6377_v56  ;;  %v6185_v22 = vadd.f32 1e-12, %v6169_v32 }
 0xd17   : > { %v6285_v42 = vmul.f32 %v8077_v45, %v6284_v28  ;;  %v6291_v0 = vmul.f32 %v8079_v25, %v6184_v6  ;;  %vm6297_vm1 = vweird.f32 %v8079_v25 }
 0xd18   : > { %6412 = vst [vmem:[#allocation2 + $0x40] sm:$0xff] %v12382_v35  ;;  %8080 = vrsqrt.f32 %v6185_v22  ;;  %vm6298_vm3 = vmor %vm6296_vm2, %vm6297_vm1  ;;  %vm6306_vm5 = vweird.f32 %v6185_v22 }
 0xd19   : > { %v6289_v13 = vsel %vm6288_vm0, %v8077_v45, %v6285_v42  ;;  %v6292_v7 = vmul.f32 %v8079_v25, %v6291_v0 }
 0xd1a   : > { %v6359_v29 = vmul.f32 %v6289_v13, %v12258_v48 }
 0xd1b   : > { %v6293_v59 = vmul.f32 0.5, %v6292_v7  ;;  %v6151_v31 = vpop.xlane.xlu2 %6150 }
 0xd1c   : > { %v6378_v19 = vmul.f32 %v12289_v46, %v6359_v29  ;;  %v6170_v34 = vmul.f32 %v6151_v31, %v12720_v30 }
 0xd1d   : > { %v6294_v9 = vsub.f32 1.5, %v6293_v59 }
 0xd1e   : > { %v8081_v11 = vpop.eup %8080  ;;  %v12389_v1 = vadd.f32 %v12296_v36, %v6378_v19  ;;  %v6186_v44 = vadd.f32 1e-12, %v6170_v34 }
 0xd1f   : > { %v6295_v39 = vmul.f32 %v8079_v25, %v6294_v9  ;;  %v6301_v5 = vmul.f32 %v8081_v11, %v6185_v22  ;;  %vm6307_vm4 = vweird.f32 %v8081_v11 }
 0xd20   : > { %6413 = vst [vmem:[#allocation2 + $0x20] sm:$0xff] %v12389_v1  ;;  %8082 = vrsqrt.f32 %v6186_v44  ;;  %vm6308_vm6 = vmor %vm6306_vm5, %vm6307_vm4  ;;  %vm6316_vm8 = vweird.f32 %v6186_v44 }
 0xd21   : > { %v6299_v48 = vsel %vm6298_vm3, %v8079_v25, %v6295_v39  ;;  %v6302_v18 = vmul.f32 %v8081_v11, %v6301_v5 }
 0xd22   : > { %v6360_v16 = vmul.f32 %v6299_v48, %v12264_v58 }
 0xd23   : > { %v6303_v17 = vmul.f32 0.5, %v6302_v18  ;;  %v6153_v27 = vpop.xlane.xlu1 %6152 }
 0xd24   : > { %v6379_v40 = vmul.f32 %v12289_v46, %v6360_v16  ;;  %v6171_v37 = vmul.f32 %v6153_v27, %v12720_v30 }
 0xd25   : > { %v6304_v55 = vsub.f32 1.5, %v6303_v17 }
 0xd26   : > { %v8083_v41 = vpop.eup %8082  ;;  %v12396_v52 = vadd.f32 %v12296_v36, %v6379_v40  ;;  %v6187_v8 = vadd.f32 1e-12, %v6171_v37 }
 0xd27   : > { %v6305_v23 = vmul.f32 %v8081_v11, %v6304_v55  ;;  %v6311_v47 = vmul.f32 %v8083_v41, %v6186_v44  ;;  %vm6317_vm7 = vweird.f32 %v8083_v41 }
 0xd28   : > { %6414 = vst [vmem:[#allocation2 + $0x10] sm:$0xff] %v12396_v52  ;;  %8084 = vrsqrt.f32 %v6187_v8  ;;  %vm6318_vm9 = vmor %vm6316_vm8, %vm6317_vm7  ;;  %vm6326_vm11 = vweird.f32 %v6187_v8 }
 0xd29   : > { %v6309_v58 = vsel %vm6308_vm6, %v8081_v11, %v6305_v23  ;;  %v6312_v21 = vmul.f32 %v8083_v41, %v6311_v47 }
 0xd2a   : > { %v6361_v51 = vmul.f32 %v6309_v58, %v12270_v53 }
 0xd2b   : > { %v6313_v61 = vmul.f32 0.5, %v6312_v21 }
 0xd2c   : > { %v6380_v3 = vmul.f32 %v12289_v46, %v6361_v51 }
 0xd2d   : > { %v6314_v45 = vsub.f32 1.5, %v6313_v61 }
 0xd2e   : > { %v8085_v6 = vpop.eup %8084  ;;  %v12402_v20 = vadd.f32 %v12296_v36, %v6380_v3 }
 0xd2f   : > { %v6315_v2 = vmul.f32 %v8083_v41, %v6314_v45  ;;  %v6321_v33 = vmul.f32 %v8085_v6, %v6187_v8  ;;  %vm6327_vm10 = vweird.f32 %v8085_v6 }
 0xd30   : > { %6415 = vst [vmem:[#allocation2 + $0x38] sm:$0xff] %v12402_v20  ;;  %vm6328_vm12 = vmor %vm6326_vm11, %vm6327_vm10 }
 0xd31   : > { %v6319_v15 = vsel %vm6318_vm9, %v8083_v41, %v6315_v2  ;;  %v6322_v26 = vmul.f32 %v8085_v6, %v6321_v33 }
 0xd32   : > { %v6362_v4 = vmul.f32 %v6319_v15, %v12276_v62 }
 0xd33   : > { %v6323_v53 = vmul.f32 0.5, %v6322_v26 }
 0xd34   : > { %v6381_v57 = vmul.f32 %v12289_v46, %v6362_v4 }
 0xd35   : > { %v6324_v56 = vsub.f32 1.5, %v6323_v53 }
 0xd36   : > { %v6400_v32 = vadd.f32 %v12296_v36, %v6381_v57 }
 0xd37   : > { %v6325_v28 = vmul.f32 %v8085_v6, %v6324_v56 }
 0xd38   : > { %6416 = vst [vmem:[#allocation2 + $0x60] sm:$0xff] %v6400_v32 }
 0xd39   : > { %v6329_v25 = vsel %vm6328_vm12, %v8085_v6, %v6325_v28 }
 0xd3a   : > { %v6363_v22 = vmul.f32 %v6329_v25, %v12282_v38 }
 0xd3c   : > { %v6382_v42 = vmul.f32 %v12289_v46, %v6363_v22 }
 0xd3e   : > { %v6401_v0 = vadd.f32 %v12296_v36, %v6382_v42 }
 0xd40   : > { %6417 = vst [vmem:[#allocation2 + $0x70] sm:$0xff] %v6401_v0 }
 0xd50   : > { %v6155_v62 = vpop.xlane.xlu0 %6154 }
 0xd51   : > { %v6172_v13 = vmul.f32 %v6155_v62, %v12720_v30 }
 0xd53   : > { %v6188_v7 = vadd.f32 1e-12, %v6172_v13 }
 0xd55   : > { %8086 = vrsqrt.f32 %v6188_v7  ;;  %vm6336_vm14 = vweird.f32 %v6188_v7 }
 0xd59   : > { %v6157_v29 = vpop.xlane.xlu2 %6156 }
 0xd5a   : > { %v6173_v59 = vmul.f32 %v6157_v29, %v12720_v30 }
 0xd5b   : > { %v8087_v31 = vpop.eup %8086 }
 0xd5c   : > { %v6189_v19 = vadd.f32 1e-12, %v6173_v59  ;;  %v6331_v34 = vmul.f32 %v8087_v31, %v6188_v7  ;;  %vm6337_vm13 = vweird.f32 %v8087_v31 }
 0xd5d   : > { %vm6338_vm15 = vmor %vm6336_vm14, %vm6337_vm13 }
 0xd5e   : > { %8088 = vrsqrt.f32 %v6189_v19  ;;  %v6332_v9 = vmul.f32 %v8087_v31, %v6331_v34  ;;  %vm6346_vm1 = vweird.f32 %v6189_v19 }
 0xd60   : > { %v6333_v11 = vmul.f32 0.5, %v6332_v9 }
 0xd62   : > { %v6334_v38 = vsub.f32 1.5, %v6333_v11 }
 0xd64   : > { %v8089_v44 = vpop.eup %8088  ;;  %v6335_v39 = vmul.f32 %v8087_v31, %v6334_v38 }
 0xd65   : > { %v6341_v5 = vmul.f32 %v8089_v44, %v6189_v19  ;;  %vm6347_vm0 = vweird.f32 %v8089_v44 }
 0xd66   : > { %v6339_v48 = vsel %vm6338_vm15, %v8087_v31, %v6335_v39  ;;  %vm6348_vm2 = vmor %vm6346_vm1, %vm6347_vm0 }
 0xd67   : > { %v6342_v18 = vmul.f32 %v8089_v44, %v6341_v5  ;;  %v6364_v16 = vmul.f32 %v6339_v48, %v12307_v10 }
 0xd69   : > { %v6343_v17 = vmul.f32 0.5, %v6342_v18  ;;  %v6383_v30 = vmul.f32 %v12289_v46, %v6364_v16 }
 0xd6b   : > { %v6344_v27 = vsub.f32 1.5, %v6343_v17  ;;  %v6402_v40 = vadd.f32 %v12296_v36, %v6383_v30 }
 0xd6d   : > { %v6345_v37 = vmul.f32 %v8089_v44, %v6344_v27  ;;  %6418 = vst [vmem:[#allocation2 + $0x78] sm:$0xff] %v6402_v40 }
 0xd6f   : > { %v6349_v55 = vsel %vm6348_vm2, %v8089_v44, %v6345_v37 }
 0xd70   : > { %v6365_v41 = vmul.f32 %v6349_v55, %v12314_v12 }
 0xd72   : > { %v6384_v8 = vmul.f32 %v12289_v46, %v6365_v41  ;;  %6423 = sbr.rel (%p7307_p12) target bundleno = 3463 (0xd87), region = 164 }
 0xd74   : > { %v6403_v23 = vadd.f32 %v12296_v36, %v6384_v8 }
 0xd76   : > { %6419 = vst [vmem:[#allocation2 + $0x28] sm:$0xff] %v6403_v23 }
 0xd77   : > { %6424 = vst [vmem:[%s9219_s19] sm:$0xff] %v12302_v50 }
 0xd78   : > { %6425 = vst [vmem:[%s9219_s19 + $0x8] sm:$0xff] %v12338_v24 }
 0xd79   : > { %6426 = vst [vmem:[%s9219_s19 + $0x10] sm:$0xff] %v12352_v14 }
 0xd7a   : > { %6427 = vst [vmem:[%s9219_s19 + $0x18] sm:$0xff] %v12324_v63 }
 0xd7b   : > { %6428 = vst [vmem:[%s9219_s19 + $0x20] sm:$0xff] %v12349_v49 }
 0xd7c   : > { %6429 = vst [vmem:[%s9219_s19 + $0x28] sm:$0xff] %v12368_v60 }
 0xd7d   : > { %6430 = vst [vmem:[%s9219_s19 + $0x30] sm:$0xff] %v12362_v43 }
 0xd7e   : > { %6431 = vst [vmem:[%s9219_s19 + $0x38] sm:$0xff] %v12375_v54 }
 0xd7f   : > { %6432 = vst [vmem:[%s9219_s19 + $0x40] sm:$0xff] %v12382_v35 }
 0xd80   : > { %6433 = vst [vmem:[%s9219_s19 + $0x48] sm:$0xff] %v12389_v1 }
 0xd81   : > { %6434 = vst [vmem:[%s9219_s19 + $0x50] sm:$0xff] %v12396_v52 }
 0xd82   : > { %6435 = vst [vmem:[%s9219_s19 + $0x58] sm:$0xff] %v12402_v20 }
 0xd83   : > { %6436 = vst [vmem:[%s9219_s19 + $0x60] sm:$0xff] %v6400_v32 }
 0xd84   : > { %6437 = vst [vmem:[%s9219_s19 + $0x68] sm:$0xff] %v6401_v0 }
 0xd85   : > { %6438 = vst [vmem:[%s9219_s19 + $0x70] sm:$0xff] %v6402_v40 }
 0xd86   : > { %6439 = vst [vmem:[%s9219_s19 + $0x78] sm:$0xff] %v6403_v23 }
 0xd87 PF: > { %s12724_s9 = sld [smem:[#allocation43_spill]]  ;;  %s6453_s6 = sshll.u32 %s9219_s19, 4  ;;  %s6454_s6 = int_to_ptr.vmem [resolvable:$true] %s6453_s6 }
 0xd88   : > { %s12726_s18 = sld [smem:[#allocation97_spill]]  ;;  %s6441_s4 = scalar_lea.sflag [#allocation5], %s9072_s22 }
 0xd8d   : > { %s7416_s13 = sshll.u32 %s12724_s9, 7 }
 0xd8e   : > { %s6452_s27 = scalar_lea.hbm %s12726_s18, %s7416_s13  ;;  %s8526_s12 = scalar_lea.hbm %s12726_s18, 256 }
 0xd8f   : > { %s6455_s8 = sshll.u32 %s6452_s27, 4  ;;  %s6456_s8 = int_to_ptr.hbm [resolvable:$true] %s6455_s8 }
 0xd90   : > { %s8520_s21 = sshra.s32 %s6456_s8, 4  ;;  %s8521_s21 = int_to_ptr.hbm [resolvable:$true] %s8520_s21 }
 0xd91   : > { %s8522_s3 = scalar_lea.hbm %s8521_s21, 128  ;;  %p8527_p10 = scmp.lt.s32.totalorder %s8521_s21, %s12726_s18 }
 0xd92   : > { %p8523_p13 = scmp.ne.s32.totalorder %s8521_s21, %s8522_s3  ;;  %p8528_p9 = scmp.lt.s32.totalorder %s8526_s12, %s8522_s3 }
 0xd94   : > { %p8524_p0 = pnand %p8523_p13, %p8926_p8  ;;  %p8529_p11 = por %p8528_p9, %p8527_p10 }
 0xd96   : > { %p8525_p5 = pneg %p8524_p0 }
 0xd98   : > { %p8530_p1 = pnand %p8529_p11, %p8525_p5 }
 0xd9a   : > { %8533 = shalt.err (!%p8530_p1)
}
 0xd9b   : > { %s8695_s22 = smov 128   ;;  %s8696_s19 = smov 8  }
 0xd9c   : > { %7473 = dma.vmem_to_hbm [thread:$0]  (%p8926_p8), %s6454_s6, 2048, %s6456_s8, %s6441_s4, %s8695_s22, %s8695_s22, %s8696_s19  }
 0xd9d PF: > { %s12727_s7 = sld [smem:[#allocation46_spill]] }
 0xd9e   : > { %s12728_s26 = sld [smem:[#allocation39_spill]] }
 0xda3   : > { %p7490_p4 = scmp.ge.s32.totalorder %s12727_s7, 2 }
 0xda4   : > { %s6470_s15 = sand.u32 1, %s12728_s26  }
 0xda5   : > { %p7483_p3 = pnand %p7490_p4, %p8933_p2  ;;  %s6471_s5 = scalar_lea.sflag [#allocation5], %s6470_s15 }
 0xda7   : > { %p7484_p6 = pneg %p7483_p3 }
 0xda9   : > { %8635 = dma.done.wait (%p7484_p6), %s6471_s5, 2048  }
 0xdaa   : > { %8637 = vsyncadd (%p7484_p6), %s6471_s5, 4294965248  ;;  %s40_s4 = sadd.s32 1, %s12727_s7   ;;  %s12730_s1 = sld [smem:[#allocation37_spill]] }
 0xdab   : > { %p37_p7 = scmp.ge.s32.totalorder %s40_s4, 6   ;;  %s12731_s22 = sld [smem:[#allocation38_spill]] }
 0xdac   : > { %s12732_s23 = sld [smem:[#allocation51_spill]] }
 0xdad   : > { %s12733_s24 = sld [smem:[#allocation40_spill]] }
 0xdae   : > { %s12734_s2 = sld [smem:[#allocation41_spill]] }
 0xdaf   : > { %s12735_s25 = sld [smem:[#allocation52_spill]]  ;;  %39 = sbr.rel (!%p37_p7) target bundleno = 34 (0x22), region = 302 }
 0xdb0   : > { %s12736_s3 = sld [smem:[#allocation44_spill]] }
 0xdb1   : > { %s12737_s26 = sld [smem:[#allocation45_spill]] }
 0xdb2   : > { %s12738_s27 = sld [smem:[#allocation48_spill]] }
 0xdb3   : > { %s12739_s28 = sld [smem:[#allocation49_spill]] }
 0xdb4   :  { %6477 = vsyncpa [#allocation4], 1 }
 0xdb5   :  { %6479 = vsyncpa [#allocation4 + $0x1], 1 }
 0xdb6   :  { %6480 = vsyncpa [#allocation7], 1 }
 0xdb7   :  { %6482 = vsyncpa [#allocation7 + $0x1], 1 }
 0xdb8   :  { %6483 = vsyncpa [#allocation10], 1 }
 0xdb9   :  { %6484 = vsyncpa [#allocation5], 1 }
 0xdba   :  { %6486 = vsyncpa [#allocation5 + $0x1], 1 }

</bundles_post_ra>
